<compile_context>
chip_gen: v5e
topology: v5e:2x2
jax: 0.10.0
libtpu: 0.0.40
codegen_flags: <defaults>
</compile_context>

<pallas_src>
import functools

import jax
import jax.numpy as jnp
from jax.experimental import pallas as pl
from jax.experimental.pallas import tpu as pltpu

EPS = 1e-6


def _round_up(x, m):
    return (x + m - 1) // m * m


def _convnext_kernel(x_hbm, z_hbm, dww_ref, dwb_ref, w1_ref, b1_ref, w2_ref,
                     b2_ref, out_ref, xbuf, sem, *, true_c, hchunk):
    # x_hbm : (N, H, W+6, Cp)  NHWC input, cols + channels zero-padded, in HBM
    # z_hbm : (3, W+6, Cp)     all-zero rows: top/bottom halo source for edge
    #                          stripes (keeps every DMA a fixed size)
    # dww   : (49, Cp)         depthwise 7x7 weights, row = ky*7 + kx
    # dwb   : (1, Cp)   f32
    # w1    : (Cp, Hdp) bf16   LayerNorm affine folded in
    # b1    : (1, Hdp)  f32
    # w2    : (Hdp, Cp) bf16   layer-scale gamma folded in
    # b2    : (1, Cp)   f32
    # out   : (1, TH, W, Cp)
    # xbuf  : (2, TH+6, W+6, Cp) VMEM double buffer (row halo lives here)
    # sem   : (2, 3) DMA semaphores: (slot, {top, body, bottom})
    n = pl.program_id(0)
    h = pl.program_id(1)
    n_h = pl.num_programs(1)

    TH = out_ref.shape[1]
    W = out_ref.shape[2]
    Cp = out_ref.shape[3]
    Hdp = w1_ref.shape[1]

    # ---- manual stripe DMA: 3 row-range copies (top halo / body / bottom) ----
    def start_fetch(hh, slot, gate):
        top_src = jnp.maximum(hh * TH - 3, 0)
        body_src = jnp.minimum(hh * TH, (n_h - 1) * TH)
        bot_src = jnp.maximum(jnp.minimum((hh + 1) * TH, n_h * TH - 3), 0)
        dst_top = xbuf.at[slot, pl.ds(0, 3)]
        dst_body = xbuf.at[slot, pl.ds(3, TH)]
        dst_bot = xbuf.at[slot, pl.ds(3 + TH, 3)]

        @pl.when(jnp.logical_and(gate, hh > 0))
        def _():
            pltpu.make_async_copy(x_hbm.at[n, pl.ds(top_src, 3)], dst_top,
                                  sem.at[slot, 0]).start()

        @pl.when(jnp.logical_and(gate, hh == 0))
        def _():
            pltpu.make_async_copy(z_hbm, dst_top, sem.at[slot, 0]).start()

        @pl.when(gate)
        def _():
            pltpu.make_async_copy(x_hbm.at[n, pl.ds(body_src, TH)], dst_body,
                                  sem.at[slot, 1]).start()

        @pl.when(jnp.logical_and(gate, hh < n_h - 1))
        def _():
            pltpu.make_async_copy(x_hbm.at[n, pl.ds(bot_src, 3)], dst_bot,
                                  sem.at[slot, 2]).start()

        @pl.when(jnp.logical_and(gate, hh == n_h - 1))
        def _():
            pltpu.make_async_copy(z_hbm, dst_bot, sem.at[slot, 2]).start()

    def wait_fetch(slot):
        # Only the semaphore + transfer size matter to .wait(); reconstruct
        # same-shaped descriptors with always-valid sources.
        pltpu.make_async_copy(z_hbm, xbuf.at[slot, pl.ds(0, 3)],
                              sem.at[slot, 0]).wait()
        pltpu.make_async_copy(x_hbm.at[n, pl.ds(0, TH)],
                              xbuf.at[slot, pl.ds(3, TH)],
                              sem.at[slot, 1]).wait()
        pltpu.make_async_copy(z_hbm, xbuf.at[slot, pl.ds(3 + TH, 3)],
                              sem.at[slot, 2]).wait()

    slot = h % 2
    # Priming fires at the first stripe of every image.  This assumes the
    # stripe axis runs 0..n_h-1 sequentially per image on one core, which
    # holds for ("parallel", "arbitrary") semantics (only the batch axis may
    # be split across TensorCores).
    start_fetch(h, slot, h == 0)
    wait_fetch(slot)                                  # current stripe resident
    start_fetch(h + 1, 1 - slot, h + 1 < n_h)         # prefetch next stripe
    # TODO(synk): prefetch stripe 0 of image n+1 at h == n_h-1 to close the
    # per-image pipeline bubble (needs core-boundary knowledge under megacore).

    x = xbuf[slot]                                    # (TH+6, W+6, Cp) f32

    # ---- depthwise 7x7 conv; kx (sublane) shift hoisted out of the ky loop --
    dww = dww_ref[...]                                # hoisted weight load
    acc = jnp.zeros((TH, W, Cp), jnp.float32)
    xres = None
    for kx in range(7):
        xs = x[:, kx:kx + W, :]                       # one sublane relayout/kx
        if kx == 3:
            xres = xs[3:3 + TH]                       # interior == residual
        for ky in range(7):                           # row offsets are free
            acc = acc + xs[ky:ky + TH] * dww[ky * 7 + kx]
    acc = acc + dwb_ref[0, :]
    # TODO(synk): on v6e/v7x the taps could run in bf16 (2x VALU, half the
    # relayout traffic) and the kx shifts could ride the XLU via pltpu.roll;
    # kept f32 slices here for v5e compatibility and an exact residual.

    # ---- LayerNorm over channels (affine folded into w1/b1) -----------------
    # The mean sums over all Cp lanes but divides by true_c: this is exact
    # because the padded channels of `acc` are guaranteed zero (channel-padded
    # input, zero-padded dw weights and bias).  Variance masks them explicitly
    # since diff = -mean on padded lanes.
    inv_c = jnp.float32(1.0 / true_c)
    mean = jnp.sum(acc, axis=-1, keepdims=True) * inv_c
    diff = acc - mean
    if true_c != Cp:
        lane = jax.lax.broadcasted_iota(jnp.int32, (1, 1, Cp), 2)
        dm = jnp.where(lane < true_c, diff, 0.0)
    else:
        dm = diff
    var = jnp.sum(dm * dm, axis=-1, keepdims=True) * inv_c
    xn = diff * jax.lax.rsqrt(var + EPS)

    # ---- pointwise MLP on the MXU, chunked over the hidden dimension --------
    xn2 = xn.reshape(TH * W, Cp).astype(jnp.bfloat16)
    y = jnp.zeros((TH * W, Cp), jnp.float32)
    for s in range(0, Hdp, hchunk):
        e = min(s + hchunk, Hdp)
        hid = jnp.dot(xn2, w1_ref[:, s:e], preferred_element_type=jnp.float32)
        # tanh-GELU rides the EUP instead of a long erf polynomial on the VALU.
        hid = jax.nn.gelu(hid + b1_ref[0, s:e], approximate=True)
        y = y + jnp.dot(hid.astype(jnp.bfloat16), w2_ref[s:e, :],
                        preferred_element_type=jnp.float32)
    y = y + b2_ref[0, :]

    # ---- residual add (gamma already folded into w2/b2) ---------------------
    out_ref[0] = (y.reshape(TH, W, Cp) + xres).astype(out_ref.dtype)


def _vmem_budget_bytes():
    """Generation-aware scoped-VMEM budget (~75% of physical, capped)."""
    try:
        cap = int(pltpu.get_tpu_info().vmem_capacity_bytes)
    except Exception:
        cap = 0
    if cap <= 0:
        cap = 64 * 1024 * 1024            # conservative (v7x per-core VMEM)
    return min(int(cap * 3 // 4), 100 * 1024 * 1024)


def _estimate_vmem_bytes(th, W, Cp, Hdp, hchunk):
    """Generous per-grid-step VMEM footprint estimate in bytes."""
    thp, wp, m = th + 6, W + 6, th * W
    xbuf = 2 * thp * wp * Cp * 4                 # double-buffered input stripe
    outb = 2 * m * Cp * 4                        # double-buffered output block
    wts = 2 * 2 * Cp * Hdp * 2                   # w1+w2 bf16 (assume 2 bufs)
    wsmall = 2 * (52 * Cp + Hdp + Cp) * 4        # dw weights/bias, mlp biases
    conv = (2 * thp * W * Cp + 3 * m * Cp) * 4   # kx relayout slabs + acc/xn
    mlp = m * (Cp * 10 + hchunk * 6)             # xn2/y + hidden chunk slabs
    return int(1.3 * (xbuf + outb + wts + wsmall + conv + mlp))


def _pick_tile_h(H, W, Cp, Hdp, hchunk, budget_bytes):
    """Largest divisor of H (>=3 so the row halo fits, unless == H) in budget."""
    valid = [t for t in range(1, H + 1) if H % t == 0 and (t >= 3 or t == H)]
    fitting = [t for t in valid
               if _estimate_vmem_bytes(t, W, Cp, Hdp, hchunk) <= budget_bytes]
    return max(fitting) if fitting else min(valid)


def convnext_block_nhwc(x_nhwc, params, *, tile_h=None):
    """ConvNeXt block forward in NHWC. x: (N, H, W, C) f32 -> (N, H, W, C)."""
    N, H, W, C = x_nhwc.shape
    Cp = _round_up(C, 128)                  # lane-dense channel axis
    Hd = 4 * C
    Hdp = _round_up(Hd, 128)                # lane-dense MLP hidden axis
    HC = min(Hdp, 512)                      # MLP hidden-dim chunk

    budget = _vmem_budget_bytes()
    if tile_h is None:
        tile_h = _pick_tile_h(H, W, Cp, Hdp, HC, budget)
    assert H % tile_h == 0, "tile_h must divide H"
    assert tile_h == H or tile_h >= 3, "row tile must cover the 3-row halo"
    TH, nH, THp, Wp = tile_h, H // tile_h, tile_h + 6, W + 6

    # Single host pass: pad the 3-col halo + channels.  The 3-row halo is
    # assembled by the kernel's own DMA, so no (H+6)-sized HBM intermediate.
    x_in = jnp.pad(x_nhwc, ((0, 0), (0, 0), (3, 3), (0, Cp - C)))
    zrows = jnp.zeros((3, Wp, Cp), x_nhwc.dtype)   # halo source, edge stripes

    f32 = jnp.float32
    dw_w = jnp.pad(params["dw_w"].astype(f32).reshape(49, C),
                   ((0, 0), (0, Cp - C)))
    dw_b = jnp.pad(params["dw_b"].astype(f32), (0, Cp - C)).reshape(1, Cp)

    nw, nb = params["norm_w"].astype(f32), params["norm_b"].astype(f32)
    w1, b1 = params["w1"].astype(f32), params["b1"].astype(f32)
    w2, b2 = params["w2"].astype(f32), params["b2"].astype(f32)
    gamma = params["gamma"].astype(f32)

    # Fold LayerNorm affine into (w1, b1) and layer-scale gamma into (w2, b2).
    w1f, b1f = nw[:, None] * w1, nb @ w1 + b1
    w2f, b2f = w2 * gamma[None, :], b2 * gamma

    w1p = jnp.pad(w1f, ((0, Cp - C), (0, Hdp - Hd))).astype(jnp.bfloat16)
    b1p = jnp.pad(b1f, (0, Hdp - Hd)).reshape(1, Hdp)
    w2p = jnp.pad(w2f, ((0, Hdp - Hd), (0, Cp - C))).astype(jnp.bfloat16)
    b2p = jnp.pad(b2f, (0, Cp - C)).reshape(1, Cp)

    def const_spec(shape, single_buffer=False):
        imap = lambda n, h: (0,) * len(shape)
        if single_buffer:
            try:   # grid-invariant operand: one VMEM buffer is enough
                return pl.BlockSpec(shape, imap, pipeline_mode=pl.Buffered(1))
            except Exception:
                pass
        return pl.BlockSpec(shape, imap)

    out_nhwc = pl.pallas_call(
        functools.partial(_convnext_kernel, true_c=C, hchunk=HC),
        out_shape=jax.ShapeDtypeStruct((N, H, W, Cp), x_nhwc.dtype),
        grid=(N, nH),
        in_specs=[
            pl.BlockSpec(memory_space=pl.ANY),          # input stays in HBM
            pl.BlockSpec(memory_space=pl.ANY),          # zero halo rows (HBM)
            const_spec((49, Cp)),
            const_spec((1, Cp)),
            const_spec((Cp, Hdp), single_buffer=True),
            const_spec((1, Hdp)),
            const_spec((Hdp, Cp), single_buffer=True),
            const_spec((1, Cp)),
        ],
        out_specs=pl.BlockSpec((1, TH, W, Cp), lambda n, h: (n, h, 0, 0)),
        scratch_shapes=[
            pltpu.VMEM((2, THp, Wp, Cp), x_nhwc.dtype),
            pltpu.SemaphoreType.DMA((2, 3)),
        ],
        compiler_params=pltpu.CompilerParams(
            dimension_semantics=("parallel", "arbitrary"),
            vmem_limit_bytes=budget),
    )(x_in, zrows, dw_w, dw_b, w1p, b1p, w2p, b2p)

    return out_nhwc[..., :C] if Cp != C else out_nhwc


def convnext_block(x_nchw, params, *, tile_h=None):
    """ConvNeXt block forward, NCHW in/out (PyTorch convention)."""
    # TODO(synk): if the surrounding model keeps NHWC activations, call
    # convnext_block_nhwc directly and drop both transposes (one HBM pass each).
    x_nhwc = jnp.transpose(x_nchw, (0, 2, 3, 1))
    out = convnext_block_nhwc(x_nhwc, params, tile_h=tile_h)
    return jnp.transpose(out, (0, 3, 1, 2))


def convnext_ref(x, p):
    """Pure-JAX reference of the PyTorch ConvNeXtBlock forward (f32)."""
    N, C, H, W = x.shape
    xt = jnp.transpose(x, (0, 2, 3, 1))
    xp = jnp.pad(xt, ((0, 0), (3, 3), (3, 3), (0, 0)))
    acc = jnp.zeros_like(xt)
    for ky in range(7):
        for kx in range(7):
            acc = acc + xp[:, ky:ky + H, kx:kx + W, :] * p["dw_w"][ky, kx]
    acc = acc + p["dw_b"]
    mean = acc.mean(-1, keepdims=True)
    var = ((acc - mean) ** 2).mean(-1, keepdims=True)
    xn = (acc - mean) * jax.lax.rsqrt(var + EPS) * p["norm_w"] + p["norm_b"]
    h1 = jax.nn.gelu(xn @ p["w1"] + p["b1"], approximate=False)
    y = (h1 @ p["w2"] + p["b2"]) * p["gamma"]
    return jnp.transpose(xt + y, (0, 3, 1, 2))


def init_params(key, dim, layer_scale_init_value=1e-6):
    ks = jax.random.split(key, 6)
    # Deterministic synthetic init (shapes match the PyTorch module).
    dw_w = jax.random.normal(ks[0], (7, 7, dim), jnp.float32) * 0.05
    dw_b = jax.random.normal(ks[1], (dim,), jnp.float32) * 0.01
    norm_w = jnp.ones((dim,), jnp.float32)
    norm_b = jnp.zeros((dim,), jnp.float32)
    w1 = jax.random.normal(ks[2], (dim, 4 * dim), jnp.float32) * 0.05
    b1 = jax.random.normal(ks[3], (4 * dim,), jnp.float32) * 0.01
    w2 = jax.random.normal(ks[4], (4 * dim, dim), jnp.float32) * 0.05
    b2 = jax.random.normal(ks[5], (dim,), jnp.float32) * 0.01
    gamma = layer_scale_init_value * jnp.ones((dim,), jnp.float32)
    return dict(dw_w=dw_w, dw_b=dw_b, norm_w=norm_w, norm_b=norm_b,
                w1=w1, b1=b1, w2=w2, b2=b2, gamma=gamma)


if __name__ == "__main__":
    key = jax.random.PRNGKey(0)
    k_x, k_p = jax.random.split(key)
    N, C, H, W = 2, 4, 16, 16
    x = jax.random.normal(k_x, (N, C, H, W), jnp.float32)
    params = init_params(k_p, C, layer_scale_init_value=1.0)

    ref = convnext_ref(x, params)

    # Multi-stripe path: exercises edge stripes (zero halo rows), interior
    # stripes (image halo rows) and the double-buffered prefetch.
    out = convnext_block(x, params, tile_h=4)
    jax.block_until_ready(out)
    assert out.shape == (N, C, H, W) and out.dtype == jnp.float32
    err = float(jnp.max(jnp.abs(out - ref)))
    assert jnp.allclose(out, ref, atol=3e-2, rtol=3e-2), err

    # Auto-tiled path: VMEM-budgeted tile picker (whole image per stripe here).
    out2 = convnext_block(x, params)
    jax.block_until_ready(out2)
    err2 = float(jnp.max(jnp.abs(out2 - ref)))
    assert jnp.allclose(out2, ref, atol=3e-2, rtol=3e-2), err2

    print("KERNEL_OK")
</pallas_src>

<mosaic_0001>
module attributes {stable_mosaic.version = 11 : i64} {
  func.func @_convnext_kernel(%arg0: i32, %arg1: i32, %arg2: memref<2x16x22x128xf32, #tpu.memory_space<any>>, %arg3: memref<3x22x128xf32, #tpu.memory_space<any>>, %arg4: memref<49x128xf32, #tpu.memory_space<vmem>>, %arg5: memref<1x128xf32, #tpu.memory_space<vmem>>, %arg6: memref<128x128xbf16, #tpu.memory_space<vmem>>, %arg7: memref<1x128xf32, #tpu.memory_space<vmem>>, %arg8: memref<128x128xbf16, #tpu.memory_space<vmem>>, %arg9: memref<1x128xf32, #tpu.memory_space<vmem>>, %arg10: memref<1x4x16x128xf32, #tpu.memory_space<vmem>>, %arg11: memref<2x10x22x128xf32, #tpu.memory_space<vmem>>, %arg12: memref<2x3x!tpu.dma_semaphore, #tpu.memory_space<semaphore_mem>>) attributes {dimension_semantics = [#tpu.dimension_semantics<parallel>, #tpu.dimension_semantics<arbitrary>], iteration_bounds = array<i64: 2, 4>, scalar_prefetch = 0 : i64, scratch_operands = 2 : i64, tpu.core_type = #tpu.core_type<tc>, window_params = [{}, {}, {pipeline_mode = #tpu.pipeline_mode<synchronous>, transform_indices = @transform_2, window_bounds = array<i64: 49, 128>}, {pipeline_mode = #tpu.pipeline_mode<synchronous>, transform_indices = @transform_3, window_bounds = array<i64: 1, 128>}, {pipeline_mode = #tpu.pipeline_mode<synchronous>, transform_indices = @transform_4, window_bounds = array<i64: 128, 128>}, {pipeline_mode = #tpu.pipeline_mode<synchronous>, transform_indices = @transform_5, window_bounds = array<i64: 1, 128>}, {pipeline_mode = #tpu.pipeline_mode<synchronous>, transform_indices = @transform_6, window_bounds = array<i64: 128, 128>}, {pipeline_mode = #tpu.pipeline_mode<synchronous>, transform_indices = @transform_7, window_bounds = array<i64: 1, 128>}, {transform_indices = @transform_8, window_bounds = array<i64: 1, 4, 16, 128>}]} {
    %c2_i32 = arith.constant 2 : i32
    %c0_i32 = arith.constant 0 : i32
    %0 = arith.cmpi eq, %c2_i32, %c0_i32 : i32
    %c1_i32 = arith.constant 1 : i32
    %1 = arith.select %0, %c1_i32, %c2_i32 : i32
    %2 = arith.remsi %arg1, %1 : i32
    %c0_i32_0 = arith.constant 0 : i32
    %3 = arith.cmpi ne, %2, %c0_i32_0 : i32
    %c0_i32_1 = arith.constant 0 : i32
    %4 = arith.cmpi slt, %2, %c0_i32_1 : i32
    %c0_i32_2 = arith.constant 0 : i32
    %5 = arith.cmpi slt, %1, %c0_i32_2 : i32
    %6 = arith.xori %4, %5 : i1
    %7 = arith.andi %6, %3 : i1
    %8 = arith.addi %2, %1 : i32
    %9 = arith.select %7, %8, %2 : i32
    %c0_i32_3 = arith.constant 0 : i32
    %10 = arith.cmpi eq, %arg1, %c0_i32_3 : i32
    %c4_i32 = arith.constant 4 : i32
    %11 = arith.muli %arg1, %c4_i32 : i32
    %c3_i32 = arith.constant 3 : i32
    %12 = arith.subi %11, %c3_i32 : i32
    %c0_i32_4 = arith.constant 0 : i32
    %13 = arith.maxsi %12, %c0_i32_4 : i32
    %c4_i32_5 = arith.constant 4 : i32
    %14 = arith.muli %arg1, %c4_i32_5 : i32
    %c12_i32 = arith.constant 12 : i32
    %15 = arith.minsi %14, %c12_i32 : i32
    %c1_i32_6 = arith.constant 1 : i32
    %16 = arith.addi %arg1, %c1_i32_6 : i32
    %c4_i32_7 = arith.constant 4 : i32
    %17 = arith.muli %16, %c4_i32_7 : i32
    %c13_i32 = arith.constant 13 : i32
    %18 = arith.minsi %17, %c13_i32 : i32
    %c0_i32_8 = arith.constant 0 : i32
    %19 = arith.maxsi %18, %c0_i32_8 : i32
    %c0_i32_9 = arith.constant 0 : i32
    %20 = arith.cmpi sgt, %arg1, %c0_i32_9 : i32
    %21 = arith.andi %10, %20 : i1
    %22 = arith.extui %21 : i1 to i32
    %c0_i32_10 = arith.constant 0 : i32
    %23 = arith.cmpi ne, %22, %c0_i32_10 : i32
    scf.if %23 {
      %c0_i32_86 = arith.constant 0 : i32
      %c0_i32_87 = arith.constant 0 : i32
      %c0_i32_88 = arith.constant 0 : i32
      %504 = tpu.memref_slice %arg2[%arg0, %13, %c0_i32_87, %c0_i32_88] : memref<2x16x22x128xf32, #tpu.memory_space<any>> -> memref<1x3x22x128xf32, #tpu.memory_space<any>>
      %505 = tpu.memref_squeeze %504 : memref<1x3x22x128xf32, #tpu.memory_space<any>> -> memref<3x22x128xf32, #tpu.memory_space<any>>
      %c0_i32_89 = arith.constant 0 : i32
      %c0_i32_90 = arith.constant 0 : i32
      %c0_i32_91 = arith.constant 0 : i32
      %506 = tpu.memref_slice %arg11[%9, %c0_i32_89, %c0_i32_90, %c0_i32_91] : memref<2x10x22x128xf32, #tpu.memory_space<vmem>> -> memref<1x3x22x128xf32, #tpu.memory_space<vmem>>
      %507 = tpu.memref_squeeze %506 : memref<1x3x22x128xf32, #tpu.memory_space<vmem>> -> memref<3x22x128xf32, #tpu.memory_space<vmem>>
      %508 = tpu.memref_slice %arg12[%9, %c0_i32_86] : memref<2x3x!tpu.dma_semaphore, #tpu.memory_space<semaphore_mem>> -> memref<1x1x!tpu.dma_semaphore, #tpu.memory_space<semaphore_mem>>
      %509 = tpu.memref_squeeze %508 : memref<1x1x!tpu.dma_semaphore, #tpu.memory_space<semaphore_mem>> -> memref<!tpu.dma_semaphore, #tpu.memory_space<semaphore_mem>>
      tpu.enqueue_dma source(%505 : memref<3x22x128xf32, #tpu.memory_space<any>>) target(%507 : memref<3x22x128xf32, #tpu.memory_space<vmem>>) target_semaphore(%509 : memref<!tpu.dma_semaphore, #tpu.memory_space<semaphore_mem>>)
    } else {
    }
    %c0_i32_11 = arith.constant 0 : i32
    %24 = arith.cmpi eq, %arg1, %c0_i32_11 : i32
    %25 = arith.andi %10, %24 : i1
    %26 = arith.extui %25 : i1 to i32
    %c0_i32_12 = arith.constant 0 : i32
    %27 = arith.cmpi ne, %26, %c0_i32_12 : i32
    scf.if %27 {
      %c0_i32_86 = arith.constant 0 : i32
      %c0_i32_87 = arith.constant 0 : i32
      %c0_i32_88 = arith.constant 0 : i32
      %c0_i32_89 = arith.constant 0 : i32
      %504 = tpu.memref_slice %arg11[%9, %c0_i32_87, %c0_i32_88, %c0_i32_89] : memref<2x10x22x128xf32, #tpu.memory_space<vmem>> -> memref<1x3x22x128xf32, #tpu.memory_space<vmem>>
      %505 = tpu.memref_squeeze %504 : memref<1x3x22x128xf32, #tpu.memory_space<vmem>> -> memref<3x22x128xf32, #tpu.memory_space<vmem>>
      %506 = tpu.memref_slice %arg12[%9, %c0_i32_86] : memref<2x3x!tpu.dma_semaphore, #tpu.memory_space<semaphore_mem>> -> memref<1x1x!tpu.dma_semaphore, #tpu.memory_space<semaphore_mem>>
      %507 = tpu.memref_squeeze %506 : memref<1x1x!tpu.dma_semaphore, #tpu.memory_space<semaphore_mem>> -> memref<!tpu.dma_semaphore, #tpu.memory_space<semaphore_mem>>
      tpu.enqueue_dma source(%arg3 : memref<3x22x128xf32, #tpu.memory_space<any>>) target(%505 : memref<3x22x128xf32, #tpu.memory_space<vmem>>) target_semaphore(%507 : memref<!tpu.dma_semaphore, #tpu.memory_space<semaphore_mem>>)
    } else {
    }
    %28 = arith.extui %10 : i1 to i32
    %c0_i32_13 = arith.constant 0 : i32
    %29 = arith.cmpi ne, %28, %c0_i32_13 : i32
    scf.if %29 {
      %c1_i32_86 = arith.constant 1 : i32
      %c0_i32_87 = arith.constant 0 : i32
      %c0_i32_88 = arith.constant 0 : i32
      %504 = tpu.memref_slice %arg2[%arg0, %15, %c0_i32_87, %c0_i32_88] : memref<2x16x22x128xf32, #tpu.memory_space<any>> -> memref<1x4x22x128xf32, #tpu.memory_space<any>>
      %505 = tpu.memref_squeeze %504 : memref<1x4x22x128xf32, #tpu.memory_space<any>> -> memref<4x22x128xf32, #tpu.memory_space<any>>
      %c3_i32_89 = arith.constant 3 : i32
      %c0_i32_90 = arith.constant 0 : i32
      %c0_i32_91 = arith.constant 0 : i32
      %506 = tpu.memref_slice %arg11[%9, %c3_i32_89, %c0_i32_90, %c0_i32_91] : memref<2x10x22x128xf32, #tpu.memory_space<vmem>> -> memref<1x4x22x128xf32, #tpu.memory_space<vmem>>
      %507 = tpu.memref_squeeze %506 : memref<1x4x22x128xf32, #tpu.memory_space<vmem>> -> memref<4x22x128xf32, #tpu.memory_space<vmem>>
      %508 = tpu.memref_slice %arg12[%9, %c1_i32_86] : memref<2x3x!tpu.dma_semaphore, #tpu.memory_space<semaphore_mem>> -> memref<1x1x!tpu.dma_semaphore, #tpu.memory_space<semaphore_mem>>
      %509 = tpu.memref_squeeze %508 : memref<1x1x!tpu.dma_semaphore, #tpu.memory_space<semaphore_mem>> -> memref<!tpu.dma_semaphore, #tpu.memory_space<semaphore_mem>>
      tpu.enqueue_dma source(%505 : memref<4x22x128xf32, #tpu.memory_space<any>>) target(%507 : memref<4x22x128xf32, #tpu.memory_space<vmem>>) target_semaphore(%509 : memref<!tpu.dma_semaphore, #tpu.memory_space<semaphore_mem>>)
    } else {
    }
    %c3_i32_14 = arith.constant 3 : i32
    %30 = arith.cmpi slt, %arg1, %c3_i32_14 : i32
    %31 = arith.andi %10, %30 : i1
    %32 = arith.extui %31 : i1 to i32
    %c0_i32_15 = arith.constant 0 : i32
    %33 = arith.cmpi ne, %32, %c0_i32_15 : i32
    scf.if %33 {
      %c2_i32_86 = arith.constant 2 : i32
      %c0_i32_87 = arith.constant 0 : i32
      %c0_i32_88 = arith.constant 0 : i32
      %504 = tpu.memref_slice %arg2[%arg0, %19, %c0_i32_87, %c0_i32_88] : memref<2x16x22x128xf32, #tpu.memory_space<any>> -> memref<1x3x22x128xf32, #tpu.memory_space<any>>
      %505 = tpu.memref_squeeze %504 : memref<1x3x22x128xf32, #tpu.memory_space<any>> -> memref<3x22x128xf32, #tpu.memory_space<any>>
      %c7_i32_89 = arith.constant 7 : i32
      %c0_i32_90 = arith.constant 0 : i32
      %c0_i32_91 = arith.constant 0 : i32
      %506 = tpu.memref_slice %arg11[%9, %c7_i32_89, %c0_i32_90, %c0_i32_91] : memref<2x10x22x128xf32, #tpu.memory_space<vmem>> -> memref<1x3x22x128xf32, #tpu.memory_space<vmem>>
      %507 = tpu.memref_squeeze %506 : memref<1x3x22x128xf32, #tpu.memory_space<vmem>> -> memref<3x22x128xf32, #tpu.memory_space<vmem>>
      %508 = tpu.memref_slice %arg12[%9, %c2_i32_86] : memref<2x3x!tpu.dma_semaphore, #tpu.memory_space<semaphore_mem>> -> memref<1x1x!tpu.dma_semaphore, #tpu.memory_space<semaphore_mem>>
      %509 = tpu.memref_squeeze %508 : memref<1x1x!tpu.dma_semaphore, #tpu.memory_space<semaphore_mem>> -> memref<!tpu.dma_semaphore, #tpu.memory_space<semaphore_mem>>
      tpu.enqueue_dma source(%505 : memref<3x22x128xf32, #tpu.memory_space<any>>) target(%507 : memref<3x22x128xf32, #tpu.memory_space<vmem>>) target_semaphore(%509 : memref<!tpu.dma_semaphore, #tpu.memory_space<semaphore_mem>>)
    } else {
    }
    %c3_i32_16 = arith.constant 3 : i32
    %34 = arith.cmpi eq, %arg1, %c3_i32_16 : i32
    %35 = arith.andi %10, %34 : i1
    %36 = arith.extui %35 : i1 to i32
    %c0_i32_17 = arith.constant 0 : i32
    %37 = arith.cmpi ne, %36, %c0_i32_17 : i32
    scf.if %37 {
      %c2_i32_86 = arith.constant 2 : i32
      %c7_i32_87 = arith.constant 7 : i32
      %c0_i32_88 = arith.constant 0 : i32
      %c0_i32_89 = arith.constant 0 : i32
      %504 = tpu.memref_slice %arg11[%9, %c7_i32_87, %c0_i32_88, %c0_i32_89] : memref<2x10x22x128xf32, #tpu.memory_space<vmem>> -> memref<1x3x22x128xf32, #tpu.memory_space<vmem>>
      %505 = tpu.memref_squeeze %504 : memref<1x3x22x128xf32, #tpu.memory_space<vmem>> -> memref<3x22x128xf32, #tpu.memory_space<vmem>>
      %506 = tpu.memref_slice %arg12[%9, %c2_i32_86] : memref<2x3x!tpu.dma_semaphore, #tpu.memory_space<semaphore_mem>> -> memref<1x1x!tpu.dma_semaphore, #tpu.memory_space<semaphore_mem>>
      %507 = tpu.memref_squeeze %506 : memref<1x1x!tpu.dma_semaphore, #tpu.memory_space<semaphore_mem>> -> memref<!tpu.dma_semaphore, #tpu.memory_space<semaphore_mem>>
      tpu.enqueue_dma source(%arg3 : memref<3x22x128xf32, #tpu.memory_space<any>>) target(%505 : memref<3x22x128xf32, #tpu.memory_space<vmem>>) target_semaphore(%507 : memref<!tpu.dma_semaphore, #tpu.memory_space<semaphore_mem>>)
    } else {
    }
    %c0_i32_18 = arith.constant 0 : i32
    %c0_i32_19 = arith.constant 0 : i32
    %c0_i32_20 = arith.constant 0 : i32
    %c0_i32_21 = arith.constant 0 : i32
    %38 = tpu.memref_slice %arg11[%9, %c0_i32_19, %c0_i32_20, %c0_i32_21] : memref<2x10x22x128xf32, #tpu.memory_space<vmem>> -> memref<1x3x22x128xf32, #tpu.memory_space<vmem>>
    %39 = tpu.memref_squeeze %38 : memref<1x3x22x128xf32, #tpu.memory_space<vmem>> -> memref<3x22x128xf32, #tpu.memory_space<vmem>>
    %40 = tpu.memref_slice %arg12[%9, %c0_i32_18] : memref<2x3x!tpu.dma_semaphore, #tpu.memory_space<semaphore_mem>> -> memref<1x1x!tpu.dma_semaphore, #tpu.memory_space<semaphore_mem>>
    %41 = tpu.memref_squeeze %40 : memref<1x1x!tpu.dma_semaphore, #tpu.memory_space<semaphore_mem>> -> memref<!tpu.dma_semaphore, #tpu.memory_space<semaphore_mem>>
    tpu.wait_dma2 semaphore(%41 : memref<!tpu.dma_semaphore, #tpu.memory_space<semaphore_mem>>) src(%arg3 : memref<3x22x128xf32, #tpu.memory_space<any>>) dst(%39 : memref<3x22x128xf32, #tpu.memory_space<vmem>>)
    %c1_i32_22 = arith.constant 1 : i32
    %c0_i32_23 = arith.constant 0 : i32
    %c0_i32_24 = arith.constant 0 : i32
    %c0_i32_25 = arith.constant 0 : i32
    %42 = tpu.memref_slice %arg2[%arg0, %c0_i32_23, %c0_i32_24, %c0_i32_25] : memref<2x16x22x128xf32, #tpu.memory_space<any>> -> memref<1x4x22x128xf32, #tpu.memory_space<any>>
    %43 = tpu.memref_squeeze %42 : memref<1x4x22x128xf32, #tpu.memory_space<any>> -> memref<4x22x128xf32, #tpu.memory_space<any>>
    %c3_i32_26 = arith.constant 3 : i32
    %c0_i32_27 = arith.constant 0 : i32
    %c0_i32_28 = arith.constant 0 : i32
    %44 = tpu.memref_slice %arg11[%9, %c3_i32_26, %c0_i32_27, %c0_i32_28] : memref<2x10x22x128xf32, #tpu.memory_space<vmem>> -> memref<1x4x22x128xf32, #tpu.memory_space<vmem>>
    %45 = tpu.memref_squeeze %44 : memref<1x4x22x128xf32, #tpu.memory_space<vmem>> -> memref<4x22x128xf32, #tpu.memory_space<vmem>>
    %46 = tpu.memref_slice %arg12[%9, %c1_i32_22] : memref<2x3x!tpu.dma_semaphore, #tpu.memory_space<semaphore_mem>> -> memref<1x1x!tpu.dma_semaphore, #tpu.memory_space<semaphore_mem>>
    %47 = tpu.memref_squeeze %46 : memref<1x1x!tpu.dma_semaphore, #tpu.memory_space<semaphore_mem>> -> memref<!tpu.dma_semaphore, #tpu.memory_space<semaphore_mem>>
    tpu.wait_dma2 semaphore(%47 : memref<!tpu.dma_semaphore, #tpu.memory_space<semaphore_mem>>) src(%43 : memref<4x22x128xf32, #tpu.memory_space<any>>) dst(%45 : memref<4x22x128xf32, #tpu.memory_space<vmem>>)
    %c2_i32_29 = arith.constant 2 : i32
    %c7_i32 = arith.constant 7 : i32
    %c0_i32_30 = arith.constant 0 : i32
    %c0_i32_31 = arith.constant 0 : i32
    %48 = tpu.memref_slice %arg11[%9, %c7_i32, %c0_i32_30, %c0_i32_31] : memref<2x10x22x128xf32, #tpu.memory_space<vmem>> -> memref<1x3x22x128xf32, #tpu.memory_space<vmem>>
    %49 = tpu.memref_squeeze %48 : memref<1x3x22x128xf32, #tpu.memory_space<vmem>> -> memref<3x22x128xf32, #tpu.memory_space<vmem>>
    %50 = tpu.memref_slice %arg12[%9, %c2_i32_29] : memref<2x3x!tpu.dma_semaphore, #tpu.memory_space<semaphore_mem>> -> memref<1x1x!tpu.dma_semaphore, #tpu.memory_space<semaphore_mem>>
    %51 = tpu.memref_squeeze %50 : memref<1x1x!tpu.dma_semaphore, #tpu.memory_space<semaphore_mem>> -> memref<!tpu.dma_semaphore, #tpu.memory_space<semaphore_mem>>
    tpu.wait_dma2 semaphore(%51 : memref<!tpu.dma_semaphore, #tpu.memory_space<semaphore_mem>>) src(%arg3 : memref<3x22x128xf32, #tpu.memory_space<any>>) dst(%49 : memref<3x22x128xf32, #tpu.memory_space<vmem>>)
    %c1_i32_32 = arith.constant 1 : i32
    %52 = arith.addi %arg1, %c1_i32_32 : i32
    %c1_i32_33 = arith.constant 1 : i32
    %53 = arith.subi %c1_i32_33, %9 : i32
    %c1_i32_34 = arith.constant 1 : i32
    %54 = arith.addi %arg1, %c1_i32_34 : i32
    %c4_i32_35 = arith.constant 4 : i32
    %55 = arith.cmpi slt, %54, %c4_i32_35 : i32
    %c4_i32_36 = arith.constant 4 : i32
    %56 = arith.muli %52, %c4_i32_36 : i32
    %c3_i32_37 = arith.constant 3 : i32
    %57 = arith.subi %56, %c3_i32_37 : i32
    %c0_i32_38 = arith.constant 0 : i32
    %58 = arith.maxsi %57, %c0_i32_38 : i32
    %c4_i32_39 = arith.constant 4 : i32
    %59 = arith.muli %52, %c4_i32_39 : i32
    %c12_i32_40 = arith.constant 12 : i32
    %60 = arith.minsi %59, %c12_i32_40 : i32
    %c1_i32_41 = arith.constant 1 : i32
    %61 = arith.addi %52, %c1_i32_41 : i32
    %c4_i32_42 = arith.constant 4 : i32
    %62 = arith.muli %61, %c4_i32_42 : i32
    %c13_i32_43 = arith.constant 13 : i32
    %63 = arith.minsi %62, %c13_i32_43 : i32
    %c0_i32_44 = arith.constant 0 : i32
    %64 = arith.maxsi %63, %c0_i32_44 : i32
    %c0_i32_45 = arith.constant 0 : i32
    %65 = arith.cmpi sgt, %52, %c0_i32_45 : i32
    %66 = arith.andi %55, %65 : i1
    %67 = arith.extui %66 : i1 to i32
    %c0_i32_46 = arith.constant 0 : i32
    %68 = arith.cmpi ne, %67, %c0_i32_46 : i32
    scf.if %68 {
      %c0_i32_86 = arith.constant 0 : i32
      %c0_i32_87 = arith.constant 0 : i32
      %c0_i32_88 = arith.constant 0 : i32
      %504 = tpu.memref_slice %arg2[%arg0, %58, %c0_i32_87, %c0_i32_88] : memref<2x16x22x128xf32, #tpu.memory_space<any>> -> memref<1x3x22x128xf32, #tpu.memory_space<any>>
      %505 = tpu.memref_squeeze %504 : memref<1x3x22x128xf32, #tpu.memory_space<any>> -> memref<3x22x128xf32, #tpu.memory_space<any>>
      %c0_i32_89 = arith.constant 0 : i32
      %c0_i32_90 = arith.constant 0 : i32
      %c0_i32_91 = arith.constant 0 : i32
      %506 = tpu.memref_slice %arg11[%53, %c0_i32_89, %c0_i32_90, %c0_i32_91] : memref<2x10x22x128xf32, #tpu.memory_space<vmem>> -> memref<1x3x22x128xf32, #tpu.memory_space<vmem>>
      %507 = tpu.memref_squeeze %506 : memref<1x3x22x128xf32, #tpu.memory_space<vmem>> -> memref<3x22x128xf32, #tpu.memory_space<vmem>>
      %508 = tpu.memref_slice %arg12[%53, %c0_i32_86] : memref<2x3x!tpu.dma_semaphore, #tpu.memory_space<semaphore_mem>> -> memref<1x1x!tpu.dma_semaphore, #tpu.memory_space<semaphore_mem>>
      %509 = tpu.memref_squeeze %508 : memref<1x1x!tpu.dma_semaphore, #tpu.memory_space<semaphore_mem>> -> memref<!tpu.dma_semaphore, #tpu.memory_space<semaphore_mem>>
      tpu.enqueue_dma source(%505 : memref<3x22x128xf32, #tpu.memory_space<any>>) target(%507 : memref<3x22x128xf32, #tpu.memory_space<vmem>>) target_semaphore(%509 : memref<!tpu.dma_semaphore, #tpu.memory_space<semaphore_mem>>)
    } else {
    }
    %c0_i32_47 = arith.constant 0 : i32
    %69 = arith.cmpi eq, %52, %c0_i32_47 : i32
    %70 = arith.andi %55, %69 : i1
    %71 = arith.extui %70 : i1 to i32
    %c0_i32_48 = arith.constant 0 : i32
    %72 = arith.cmpi ne, %71, %c0_i32_48 : i32
    scf.if %72 {
      %c0_i32_86 = arith.constant 0 : i32
      %c0_i32_87 = arith.constant 0 : i32
      %c0_i32_88 = arith.constant 0 : i32
      %c0_i32_89 = arith.constant 0 : i32
      %504 = tpu.memref_slice %arg11[%53, %c0_i32_87, %c0_i32_88, %c0_i32_89] : memref<2x10x22x128xf32, #tpu.memory_space<vmem>> -> memref<1x3x22x128xf32, #tpu.memory_space<vmem>>
      %505 = tpu.memref_squeeze %504 : memref<1x3x22x128xf32, #tpu.memory_space<vmem>> -> memref<3x22x128xf32, #tpu.memory_space<vmem>>
      %506 = tpu.memref_slice %arg12[%53, %c0_i32_86] : memref<2x3x!tpu.dma_semaphore, #tpu.memory_space<semaphore_mem>> -> memref<1x1x!tpu.dma_semaphore, #tpu.memory_space<semaphore_mem>>
      %507 = tpu.memref_squeeze %506 : memref<1x1x!tpu.dma_semaphore, #tpu.memory_space<semaphore_mem>> -> memref<!tpu.dma_semaphore, #tpu.memory_space<semaphore_mem>>
      tpu.enqueue_dma source(%arg3 : memref<3x22x128xf32, #tpu.memory_space<any>>) target(%505 : memref<3x22x128xf32, #tpu.memory_space<vmem>>) target_semaphore(%507 : memref<!tpu.dma_semaphore, #tpu.memory_space<semaphore_mem>>)
    } else {
    }
    %73 = arith.extui %55 : i1 to i32
    %c0_i32_49 = arith.constant 0 : i32
    %74 = arith.cmpi ne, %73, %c0_i32_49 : i32
    scf.if %74 {
      %c1_i32_86 = arith.constant 1 : i32
      %c0_i32_87 = arith.constant 0 : i32
      %c0_i32_88 = arith.constant 0 : i32
      %504 = tpu.memref_slice %arg2[%arg0, %60, %c0_i32_87, %c0_i32_88] : memref<2x16x22x128xf32, #tpu.memory_space<any>> -> memref<1x4x22x128xf32, #tpu.memory_space<any>>
      %505 = tpu.memref_squeeze %504 : memref<1x4x22x128xf32, #tpu.memory_space<any>> -> memref<4x22x128xf32, #tpu.memory_space<any>>
      %c3_i32_89 = arith.constant 3 : i32
      %c0_i32_90 = arith.constant 0 : i32
      %c0_i32_91 = arith.constant 0 : i32
      %506 = tpu.memref_slice %arg11[%53, %c3_i32_89, %c0_i32_90, %c0_i32_91] : memref<2x10x22x128xf32, #tpu.memory_space<vmem>> -> memref<1x4x22x128xf32, #tpu.memory_space<vmem>>
      %507 = tpu.memref_squeeze %506 : memref<1x4x22x128xf32, #tpu.memory_space<vmem>> -> memref<4x22x128xf32, #tpu.memory_space<vmem>>
      %508 = tpu.memref_slice %arg12[%53, %c1_i32_86] : memref<2x3x!tpu.dma_semaphore, #tpu.memory_space<semaphore_mem>> -> memref<1x1x!tpu.dma_semaphore, #tpu.memory_space<semaphore_mem>>
      %509 = tpu.memref_squeeze %508 : memref<1x1x!tpu.dma_semaphore, #tpu.memory_space<semaphore_mem>> -> memref<!tpu.dma_semaphore, #tpu.memory_space<semaphore_mem>>
      tpu.enqueue_dma source(%505 : memref<4x22x128xf32, #tpu.memory_space<any>>) target(%507 : memref<4x22x128xf32, #tpu.memory_space<vmem>>) target_semaphore(%509 : memref<!tpu.dma_semaphore, #tpu.memory_space<semaphore_mem>>)
    } else {
    }
    %c3_i32_50 = arith.constant 3 : i32
    %75 = arith.cmpi slt, %52, %c3_i32_50 : i32
    %76 = arith.andi %55, %75 : i1
    %77 = arith.extui %76 : i1 to i32
    %c0_i32_51 = arith.constant 0 : i32
    %78 = arith.cmpi ne, %77, %c0_i32_51 : i32
    scf.if %78 {
      %c2_i32_86 = arith.constant 2 : i32
      %c0_i32_87 = arith.constant 0 : i32
      %c0_i32_88 = arith.constant 0 : i32
      %504 = tpu.memref_slice %arg2[%arg0, %64, %c0_i32_87, %c0_i32_88] : memref<2x16x22x128xf32, #tpu.memory_space<any>> -> memref<1x3x22x128xf32, #tpu.memory_space<any>>
      %505 = tpu.memref_squeeze %504 : memref<1x3x22x128xf32, #tpu.memory_space<any>> -> memref<3x22x128xf32, #tpu.memory_space<any>>
      %c7_i32_89 = arith.constant 7 : i32
      %c0_i32_90 = arith.constant 0 : i32
      %c0_i32_91 = arith.constant 0 : i32
      %506 = tpu.memref_slice %arg11[%53, %c7_i32_89, %c0_i32_90, %c0_i32_91] : memref<2x10x22x128xf32, #tpu.memory_space<vmem>> -> memref<1x3x22x128xf32, #tpu.memory_space<vmem>>
      %507 = tpu.memref_squeeze %506 : memref<1x3x22x128xf32, #tpu.memory_space<vmem>> -> memref<3x22x128xf32, #tpu.memory_space<vmem>>
      %508 = tpu.memref_slice %arg12[%53, %c2_i32_86] : memref<2x3x!tpu.dma_semaphore, #tpu.memory_space<semaphore_mem>> -> memref<1x1x!tpu.dma_semaphore, #tpu.memory_space<semaphore_mem>>
      %509 = tpu.memref_squeeze %508 : memref<1x1x!tpu.dma_semaphore, #tpu.memory_space<semaphore_mem>> -> memref<!tpu.dma_semaphore, #tpu.memory_space<semaphore_mem>>
      tpu.enqueue_dma source(%505 : memref<3x22x128xf32, #tpu.memory_space<any>>) target(%507 : memref<3x22x128xf32, #tpu.memory_space<vmem>>) target_semaphore(%509 : memref<!tpu.dma_semaphore, #tpu.memory_space<semaphore_mem>>)
    } else {
    }
    %c3_i32_52 = arith.constant 3 : i32
    %79 = arith.cmpi eq, %52, %c3_i32_52 : i32
    %80 = arith.andi %55, %79 : i1
    %81 = arith.extui %80 : i1 to i32
    %c0_i32_53 = arith.constant 0 : i32
    %82 = arith.cmpi ne, %81, %c0_i32_53 : i32
    scf.if %82 {
      %c2_i32_86 = arith.constant 2 : i32
      %c7_i32_87 = arith.constant 7 : i32
      %c0_i32_88 = arith.constant 0 : i32
      %c0_i32_89 = arith.constant 0 : i32
      %504 = tpu.memref_slice %arg11[%53, %c7_i32_87, %c0_i32_88, %c0_i32_89] : memref<2x10x22x128xf32, #tpu.memory_space<vmem>> -> memref<1x3x22x128xf32, #tpu.memory_space<vmem>>
      %505 = tpu.memref_squeeze %504 : memref<1x3x22x128xf32, #tpu.memory_space<vmem>> -> memref<3x22x128xf32, #tpu.memory_space<vmem>>
      %506 = tpu.memref_slice %arg12[%53, %c2_i32_86] : memref<2x3x!tpu.dma_semaphore, #tpu.memory_space<semaphore_mem>> -> memref<1x1x!tpu.dma_semaphore, #tpu.memory_space<semaphore_mem>>
      %507 = tpu.memref_squeeze %506 : memref<1x1x!tpu.dma_semaphore, #tpu.memory_space<semaphore_mem>> -> memref<!tpu.dma_semaphore, #tpu.memory_space<semaphore_mem>>
      tpu.enqueue_dma source(%arg3 : memref<3x22x128xf32, #tpu.memory_space<any>>) target(%505 : memref<3x22x128xf32, #tpu.memory_space<vmem>>) target_semaphore(%507 : memref<!tpu.dma_semaphore, #tpu.memory_space<semaphore_mem>>)
    } else {
    }
    %83 = arith.index_cast %9 : i32 to index
    %c0 = arith.constant 0 : index
    %c0_54 = arith.constant 0 : index
    %c0_55 = arith.constant 0 : index
    %84 = vector.load %arg11[%83, %c0, %c0_54, %c0_55] : memref<2x10x22x128xf32, #tpu.memory_space<vmem>>, vector<1x10x22x128xf32>
    %85 = vector.shape_cast %84 : vector<1x10x22x128xf32> to vector<10x22x128xf32>
    %c0_56 = arith.constant 0 : index
    %c0_57 = arith.constant 0 : index
    %86 = vector.load %arg4[%c0_56, %c0_57] : memref<49x128xf32, #tpu.memory_space<vmem>>, vector<49x128xf32>
    %cst = arith.constant 0.000000e+00 : f32
    %87 = vector.broadcast %cst : f32 to vector<4x16x128xf32>
    %88 = vector.extract_strided_slice %85 {offsets = [0, 0, 0], sizes = [10, 16, 128], strides = [1, 1, 1]} : vector<10x22x128xf32> to vector<10x16x128xf32>
    %89 = vector.extract_strided_slice %88 {offsets = [0, 0, 0], sizes = [4, 16, 128], strides = [1, 1, 1]} : vector<10x16x128xf32> to vector<4x16x128xf32>
    %90 = vector.extract_strided_slice %86 {offsets = [0, 0], sizes = [1, 128], strides = [1, 1]} : vector<49x128xf32> to vector<1x128xf32>
    %91 = vector.shape_cast %90 : vector<1x128xf32> to vector<128xf32>
    %92 = vector.shape_cast %91 : vector<128xf32> to vector<1x1x128xf32>
    %93 = vector.broadcast %92 : vector<1x1x128xf32> to vector<4x16x128xf32>
    %94 = arith.mulf %89, %93 : vector<4x16x128xf32>
    %95 = arith.addf %87, %94 : vector<4x16x128xf32>
    %96 = vector.extract_strided_slice %88 {offsets = [1, 0, 0], sizes = [4, 16, 128], strides = [1, 1, 1]} : vector<10x16x128xf32> to vector<4x16x128xf32>
    %97 = vector.extract_strided_slice %86 {offsets = [7, 0], sizes = [1, 128], strides = [1, 1]} : vector<49x128xf32> to vector<1x128xf32>
    %98 = vector.shape_cast %97 : vector<1x128xf32> to vector<128xf32>
    %99 = vector.shape_cast %98 : vector<128xf32> to vector<1x1x128xf32>
    %100 = vector.broadcast %99 : vector<1x1x128xf32> to vector<4x16x128xf32>
    %101 = arith.mulf %96, %100 : vector<4x16x128xf32>
    %102 = arith.addf %95, %101 : vector<4x16x128xf32>
    %103 = vector.extract_strided_slice %88 {offsets = [2, 0, 0], sizes = [4, 16, 128], strides = [1, 1, 1]} : vector<10x16x128xf32> to vector<4x16x128xf32>
    %104 = vector.extract_strided_slice %86 {offsets = [14, 0], sizes = [1, 128], strides = [1, 1]} : vector<49x128xf32> to vector<1x128xf32>
    %105 = vector.shape_cast %104 : vector<1x128xf32> to vector<128xf32>
    %106 = vector.shape_cast %105 : vector<128xf32> to vector<1x1x128xf32>
    %107 = vector.broadcast %106 : vector<1x1x128xf32> to vector<4x16x128xf32>
    %108 = arith.mulf %103, %107 : vector<4x16x128xf32>
    %109 = arith.addf %102, %108 : vector<4x16x128xf32>
    %110 = vector.extract_strided_slice %88 {offsets = [3, 0, 0], sizes = [4, 16, 128], strides = [1, 1, 1]} : vector<10x16x128xf32> to vector<4x16x128xf32>
    %111 = vector.extract_strided_slice %86 {offsets = [21, 0], sizes = [1, 128], strides = [1, 1]} : vector<49x128xf32> to vector<1x128xf32>
    %112 = vector.shape_cast %111 : vector<1x128xf32> to vector<128xf32>
    %113 = vector.shape_cast %112 : vector<128xf32> to vector<1x1x128xf32>
    %114 = vector.broadcast %113 : vector<1x1x128xf32> to vector<4x16x128xf32>
    %115 = arith.mulf %110, %114 : vector<4x16x128xf32>
    %116 = arith.addf %109, %115 : vector<4x16x128xf32>
    %117 = vector.extract_strided_slice %88 {offsets = [4, 0, 0], sizes = [4, 16, 128], strides = [1, 1, 1]} : vector<10x16x128xf32> to vector<4x16x128xf32>
    %118 = vector.extract_strided_slice %86 {offsets = [28, 0], sizes = [1, 128], strides = [1, 1]} : vector<49x128xf32> to vector<1x128xf32>
    %119 = vector.shape_cast %118 : vector<1x128xf32> to vector<128xf32>
    %120 = vector.shape_cast %119 : vector<128xf32> to vector<1x1x128xf32>
    %121 = vector.broadcast %120 : vector<1x1x128xf32> to vector<4x16x128xf32>
    %122 = arith.mulf %117, %121 : vector<4x16x128xf32>
    %123 = arith.addf %116, %122 : vector<4x16x128xf32>
    %124 = vector.extract_strided_slice %88 {offsets = [5, 0, 0], sizes = [4, 16, 128], strides = [1, 1, 1]} : vector<10x16x128xf32> to vector<4x16x128xf32>
    %125 = vector.extract_strided_slice %86 {offsets = [35, 0], sizes = [1, 128], strides = [1, 1]} : vector<49x128xf32> to vector<1x128xf32>
    %126 = vector.shape_cast %125 : vector<1x128xf32> to vector<128xf32>
    %127 = vector.shape_cast %126 : vector<128xf32> to vector<1x1x128xf32>
    %128 = vector.broadcast %127 : vector<1x1x128xf32> to vector<4x16x128xf32>
    %129 = arith.mulf %124, %128 : vector<4x16x128xf32>
    %130 = arith.addf %123, %129 : vector<4x16x128xf32>
    %131 = vector.extract_strided_slice %88 {offsets = [6, 0, 0], sizes = [4, 16, 128], strides = [1, 1, 1]} : vector<10x16x128xf32> to vector<4x16x128xf32>
    %132 = vector.extract_strided_slice %86 {offsets = [42, 0], sizes = [1, 128], strides = [1, 1]} : vector<49x128xf32> to vector<1x128xf32>
    %133 = vector.shape_cast %132 : vector<1x128xf32> to vector<128xf32>
    %134 = vector.shape_cast %133 : vector<128xf32> to vector<1x1x128xf32>
    %135 = vector.broadcast %134 : vector<1x1x128xf32> to vector<4x16x128xf32>
    %136 = arith.mulf %131, %135 : vector<4x16x128xf32>
    %137 = arith.addf %130, %136 : vector<4x16x128xf32>
    %138 = vector.extract_strided_slice %85 {offsets = [0, 1, 0], sizes = [10, 16, 128], strides = [1, 1, 1]} : vector<10x22x128xf32> to vector<10x16x128xf32>
    %139 = vector.extract_strided_slice %138 {offsets = [0, 0, 0], sizes = [4, 16, 128], strides = [1, 1, 1]} : vector<10x16x128xf32> to vector<4x16x128xf32>
    %140 = vector.extract_strided_slice %86 {offsets = [1, 0], sizes = [1, 128], strides = [1, 1]} : vector<49x128xf32> to vector<1x128xf32>
    %141 = vector.shape_cast %140 : vector<1x128xf32> to vector<128xf32>
    %142 = vector.shape_cast %141 : vector<128xf32> to vector<1x1x128xf32>
    %143 = vector.broadcast %142 : vector<1x1x128xf32> to vector<4x16x128xf32>
    %144 = arith.mulf %139, %143 : vector<4x16x128xf32>
    %145 = arith.addf %137, %144 : vector<4x16x128xf32>
    %146 = vector.extract_strided_slice %138 {offsets = [1, 0, 0], sizes = [4, 16, 128], strides = [1, 1, 1]} : vector<10x16x128xf32> to vector<4x16x128xf32>
    %147 = vector.extract_strided_slice %86 {offsets = [8, 0], sizes = [1, 128], strides = [1, 1]} : vector<49x128xf32> to vector<1x128xf32>
    %148 = vector.shape_cast %147 : vector<1x128xf32> to vector<128xf32>
    %149 = vector.shape_cast %148 : vector<128xf32> to vector<1x1x128xf32>
    %150 = vector.broadcast %149 : vector<1x1x128xf32> to vector<4x16x128xf32>
    %151 = arith.mulf %146, %150 : vector<4x16x128xf32>
    %152 = arith.addf %145, %151 : vector<4x16x128xf32>
    %153 = vector.extract_strided_slice %138 {offsets = [2, 0, 0], sizes = [4, 16, 128], strides = [1, 1, 1]} : vector<10x16x128xf32> to vector<4x16x128xf32>
    %154 = vector.extract_strided_slice %86 {offsets = [15, 0], sizes = [1, 128], strides = [1, 1]} : vector<49x128xf32> to vector<1x128xf32>
    %155 = vector.shape_cast %154 : vector<1x128xf32> to vector<128xf32>
    %156 = vector.shape_cast %155 : vector<128xf32> to vector<1x1x128xf32>
    %157 = vector.broadcast %156 : vector<1x1x128xf32> to vector<4x16x128xf32>
    %158 = arith.mulf %153, %157 : vector<4x16x128xf32>
    %159 = arith.addf %152, %158 : vector<4x16x128xf32>
    %160 = vector.extract_strided_slice %138 {offsets = [3, 0, 0], sizes = [4, 16, 128], strides = [1, 1, 1]} : vector<10x16x128xf32> to vector<4x16x128xf32>
    %161 = vector.extract_strided_slice %86 {offsets = [22, 0], sizes = [1, 128], strides = [1, 1]} : vector<49x128xf32> to vector<1x128xf32>
    %162 = vector.shape_cast %161 : vector<1x128xf32> to vector<128xf32>
    %163 = vector.shape_cast %162 : vector<128xf32> to vector<1x1x128xf32>
    %164 = vector.broadcast %163 : vector<1x1x128xf32> to vector<4x16x128xf32>
    %165 = arith.mulf %160, %164 : vector<4x16x128xf32>
    %166 = arith.addf %159, %165 : vector<4x16x128xf32>
    %167 = vector.extract_strided_slice %138 {offsets = [4, 0, 0], sizes = [4, 16, 128], strides = [1, 1, 1]} : vector<10x16x128xf32> to vector<4x16x128xf32>
    %168 = vector.extract_strided_slice %86 {offsets = [29, 0], sizes = [1, 128], strides = [1, 1]} : vector<49x128xf32> to vector<1x128xf32>
    %169 = vector.shape_cast %168 : vector<1x128xf32> to vector<128xf32>
    %170 = vector.shape_cast %169 : vector<128xf32> to vector<1x1x128xf32>
    %171 = vector.broadcast %170 : vector<1x1x128xf32> to vector<4x16x128xf32>
    %172 = arith.mulf %167, %171 : vector<4x16x128xf32>
    %173 = arith.addf %166, %172 : vector<4x16x128xf32>
    %174 = vector.extract_strided_slice %138 {offsets = [5, 0, 0], sizes = [4, 16, 128], strides = [1, 1, 1]} : vector<10x16x128xf32> to vector<4x16x128xf32>
    %175 = vector.extract_strided_slice %86 {offsets = [36, 0], sizes = [1, 128], strides = [1, 1]} : vector<49x128xf32> to vector<1x128xf32>
    %176 = vector.shape_cast %175 : vector<1x128xf32> to vector<128xf32>
    %177 = vector.shape_cast %176 : vector<128xf32> to vector<1x1x128xf32>
    %178 = vector.broadcast %177 : vector<1x1x128xf32> to vector<4x16x128xf32>
    %179 = arith.mulf %174, %178 : vector<4x16x128xf32>
    %180 = arith.addf %173, %179 : vector<4x16x128xf32>
    %181 = vector.extract_strided_slice %138 {offsets = [6, 0, 0], sizes = [4, 16, 128], strides = [1, 1, 1]} : vector<10x16x128xf32> to vector<4x16x128xf32>
    %182 = vector.extract_strided_slice %86 {offsets = [43, 0], sizes = [1, 128], strides = [1, 1]} : vector<49x128xf32> to vector<1x128xf32>
    %183 = vector.shape_cast %182 : vector<1x128xf32> to vector<128xf32>
    %184 = vector.shape_cast %183 : vector<128xf32> to vector<1x1x128xf32>
    %185 = vector.broadcast %184 : vector<1x1x128xf32> to vector<4x16x128xf32>
    %186 = arith.mulf %181, %185 : vector<4x16x128xf32>
    %187 = arith.addf %180, %186 : vector<4x16x128xf32>
    %188 = vector.extract_strided_slice %85 {offsets = [0, 2, 0], sizes = [10, 16, 128], strides = [1, 1, 1]} : vector<10x22x128xf32> to vector<10x16x128xf32>
    %189 = vector.extract_strided_slice %188 {offsets = [0, 0, 0], sizes = [4, 16, 128], strides = [1, 1, 1]} : vector<10x16x128xf32> to vector<4x16x128xf32>
    %190 = vector.extract_strided_slice %86 {offsets = [2, 0], sizes = [1, 128], strides = [1, 1]} : vector<49x128xf32> to vector<1x128xf32>
    %191 = vector.shape_cast %190 : vector<1x128xf32> to vector<128xf32>
    %192 = vector.shape_cast %191 : vector<128xf32> to vector<1x1x128xf32>
    %193 = vector.broadcast %192 : vector<1x1x128xf32> to vector<4x16x128xf32>
    %194 = arith.mulf %189, %193 : vector<4x16x128xf32>
    %195 = arith.addf %187, %194 : vector<4x16x128xf32>
    %196 = vector.extract_strided_slice %188 {offsets = [1, 0, 0], sizes = [4, 16, 128], strides = [1, 1, 1]} : vector<10x16x128xf32> to vector<4x16x128xf32>
    %197 = vector.extract_strided_slice %86 {offsets = [9, 0], sizes = [1, 128], strides = [1, 1]} : vector<49x128xf32> to vector<1x128xf32>
    %198 = vector.shape_cast %197 : vector<1x128xf32> to vector<128xf32>
    %199 = vector.shape_cast %198 : vector<128xf32> to vector<1x1x128xf32>
    %200 = vector.broadcast %199 : vector<1x1x128xf32> to vector<4x16x128xf32>
    %201 = arith.mulf %196, %200 : vector<4x16x128xf32>
    %202 = arith.addf %195, %201 : vector<4x16x128xf32>
    %203 = vector.extract_strided_slice %188 {offsets = [2, 0, 0], sizes = [4, 16, 128], strides = [1, 1, 1]} : vector<10x16x128xf32> to vector<4x16x128xf32>
    %204 = vector.extract_strided_slice %86 {offsets = [16, 0], sizes = [1, 128], strides = [1, 1]} : vector<49x128xf32> to vector<1x128xf32>
    %205 = vector.shape_cast %204 : vector<1x128xf32> to vector<128xf32>
    %206 = vector.shape_cast %205 : vector<128xf32> to vector<1x1x128xf32>
    %207 = vector.broadcast %206 : vector<1x1x128xf32> to vector<4x16x128xf32>
    %208 = arith.mulf %203, %207 : vector<4x16x128xf32>
    %209 = arith.addf %202, %208 : vector<4x16x128xf32>
    %210 = vector.extract_strided_slice %188 {offsets = [3, 0, 0], sizes = [4, 16, 128], strides = [1, 1, 1]} : vector<10x16x128xf32> to vector<4x16x128xf32>
    %211 = vector.extract_strided_slice %86 {offsets = [23, 0], sizes = [1, 128], strides = [1, 1]} : vector<49x128xf32> to vector<1x128xf32>
    %212 = vector.shape_cast %211 : vector<1x128xf32> to vector<128xf32>
    %213 = vector.shape_cast %212 : vector<128xf32> to vector<1x1x128xf32>
    %214 = vector.broadcast %213 : vector<1x1x128xf32> to vector<4x16x128xf32>
    %215 = arith.mulf %210, %214 : vector<4x16x128xf32>
    %216 = arith.addf %209, %215 : vector<4x16x128xf32>
    %217 = vector.extract_strided_slice %188 {offsets = [4, 0, 0], sizes = [4, 16, 128], strides = [1, 1, 1]} : vector<10x16x128xf32> to vector<4x16x128xf32>
    %218 = vector.extract_strided_slice %86 {offsets = [30, 0], sizes = [1, 128], strides = [1, 1]} : vector<49x128xf32> to vector<1x128xf32>
    %219 = vector.shape_cast %218 : vector<1x128xf32> to vector<128xf32>
    %220 = vector.shape_cast %219 : vector<128xf32> to vector<1x1x128xf32>
    %221 = vector.broadcast %220 : vector<1x1x128xf32> to vector<4x16x128xf32>
    %222 = arith.mulf %217, %221 : vector<4x16x128xf32>
    %223 = arith.addf %216, %222 : vector<4x16x128xf32>
    %224 = vector.extract_strided_slice %188 {offsets = [5, 0, 0], sizes = [4, 16, 128], strides = [1, 1, 1]} : vector<10x16x128xf32> to vector<4x16x128xf32>
    %225 = vector.extract_strided_slice %86 {offsets = [37, 0], sizes = [1, 128], strides = [1, 1]} : vector<49x128xf32> to vector<1x128xf32>
    %226 = vector.shape_cast %225 : vector<1x128xf32> to vector<128xf32>
    %227 = vector.shape_cast %226 : vector<128xf32> to vector<1x1x128xf32>
    %228 = vector.broadcast %227 : vector<1x1x128xf32> to vector<4x16x128xf32>
    %229 = arith.mulf %224, %228 : vector<4x16x128xf32>
    %230 = arith.addf %223, %229 : vector<4x16x128xf32>
    %231 = vector.extract_strided_slice %188 {offsets = [6, 0, 0], sizes = [4, 16, 128], strides = [1, 1, 1]} : vector<10x16x128xf32> to vector<4x16x128xf32>
    %232 = vector.extract_strided_slice %86 {offsets = [44, 0], sizes = [1, 128], strides = [1, 1]} : vector<49x128xf32> to vector<1x128xf32>
    %233 = vector.shape_cast %232 : vector<1x128xf32> to vector<128xf32>
    %234 = vector.shape_cast %233 : vector<128xf32> to vector<1x1x128xf32>
    %235 = vector.broadcast %234 : vector<1x1x128xf32> to vector<4x16x128xf32>
    %236 = arith.mulf %231, %235 : vector<4x16x128xf32>
    %237 = arith.addf %230, %236 : vector<4x16x128xf32>
    %238 = vector.extract_strided_slice %85 {offsets = [0, 3, 0], sizes = [10, 16, 128], strides = [1, 1, 1]} : vector<10x22x128xf32> to vector<10x16x128xf32>
    %239 = vector.extract_strided_slice %238 {offsets = [3, 0, 0], sizes = [4, 16, 128], strides = [1, 1, 1]} : vector<10x16x128xf32> to vector<4x16x128xf32>
    %240 = vector.extract_strided_slice %238 {offsets = [0, 0, 0], sizes = [4, 16, 128], strides = [1, 1, 1]} : vector<10x16x128xf32> to vector<4x16x128xf32>
    %241 = vector.extract_strided_slice %86 {offsets = [3, 0], sizes = [1, 128], strides = [1, 1]} : vector<49x128xf32> to vector<1x128xf32>
    %242 = vector.shape_cast %241 : vector<1x128xf32> to vector<128xf32>
    %243 = vector.shape_cast %242 : vector<128xf32> to vector<1x1x128xf32>
    %244 = vector.broadcast %243 : vector<1x1x128xf32> to vector<4x16x128xf32>
    %245 = arith.mulf %240, %244 : vector<4x16x128xf32>
    %246 = arith.addf %237, %245 : vector<4x16x128xf32>
    %247 = vector.extract_strided_slice %238 {offsets = [1, 0, 0], sizes = [4, 16, 128], strides = [1, 1, 1]} : vector<10x16x128xf32> to vector<4x16x128xf32>
    %248 = vector.extract_strided_slice %86 {offsets = [10, 0], sizes = [1, 128], strides = [1, 1]} : vector<49x128xf32> to vector<1x128xf32>
    %249 = vector.shape_cast %248 : vector<1x128xf32> to vector<128xf32>
    %250 = vector.shape_cast %249 : vector<128xf32> to vector<1x1x128xf32>
    %251 = vector.broadcast %250 : vector<1x1x128xf32> to vector<4x16x128xf32>
    %252 = arith.mulf %247, %251 : vector<4x16x128xf32>
    %253 = arith.addf %246, %252 : vector<4x16x128xf32>
    %254 = vector.extract_strided_slice %238 {offsets = [2, 0, 0], sizes = [4, 16, 128], strides = [1, 1, 1]} : vector<10x16x128xf32> to vector<4x16x128xf32>
    %255 = vector.extract_strided_slice %86 {offsets = [17, 0], sizes = [1, 128], strides = [1, 1]} : vector<49x128xf32> to vector<1x128xf32>
    %256 = vector.shape_cast %255 : vector<1x128xf32> to vector<128xf32>
    %257 = vector.shape_cast %256 : vector<128xf32> to vector<1x1x128xf32>
    %258 = vector.broadcast %257 : vector<1x1x128xf32> to vector<4x16x128xf32>
    %259 = arith.mulf %254, %258 : vector<4x16x128xf32>
    %260 = arith.addf %253, %259 : vector<4x16x128xf32>
    %261 = vector.extract_strided_slice %238 {offsets = [3, 0, 0], sizes = [4, 16, 128], strides = [1, 1, 1]} : vector<10x16x128xf32> to vector<4x16x128xf32>
    %262 = vector.extract_strided_slice %86 {offsets = [24, 0], sizes = [1, 128], strides = [1, 1]} : vector<49x128xf32> to vector<1x128xf32>
    %263 = vector.shape_cast %262 : vector<1x128xf32> to vector<128xf32>
    %264 = vector.shape_cast %263 : vector<128xf32> to vector<1x1x128xf32>
    %265 = vector.broadcast %264 : vector<1x1x128xf32> to vector<4x16x128xf32>
    %266 = arith.mulf %261, %265 : vector<4x16x128xf32>
    %267 = arith.addf %260, %266 : vector<4x16x128xf32>
    %268 = vector.extract_strided_slice %238 {offsets = [4, 0, 0], sizes = [4, 16, 128], strides = [1, 1, 1]} : vector<10x16x128xf32> to vector<4x16x128xf32>
    %269 = vector.extract_strided_slice %86 {offsets = [31, 0], sizes = [1, 128], strides = [1, 1]} : vector<49x128xf32> to vector<1x128xf32>
    %270 = vector.shape_cast %269 : vector<1x128xf32> to vector<128xf32>
    %271 = vector.shape_cast %270 : vector<128xf32> to vector<1x1x128xf32>
    %272 = vector.broadcast %271 : vector<1x1x128xf32> to vector<4x16x128xf32>
    %273 = arith.mulf %268, %272 : vector<4x16x128xf32>
    %274 = arith.addf %267, %273 : vector<4x16x128xf32>
    %275 = vector.extract_strided_slice %238 {offsets = [5, 0, 0], sizes = [4, 16, 128], strides = [1, 1, 1]} : vector<10x16x128xf32> to vector<4x16x128xf32>
    %276 = vector.extract_strided_slice %86 {offsets = [38, 0], sizes = [1, 128], strides = [1, 1]} : vector<49x128xf32> to vector<1x128xf32>
    %277 = vector.shape_cast %276 : vector<1x128xf32> to vector<128xf32>
    %278 = vector.shape_cast %277 : vector<128xf32> to vector<1x1x128xf32>
    %279 = vector.broadcast %278 : vector<1x1x128xf32> to vector<4x16x128xf32>
    %280 = arith.mulf %275, %279 : vector<4x16x128xf32>
    %281 = arith.addf %274, %280 : vector<4x16x128xf32>
    %282 = vector.extract_strided_slice %238 {offsets = [6, 0, 0], sizes = [4, 16, 128], strides = [1, 1, 1]} : vector<10x16x128xf32> to vector<4x16x128xf32>
    %283 = vector.extract_strided_slice %86 {offsets = [45, 0], sizes = [1, 128], strides = [1, 1]} : vector<49x128xf32> to vector<1x128xf32>
    %284 = vector.shape_cast %283 : vector<1x128xf32> to vector<128xf32>
    %285 = vector.shape_cast %284 : vector<128xf32> to vector<1x1x128xf32>
    %286 = vector.broadcast %285 : vector<1x1x128xf32> to vector<4x16x128xf32>
    %287 = arith.mulf %282, %286 : vector<4x16x128xf32>
    %288 = arith.addf %281, %287 : vector<4x16x128xf32>
    %289 = vector.extract_strided_slice %85 {offsets = [0, 4, 0], sizes = [10, 16, 128], strides = [1, 1, 1]} : vector<10x22x128xf32> to vector<10x16x128xf32>
    %290 = vector.extract_strided_slice %289 {offsets = [0, 0, 0], sizes = [4, 16, 128], strides = [1, 1, 1]} : vector<10x16x128xf32> to vector<4x16x128xf32>
    %291 = vector.extract_strided_slice %86 {offsets = [4, 0], sizes = [1, 128], strides = [1, 1]} : vector<49x128xf32> to vector<1x128xf32>
    %292 = vector.shape_cast %291 : vector<1x128xf32> to vector<128xf32>
    %293 = vector.shape_cast %292 : vector<128xf32> to vector<1x1x128xf32>
    %294 = vector.broadcast %293 : vector<1x1x128xf32> to vector<4x16x128xf32>
    %295 = arith.mulf %290, %294 : vector<4x16x128xf32>
    %296 = arith.addf %288, %295 : vector<4x16x128xf32>
    %297 = vector.extract_strided_slice %289 {offsets = [1, 0, 0], sizes = [4, 16, 128], strides = [1, 1, 1]} : vector<10x16x128xf32> to vector<4x16x128xf32>
    %298 = vector.extract_strided_slice %86 {offsets = [11, 0], sizes = [1, 128], strides = [1, 1]} : vector<49x128xf32> to vector<1x128xf32>
    %299 = vector.shape_cast %298 : vector<1x128xf32> to vector<128xf32>
    %300 = vector.shape_cast %299 : vector<128xf32> to vector<1x1x128xf32>
    %301 = vector.broadcast %300 : vector<1x1x128xf32> to vector<4x16x128xf32>
    %302 = arith.mulf %297, %301 : vector<4x16x128xf32>
    %303 = arith.addf %296, %302 : vector<4x16x128xf32>
    %304 = vector.extract_strided_slice %289 {offsets = [2, 0, 0], sizes = [4, 16, 128], strides = [1, 1, 1]} : vector<10x16x128xf32> to vector<4x16x128xf32>
    %305 = vector.extract_strided_slice %86 {offsets = [18, 0], sizes = [1, 128], strides = [1, 1]} : vector<49x128xf32> to vector<1x128xf32>
    %306 = vector.shape_cast %305 : vector<1x128xf32> to vector<128xf32>
    %307 = vector.shape_cast %306 : vector<128xf32> to vector<1x1x128xf32>
    %308 = vector.broadcast %307 : vector<1x1x128xf32> to vector<4x16x128xf32>
    %309 = arith.mulf %304, %308 : vector<4x16x128xf32>
    %310 = arith.addf %303, %309 : vector<4x16x128xf32>
    %311 = vector.extract_strided_slice %289 {offsets = [3, 0, 0], sizes = [4, 16, 128], strides = [1, 1, 1]} : vector<10x16x128xf32> to vector<4x16x128xf32>
    %312 = vector.extract_strided_slice %86 {offsets = [25, 0], sizes = [1, 128], strides = [1, 1]} : vector<49x128xf32> to vector<1x128xf32>
    %313 = vector.shape_cast %312 : vector<1x128xf32> to vector<128xf32>
    %314 = vector.shape_cast %313 : vector<128xf32> to vector<1x1x128xf32>
    %315 = vector.broadcast %314 : vector<1x1x128xf32> to vector<4x16x128xf32>
    %316 = arith.mulf %311, %315 : vector<4x16x128xf32>
    %317 = arith.addf %310, %316 : vector<4x16x128xf32>
    %318 = vector.extract_strided_slice %289 {offsets = [4, 0, 0], sizes = [4, 16, 128], strides = [1, 1, 1]} : vector<10x16x128xf32> to vector<4x16x128xf32>
    %319 = vector.extract_strided_slice %86 {offsets = [32, 0], sizes = [1, 128], strides = [1, 1]} : vector<49x128xf32> to vector<1x128xf32>
    %320 = vector.shape_cast %319 : vector<1x128xf32> to vector<128xf32>
    %321 = vector.shape_cast %320 : vector<128xf32> to vector<1x1x128xf32>
    %322 = vector.broadcast %321 : vector<1x1x128xf32> to vector<4x16x128xf32>
    %323 = arith.mulf %318, %322 : vector<4x16x128xf32>
    %324 = arith.addf %317, %323 : vector<4x16x128xf32>
    %325 = vector.extract_strided_slice %289 {offsets = [5, 0, 0], sizes = [4, 16, 128], strides = [1, 1, 1]} : vector<10x16x128xf32> to vector<4x16x128xf32>
    %326 = vector.extract_strided_slice %86 {offsets = [39, 0], sizes = [1, 128], strides = [1, 1]} : vector<49x128xf32> to vector<1x128xf32>
    %327 = vector.shape_cast %326 : vector<1x128xf32> to vector<128xf32>
    %328 = vector.shape_cast %327 : vector<128xf32> to vector<1x1x128xf32>
    %329 = vector.broadcast %328 : vector<1x1x128xf32> to vector<4x16x128xf32>
    %330 = arith.mulf %325, %329 : vector<4x16x128xf32>
    %331 = arith.addf %324, %330 : vector<4x16x128xf32>
    %332 = vector.extract_strided_slice %289 {offsets = [6, 0, 0], sizes = [4, 16, 128], strides = [1, 1, 1]} : vector<10x16x128xf32> to vector<4x16x128xf32>
    %333 = vector.extract_strided_slice %86 {offsets = [46, 0], sizes = [1, 128], strides = [1, 1]} : vector<49x128xf32> to vector<1x128xf32>
    %334 = vector.shape_cast %333 : vector<1x128xf32> to vector<128xf32>
    %335 = vector.shape_cast %334 : vector<128xf32> to vector<1x1x128xf32>
    %336 = vector.broadcast %335 : vector<1x1x128xf32> to vector<4x16x128xf32>
    %337 = arith.mulf %332, %336 : vector<4x16x128xf32>
    %338 = arith.addf %331, %337 : vector<4x16x128xf32>
    %339 = vector.extract_strided_slice %85 {offsets = [0, 5, 0], sizes = [10, 16, 128], strides = [1, 1, 1]} : vector<10x22x128xf32> to vector<10x16x128xf32>
    %340 = vector.extract_strided_slice %339 {offsets = [0, 0, 0], sizes = [4, 16, 128], strides = [1, 1, 1]} : vector<10x16x128xf32> to vector<4x16x128xf32>
    %341 = vector.extract_strided_slice %86 {offsets = [5, 0], sizes = [1, 128], strides = [1, 1]} : vector<49x128xf32> to vector<1x128xf32>
    %342 = vector.shape_cast %341 : vector<1x128xf32> to vector<128xf32>
    %343 = vector.shape_cast %342 : vector<128xf32> to vector<1x1x128xf32>
    %344 = vector.broadcast %343 : vector<1x1x128xf32> to vector<4x16x128xf32>
    %345 = arith.mulf %340, %344 : vector<4x16x128xf32>
    %346 = arith.addf %338, %345 : vector<4x16x128xf32>
    %347 = vector.extract_strided_slice %339 {offsets = [1, 0, 0], sizes = [4, 16, 128], strides = [1, 1, 1]} : vector<10x16x128xf32> to vector<4x16x128xf32>
    %348 = vector.extract_strided_slice %86 {offsets = [12, 0], sizes = [1, 128], strides = [1, 1]} : vector<49x128xf32> to vector<1x128xf32>
    %349 = vector.shape_cast %348 : vector<1x128xf32> to vector<128xf32>
    %350 = vector.shape_cast %349 : vector<128xf32> to vector<1x1x128xf32>
    %351 = vector.broadcast %350 : vector<1x1x128xf32> to vector<4x16x128xf32>
    %352 = arith.mulf %347, %351 : vector<4x16x128xf32>
    %353 = arith.addf %346, %352 : vector<4x16x128xf32>
    %354 = vector.extract_strided_slice %339 {offsets = [2, 0, 0], sizes = [4, 16, 128], strides = [1, 1, 1]} : vector<10x16x128xf32> to vector<4x16x128xf32>
    %355 = vector.extract_strided_slice %86 {offsets = [19, 0], sizes = [1, 128], strides = [1, 1]} : vector<49x128xf32> to vector<1x128xf32>
    %356 = vector.shape_cast %355 : vector<1x128xf32> to vector<128xf32>
    %357 = vector.shape_cast %356 : vector<128xf32> to vector<1x1x128xf32>
    %358 = vector.broadcast %357 : vector<1x1x128xf32> to vector<4x16x128xf32>
    %359 = arith.mulf %354, %358 : vector<4x16x128xf32>
    %360 = arith.addf %353, %359 : vector<4x16x128xf32>
    %361 = vector.extract_strided_slice %339 {offsets = [3, 0, 0], sizes = [4, 16, 128], strides = [1, 1, 1]} : vector<10x16x128xf32> to vector<4x16x128xf32>
    %362 = vector.extract_strided_slice %86 {offsets = [26, 0], sizes = [1, 128], strides = [1, 1]} : vector<49x128xf32> to vector<1x128xf32>
    %363 = vector.shape_cast %362 : vector<1x128xf32> to vector<128xf32>
    %364 = vector.shape_cast %363 : vector<128xf32> to vector<1x1x128xf32>
    %365 = vector.broadcast %364 : vector<1x1x128xf32> to vector<4x16x128xf32>
    %366 = arith.mulf %361, %365 : vector<4x16x128xf32>
    %367 = arith.addf %360, %366 : vector<4x16x128xf32>
    %368 = vector.extract_strided_slice %339 {offsets = [4, 0, 0], sizes = [4, 16, 128], strides = [1, 1, 1]} : vector<10x16x128xf32> to vector<4x16x128xf32>
    %369 = vector.extract_strided_slice %86 {offsets = [33, 0], sizes = [1, 128], strides = [1, 1]} : vector<49x128xf32> to vector<1x128xf32>
    %370 = vector.shape_cast %369 : vector<1x128xf32> to vector<128xf32>
    %371 = vector.shape_cast %370 : vector<128xf32> to vector<1x1x128xf32>
    %372 = vector.broadcast %371 : vector<1x1x128xf32> to vector<4x16x128xf32>
    %373 = arith.mulf %368, %372 : vector<4x16x128xf32>
    %374 = arith.addf %367, %373 : vector<4x16x128xf32>
    %375 = vector.extract_strided_slice %339 {offsets = [5, 0, 0], sizes = [4, 16, 128], strides = [1, 1, 1]} : vector<10x16x128xf32> to vector<4x16x128xf32>
    %376 = vector.extract_strided_slice %86 {offsets = [40, 0], sizes = [1, 128], strides = [1, 1]} : vector<49x128xf32> to vector<1x128xf32>
    %377 = vector.shape_cast %376 : vector<1x128xf32> to vector<128xf32>
    %378 = vector.shape_cast %377 : vector<128xf32> to vector<1x1x128xf32>
    %379 = vector.broadcast %378 : vector<1x1x128xf32> to vector<4x16x128xf32>
    %380 = arith.mulf %375, %379 : vector<4x16x128xf32>
    %381 = arith.addf %374, %380 : vector<4x16x128xf32>
    %382 = vector.extract_strided_slice %339 {offsets = [6, 0, 0], sizes = [4, 16, 128], strides = [1, 1, 1]} : vector<10x16x128xf32> to vector<4x16x128xf32>
    %383 = vector.extract_strided_slice %86 {offsets = [47, 0], sizes = [1, 128], strides = [1, 1]} : vector<49x128xf32> to vector<1x128xf32>
    %384 = vector.shape_cast %383 : vector<1x128xf32> to vector<128xf32>
    %385 = vector.shape_cast %384 : vector<128xf32> to vector<1x1x128xf32>
    %386 = vector.broadcast %385 : vector<1x1x128xf32> to vector<4x16x128xf32>
    %387 = arith.mulf %382, %386 : vector<4x16x128xf32>
    %388 = arith.addf %381, %387 : vector<4x16x128xf32>
    %389 = vector.extract_strided_slice %85 {offsets = [0, 6, 0], sizes = [10, 16, 128], strides = [1, 1, 1]} : vector<10x22x128xf32> to vector<10x16x128xf32>
    %390 = vector.extract_strided_slice %389 {offsets = [0, 0, 0], sizes = [4, 16, 128], strides = [1, 1, 1]} : vector<10x16x128xf32> to vector<4x16x128xf32>
    %391 = vector.extract_strided_slice %86 {offsets = [6, 0], sizes = [1, 128], strides = [1, 1]} : vector<49x128xf32> to vector<1x128xf32>
    %392 = vector.shape_cast %391 : vector<1x128xf32> to vector<128xf32>
    %393 = vector.shape_cast %392 : vector<128xf32> to vector<1x1x128xf32>
    %394 = vector.broadcast %393 : vector<1x1x128xf32> to vector<4x16x128xf32>
    %395 = arith.mulf %390, %394 : vector<4x16x128xf32>
    %396 = arith.addf %388, %395 : vector<4x16x128xf32>
    %397 = vector.extract_strided_slice %389 {offsets = [1, 0, 0], sizes = [4, 16, 128], strides = [1, 1, 1]} : vector<10x16x128xf32> to vector<4x16x128xf32>
    %398 = vector.extract_strided_slice %86 {offsets = [13, 0], sizes = [1, 128], strides = [1, 1]} : vector<49x128xf32> to vector<1x128xf32>
    %399 = vector.shape_cast %398 : vector<1x128xf32> to vector<128xf32>
    %400 = vector.shape_cast %399 : vector<128xf32> to vector<1x1x128xf32>
    %401 = vector.broadcast %400 : vector<1x1x128xf32> to vector<4x16x128xf32>
    %402 = arith.mulf %397, %401 : vector<4x16x128xf32>
    %403 = arith.addf %396, %402 : vector<4x16x128xf32>
    %404 = vector.extract_strided_slice %389 {offsets = [2, 0, 0], sizes = [4, 16, 128], strides = [1, 1, 1]} : vector<10x16x128xf32> to vector<4x16x128xf32>
    %405 = vector.extract_strided_slice %86 {offsets = [20, 0], sizes = [1, 128], strides = [1, 1]} : vector<49x128xf32> to vector<1x128xf32>
    %406 = vector.shape_cast %405 : vector<1x128xf32> to vector<128xf32>
    %407 = vector.shape_cast %406 : vector<128xf32> to vector<1x1x128xf32>
    %408 = vector.broadcast %407 : vector<1x1x128xf32> to vector<4x16x128xf32>
    %409 = arith.mulf %404, %408 : vector<4x16x128xf32>
    %410 = arith.addf %403, %409 : vector<4x16x128xf32>
    %411 = vector.extract_strided_slice %389 {offsets = [3, 0, 0], sizes = [4, 16, 128], strides = [1, 1, 1]} : vector<10x16x128xf32> to vector<4x16x128xf32>
    %412 = vector.extract_strided_slice %86 {offsets = [27, 0], sizes = [1, 128], strides = [1, 1]} : vector<49x128xf32> to vector<1x128xf32>
    %413 = vector.shape_cast %412 : vector<1x128xf32> to vector<128xf32>
    %414 = vector.shape_cast %413 : vector<128xf32> to vector<1x1x128xf32>
    %415 = vector.broadcast %414 : vector<1x1x128xf32> to vector<4x16x128xf32>
    %416 = arith.mulf %411, %415 : vector<4x16x128xf32>
    %417 = arith.addf %410, %416 : vector<4x16x128xf32>
    %418 = vector.extract_strided_slice %389 {offsets = [4, 0, 0], sizes = [4, 16, 128], strides = [1, 1, 1]} : vector<10x16x128xf32> to vector<4x16x128xf32>
    %419 = vector.extract_strided_slice %86 {offsets = [34, 0], sizes = [1, 128], strides = [1, 1]} : vector<49x128xf32> to vector<1x128xf32>
    %420 = vector.shape_cast %419 : vector<1x128xf32> to vector<128xf32>
    %421 = vector.shape_cast %420 : vector<128xf32> to vector<1x1x128xf32>
    %422 = vector.broadcast %421 : vector<1x1x128xf32> to vector<4x16x128xf32>
    %423 = arith.mulf %418, %422 : vector<4x16x128xf32>
    %424 = arith.addf %417, %423 : vector<4x16x128xf32>
    %425 = vector.extract_strided_slice %389 {offsets = [5, 0, 0], sizes = [4, 16, 128], strides = [1, 1, 1]} : vector<10x16x128xf32> to vector<4x16x128xf32>
    %426 = vector.extract_strided_slice %86 {offsets = [41, 0], sizes = [1, 128], strides = [1, 1]} : vector<49x128xf32> to vector<1x128xf32>
    %427 = vector.shape_cast %426 : vector<1x128xf32> to vector<128xf32>
    %428 = vector.shape_cast %427 : vector<128xf32> to vector<1x1x128xf32>
    %429 = vector.broadcast %428 : vector<1x1x128xf32> to vector<4x16x128xf32>
    %430 = arith.mulf %425, %429 : vector<4x16x128xf32>
    %431 = arith.addf %424, %430 : vector<4x16x128xf32>
    %432 = vector.extract_strided_slice %389 {offsets = [6, 0, 0], sizes = [4, 16, 128], strides = [1, 1, 1]} : vector<10x16x128xf32> to vector<4x16x128xf32>
    %433 = vector.extract_strided_slice %86 {offsets = [48, 0], sizes = [1, 128], strides = [1, 1]} : vector<49x128xf32> to vector<1x128xf32>
    %434 = vector.shape_cast %433 : vector<1x128xf32> to vector<128xf32>
    %435 = vector.shape_cast %434 : vector<128xf32> to vector<1x1x128xf32>
    %436 = vector.broadcast %435 : vector<1x1x128xf32> to vector<4x16x128xf32>
    %437 = arith.mulf %432, %436 : vector<4x16x128xf32>
    %438 = arith.addf %431, %437 : vector<4x16x128xf32>
    %c0_58 = arith.constant 0 : index
    %c0_59 = arith.constant 0 : index
    %439 = vector.load %arg5[%c0_58, %c0_59] : memref<1x128xf32, #tpu.memory_space<vmem>>, vector<1x128xf32>
    %440 = vector.shape_cast %439 : vector<1x128xf32> to vector<128xf32>
    %441 = vector.shape_cast %440 : vector<128xf32> to vector<1x1x128xf32>
    %442 = vector.broadcast %441 : vector<1x1x128xf32> to vector<4x16x128xf32>
    %443 = arith.addf %438, %442 : vector<4x16x128xf32>
    %cst_60 = arith.constant dense<0.000000e+00> : vector<4x16xf32>
    %444 = vector.multi_reduction <add>, %443, %cst_60 [2] : vector<4x16x128xf32> to vector<4x16xf32>
    %445 = vector.shape_cast %444 : vector<4x16xf32> to vector<4x16x1xf32>
    %cst_61 = arith.constant 2.500000e-01 : f32
    %446 = vector.broadcast %cst_61 : f32 to vector<4x16x1xf32>
    %447 = arith.mulf %445, %446 : vector<4x16x1xf32>
    %448 = vector.broadcast %447 : vector<4x16x1xf32> to vector<4x16x128xf32>
    %449 = arith.subf %443, %448 : vector<4x16x128xf32>
    %450 = tpu.iota {dimensions = array<i32: 2>} : vector<1x1x128xi32>
    %c4_i32_62 = arith.constant 4 : i32
    %451 = vector.broadcast %c4_i32_62 : i32 to vector<1x1x128xi32>
    %452 = arith.cmpi slt, %450, %451 : vector<1x1x128xi32>
    %cst_63 = arith.constant 0.000000e+00 : f32
    %453 = vector.shape_cast %452 : vector<1x1x128xi1> to vector<1x1x128xi1>
    %454 = vector.broadcast %453 : vector<1x1x128xi1> to vector<4x16x128xi1>
    %455 = vector.broadcast %cst_63 : f32 to vector<4x16x128xf32>
    %456 = arith.select %454, %449, %455 : vector<4x16x128xi1>, vector<4x16x128xf32>
    %457 = arith.mulf %456, %456 : vector<4x16x128xf32>
    %cst_64 = arith.constant dense<0.000000e+00> : vector<4x16xf32>
    %458 = vector.multi_reduction <add>, %457, %cst_64 [2] : vector<4x16x128xf32> to vector<4x16xf32>
    %459 = vector.shape_cast %458 : vector<4x16xf32> to vector<4x16x1xf32>
    %cst_65 = arith.constant 2.500000e-01 : f32
    %460 = vector.broadcast %cst_65 : f32 to vector<4x16x1xf32>
    %461 = arith.mulf %459, %460 : vector<4x16x1xf32>
    %cst_66 = arith.constant 9.99999997E-7 : f32
    %462 = vector.broadcast %cst_66 : f32 to vector<4x16x1xf32>
    %463 = arith.addf %461, %462 : vector<4x16x1xf32>
    %464 = math.rsqrt %463 : vector<4x16x1xf32>
    %465 = vector.broadcast %464 : vector<4x16x1xf32> to vector<4x16x128xf32>
    %466 = arith.mulf %449, %465 : vector<4x16x128xf32>
    %467 = vector.shape_cast %466 : vector<4x16x128xf32> to vector<64x128xf32>
    %468 = arith.truncf %467 : vector<64x128xf32> to vector<64x128xbf16>
    %cst_67 = arith.constant 0.000000e+00 : f32
    %469 = vector.broadcast %cst_67 : f32 to vector<64x128xf32>
    %c0_68 = arith.constant 0 : index
    %c0_69 = arith.constant 0 : index
    %470 = vector.load %arg6[%c0_68, %c0_69] : memref<128x128xbf16, #tpu.memory_space<vmem>>, vector<128x128xbf16>
    %cst_70 = arith.constant dense<0.000000e+00> : vector<64x128xf32>
    %471 = tpu.matmul %468, %470, %cst_70 {dimension_numbers = #tpu.dot_dimension_numbers<[1], [0], [0], [1], [0, 0, 1, 1], [], []>} : vector<64x128xbf16>, vector<128x128xbf16>, vector<64x128xf32> -> vector<64x128xf32>
    %c0_71 = arith.constant 0 : index
    %c0_72 = arith.constant 0 : index
    %472 = vector.load %arg7[%c0_71, %c0_72] : memref<1x128xf32, #tpu.memory_space<vmem>>, vector<1x128xf32>
    %473 = vector.shape_cast %472 : vector<1x128xf32> to vector<128xf32>
    %474 = vector.shape_cast %473 : vector<128xf32> to vector<1x128xf32>
    %475 = vector.broadcast %474 : vector<1x128xf32> to vector<64x128xf32>
    %476 = arith.addf %471, %475 : vector<64x128xf32>
    %477 = arith.mulf %476, %476 : vector<64x128xf32>
    %478 = arith.mulf %476, %477 : vector<64x128xf32>
    %cst_73 = arith.constant 4.471500e-02 : f32
    %479 = vector.broadcast %cst_73 : f32 to vector<64x128xf32>
    %480 = arith.mulf %479, %478 : vector<64x128xf32>
    %481 = arith.addf %476, %480 : vector<64x128xf32>
    %cst_74 = arith.constant 0.797884583 : f32
    %482 = vector.broadcast %cst_74 : f32 to vector<64x128xf32>
    %483 = arith.mulf %482, %481 : vector<64x128xf32>
    %484 = math.tanh %483 : vector<64x128xf32>
    %cst_75 = arith.constant 1.000000e+00 : f32
    %485 = vector.broadcast %cst_75 : f32 to vector<64x128xf32>
    %486 = arith.addf %485, %484 : vector<64x128xf32>
    %cst_76 = arith.constant 5.000000e-01 : f32
    %487 = vector.broadcast %cst_76 : f32 to vector<64x128xf32>
    %488 = arith.mulf %487, %486 : vector<64x128xf32>
    %489 = arith.mulf %476, %488 : vector<64x128xf32>
    %490 = arith.truncf %489 : vector<64x128xf32> to vector<64x128xbf16>
    %c0_77 = arith.constant 0 : index
    %c0_78 = arith.constant 0 : index
    %491 = vector.load %arg8[%c0_77, %c0_78] : memref<128x128xbf16, #tpu.memory_space<vmem>>, vector<128x128xbf16>
    %cst_79 = arith.constant dense<0.000000e+00> : vector<64x128xf32>
    %492 = tpu.matmul %490, %491, %cst_79 {dimension_numbers = #tpu.dot_dimension_numbers<[1], [0], [0], [1], [0, 0, 1, 1], [], []>} : vector<64x128xbf16>, vector<128x128xbf16>, vector<64x128xf32> -> vector<64x128xf32>
    %493 = arith.addf %469, %492 : vector<64x128xf32>
    %c0_80 = arith.constant 0 : index
    %c0_81 = arith.constant 0 : index
    %494 = vector.load %arg9[%c0_80, %c0_81] : memref<1x128xf32, #tpu.memory_space<vmem>>, vector<1x128xf32>
    %495 = vector.shape_cast %494 : vector<1x128xf32> to vector<128xf32>
    %496 = vector.shape_cast %495 : vector<128xf32> to vector<1x128xf32>
    %497 = vector.broadcast %496 : vector<1x128xf32> to vector<64x128xf32>
    %498 = arith.addf %493, %497 : vector<64x128xf32>
    %499 = vector.shape_cast %498 : vector<64x128xf32> to vector<4x16x128xf32>
    %500 = arith.addf %499, %239 : vector<4x16x128xf32>
    %c0_82 = arith.constant 0 : index
    %c0_83 = arith.constant 0 : index
    %c0_84 = arith.constant 0 : index
    %c0_85 = arith.constant 0 : index
    %501 = vector.load %arg10[%c0_82, %c0_83, %c0_84, %c0_85] : memref<1x4x16x128xf32, #tpu.memory_space<vmem>>, vector<1x4x16x128xf32>
    %502 = vector.shape_cast %501 : vector<1x4x16x128xf32> to vector<4x16x128xf32>
    %503 = vector.shape_cast %500 : vector<4x16x128xf32> to vector<1x4x16x128xf32>
    tpu.vector_store %arg10[%c0_82, %c0_83, %c0_84, %c0_85], %503 {strides = array<i32>} : memref<1x4x16x128xf32, #tpu.memory_space<vmem>>, vector<1x4x16x128xf32>,
    return
  }
  func.func @transform_2(%arg0: i32, %arg1: i32) -> (i32, i32) {
    %c0_i32 = arith.constant 0 : i32
    %c0_i32_0 = arith.constant 0 : i32
    %c0_i32_1 = arith.constant 0 : i32
    return %c0_i32, %c0_i32_0 : i32, i32
  }
  func.func @transform_3(%arg0: i32, %arg1: i32) -> (i32, i32) {
    %c0_i32 = arith.constant 0 : i32
    %c0_i32_0 = arith.constant 0 : i32
    %c0_i32_1 = arith.constant 0 : i32
    return %c0_i32, %c0_i32_0 : i32, i32
  }
  func.func @transform_4(%arg0: i32, %arg1: i32) -> (i32, i32) {
    %c0_i32 = arith.constant 0 : i32
    %c0_i32_0 = arith.constant 0 : i32
    %c0_i32_1 = arith.constant 0 : i32
    return %c0_i32, %c0_i32_0 : i32, i32
  }
  func.func @transform_5(%arg0: i32, %arg1: i32) -> (i32, i32) {
    %c0_i32 = arith.constant 0 : i32
    %c0_i32_0 = arith.constant 0 : i32
    %c0_i32_1 = arith.constant 0 : i32
    return %c0_i32, %c0_i32_0 : i32, i32
  }
  func.func @transform_6(%arg0: i32, %arg1: i32) -> (i32, i32) {
    %c0_i32 = arith.constant 0 : i32
    %c0_i32_0 = arith.constant 0 : i32
    %c0_i32_1 = arith.constant 0 : i32
    return %c0_i32, %c0_i32_0 : i32, i32
  }
  func.func @transform_7(%arg0: i32, %arg1: i32) -> (i32, i32) {
    %c0_i32 = arith.constant 0 : i32
    %c0_i32_0 = arith.constant 0 : i32
    %c0_i32_1 = arith.constant 0 : i32
    return %c0_i32, %c0_i32_0 : i32, i32
  }
  func.func @transform_8(%arg0: i32, %arg1: i32) -> (i32, i32, i32, i32) {
    %c0_i32 = arith.constant 0 : i32
    %c0_i32_0 = arith.constant 0 : i32
    %c0_i32_1 = arith.constant 0 : i32
    return %arg0, %arg1, %c0_i32, %c0_i32_0 : i32, i32, i32, i32
  }
}

</mosaic_0001>

<bundles_post_ra>
// kernel: tpu_custom_call.1
= control target key start
LH: loop header
LB: loop body
LE: loop exit
PB: predicated region body
PF: predicated region fallthrough
CT: control target
= control target key end

     0   :  { %13 = vsyncpa [#allocation5], 0  ;;  %s8873_s0 = inlined_call_operand.vmem [shape: f32[2,16,22,128], index: 0, kind: input, shape index: {}]   ;;  %s8874_s1 = inlined_call_operand.vmem [shape: f32[3,22,128], index: 1, kind: input, shape index: {}]   ;;  %s8875_s2 = inlined_call_operand.vmem [shape: f32[49,128], index: 2, kind: input, shape index: {}]   ;;  %s8876_s3 = inlined_call_operand.vmem [shape: f32[1,128], index: 3, kind: input, shape index: {}]   ;;  %s8877_s4 = inlined_call_operand.vmem [shape: bf16[128,128], index: 4, kind: input, shape index: {}]   ;;  %s8878_s5 = inlined_call_operand.vmem [shape: f32[1,128], index: 5, kind: input, shape index: {}]   ;;  %s8879_s6 = inlined_call_operand.vmem [shape: bf16[128,128], index: 6, kind: input, shape index: {}]   ;;  %s8880_s7 = inlined_call_operand.vmem [shape: f32[1,128], index: 7, kind: input, shape index: {}]   ;;  %s8881_s8 = inlined_call_operand.hbm [shape: f32[2,16,16,128], index: 8, kind: output, shape index: {}]  }
   0x1   :  { %15 = vsyncpa [#allocation5 + $0x1], 0  ;;  %s4963_s27 = smov 0   ;;  %s4965_s28 = smov 0  }
   0x2   :  { %s4967_s29 = smov 0   ;;  %s4969_s30 = smov 0  }
   0x3   :  { %s4971_s9 = smov 0   ;;  %s4973_s10 = smov 0  }
   0x4   :  { %s4975_s11 = smov 0   ;;  %s4977_s12 = smov 0  }
   0x5 LB: > { %9299 = sst [smem:[#allocation20_spill]] %s4886_s27  ;;  %s4405_s13 = sadd.s32 4294967295, %s4914_s12   ;;  %s4914_s12 = sphi %s4977_s12, %s21_s12   ;;  %s4910_s11 = sphi %s4975_s11, %s10187_s11   ;;  %s4906_s10 = sphi %s4973_s10, %s10186_s10   ;;  %s4902_s9 = sphi %s4971_s9, %s10185_s9   ;;  %s4898_s30 = sphi %s4969_s30, %s10184_s30   ;;  %s4894_s29 = sphi %s4967_s29, %s10183_s29   ;;  %s4890_s28 = sphi %s4965_s28, %s10189_s28   ;;  %s4886_s27 = sphi %s4963_s27, %s10188_s27  }
   0x6   : > { %9300 = sst [smem:[#allocation21_spill]] %s4894_s29  ;;  %s4406_s14 = sadd.s32 4294967294, %s4914_s12  }
   0x7   : > { %9301 = sst [smem:[#allocation22_spill]] %s4906_s10  ;;  %s30_s15 = sadd.s32 1, %s4906_s10 }
   0x8   : > { %9302 = sst [smem:[#allocation23_spill]] %s4910_s11  ;;  %p31_p0 = scmp.ge.s32.totalorder %s30_s15, 4 }
   0x9   : > { %9303 = sst [smem:[#allocation24_spill]] %s4914_s12  ;;  %s33_s16 = sadd.s32 1, %s4910_s11 }
   0xa   : > { %p178_p1 = scmp.ne.s32.totalorder %s4894_s29, %s4890_s28  ;;  %p179_p2 = scmp.eq.s32.totalorder %s4405_s13, 7 }
   0xb   : > { %s10191_s15 = smov (%p31_p0, %s30_s15), 0  ;;  %s10193_s16 = smov (!%p31_p0, %s33_s16), %s4910_s11 }
   0xc   : > { %9304 = sst [smem:[#allocation25_spill]] %s10191_s15  ;;  %s164_s17 = ssub.s32 %s4906_s10, %s10191_s15 }
   0xd   : > { %p5014_p3 = por %p179_p2, %p178_p1  ;;  %p35_p4 = scmp.ge.s32.totalorder %s10193_s16, 2 }
   0xe   : > { %p184_p5 = scmp.ne.s32.totalorder %s4890_s28, %s4886_s27  ;;  %p185_p6 = scmp.eq.s32.totalorder %s4406_s14, 7 }
   0xf   : > { %s9305_s18 = scalar_select %p5014_p3, 1, 0 }
  0x10   : > { %p4408_p7 = scmp.ge.s32.totalorder %s4914_s12, 1  ;;  %s10195_s16 = smov (%p35_p4, %s10193_s16), 0 }
  0x11   : > { %9306 = sst [smem:[#allocation26_spill]] %s9305_s18  ;;  %p5023_p8 = por %p185_p6, %p184_p5 }
  0x12   : > { %9307 = sst [smem:[#allocation27_spill]] %s10195_s16  ;;  %p221_p9 = scmp.lt.s32.totalorder %s4914_s12, 9 }
  0x13   : > { %s9308_s19 = scalar_select %p5023_p8, 1, 0 }
  0x14   : > { %s163_s20 = ssub.s32 %s4910_s11, %s10195_s16  ;;  %s168_s21 = sadd.s32 1, %s4894_s29 }
  0x15   : > { %9309 = sst [smem:[#allocation28_spill]] %s9308_s19  ;;  %s165_s22 = sor.u32 %s164_s17, %s163_s20 }
  0x16   : > { %p222_p10 = pnand %p4408_p7, %p221_p9  ;;  %p166_p11 = scmp.eq.s32.totalorder %s165_s22, 0 }
  0x18   : > { %s5032_s23 = scalar_select %p166_p11, %s4894_s29, %s168_s21  }
  0x19   : > { %225 = sbr.rel (%p222_p10) target bundleno = 1365 (0x555), region = 44 }
  0x1a   : > { %9310 = sst [smem:[#allocation29_spill]] %s5032_s23 }
  0x1e   : > { %s8882_s24 = sand.u32 1, %s4890_s28   ;;  %p247_p12 = scmp.lt.s32.totalorder %s4898_s30, 0 }
  0x1f   : > { %s4409_s25 = sshll.u32 %s8882_s24, 6  ;;  %s248_s26 = ssub.s32 0, %s4898_s30 }
  0x20   : > { %s4410_s13 = smin.u32 %s4898_s30, %s248_s26  ;;  %p259_p13 = scmp.eq.s32.totalorder %s4898_s30, 0 }
  0x21   : > { %s250_s14 = sand.u32 1, %s4410_s13   ;;  %s5042_s20 = sshll.u32 %s4898_s30, 2 }
  0x22   : > { %s251_s17 = ssub.s32 0, %s250_s14  ;;  %s4414_s21 = sadd.s32 4294967293, %s5042_s20 }
  0x23   : > { %s10197_s17 = smov (!%p247_p12, %s251_s17), %s250_s14  ;;  %p264_p0 = scmp.lt.s32.totalorder %s5042_s20, 12 }
  0x24   : > { %p4412_p1 = scmp.lt.s32.totalorder %s10197_s17, 0  ;;  %s257_s22 = sadd.s32 2, %s10197_s17 }
  0x25   : > { %p262_p2 = scmp.gt.s32.totalorder %s4414_s21, 0  ;;  %s5047_s24 = sadd.s32 1, %s4898_s30 }
  0x26   : > { %s10199_s22 = smov (!%p4412_p1, %s257_s22), %s10197_s17  ;;  %s5055_s13 = sadd.s32 4, %s5042_s20 }
  0x27   : > { %s10201_s21 = smov (!%p262_p2, %s4414_s21), 0  ;;  %p272_p4 = scmp.gt.s32.totalorder %s4898_s30, 0 }
  0x28   : > { %s5052_s26 = scalar_select %p264_p0, %s5042_s20, 12 }
  0x29   : > { %p268_p5 = scmp.lt.s32.totalorder %s5055_s13, 13  ;;  %p4416_p6 = scmp.gt.s32.totalorder %s5055_s13, 0 }
  0x2a   : > { %p273_p7 = pnand %p272_p4, %p259_p13  ;;  %s5065_s16 = scalar_lea.vmem [#allocation4], %s4409_s25 }
  0x2b   : > { %s269_s14 = scalar_select %p268_p5, %s5055_s13, 13 }
  0x2c   : > { %276 = sbr.rel (%p273_p7) target bundleno = 61 (0x3d), region = 48 }
  0x2d   : > { %s10203_s14 = smov (!%p4416_p6, %s269_s14), 0  ;;  %s277_s17 = smul.u32 (!%p273_p7), 24, %s10201_s21 }
  0x2e   : > { %s278_s15 = smul.u32 (!%p273_p7), 384, %s4902_s9 }
  0x2f   : > { %s281_s11 = smul.u32 (!%p273_p7), 240, %s10199_s22 }
  0x30   : > { %s279_s10 = sadd.s32 (!%p273_p7), %s278_s15, %s277_s17  ;;  %s283_s23 = smul.u32 (!%p273_p7), 3, %s10199_s22 }
  0x31   : > { %s280_s27 = scalar_lea.vmem %s8873_s0, %s279_s10  ;;  %s282_s12 = scalar_lea.vmem [#allocation2], %s281_s11 }
  0x32   : > { %v297_v0 = vld [vmem:[%s280_s27] sm:$0xff]  ;;  %v299_v1 = vld [vmem:[%s280_s27 + $0x8] sm:$0xff]  ;;  %v301_v2 = vld [vmem:[%s280_s27 + $0x18] sm:$0xff]  ;;  %s284_s29 = scalar_lea.sflag [#allocation3], %s283_s23 }
  0x33   : > { %298 = vst [vmem:[%s282_s12] sm:$0xff] %v297_v0  ;;  %v303_v3 = vld [vmem:[%s280_s27 + $0x20] sm:$0xff]  ;;  %v305_v4 = vld [vmem:[%s280_s27 + $0x30] sm:$0xff]  ;;  %v307_v5 = vld [vmem:[%s280_s27 + $0x38] sm:$0xff] }
  0x34   : > { %300 = vst [vmem:[%s282_s12 + $0x8] sm:$0xff] %v299_v1  ;;  %v4421_v6 = vld [vmem:[%s280_s27 + $0x10] sm:$0x3f]  ;;  %v4423_v7 = vld [vmem:[%s280_s27 + $0x28] sm:$0x3f] }
  0x35   : > { %302 = vst [vmem:[%s282_s12 + $0x18] sm:$0xff] %v301_v2  ;;  %v4425_v8 = vld [vmem:[%s280_s27 + $0x40] sm:$0x3f] }
  0x36   : > { %304 = vst [vmem:[%s282_s12 + $0x20] sm:$0xff] %v303_v3 }
  0x37   : > { %306 = vst [vmem:[%s282_s12 + $0x30] sm:$0xff] %v305_v4 }
  0x38   : > { %308 = vst [vmem:[%s282_s12 + $0x38] sm:$0xff] %v307_v5 }
  0x39   : > { %4422 = vst [vmem:[%s282_s12 + $0x10] sm:$0x3f] %v4421_v6 }
  0x3a   : > { %4424 = vst [vmem:[%s282_s12 + $0x28] sm:$0x3f] %v4423_v7 }
  0x3b   : > { %4426 = vst [vmem:[%s282_s12 + $0x40] sm:$0x3f] %v4425_v8 }
  0x3c   : > { %328 = vsyncadd %s284_s29, 1056 }
  0x3d PF: > { %p4427_p9 = scmp.ne.s32.totalorder %s4898_s30, 0 }
  0x3e   : > { %s332_s10 = smul.u32 (!%p4427_p9), 240, %s10199_s22 }
  0x3f   : > { %331 = sbr.rel (%p4427_p9) target bundleno = 97 (0x61), region = 74 }
  0x40   : > { %s334_s19 = smul.u32 (!%p4427_p9), 3, %s10199_s22  ;;  %s5085_s23 = scalar_lea.vmem (!%p4427_p9), [#allocation2], %s332_s10 }
  0x42   : > { %s5114_s11 = scalar_lea.sflag (!%p4427_p9), [#allocation3], %s334_s19 }
  0x44   : > { %v348_v9 = vld [vmem:[%s8874_s1] sm:$0xff]  ;;  %v350_v10 = vld [vmem:[%s8874_s1 + $0x8] sm:$0xff]  ;;  %v352_v11 = vld [vmem:[%s8874_s1 + $0x18] sm:$0xff] }
  0x45   : > { %349 = vst [vmem:[%s5085_s23] sm:$0xff] %v348_v9  ;;  %v354_v12 = vld [vmem:[%s8874_s1 + $0x20] sm:$0xff]  ;;  %v356_v13 = vld [vmem:[%s8874_s1 + $0x30] sm:$0xff]  ;;  %v358_v14 = vld [vmem:[%s8874_s1 + $0x38] sm:$0xff] }
  0x46   : > { %351 = vst [vmem:[%s5085_s23 + $0x8] sm:$0xff] %v350_v10  ;;  %v4428_v15 = vld [vmem:[%s8874_s1 + $0x10] sm:$0x3f]  ;;  %v4430_v16 = vld [vmem:[%s8874_s1 + $0x28] sm:$0x3f] }
  0x47   : > { %353 = vst [vmem:[%s5085_s23 + $0x18] sm:$0xff] %v352_v11  ;;  %v4432_v17 = vld [vmem:[%s8874_s1 + $0x40] sm:$0x3f] }
  0x48   : > { %355 = vst [vmem:[%s5085_s23 + $0x20] sm:$0xff] %v354_v12 }
  0x49   : > { %357 = vst [vmem:[%s5085_s23 + $0x30] sm:$0xff] %v356_v13 }
  0x4a   : > { %359 = vst [vmem:[%s5085_s23 + $0x38] sm:$0xff] %v358_v14 }
  0x4b   : > { %4429 = vst [vmem:[%s5085_s23 + $0x10] sm:$0x3f] %v4428_v15 }
  0x4c   : > { %4431 = vst [vmem:[%s5085_s23 + $0x28] sm:$0x3f] %v4430_v16 }
  0x4d   : > { %4433 = vst [vmem:[%s5085_s23 + $0x40] sm:$0x3f] %v4432_v17 }
  0x4e   : > { %379 = vsyncadd %s5114_s11, 1056  ;;  %s380_s18 = smul.u32 24, %s5052_s26  ;;  %s4217_s15 = scalar_lea.sflag %s5114_s11, 1 [#allocation3] }
  0x4f   : > { %s381_s10 = smul.u32 384, %s4902_s9 }
  0x51   : > { %s382_s25 = sadd.s32 %s381_s10, %s380_s18 }
  0x52   : > { %s383_s19 = scalar_lea.vmem %s8873_s0, %s382_s25 }
  0x53   : > { %v400_v18 = vld [vmem:[%s383_s19] sm:$0xff]  ;;  %v402_v19 = vld [vmem:[%s383_s19 + $0x8] sm:$0xff]  ;;  %v404_v20 = vld [vmem:[%s383_s19 + $0x18] sm:$0xff] }
  0x54   : > { %4434 = vst [vmem:[%s5085_s23 + $0x48] sm:$0xff] %v400_v18  ;;  %v406_v21 = vld [vmem:[%s383_s19 + $0x20] sm:$0xff]  ;;  %v408_v22 = vld [vmem:[%s383_s19 + $0x30] sm:$0xff]  ;;  %v410_v23 = vld [vmem:[%s383_s19 + $0x38] sm:$0xff] }
  0x55   : > { %4435 = vst [vmem:[%s5085_s23 + $0x50] sm:$0xff] %v402_v19  ;;  %v412_v24 = vld [vmem:[%s383_s19 + $0x48] sm:$0xff]  ;;  %v414_v25 = vld [vmem:[%s383_s19 + $0x50] sm:$0xff]  ;;  %v4446_v28 = vld [vmem:[%s383_s19 + $0x40] sm:$0x3f] }
  0x56   : > { %4436 = vst [vmem:[%s5085_s23 + $0x60] sm:$0xff] %v404_v20  ;;  %v4442_v26 = vld [vmem:[%s383_s19 + $0x10] sm:$0x3f]  ;;  %v4444_v27 = vld [vmem:[%s383_s19 + $0x28] sm:$0x3f] }
  0x57   : > { %4437 = vst [vmem:[%s5085_s23 + $0x68] sm:$0xff] %v406_v21  ;;  %v4448_v29 = vld [vmem:[%s383_s19 + $0x58] sm:$0x3f] }
  0x58   : > { %4438 = vst [vmem:[%s5085_s23 + $0x78] sm:$0xff] %v408_v22 }
  0x59   : > { %4439 = vst [vmem:[%s5085_s23 + $0x80] sm:$0xff] %v410_v23 }
  0x5a   : > { %4440 = vst [vmem:[%s5085_s23 + $0x90] sm:$0xff] %v412_v24 }
  0x5b   : > { %4441 = vst [vmem:[%s5085_s23 + $0x98] sm:$0xff] %v414_v25 }
  0x5c   : > { %4443 = vst [vmem:[%s5085_s23 + $0x58] sm:$0x3f] %v4442_v26 }
  0x5d   : > { %4445 = vst [vmem:[%s5085_s23 + $0x70] sm:$0x3f] %v4444_v27 }
  0x5e   : > { %4447 = vst [vmem:[%s5085_s23 + $0x88] sm:$0x3f] %v4446_v28 }
  0x5f   : > { %4449 = vst [vmem:[%s5085_s23 + $0xa0] sm:$0x3f] %v4448_v29 }
  0x60   : > { %437 = vsyncadd %s4217_s15, 1408 }
  0x61 PF: > { %p438_p10 = scmp.lt.s32.totalorder %s4898_s30, 3 }
  0x63   : > { %p439_p11 = pnand %p438_p10, %p259_p13 }
  0x64   : > { %s443_s26 = smul.u32 (!%p439_p11), 24, %s10203_s14 }
  0x65   : > { %442 = sbr.rel (%p439_p11) target bundleno = 117 (0x75), region = 122 }
  0x66   : > { %s444_s12 = smul.u32 (!%p439_p11), 384, %s4902_s9 }
  0x67   : > { %s4223_s17 = smul.u32 (!%p439_p11), 240, %s10199_s22 }
  0x68   : > { %s445_s29 = sadd.s32 (!%p439_p11), %s444_s12, %s443_s26  ;;  %s4226_s11 = smul.u32 (!%p439_p11), 3, %s10199_s22 }
  0x69   : > { %s446_s23 = scalar_lea.vmem (!%p439_p11), %s8873_s0, %s445_s29  ;;  %s4224_s21 = scalar_lea.vmem (!%p439_p11), [#allocation2], %s4223_s17 }
  0x6a   : > { %v465_v30 = vld [vmem:[%s446_s23] sm:$0xff]  ;;  %v467_v31 = vld [vmem:[%s446_s23 + $0x8] sm:$0xff]  ;;  %v469_v32 = vld [vmem:[%s446_s23 + $0x18] sm:$0xff]  ;;  %s4227_s15 = scalar_lea.sflag [#allocation3], %s4226_s11 }
  0x6b   : > { %s4228_s25 = scalar_lea.sflag %s4227_s15, 2 [#allocation3]  ;;  %4450 = vst [vmem:[%s4224_s21 + $0xa8] sm:$0xff] %v465_v30  ;;  %v471_v33 = vld [vmem:[%s446_s23 + $0x20] sm:$0xff]  ;;  %v473_v34 = vld [vmem:[%s446_s23 + $0x30] sm:$0xff]  ;;  %v475_v35 = vld [vmem:[%s446_s23 + $0x38] sm:$0xff] }
  0x6c   : > { %4451 = vst [vmem:[%s4224_s21 + $0xb0] sm:$0xff] %v467_v31  ;;  %v4456_v36 = vld [vmem:[%s446_s23 + $0x10] sm:$0x3f]  ;;  %v4458_v37 = vld [vmem:[%s446_s23 + $0x28] sm:$0x3f] }
  0x6d   : > { %4452 = vst [vmem:[%s4224_s21 + $0xc0] sm:$0xff] %v469_v32  ;;  %v4460_v38 = vld [vmem:[%s446_s23 + $0x40] sm:$0x3f] }
  0x6e   : > { %4453 = vst [vmem:[%s4224_s21 + $0xc8] sm:$0xff] %v471_v33 }
  0x6f   : > { %4454 = vst [vmem:[%s4224_s21 + $0xd8] sm:$0xff] %v473_v34 }
  0x70   : > { %4455 = vst [vmem:[%s4224_s21 + $0xe0] sm:$0xff] %v475_v35 }
  0x71   : > { %4457 = vst [vmem:[%s4224_s21 + $0xb8] sm:$0x3f] %v4456_v36 }
  0x72   : > { %4459 = vst [vmem:[%s4224_s21 + $0xd0] sm:$0x3f] %v4458_v37 }
  0x73   : > { %4461 = vst [vmem:[%s4224_s21 + $0xe8] sm:$0x3f] %v4460_v38 }
  0x74   : > { %496 = vsyncadd %s4228_s25, 1056 }
  0x75 PF: > { %p497_p12 = scmp.eq.s32.totalorder %s4898_s30, 3 }
  0x77   : > { %p498_p0 = pnand %p497_p12, %p259_p13 }
  0x78   : > { %s4230_s14 = smul.u32 (!%p498_p0), 240, %s10199_s22 }
  0x79   : > { %501 = sbr.rel (%p498_p0) target bundleno = 137 (0x89), region = 148 }
  0x7a   : > { %s4233_s26 = smul.u32 (!%p498_p0), 3, %s10199_s22  ;;  %s4231_s18 = scalar_lea.vmem (!%p498_p0), [#allocation2], %s4230_s14 }
  0x7c   : > { %s4234_s15 = scalar_lea.sflag (!%p498_p0), [#allocation3], %s4233_s26 }
  0x7d   : > { %s4235_s25 = scalar_lea.sflag (!%p498_p0), %s4234_s15, 2 [#allocation3] }
  0x7e   : > { %v520_v39 = vld [vmem:[%s8874_s1] sm:$0xff]  ;;  %v522_v40 = vld [vmem:[%s8874_s1 + $0x8] sm:$0xff]  ;;  %v524_v41 = vld [vmem:[%s8874_s1 + $0x18] sm:$0xff] }
  0x7f   : > { %4462 = vst [vmem:[%s4231_s18 + $0xa8] sm:$0xff] %v520_v39  ;;  %v526_v42 = vld [vmem:[%s8874_s1 + $0x20] sm:$0xff]  ;;  %v528_v43 = vld [vmem:[%s8874_s1 + $0x30] sm:$0xff]  ;;  %v530_v44 = vld [vmem:[%s8874_s1 + $0x38] sm:$0xff] }
  0x80   : > { %4463 = vst [vmem:[%s4231_s18 + $0xb0] sm:$0xff] %v522_v40  ;;  %v4468_v45 = vld [vmem:[%s8874_s1 + $0x10] sm:$0x3f]  ;;  %v4470_v46 = vld [vmem:[%s8874_s1 + $0x28] sm:$0x3f] }
  0x81   : > { %4464 = vst [vmem:[%s4231_s18 + $0xc0] sm:$0xff] %v524_v41  ;;  %v4472_v47 = vld [vmem:[%s8874_s1 + $0x40] sm:$0x3f] }
  0x82   : > { %4465 = vst [vmem:[%s4231_s18 + $0xc8] sm:$0xff] %v526_v42 }
  0x83   : > { %4466 = vst [vmem:[%s4231_s18 + $0xd8] sm:$0xff] %v528_v43 }
  0x84   : > { %4467 = vst [vmem:[%s4231_s18 + $0xe0] sm:$0xff] %v530_v44 }
  0x85   : > { %4469 = vst [vmem:[%s4231_s18 + $0xb8] sm:$0x3f] %v4468_v45 }
  0x86   : > { %4471 = vst [vmem:[%s4231_s18 + $0xd0] sm:$0x3f] %v4470_v46 }
  0x87   : > { %4473 = vst [vmem:[%s4231_s18 + $0xe8] sm:$0x3f] %v4472_v47 }
  0x88   : > { %551 = vsyncadd %s4235_s25, 1056 }
  0x89 PF: > { %s552_s23 = smul.u32 3, %s10199_s22 }
  0x8b   : > { %s553_s15 = scalar_lea.sflag [#allocation3], %s552_s23 }
  0x8c   : > { %4874 = dma.done.wait %s553_s15, 1056 }
  0x8d   : > { %4875 = vsyncadd %s553_s15, 4294966240  ;;  %s4241_s21 = scalar_lea.sflag %s553_s15, 1 [#allocation3] }
  0x8e   : > { %4876 = dma.done.wait %s4241_s21, 1408 }
  0x8f   : > { %4877 = vsyncadd %s4241_s21, 4294965888  ;;  %s4244_s27 = scalar_lea.sflag %s553_s15, 2 [#allocation3] }
  0x90   : > { %4878 = dma.done.wait %s4244_s27, 1056 }
  0x91   : > { %4879 = vsyncadd %s4244_s27, 4294966240  ;;  %s5179_s18 = ssub.s32 1, %s10199_s22  ;;  %p569_p13 = scmp.lt.s32.totalorder %s5047_s24, 4 }
  0x92   : > { %s4474_s25 = sadd.s32 4294967293, %s5055_s13  ;;  %p573_p1 = scmp.lt.s32.totalorder %s5055_s13, 12 }
  0x93   : > { %p571_p2 = scmp.gt.s32.totalorder %s4474_s25, 0  ;;  %s4616_s19 = sadd.s32 8, %s5042_s20 }
  0x94   : > { %s10205_s13 = smov (!%p573_p1, %s5055_s13), 12  ;;  %p577_p4 = scmp.lt.s32.totalorder %s4616_s19, 13 }
  0x95   : > { %s10207_s25 = smov (!%p571_p2, %s4474_s25), 0  ;;  %p4476_p5 = scmp.gt.s32.totalorder %s4616_s19, 0 }
  0x96   : > { %p581_p6 = scmp.gt.s32.totalorder %s5047_s24, 0  ;;  %s10209_s19 = smov (!%p577_p4, %s4616_s19), 13 }
  0x97   : > { %s10211_s19 = smov (!%p4476_p5, %s10209_s19), 0 }
  0x98   : > { %p582_p7 = pnand %p581_p6, %p569_p13 }
  0x99   : > { %s586_s12 = smul.u32 (!%p582_p7), 24, %s10207_s25 }
  0x9a   : > { %585 = sbr.rel (%p582_p7) target bundleno = 170 (0xaa), region = 174 }
  0x9b   : > { %s587_s17 = smul.u32 (!%p582_p7), 384, %s4902_s9 }
  0x9c   : > { %s590_s14 = smul.u32 (!%p582_p7), 240, %s5179_s18 }
  0x9d   : > { %s588_s29 = sadd.s32 (!%p582_p7), %s587_s17, %s586_s12  ;;  %s592_s20 = smul.u32 (!%p582_p7), 3, %s5179_s18 }
  0x9e   : > { %s589_s10 = scalar_lea.vmem (!%p582_p7), %s8873_s0, %s588_s29  ;;  %s591_s23 = scalar_lea.vmem (!%p582_p7), [#allocation2], %s590_s14 }
  0x9f   : > { %v606_v48 = vld [vmem:[%s589_s10] sm:$0xff]  ;;  %v608_v49 = vld [vmem:[%s589_s10 + $0x8] sm:$0xff]  ;;  %v610_v50 = vld [vmem:[%s589_s10 + $0x18] sm:$0xff]  ;;  %s593_s15 = scalar_lea.sflag [#allocation3], %s592_s20 }
  0xa0   : > { %607 = vst [vmem:[%s591_s23] sm:$0xff] %v606_v48  ;;  %v612_v51 = vld [vmem:[%s589_s10 + $0x20] sm:$0xff]  ;;  %v614_v52 = vld [vmem:[%s589_s10 + $0x30] sm:$0xff]  ;;  %v616_v53 = vld [vmem:[%s589_s10 + $0x38] sm:$0xff] }
  0xa1   : > { %609 = vst [vmem:[%s591_s23 + $0x8] sm:$0xff] %v608_v49  ;;  %v4481_v54 = vld [vmem:[%s589_s10 + $0x10] sm:$0x3f]  ;;  %v4483_v55 = vld [vmem:[%s589_s10 + $0x28] sm:$0x3f] }
  0xa2   : > { %611 = vst [vmem:[%s591_s23 + $0x18] sm:$0xff] %v610_v50  ;;  %v4485_v56 = vld [vmem:[%s589_s10 + $0x40] sm:$0x3f] }
  0xa3   : > { %613 = vst [vmem:[%s591_s23 + $0x20] sm:$0xff] %v612_v51 }
  0xa4   : > { %615 = vst [vmem:[%s591_s23 + $0x30] sm:$0xff] %v614_v52 }
  0xa5   : > { %617 = vst [vmem:[%s591_s23 + $0x38] sm:$0xff] %v616_v53 }
  0xa6   : > { %4482 = vst [vmem:[%s591_s23 + $0x10] sm:$0x3f] %v4481_v54 }
  0xa7   : > { %4484 = vst [vmem:[%s591_s23 + $0x28] sm:$0x3f] %v4483_v55 }
  0xa8   : > { %4486 = vst [vmem:[%s591_s23 + $0x40] sm:$0x3f] %v4485_v56 }
  0xa9   : > { %637 = vsyncadd %s593_s15, 1056 }
  0xaa PF: > { %p638_p9 = scmp.eq.s32.totalorder %s5047_s24, 0 }
  0xac   : > { %p639_p10 = pnand %p638_p9, %p569_p13 }
  0xad   : > { %s643_s21 = smul.u32 (!%p639_p10), 240, %s5179_s18 }
  0xae   : > { %642 = sbr.rel (%p639_p10) target bundleno = 190 (0xbe), region = 200 }
  0xaf   : > { %s645_s12 = smul.u32 (!%p639_p10), 3, %s5179_s18  ;;  %s644_s11 = scalar_lea.vmem (!%p639_p10), [#allocation2], %s643_s21 }
  0xb1   : > { %s646_s10 = scalar_lea.sflag (!%p639_p10), [#allocation3], %s645_s12 }
  0xb3   : > { %v659_v57 = vld [vmem:[%s8874_s1] sm:$0xff]  ;;  %v661_v58 = vld [vmem:[%s8874_s1 + $0x8] sm:$0xff]  ;;  %v663_v59 = vld [vmem:[%s8874_s1 + $0x18] sm:$0xff] }
  0xb4   : > { %660 = vst [vmem:[%s644_s11] sm:$0xff] %v659_v57  ;;  %v665_v60 = vld [vmem:[%s8874_s1 + $0x20] sm:$0xff]  ;;  %v667_v61 = vld [vmem:[%s8874_s1 + $0x30] sm:$0xff]  ;;  %v669_v62 = vld [vmem:[%s8874_s1 + $0x38] sm:$0xff] }
  0xb5   : > { %662 = vst [vmem:[%s644_s11 + $0x8] sm:$0xff] %v661_v58  ;;  %v4487_v63 = vld [vmem:[%s8874_s1 + $0x10] sm:$0x3f]  ;;  %v4489_v0 = vld [vmem:[%s8874_s1 + $0x28] sm:$0x3f] }
  0xb6   : > { %664 = vst [vmem:[%s644_s11 + $0x18] sm:$0xff] %v663_v59  ;;  %v4491_v1 = vld [vmem:[%s8874_s1 + $0x40] sm:$0x3f] }
  0xb7   : > { %666 = vst [vmem:[%s644_s11 + $0x20] sm:$0xff] %v665_v60 }
  0xb8   : > { %668 = vst [vmem:[%s644_s11 + $0x30] sm:$0xff] %v667_v61 }
  0xb9   : > { %670 = vst [vmem:[%s644_s11 + $0x38] sm:$0xff] %v669_v62 }
  0xba   : > { %4488 = vst [vmem:[%s644_s11 + $0x10] sm:$0x3f] %v4487_v63 }
  0xbb   : > { %4490 = vst [vmem:[%s644_s11 + $0x28] sm:$0x3f] %v4489_v0 }
  0xbc   : > { %4492 = vst [vmem:[%s644_s11 + $0x40] sm:$0x3f] %v4491_v1 }
  0xbd   : > { %690 = vsyncadd %s646_s10, 1056 }
  0xbe PF: > { %p4493_p11 = scmp.ge.s32.totalorder %s5047_s24, 4 }
  0xbf   : > { %s694_s23 = smul.u32 (!%p4493_p11), 24, %s10205_s13 }
  0xc0   : > { %693 = sbr.rel (%p4493_p11) target bundleno = 211 (0xd3), region = 226 }
  0xc1   : > { %s695_s15 = smul.u32 (!%p4493_p11), 384, %s4902_s9 }
  0xc2   : > { %s4261_s27 = smul.u32 (!%p4493_p11), 240, %s5179_s18 }
  0xc3   : > { %s696_s25 = sadd.s32 (!%p4493_p11), %s695_s15, %s694_s23  ;;  %s4264_s17 = smul.u32 (!%p4493_p11), 3, %s5179_s18 }
  0xc4   : > { %s697_s29 = scalar_lea.vmem (!%p4493_p11), %s8873_s0, %s696_s25  ;;  %s4262_s20 = scalar_lea.vmem (!%p4493_p11), [#allocation2], %s4261_s27 }
  0xc5   : > { %v716_v2 = vld [vmem:[%s697_s29] sm:$0xff]  ;;  %v718_v3 = vld [vmem:[%s697_s29 + $0x8] sm:$0xff]  ;;  %v720_v4 = vld [vmem:[%s697_s29 + $0x18] sm:$0xff]  ;;  %s4265_s12 = scalar_lea.sflag [#allocation3], %s4264_s17 }
  0xc6   : > { %s4266_s11 = scalar_lea.sflag %s4265_s12, 1 [#allocation3]  ;;  %4494 = vst [vmem:[%s4262_s20 + $0x48] sm:$0xff] %v716_v2  ;;  %v722_v5 = vld [vmem:[%s697_s29 + $0x20] sm:$0xff]  ;;  %v724_v6 = vld [vmem:[%s697_s29 + $0x30] sm:$0xff]  ;;  %v726_v7 = vld [vmem:[%s697_s29 + $0x38] sm:$0xff] }
  0xc7   : > { %4495 = vst [vmem:[%s4262_s20 + $0x50] sm:$0xff] %v718_v3  ;;  %v728_v8 = vld [vmem:[%s697_s29 + $0x48] sm:$0xff]  ;;  %v730_v9 = vld [vmem:[%s697_s29 + $0x50] sm:$0xff]  ;;  %v4506_v12 = vld [vmem:[%s697_s29 + $0x40] sm:$0x3f] }
  0xc8   : > { %4496 = vst [vmem:[%s4262_s20 + $0x60] sm:$0xff] %v720_v4  ;;  %v4502_v10 = vld [vmem:[%s697_s29 + $0x10] sm:$0x3f]  ;;  %v4504_v11 = vld [vmem:[%s697_s29 + $0x28] sm:$0x3f] }
  0xc9   : > { %4497 = vst [vmem:[%s4262_s20 + $0x68] sm:$0xff] %v722_v5  ;;  %v4508_v13 = vld [vmem:[%s697_s29 + $0x58] sm:$0x3f] }
  0xca   : > { %4498 = vst [vmem:[%s4262_s20 + $0x78] sm:$0xff] %v724_v6 }
  0xcb   : > { %4499 = vst [vmem:[%s4262_s20 + $0x80] sm:$0xff] %v726_v7 }
  0xcc   : > { %4500 = vst [vmem:[%s4262_s20 + $0x90] sm:$0xff] %v728_v8 }
  0xcd   : > { %4501 = vst [vmem:[%s4262_s20 + $0x98] sm:$0xff] %v730_v9 }
  0xce   : > { %4503 = vst [vmem:[%s4262_s20 + $0x58] sm:$0x3f] %v4502_v10 }
  0xcf   : > { %4505 = vst [vmem:[%s4262_s20 + $0x70] sm:$0x3f] %v4504_v11 }
  0xd0   : > { %4507 = vst [vmem:[%s4262_s20 + $0x88] sm:$0x3f] %v4506_v12 }
  0xd1   : > { %4509 = vst [vmem:[%s4262_s20 + $0xa0] sm:$0x3f] %v4508_v13 }
  0xd2   : > { %753 = vsyncadd %s4266_s11, 1408 }
  0xd3 PF: > { %p754_p12 = scmp.lt.s32.totalorder %s5047_s24, 3 }
  0xd5   : > { %p755_p0 = pnand %p754_p12, %p569_p13 }
  0xd6   : > { %s759_s13 = smul.u32 (!%p755_p0), 24, %s10211_s19 }
  0xd7   : > { %758 = sbr.rel (%p755_p0) target bundleno = 231 (0xe7), region = 252 }
  0xd8   : > { %s760_s26 = smul.u32 (!%p755_p0), 384, %s4902_s9 }
  0xd9   : > { %s4272_s10 = smul.u32 (!%p755_p0), 240, %s5179_s18 }
  0xda   : > { %s761_s23 = sadd.s32 (!%p755_p0), %s760_s26, %s759_s13  ;;  %s4275_s15 = smul.u32 (!%p755_p0), 3, %s5179_s18 }
  0xdb   : > { %s762_s17 = scalar_lea.vmem (!%p755_p0), %s8873_s0, %s761_s23  ;;  %s4273_s29 = scalar_lea.vmem (!%p755_p0), [#allocation2], %s4272_s10 }
  0xdc   : > { %v781_v14 = vld [vmem:[%s762_s17] sm:$0xff]  ;;  %v783_v15 = vld [vmem:[%s762_s17 + $0x8] sm:$0xff]  ;;  %v785_v16 = vld [vmem:[%s762_s17 + $0x18] sm:$0xff]  ;;  %s4276_s14 = scalar_lea.sflag [#allocation3], %s4275_s15 }
  0xdd   : > { %s4277_s21 = scalar_lea.sflag %s4276_s14, 2 [#allocation3]  ;;  %4510 = vst [vmem:[%s4273_s29 + $0xa8] sm:$0xff] %v781_v14  ;;  %v787_v17 = vld [vmem:[%s762_s17 + $0x20] sm:$0xff]  ;;  %v789_v18 = vld [vmem:[%s762_s17 + $0x30] sm:$0xff]  ;;  %v791_v19 = vld [vmem:[%s762_s17 + $0x38] sm:$0xff] }
  0xde   : > { %4511 = vst [vmem:[%s4273_s29 + $0xb0] sm:$0xff] %v783_v15  ;;  %v4516_v20 = vld [vmem:[%s762_s17 + $0x10] sm:$0x3f]  ;;  %v4518_v21 = vld [vmem:[%s762_s17 + $0x28] sm:$0x3f] }
  0xdf   : > { %4512 = vst [vmem:[%s4273_s29 + $0xc0] sm:$0xff] %v785_v16  ;;  %v4520_v22 = vld [vmem:[%s762_s17 + $0x40] sm:$0x3f] }
  0xe0   : > { %4513 = vst [vmem:[%s4273_s29 + $0xc8] sm:$0xff] %v787_v17 }
  0xe1   : > { %4514 = vst [vmem:[%s4273_s29 + $0xd8] sm:$0xff] %v789_v18 }
  0xe2   : > { %4515 = vst [vmem:[%s4273_s29 + $0xe0] sm:$0xff] %v791_v19 }
  0xe3   : > { %4517 = vst [vmem:[%s4273_s29 + $0xb8] sm:$0x3f] %v4516_v20 }
  0xe4   : > { %4519 = vst [vmem:[%s4273_s29 + $0xd0] sm:$0x3f] %v4518_v21 }
  0xe5   : > { %4521 = vst [vmem:[%s4273_s29 + $0xe8] sm:$0x3f] %v4520_v22 }
  0xe6   : > { %812 = vsyncadd %s4277_s21, 1056 }
  0xe7 PF: > { %p813_p1 = scmp.eq.s32.totalorder %s5047_s24, 3 }
  0xe9   : > { %p814_p2 = pnand %p813_p1, %p569_p13 }
  0xea   : > { %s4279_s19 = smul.u32 (!%p814_p2), 240, %s5179_s18 }
  0xeb   : > { %817 = sbr.rel (%p814_p2) target bundleno = 251 (0xfb), region = 278 }
  0xec   : > { %s4282_s20 = smul.u32 (!%p814_p2), 3, %s5179_s18  ;;  %s4280_s15 = scalar_lea.vmem (!%p814_p2), [#allocation2], %s4279_s19 }
  0xee   : > { %s4283_s25 = scalar_lea.sflag (!%p814_p2), [#allocation3], %s4282_s20 }
  0xef   : > { %s4284_s17 = scalar_lea.sflag (!%p814_p2), %s4283_s25, 2 [#allocation3] }
  0xf0   : > { %v836_v23 = vld [vmem:[%s8874_s1] sm:$0xff]  ;;  %v838_v24 = vld [vmem:[%s8874_s1 + $0x8] sm:$0xff]  ;;  %v840_v25 = vld [vmem:[%s8874_s1 + $0x18] sm:$0xff] }
  0xf1   : > { %4522 = vst [vmem:[%s4280_s15 + $0xa8] sm:$0xff] %v836_v23  ;;  %v842_v26 = vld [vmem:[%s8874_s1 + $0x20] sm:$0xff]  ;;  %v844_v27 = vld [vmem:[%s8874_s1 + $0x30] sm:$0xff]  ;;  %v846_v28 = vld [vmem:[%s8874_s1 + $0x38] sm:$0xff] }
  0xf2   : > { %4523 = vst [vmem:[%s4280_s15 + $0xb0] sm:$0xff] %v838_v24  ;;  %v4528_v29 = vld [vmem:[%s8874_s1 + $0x10] sm:$0x3f]  ;;  %v4530_v30 = vld [vmem:[%s8874_s1 + $0x28] sm:$0x3f] }
  0xf3   : > { %4524 = vst [vmem:[%s4280_s15 + $0xc0] sm:$0xff] %v840_v25  ;;  %v4532_v31 = vld [vmem:[%s8874_s1 + $0x40] sm:$0x3f] }
  0xf4   : > { %4525 = vst [vmem:[%s4280_s15 + $0xc8] sm:$0xff] %v842_v26 }
  0xf5   : > { %4526 = vst [vmem:[%s4280_s15 + $0xd8] sm:$0xff] %v844_v27 }
  0xf6   : > { %4527 = vst [vmem:[%s4280_s15 + $0xe0] sm:$0xff] %v846_v28 }
  0xf7   : > { %4529 = vst [vmem:[%s4280_s15 + $0xb8] sm:$0x3f] %v4528_v29 }
  0xf8   : > { %4531 = vst [vmem:[%s4280_s15 + $0xd0] sm:$0x3f] %v4530_v30 }
  0xf9   : > { %4533 = vst [vmem:[%s4280_s15 + $0xe8] sm:$0x3f] %v4532_v31 }
  0xfa   : > { %867 = vsyncadd %s4284_s17, 1056 }
  0xfb PF: > { %s868_s10 = smul.u32 240, %s10199_s22  ;;  %v5285_v32 = vld [vmem:[%s8875_s2] sm:$0xff]  ;;  %v5290_v33 = vld [vmem:[%s8875_s2 + $0x8] sm:$0xff]  ;;  %v5295_v34 = vld [vmem:[%s8875_s2 + $0x10] sm:$0xff]  ;;  %vm1051_vm0 = vcmask 1046528   ;;  %vm1479_vm1 = vcmask 1045504  }
  0xfc   : > { %v5300_v35 = vld [vmem:[%s8875_s2 + $0x18] sm:$0xff]  ;;  %v5305_v36 = vld [vmem:[%s8875_s2 + $0x20] sm:$0xff]  ;;  %v5310_v37 = vld [vmem:[%s8875_s2 + $0x28] sm:$0xff]  ;;  %v5313_v38 = vperm.slane %v5285_v32, 0  ;;  %v5316_v39 = vperm.slane %v5285_v32, 7  ;;  %v5319_v40 = vperm.slane %v5290_v33, 6 }
  0xfd   : > { %v5322_v41 = vperm.slane %v5295_v34, 5  ;;  %v5325_v42 = vperm.slane %v5300_v35, 4  ;;  %s5327_s19 = scalar_lea.vmem [#allocation2], %s868_s10  ;;  %v5337_v46 = vperm.slane %v5305_v36, 3  ;;  %v5340_v47 = vperm.slane %v5285_v32, 1  ;;  %s4635_s18 = sshll.u32 %s4898_s30, 3 }
  0xfe   : > { %9311 = vst [vmem:[#allocation30_spill] sm:$0xff] %v5313_v38  ;;  %v5353_v52 = vperm.slane %v5310_v37, 2  ;;  %v5356_v53 = vperm.slane %v5290_v33, 0  ;;  %v5374_v60 = vperm.slane %v5290_v33, 7  ;;  %vm1907_vm2 = vcmask 1044480   ;;  %s4601_s29 = sshll.u32 %s4902_s9, 5 }
  0xff   : > { %9312 = vst [vmem:[#allocation31_spill] sm:$0xff] %v5316_v39  ;;  %vm2335_vm3 = vcmask 1043456   ;;  %vm2763_vm4 = vcmask 1042432   ;;  %vm3191_vm5 = vcmask 1041408   ;;  %s4122_s12 = sadd.s32 %s4635_s18, %s4601_s29  ;;  %s4125_s30 = sshll.u32 %s5065_s16, 4  ;;  %s4126_s30 = int_to_ptr.vmem [resolvable:$true] %s4125_s30 }
 0x100   : > { %9313 = vst [vmem:[#allocation32_spill] sm:$0xff] %v5319_v40  ;;  %v5330_v43 = vld [vmem:[%s5327_s19 + $0x48] sm:$0xff]  ;;  %v5333_v44 = vld [vmem:[%s5327_s19 + $0x50] sm:$0xff]  ;;  %v881_v45 = vld [vmem:[%s5327_s19 + $0x58] sm:$0x3f]  ;;  %s4602_s11 = sshll.u32 %s4122_s12, 3 }
 0x101   : > { %9314 = vst [vmem:[#allocation33_spill] sm:$0xff] %v5322_v41  ;;  %v5343_v48 = vld [vmem:[%s5327_s19 + $0x60] sm:$0xff]  ;;  %v5346_v49 = vld [vmem:[%s5327_s19 + $0x68] sm:$0xff]  ;;  %v914_v50 = vmul.f32 %v5313_v38, %v5330_v43  ;;  %v915_v51 = vmul.f32 %v5313_v38, %v5333_v44  ;;  %v5359_v54 = vld [vmem:[%s5327_s19 + $0x78] sm:$0xff]  ;;  %v1036_v59 = vmul.f32 %v5340_v47, %v5330_v43  ;;  %v1037_v2 = vmul.f32 %v5340_v47, %v5333_v44  ;;  %s4124_s10 = scalar_lea.hbm %s8881_s8, %s4602_s11  ;;  %s10178_s23 = sand.u32 1, %s4890_s28  }
 0x102   : > { %9315 = vst [vmem:[#allocation34_spill] sm:$0xff] %v5325_v42  ;;  %v5362_v55 = vld [vmem:[%s5327_s19 + $0x80] sm:$0xff]  ;;  %v5365_v56 = vld [vmem:[%s5327_s19 + $0x90] sm:$0xff]  ;;  %v931_v57 = vmul.f32 %v5316_v39, %v5343_v48  ;;  %v932_v58 = vmul.f32 %v5316_v39, %v5346_v49  ;;  %v5377_v61 = vld [vmem:[%s5327_s19 + $0x98] sm:$0xff]  ;;  %v948_v0 = vmul.f32 %v5319_v40, %v5359_v54  ;;  %v1038_v3 = vmul.f32 %v5340_v47, %v881_v45  ;;  %s4127_s9 = sshll.u32 %s4124_s10, 4  ;;  %s4834_s21 = scalar_lea.hbm %s8881_s8, 512  ;;  %s4128_s9 = int_to_ptr.hbm [resolvable:$true] %s4127_s9 }
 0x103   : > { %9316 = vst [vmem:[#allocation35_spill] sm:$0xff] %v5337_v46  ;;  %v5380_v62 = vld [vmem:[%s5327_s19 + $0xa8] sm:$0xff]  ;;  %v5383_v63 = vld [vmem:[%s5327_s19 + $0xb0] sm:$0xff]  ;;  %v949_v1 = vmul.f32 %v5319_v40, %v5362_v55  ;;  %v5393_v4 = vld [vmem:[%s5327_s19 + $0xc0] sm:$0xff]  ;;  %v965_v9 = vmul.f32 %v5322_v41, %v5365_v56  ;;  %v966_v10 = vmul.f32 %v5322_v41, %v5377_v61  ;;  %v1067_v20 = vrot.slane %v1036_v59, 1  ;;  %s4828_s24 = sshra.s32 %s4128_s9, 4  ;;  %s4829_s24 = int_to_ptr.hbm [resolvable:$true] %s4828_s24 }
 0x104   : > { %9317 = vst [vmem:[#allocation36_spill] sm:$0xff] %v5340_v47  ;;  %v5396_v5 = vld [vmem:[%s5327_s19 + $0xc8] sm:$0xff]  ;;  %v5399_v6 = vld [vmem:[%s5327_s19 + $0xd8] sm:$0xff]  ;;  %v939_v7 = vadd.f32 %v931_v57, %v914_v50  ;;  %v940_v8 = vadd.f32 %v932_v58, %v915_v51  ;;  %v884_v11 = vld [vmem:[%s5327_s19 + $0x70] sm:$0x3f]  ;;  %v982_v12 = vmul.f32 %v5325_v42, %v5380_v62  ;;  %v983_v13 = vmul.f32 %v5325_v42, %v5383_v63  ;;  %s4830_s27 = scalar_lea.hbm %s4829_s24, 64  ;;  %p4835_p6 = scmp.lt.s32.totalorder %s4829_s24, %s8881_s8 }
 0x105   : > { %9318 = vst [vmem:[#allocation37_spill] sm:$0xff] %v5353_v52  ;;  %v999_v14 = vmul.f32 %v5337_v46, %v5393_v4  ;;  %v1000_v15 = vmul.f32 %v5337_v46, %v5396_v5  ;;  %v5415_v16 = vld [vmem:[%s5327_s19 + $0xe0] sm:$0xff]  ;;  %v1016_v19 = vmul.f32 %v5353_v52, %v5399_v6  ;;  %v1068_v21 = vrot.slane %v1037_v2, 1  ;;  %p4831_p13 = scmp.ne.s32.totalorder %s4829_s24, %s4830_s27  ;;  %p4836_p7 = scmp.lt.s32.totalorder %s4834_s21, %s4830_s27 }
 0x106   : > { %9319 = vst [vmem:[#allocation38_spill] sm:$0xff] %v5356_v53  ;;  %v956_v17 = vadd.f32 %v948_v0, %v939_v7  ;;  %v957_v18 = vadd.f32 %v949_v1, %v940_v8  ;;  %v1070_v22 = vrot.slane %v1038_v3, 1  ;;  %v1098_v23 = vmul.f32 %v5356_v53, %v5343_v48 }
 0x107   : > { %9320 = vst [vmem:[#allocation39_spill] sm:$0xff] %v5374_v60  ;;  %v1099_v24 = vmul.f32 %v5356_v53, %v5346_v49  ;;  %v1100_v27 = vmul.f32 %v5356_v53, %v884_v11  ;;  %v1159_v28 = vmul.f32 %v5374_v60, %v5359_v54  ;;  %v1017_v29 = vmul.f32 %v5353_v52, %v5415_v16  ;;  %p4832_p4 = pnand %p4831_p13, %p5014_p3  ;;  %p4837_p9 = por %p4836_p7, %p4835_p6 }
 0x108   : > { %v973_v25 = vadd.f32 %v965_v9, %v956_v17  ;;  %v974_v26 = vadd.f32 %v966_v10, %v957_v18  ;;  %v1069_v30 = vsel %vm1051_vm0, %v1067_v20, %v1068_v21  ;;  %v1128_v31 = vrot.slane %v1098_v23, 1 }
 0x109   : > { %v1129_v45 = vrot.slane %v1099_v24, 1  ;;  %v1131_v57 = vrot.slane %v1100_v27, 1  ;;  %v5431_v58 = vmul.f32 %v5374_v60, %v5362_v55  ;;  %v1071_v59 = vsel %vm1051_vm0, %v1068_v21, %v1070_v22  ;;  %p4833_p5 = pneg %p4832_p4 }
 0x10a   : > { %v990_v50 = vadd.f32 %v982_v12, %v973_v25  ;;  %v991_v51 = vadd.f32 %v983_v13, %v974_v26  ;;  %v1189_v0 = vrot.slane %v1159_v28, 1  ;;  %v5435_v1 = vperm.slane %v5295_v34, 6 }
 0x10b   : > { %9321 = vst [vmem:[#allocation40_spill] sm:$0xff] %v5431_v58  ;;  %v5438_v2 = vperm.slane %v5300_v35, 5  ;;  %v1130_v8 = vsel %vm1051_vm0, %v1128_v31, %v1129_v45  ;;  %v8897_v9 = vrot.slane %v5431_v58, 1  ;;  %v1132_v17 = vsel %vm1051_vm0, %v1129_v45, %v1131_v57  ;;  %p4838_p10 = pnand %p4837_p9, %p4833_p5 }
 0x10c   : > { %9322 = vst [vmem:[#allocation41_spill] sm:$0xff] %v5435_v1  ;;  %v1007_v3 = vadd.f32 %v999_v14, %v990_v50  ;;  %v1008_v7 = vadd.f32 %v1000_v15, %v991_v51  ;;  %v1220_v10 = vmul.f32 %v5435_v1, %v5365_v56  ;;  %v5446_v11 = vmul.f32 %v5435_v1, %v5377_v61 }
 0x10d   : > { %9323 = vst [vmem:[#allocation42_spill] sm:$0xff] %v5438_v2  ;;  %v1281_v12 = vmul.f32 %v5438_v2, %v5380_v62  ;;  %v5452_v13 = vmul.f32 %v5438_v2, %v5383_v63  ;;  %v5456_v18 = vperm.slane %v5305_v36, 4  ;;  %v1191_v20 = vsel %vm1051_vm0, %v1189_v0, %v8897_v9 }
 0x10e   : > { %9324 = vst [vmem:[#allocation43_spill] sm:$0xff] %v5446_v11  ;;  %v1024_v14 = vadd.f32 %v1016_v19, %v1007_v3  ;;  %v1025_v15 = vadd.f32 %v1017_v29, %v1008_v7  ;;  %v1250_v21 = vrot.slane %v1220_v10, 1  ;;  %v8896_v22 = vrot.slane %v5446_v11, 1 }
 0x10f   : > { %9325 = vst [vmem:[#allocation44_spill] sm:$0xff] %v5452_v13  ;;  %v1311_v23 = vrot.slane %v1281_v12, 1  ;;  %v1342_v26 = vmul.f32 %v5456_v18, %v5393_v4  ;;  %v5466_v19 = vmul.f32 %v5456_v18, %v5396_v5  ;;  %v8895_v28 = vrot.slane %v5452_v13, 1 }
 0x110   : > { %9326 = vst [vmem:[#allocation45_spill] sm:$0xff] %v5456_v18  ;;  %v1086_v24 = vadd.f32 %v1069_v30, %v1024_v14  ;;  %v1087_v25 = vadd.f32 %v1071_v59, %v1025_v15  ;;  %v1252_v27 = vsel %vm1051_vm0, %v1250_v21, %v8896_v22  ;;  %v5473_v29 = vperm.slane %v5310_v37, 3 }
 0x111   : > { %9327 = vst [vmem:[#allocation46_spill] sm:$0xff] %v5466_v19  ;;  %v5476_v31 = vperm.slane %v5285_v32, 2  ;;  %v1372_v50 = vrot.slane %v1342_v26, 1  ;;  %v8894_v51 = vrot.slane %v5466_v19, 1  ;;  %v5497_v10 = vperm.slane %v5295_v34, 0 }
 0x112   : > { %9328 = vst [vmem:[#allocation47_spill] sm:$0xff] %v5473_v29  ;;  %v1147_v30 = vadd.f32 %v1130_v8, %v1086_v24  ;;  %v5478_v45 = vadd.f32 %v1132_v17, %v1087_v25  ;;  %v1403_v57 = vmul.f32 %v5473_v29, %v5399_v6  ;;  %v5485_v59 = vmul.f32 %v5473_v29, %v5415_v16 }
 0x113   : > { %9329 = vst [vmem:[#allocation48_spill] sm:$0xff] %v5476_v31  ;;  %v1464_v0 = vmul.f32 %v5476_v31, %v5330_v43  ;;  %v5491_v3 = vmul.f32 %v5476_v31, %v5333_v44  ;;  %v5494_v8 = vperm.slane %v5290_v33, 1  ;;  %v1313_v12 = vsel %vm1051_vm0, %v1311_v23, %v8895_v28 }
 0x114   : > { %9330 = vst [vmem:[#allocation49_spill] sm:$0xff] %v5478_v45  ;;  %v1208_v7 = vadd.f32 %v1191_v20, %v1147_v30  ;;  %v1374_v14 = vsel %vm1051_vm0, %v1372_v50, %v8894_v51  ;;  %v1433_v15 = vrot.slane %v1403_v57, 1  ;;  %v8898_v17 = vrot.slane %v5485_v59, 1 }
 0x115   : > { %9331 = vst [vmem:[#allocation50_spill] sm:$0xff] %v5485_v59  ;;  %v1526_v20 = vmul.f32 %v5494_v8, %v5343_v48  ;;  %v5510_v24 = vmul.f32 %v5494_v8, %v5346_v49  ;;  %v1587_v25 = vmul.f32 %v5497_v10, %v5359_v54  ;;  %v1495_v26 = vrot.slane %v1464_v0, 2 }
 0x116   : > { %9332 = vst [vmem:[#allocation51_spill] sm:$0xff] %v5491_v3  ;;  %v1269_v21 = vadd.f32 %v1252_v27, %v1208_v7  ;;  %v5517_v30 = vmul.f32 %v5497_v10, %v5362_v55  ;;  %v5520_v50 = vperm.slane %v5295_v34, 7  ;;  %v1435_v57 = vsel %vm1051_vm0, %v1433_v15, %v8898_v17 }
 0x117   : > { %9333 = vst [vmem:[#allocation52_spill] sm:$0xff] %v5497_v10  ;;  %v1556_v7 = vrot.slane %v1526_v20, 2  ;;  %v1617_v28 = vrot.slane %v1587_v25, 2  ;;  %v5533_v9 = vperm.slane %v5300_v35, 6  ;;  %v5540_v15 = vperm.slane %v5310_v37, 4 }
 0x118   : > { %9334 = vst [vmem:[#allocation53_spill] sm:$0xff] %v5510_v24  ;;  %v1330_v27 = vadd.f32 %v1313_v12, %v1269_v21  ;;  %v1648_v0 = vmul.f32 %v5520_v50, %v5365_v56  ;;  %v5530_v22 = vmul.f32 %v5520_v50, %v5377_v61  ;;  %v5537_v21 = vperm.slane %v5305_v36, 5 }
 0x119   : > { %9335 = vst [vmem:[#allocation54_spill] sm:$0xff] %v5517_v30  ;;  %v9341_v20 = vrot.slane %v5491_v3, 2  ;;  %v1709_v59 = vmul.f32 %v5533_v9, %v5380_v62  ;;  %v1831_v51 = vmul.f32 %v5540_v15, %v5399_v6  ;;  %v9346_v3 = vrot.slane %v5517_v30, 2 }
 0x11a   : > { %9336 = vst [vmem:[#allocation55_spill] sm:$0xff] %v5520_v50  ;;  %v1391_v23 = vadd.f32 %v1374_v14, %v1330_v27  ;;  %v1678_v17 = vrot.slane %v1648_v0, 2  ;;  %v5550_v14 = vmul.f32 %v5533_v9, %v5383_v63  ;;  %v1770_v27 = vmul.f32 %v5537_v21, %v5393_v4 }
 0x11b   : > { %9337 = vst [vmem:[#allocation56_spill] sm:$0xff] %v5530_v22  ;;  %v1497_v25 = vsel %vm1479_vm1, %v1495_v26, %v9341_v20  ;;  %v5556_v12 = vmul.f32 %v5537_v21, %v5396_v5  ;;  %v9344_v26 = vrot.slane %v5510_v24, 2  ;;  %v1739_v20 = vrot.slane %v1709_v59, 2 }
 0x11c   : > { %9338 = vst [vmem:[#allocation57_spill] sm:$0xff] %v5533_v9  ;;  %v1452_v19 = vadd.f32 %v1435_v57, %v1391_v23  ;;  %v5565_v23 = vmul.f32 %v5540_v15, %v5415_v16  ;;  %v1619_v13 = vsel %vm1479_vm1, %v1617_v28, %v9346_v3  ;;  %v9347_v11 = vrot.slane %v5530_v22, 2 }
 0x11d   : > { %9339 = vst [vmem:[#allocation58_spill] sm:$0xff] %v5537_v21  ;;  %v1558_v0 = vsel %vm1479_vm1, %v1556_v7, %v9344_v26  ;;  %v8908_v24 = vrot.slane %v5550_v14, 2  ;;  %v1800_v7 = vrot.slane %v1770_v27, 2  ;;  %v1861_v26 = vrot.slane %v1831_v51, 2 }
 0x11e   : > { %9340 = vst [vmem:[#allocation59_spill] sm:$0xff] %v5540_v15  ;;  %v1514_v57 = vadd.f32 %v1497_v25, %v1452_v19  ;;  %v1680_v45 = vsel %vm1479_vm1, %v1678_v17, %v9347_v11  ;;  %v5576_v58 = vperm.slane %v5285_v32, 3  ;;  %v5580_v25 = vperm.slane %v5290_v33, 2 }
 0x11f   : > { %9342 = vst [vmem:[#allocation60_spill] sm:$0xff] %v5550_v14  ;;  %v1741_v11 = vsel %vm1479_vm1, %v1739_v20, %v8908_v24  ;;  %v5592_v3 = vperm.slane %v5295_v34, 1  ;;  %v5601_v20 = vperm.slane %v5300_v35, 0  ;;  %v9356_v30 = vrot.slane %v5565_v23, 2 }
 0x120   : > { %9343 = vst [vmem:[#allocation61_spill] sm:$0xff] %v5556_v12  ;;  %v1575_v15 = vadd.f32 %v1558_v0, %v1514_v57  ;;  %v1892_v28 = vmul.f32 %v5576_v58, %v5330_v43  ;;  %v5589_v51 = vmul.f32 %v5576_v58, %v5333_v44  ;;  %v1954_v27 = vmul.f32 %v5580_v25, %v5343_v48 }
 0x121   : > { %9345 = vst [vmem:[#allocation62_spill] sm:$0xff] %v5565_v23  ;;  %v5598_v0 = vmul.f32 %v5580_v25, %v5346_v49  ;;  %v2015_v19 = vmul.f32 %v5592_v3, %v5359_v54  ;;  %v5608_v59 = vmul.f32 %v5592_v3, %v5362_v55  ;;  %v2076_v22 = vmul.f32 %v5601_v20, %v5365_v56 }
 0x122   : > { %9348 = vst [vmem:[#allocation63_spill] sm:$0xff] %v5576_v58  ;;  %v1636_v17 = vadd.f32 %v1619_v13, %v1575_v15  ;;  %v1923_v57 = vrot.slane %v1892_v28, 3  ;;  %v9355_v15 = vrot.slane %v5556_v12, 2  ;;  %v1863_v28 = vsel %vm1479_vm1, %v1861_v26, %v9356_v30 }
 0x123   : > { %9349 = vst [vmem:[#allocation64_spill] sm:$0xff] %v5580_v25  ;;  %v1984_v24 = vrot.slane %v1954_v27, 3  ;;  %v5621_v58 = vmul.f32 %v5601_v20, %v5377_v61  ;;  %v2106_v12 = vrot.slane %v2076_v22, 3  ;;  %v5631_v30 = vperm.slane %v5305_v36, 6 }
 0x124   : > { %9350 = vst [vmem:[#allocation65_spill] sm:$0xff] %v5589_v51  ;;  %v1697_v13 = vadd.f32 %v1680_v45, %v1636_v17  ;;  %v1802_v14 = vsel %vm1479_vm1, %v1800_v7, %v9355_v15  ;;  %v9358_v45 = vrot.slane %v5589_v51, 3  ;;  %v2045_v7 = vrot.slane %v2015_v19, 3 }
 0x125   : > { %9351 = vst [vmem:[#allocation66_spill] sm:$0xff] %v5592_v3  ;;  %v5627_v15 = vperm.slane %v5300_v35, 7  ;;  %v5634_v26 = vperm.slane %v5310_v37, 5  ;;  %v5647_v22 = vmul.f32 %v5631_v30, %v5396_v5  ;;  %v9366_v51 = vrot.slane %v5598_v0, 3 }
 0x126   : > { %9352 = vst [vmem:[#allocation67_spill] sm:$0xff] %v5598_v0  ;;  %v1758_v3 = vadd.f32 %v1741_v11, %v1697_v13  ;;  %v1925_v17 = vsel %vm1907_vm2, %v1923_v57, %v9358_v45  ;;  %v2198_v57 = vmul.f32 %v5631_v30, %v5393_v4  ;;  %v9368_v9 = vrot.slane %v5621_v58, 3 }
 0x127   : > { %9353 = vst [vmem:[#allocation68_spill] sm:$0xff] %v5601_v20  ;;  %v2137_v13 = vmul.f32 %v5627_v15, %v5380_v62  ;;  %v5641_v19 = vmul.f32 %v5627_v15, %v5383_v63  ;;  %v2259_v45 = vmul.f32 %v5634_v26, %v5399_v6  ;;  %v5657_v25 = vmul.f32 %v5634_v26, %v5415_v16 }
 0x128   : > { %9354 = vst [vmem:[#allocation69_spill] sm:$0xff] %v5608_v59  ;;  %v1819_v27 = vadd.f32 %v1802_v14, %v1758_v3  ;;  %v5652_v14 = vperm.slane %v5285_v32, 4  ;;  %v5732_v0 = vperm.slane %v5285_v32, 5 }
 0x129   : > { %9357 = vst [vmem:[#allocation70_spill] sm:$0xff] %v5621_v58  ;;  %v2167_v11 = vrot.slane %v2137_v13, 3  ;;  %v8935_v23 = vrot.slane %v5641_v19, 3  ;;  %v8938_v13 = vrot.slane %v5647_v22, 3  ;;  %v2289_v50 = vrot.slane %v2259_v45, 3 }
 0x12a   : > { %9359 = vst [vmem:[#allocation71_spill] sm:$0xff] %v5627_v15  ;;  %v1880_v3 = vadd.f32 %v1863_v28, %v1819_v27  ;;  %v1986_v15 = vsel %vm1907_vm2, %v1984_v24, %v9366_v51  ;;  %v2108_v28 = vsel %vm1907_vm2, %v2106_v12, %v9368_v9  ;;  %v2228_v27 = vrot.slane %v2198_v57, 3 }
 0x12b   : > { %9360 = vst [vmem:[#allocation72_spill] sm:$0xff] %v5631_v30  ;;  %v9367_v30 = vrot.slane %v5608_v59, 3  ;;  %v2320_v24 = vmul.f32 %v5652_v14, %v5330_v43  ;;  %v5675_v51 = vperm.slane %v5290_v33, 3  ;;  %v5680_v9 = vmul.f32 %v5652_v14, %v5333_v44 }
 0x12c   : > { %9361 = vst [vmem:[#allocation73_spill] sm:$0xff] %v5634_v26  ;;  %v1942_v21 = vadd.f32 %v1925_v17, %v1880_v3  ;;  %v2169_v26 = vsel %vm1907_vm2, %v2167_v11, %v8935_v23  ;;  %v5683_v12 = vperm.slane %v5295_v34, 2  ;;  %v5692_v57 = vperm.slane %v5300_v35, 1 }
 0x12d   : > { %9362 = vst [vmem:[#allocation74_spill] sm:$0xff] %v5641_v19  ;;  %v2047_v20 = vsel %vm1907_vm2, %v2045_v7, %v9367_v30  ;;  %v2382_v30 = vmul.f32 %v5675_v51, %v5343_v48  ;;  %v5689_v11 = vmul.f32 %v5675_v51, %v5346_v49  ;;  %v2230_v45 = vsel %vm1907_vm2, %v2228_v27, %v8938_v13 }
 0x12e   : > { %9363 = vst [vmem:[#allocation75_spill] sm:$0xff] %v5647_v22  ;;  %v2003_v7 = vadd.f32 %v1986_v15, %v1942_v21  ;;  %v5695_v21 = vperm.slane %v5305_v36, 0  ;;  %v2443_v3 = vmul.f32 %v5683_v12, %v5359_v54  ;;  %v5704_v23 = vmul.f32 %v5683_v12, %v5362_v55 }
 0x12f   : > { %9364 = vst [vmem:[#allocation76_spill] sm:$0xff] %v5652_v14  ;;  %v2351_v17 = vrot.slane %v2320_v24, 4  ;;  %v2504_v19 = vmul.f32 %v5692_v57, %v5365_v56  ;;  %v5710_v58 = vmul.f32 %v5692_v57, %v5377_v61  ;;  %v2412_v27 = vrot.slane %v2382_v30, 4 }
 0x130   : > { %9365 = vst [vmem:[#allocation77_spill] sm:$0xff] %v5657_v25  ;;  %v2064_v15 = vadd.f32 %v2047_v20, %v2003_v7  ;;  %v2565_v13 = vmul.f32 %v5695_v21, %v5380_v62  ;;  %v2473_v59 = vrot.slane %v2443_v3, 4  ;;  %v5719_v24 = vmul.f32 %v5695_v21, %v5383_v63 }
 0x131   : > { %9369 = vst [vmem:[#allocation78_spill] sm:$0xff] %v5675_v51  ;;  %v2534_v51 = vrot.slane %v2504_v19, 4  ;;  %v9379_v30 = vrot.slane %v5657_v25, 3  ;;  %v5729_v3 = vperm.slane %v5310_v37, 6  ;;  %v9385_v25 = vrot.slane %v5704_v23, 4 }
 0x132   : > { %9370 = vst [vmem:[#allocation79_spill] sm:$0xff] %v5680_v9  ;;  %v2125_v20 = vadd.f32 %v2108_v28, %v2064_v15  ;;  %v5723_v28 = vperm.slane %v5305_v36, 7  ;;  %v2595_v7 = vrot.slane %v2565_v13, 4  ;;  %v9384_v13 = vrot.slane %v5689_v11, 4 }
 0x133   : > { %9371 = vst [vmem:[#allocation80_spill] sm:$0xff] %v5683_v12  ;;  %v2291_v15 = vsel %vm1907_vm2, %v2289_v50, %v9379_v30 }
 0x134   : > { %9372 = vst [vmem:[#allocation81_spill] sm:$0xff] %v5689_v11  ;;  %v2186_v12 = vadd.f32 %v2169_v26, %v2125_v20  ;;  %v2626_v19 = vmul.f32 %v5723_v28, %v5393_v4  ;;  %v5739_v20 = vmul.f32 %v5723_v28, %v5396_v5  ;;  %v2414_v30 = vsel %vm2335_vm3, %v2412_v27, %v9384_v13 }
 0x135   : > { %9373 = vst [vmem:[#allocation82_spill] sm:$0xff] %v5692_v57  ;;  %v9383_v57 = vrot.slane %v5680_v9, 4  ;;  %v5757_v9 = vmul.f32 %v5729_v3, %v5415_v16  ;;  %v2748_v27 = vmul.f32 %v5732_v0, %v5330_v43 }
 0x136   : > { %9374 = vst [vmem:[#allocation83_spill] sm:$0xff] %v5695_v21  ;;  %v2247_v22 = vadd.f32 %v2230_v45, %v2186_v12  ;;  %v2475_v12 = vsel %vm2335_vm3, %v2473_v59, %v9385_v25  ;;  %v2687_v45 = vmul.f32 %v5729_v3, %v5399_v6  ;;  %v9386_v21 = vrot.slane %v5710_v58, 4 }
 0x137   : > { %9375 = vst [vmem:[#allocation84_spill] sm:$0xff] %v5704_v23  ;;  %v2353_v50 = vsel %vm2335_vm3, %v2351_v17, %v9383_v57  ;;  %v2656_v17 = vrot.slane %v2626_v19, 4  ;;  %v5763_v59 = vperm.slane %v5290_v33, 4  ;;  %v2779_v23 = vrot.slane %v2748_v27, 5 }
 0x138   : > { %9376 = vst [vmem:[#allocation85_spill] sm:$0xff] %v5710_v58  ;;  %v2308_v26 = vadd.f32 %v2291_v15, %v2247_v22  ;;  %v9389_v22 = vrot.slane %v5719_v24, 4  ;;  %v2717_v19 = vrot.slane %v2687_v45, 4  ;;  %v9395_v45 = vrot.slane %v5739_v20, 4 }
 0x139   : > { %9377 = vst [vmem:[#allocation86_spill] sm:$0xff] %v5719_v24  ;;  %v2810_v13 = vmul.f32 %v5763_v59, %v5343_v48  ;;  %v5779_v57 = vmul.f32 %v5763_v59, %v5346_v49  ;;  %v5807_v27 = vperm.slane %v5310_v37, 0 }
 0x13a   : > { %9378 = vst [vmem:[#allocation87_spill] sm:$0xff] %v5723_v28  ;;  %v2536_v28 = vsel %vm2335_vm3, %v2534_v51, %v9386_v21  ;;  %v2370_v25 = vadd.f32 %v2353_v50, %v2308_v26  ;;  %v2597_v15 = vsel %vm2335_vm3, %v2595_v7, %v9389_v22  ;;  %v5770_v51 = vmul.f32 %v5732_v0, %v5333_v44 }
 0x13b   : > { %9380 = vst [vmem:[#allocation88_spill] sm:$0xff] %v5729_v3  ;;  %v5773_v21 = vperm.slane %v5295_v34, 3  ;;  %v5782_v26 = vperm.slane %v5300_v35, 2  ;;  %v2658_v58 = vsel %vm2335_vm3, %v2656_v17, %v9395_v45  ;;  %v5823_v17 = vperm.slane %v5310_v37, 7 }
 0x13c   : > { %9381 = vst [vmem:[#allocation89_spill] sm:$0xff] %v5732_v0  ;;  %v2431_v50 = vadd.f32 %v2414_v30, %v2370_v25  ;;  %v5802_v0 = vperm.slane %v5305_v36, 1  ;;  %v9403_v7 = vrot.slane %v5757_v9, 4 }
 0x13d   : > { %9382 = vst [vmem:[#allocation90_spill] sm:$0xff] %v5739_v20  ;;  %v2871_v22 = vmul.f32 %v5773_v21, %v5359_v54  ;;  %v5789_v24 = vmul.f32 %v5773_v21, %v5362_v55  ;;  %v2932_v11 = vmul.f32 %v5782_v26, %v5365_v56  ;;  %v5798_v30 = vmul.f32 %v5782_v26, %v5377_v61 }
 0x13e   : > { %9387 = vst [vmem:[#allocation91_spill] sm:$0xff] %v5757_v9  ;;  %v2492_v25 = vadd.f32 %v2475_v12, %v2431_v50  ;;  %v5813_v12 = vmul.f32 %v5802_v0, %v5383_v63  ;;  %v3054_v50 = vmul.f32 %v5807_v27, %v5393_v4 }
 0x13f   : > { %9388 = vst [vmem:[#allocation92_spill] sm:$0xff] %v5763_v59  ;;  %v2840_v59 = vrot.slane %v2810_v13, 5  ;;  %v2901_v20 = vrot.slane %v2871_v22, 5  ;;  %v2962_v3 = vrot.slane %v2932_v11, 5  ;;  %v5820_v22 = vmul.f32 %v5807_v27, %v5396_v5 }
 0x140   : > { %9390 = vst [vmem:[#allocation93_spill] sm:$0xff] %v5770_v51  ;;  %v2553_v45 = vadd.f32 %v2536_v28, %v2492_v25  ;;  %v2719_v13 = vsel %vm2335_vm3, %v2717_v19, %v9403_v7  ;;  %v3084_v25 = vrot.slane %v3054_v50, 5  ;;  %v9407_v19 = vrot.slane %v5789_v24, 5 }
 0x141   : > { %9391 = vst [vmem:[#allocation94_spill] sm:$0xff] %v5773_v21  ;;  %v5827_v21 = vperm.slane %v5285_v32, 6  ;;  %v8979_v9 = vrot.slane %v5820_v22, 5 }
 0x142   : > { %9392 = vst [vmem:[#allocation95_spill] sm:$0xff] %v5779_v57  ;;  %v2614_v11 = vadd.f32 %v2597_v15, %v2553_v45  ;;  %v5839_v15 = vmul.f32 %v5823_v17, %v5415_v16  ;;  %v9406_v45 = vrot.slane %v5779_v57, 5  ;;  %v2903_v7 = vsel %vm2763_vm4, %v2901_v20, %v9407_v19 }
 0x143   : > { %9393 = vst [vmem:[#allocation96_spill] sm:$0xff] %v5782_v26  ;;  %v2993_v26 = vmul.f32 %v5802_v0, %v5380_v62  ;;  %v5858_v50 = vmul.f32 %v5827_v21, %v5333_v44  ;;  %v5868_v19 = vperm.slane %v5300_v35, 3 }
 0x144   : > { %9394 = vst [vmem:[#allocation97_spill] sm:$0xff] %v5789_v24  ;;  %v2842_v32 = vsel %vm2763_vm4, %v2840_v59, %v9406_v45  ;;  %v5861_v45 = vperm.slane %v5290_v33, 5  ;;  %v8990_v20 = vrot.slane %v5839_v15, 5 }
 0x145   : > { %9396 = vst [vmem:[#allocation98_spill] sm:$0xff] %v5798_v30  ;;  %v3023_v28 = vrot.slane %v2993_v26, 5  ;;  %v2675_v26 = vadd.f32 %v2658_v58, %v2614_v11  ;;  %v3176_v58 = vmul.f32 %v5827_v21, %v5330_v43 }
 0x146   : > { %9397 = vst [vmem:[#allocation99_spill] sm:$0xff] %v5802_v0  ;;  %v9404_v0 = vrot.slane %v5770_v51, 5  ;;  %v9409_v51 = vrot.slane %v5813_v12, 5  ;;  %v3238_v33 = vmul.f32 %v5861_v45, %v5343_v48 }
 0x147   : > { %9398 = vst [vmem:[#allocation100_spill] sm:$0xff] %v5807_v27  ;;  %v3115_v27 = vmul.f32 %v5823_v17, %v5399_v6  ;;  %v2736_v11 = vadd.f32 %v2719_v13, %v2675_v26  ;;  %v3207_v26 = vrot.slane %v3176_v58, 6 }
 0x148   : > { %9399 = vst [vmem:[#allocation101_spill] sm:$0xff] %v5813_v12  ;;  %v2781_v14 = vsel %vm2763_vm4, %v2779_v23, %v9404_v0  ;;  %v9408_v23 = vrot.slane %v5798_v30, 5  ;;  %v3268_v12 = vrot.slane %v3238_v33, 6 }
 0x149   : > { %9400 = vst [vmem:[#allocation102_spill] sm:$0xff] %v5820_v22  ;;  %v3145_v59 = vrot.slane %v3115_v27, 5  ;;  %v2798_v13 = vadd.f32 %v2781_v14, %v2736_v11  ;;  %v3086_v27 = vsel %vm2763_vm4, %v3084_v25, %v8979_v9  ;;  %v5892_v14 = vmul.f32 %v5868_v19, %v5377_v61  ;;  %v5899_v11 = vld [vmem:[%s8875_s2 + $0x30] ss:$0 sm:$0xff] }
 0x14a   : > { %9401 = vst [vmem:[#allocation103_spill] sm:$0xff] %v5823_v17  ;;  %v2964_v0 = vsel %vm2763_vm4, %v2962_v3, %v9408_v23  ;;  %v3025_v17 = vsel %vm2763_vm4, %v3023_v28, %v9409_v51  ;;  %v5865_v3 = vperm.slane %v5295_v34, 4  ;;  %v5871_v51 = vperm.slane %v5305_v36, 2 }
 0x14b   : > { %9402 = vst [vmem:[#allocation104_spill] sm:$0xff] %v5827_v21  ;;  %v5880_v28 = vmul.f32 %v5861_v45, %v5346_v49  ;;  %v3360_v36 = vmul.f32 %v5868_v19, %v5365_v56  ;;  %v2859_v25 = vadd.f32 %v2842_v32, %v2798_v13  ;;  %v3147_v9 = vsel %vm2763_vm4, %v3145_v59, %v8990_v20  ;;  %v5907_v32 = vld [vmem:[%s5327_s19 + $0x30] sm:$0xff] }
 0x14c   : > { %9405 = vst [vmem:[#allocation105_spill] sm:$0xff] %v5839_v15  ;;  %v3299_v34 = vmul.f32 %v5865_v3, %v5359_v54  ;;  %v5886_v35 = vmul.f32 %v5865_v3, %v5362_v55  ;;  %v3421_v23 = vmul.f32 %v5871_v51, %v5380_v62  ;;  %v8991_v22 = vrot.slane %v5858_v50, 6 }
 0x14d   : > { %9410 = vst [vmem:[#allocation106_spill] sm:$0xff] %v5858_v50  ;;  %v8992_v30 = vrot.slane %v5880_v28, 6  ;;  %v2920_v58 = vadd.f32 %v2903_v7, %v2859_v25  ;;  %v5912_v57 = vmul.f32 %v5871_v51, %v5383_v63  ;;  %v8996_v15 = vrot.slane %v5892_v14, 6 }
 0x14e   : > { %9411 = vst [vmem:[#allocation107_spill] sm:$0xff] %v5861_v45  ;;  %v3329_v13 = vrot.slane %v3299_v34, 6  ;;  %v8993_v24 = vrot.slane %v5886_v35, 6  ;;  %v5916_v59 = vperm.slane %v5310_v37, 1  ;;  %v5921_v7 = vmul.f32 %v5899_v11, %v5399_v6 }
 0x14f   : > { %9412 = vst [vmem:[#allocation108_spill] sm:$0xff] %v5865_v3  ;;  %v3451_v3 = vrot.slane %v3421_v23, 6  ;;  %v2981_v33 = vadd.f32 %v2964_v0, %v2920_v58  ;;  %v912_v34 = vmul.f32 %v5313_v38, %v5907_v32  ;;  %v929_v0 = vmul.f32 %v5316_v39, %v5330_v43 }
 0x150   : > { %9413 = vst [vmem:[#allocation109_spill] sm:$0xff] %v5868_v19  ;;  %v3390_v19 = vrot.slane %v3360_v36, 6  ;;  %v3209_v36 = vsel %vm3191_vm5, %v3207_v26, %v8991_v22  ;;  %v3482_v25 = vmul.f32 %v5916_v59, %v5393_v4  ;;  %v5932_v37 = vmul.f32 %v5916_v59, %v5396_v5 }
 0x151   : > { %9414 = vst [vmem:[#allocation110_spill] sm:$0xff] %v5871_v51  ;;  %v3042_v23 = vadd.f32 %v3025_v17, %v2981_v33  ;;  %v3270_v6 = vsel %vm3191_vm5, %v3268_v12, %v8992_v30  ;;  %v3331_v58 = vsel %vm3191_vm5, %v3329_v13, %v8993_v24  ;;  %v946_v26 = vmul.f32 %v5319_v40, %v5343_v48  ;;  %v5952_v17 = vld [vmem:[%s5327_s19 + $0x38] sm:$0xff] }
 0x152   : > { %9415 = vst [vmem:[#allocation111_spill] sm:$0xff] %v5880_v28  ;;  %v3392_v22 = vsel %vm3191_vm5, %v3390_v19, %v8996_v15  ;;  %v5949_v20 = vmul.f32 %v5899_v11, %v5415_v16  ;;  %v937_v33 = vadd.f32 %v929_v0, %v912_v34  ;;  %v963_v12 = vmul.f32 %v5322_v41, %v5359_v54 }
 0x153   : > { %9416 = vst [vmem:[#allocation112_spill] sm:$0xff] %v5886_v35  ;;  %v3103_v30 = vadd.f32 %v3086_v27, %v3042_v23  ;;  %v9422_v13 = vrot.slane %v5912_v57, 6  ;;  %v3512_v35 = vrot.slane %v3482_v25, 6  ;;  %v980_v16 = vmul.f32 %v5325_v42, %v5365_v56 }
 0x154   : > { %9417 = vst [vmem:[#allocation113_spill] sm:$0xff] %v5892_v14  ;;  %v3573_v14 = vrot.slane %v5921_v7, 6  ;;  %v954_v15 = vadd.f32 %v946_v26, %v937_v33  ;;  %v1033_v34 = vmul.f32 %v5340_v47, %v5907_v32  ;;  %v5967_v27 = vmul.f32 %v5340_v47, %v5952_v17 }
 0x155   : > { %9418 = vst [vmem:[#allocation114_spill] sm:$0xff] %v5912_v57  ;;  %v3453_v24 = vsel %vm3191_vm5, %v3451_v3, %v9422_v13  ;;  %v3164_v0 = vadd.f32 %v3147_v9, %v3103_v30  ;;  %v1095_v3 = vmul.f32 %v5356_v53, %v5330_v43  ;;  %v5973_v7 = vmul.f32 %v5356_v53, %v5333_v44 }
 0x156   : > { %9419 = vst [vmem:[#allocation115_spill] sm:$0xff] %v5916_v59  ;;  %v971_v25 = vadd.f32 %v963_v12, %v954_v15  ;;  %v997_v23 = vmul.f32 %v5337_v46, %v5380_v62  ;;  %v1156_v26 = vmul.f32 %v5374_v60, %v5343_v48  ;;  %v5981_v9 = vmul.f32 %v5374_v60, %v5346_v49 }
 0x157   : > { %9420 = vst [vmem:[#allocation116_spill] sm:$0xff] %v5932_v37  ;;  %v3226_v30 = vadd.f32 %v3209_v36, %v3164_v0  ;;  %v1014_v33 = vmul.f32 %v5353_v52, %v5393_v4  ;;  %v1062_v13 = vrot.slane %v1033_v34, 1  ;;  %v9004_v19 = vrot.slane %v5967_v27, 1 }
 0x158   : > { %9421 = vst [vmem:[#allocation117_spill] sm:$0xff] %v5949_v20  ;;  %v988_v57 = vadd.f32 %v980_v16, %v971_v25  ;;  %v1123_v28 = vrot.slane %v1095_v3, 1  ;;  %v1217_v12 = vmul.f32 %v5435_v1, %v5359_v54  ;;  %v1184_v46 = vrot.slane %v1156_v26, 1 }
 0x159   : > { %9423 = vst [vmem:[#allocation118_spill] sm:$0xff] %v5967_v27  ;;  %v3287_v50 = vadd.f32 %v3270_v6, %v3226_v30  ;;  %v5992_v36 = vmul.f32 %v5435_v1, %v5362_v55  ;;  %v9427_v0 = vrot.slane %v5932_v37, 6  ;;  %v1278_v25 = vmul.f32 %v5438_v2, %v5365_v56 }
 0x15a   : > { %9424 = vst [vmem:[#allocation119_spill] sm:$0xff] %v5973_v7  ;;  %v1005_v3 = vadd.f32 %v997_v23, %v988_v57  ;;  %v1064_v6 = vsel %vm1051_vm0, %v1062_v13, %v9004_v19  ;;  %v6005_v26 = vmul.f32 %v5438_v2, %v5377_v61  ;;  %v1339_v30 = vmul.f32 %v5456_v18, %v5380_v62 }
 0x15b   : > { %9425 = vst [vmem:[#allocation120_spill] sm:$0xff] %v5981_v9  ;;  %v3514_v34 = vsel %vm3191_vm5, %v3512_v35, %v9427_v0  ;;  %v3348_v15 = vadd.f32 %v3331_v58, %v3287_v50  ;;  %v1245_v35 = vrot.slane %v1217_v12, 1  ;;  %v6012_v57 = vmul.f32 %v5456_v18, %v5383_v63 }
 0x15c   : > { %9426 = vst [vmem:[#allocation121_spill] sm:$0xff] %v5992_v36  ;;  %v1022_v53 = vadd.f32 %v1014_v33, %v1005_v3  ;;  %v9430_v58 = vrot.slane %v5973_v7, 1  ;;  %v9431_v13 = vrot.slane %v5981_v9, 1  ;;  %v1400_v16 = vmul.f32 %v5473_v29, %v5393_v4 }
 0x15d   : > { %9428 = vst [vmem:[#allocation122_spill] sm:$0xff] %v6005_v26  ;;  %v3409_v50 = vadd.f32 %v3392_v22, %v3348_v15  ;;  %v1306_v12 = vrot.slane %v1278_v25, 1  ;;  %v9007_v3 = vrot.slane %v6005_v26, 1  ;;  %v6025_v0 = vmul.f32 %v5473_v29, %v5396_v5 }
 0x15e   : > { %9429 = vst [vmem:[#allocation123_spill] sm:$0xff] %v6012_v57  ;;  %v1125_v23 = vsel %vm1051_vm0, %v1123_v28, %v9430_v58  ;;  %v1186_v19 = vsel %vm1051_vm0, %v1184_v46, %v9431_v13  ;;  %v1084_v33 = vadd.f32 %v1064_v6, %v1022_v53  ;;  %v1367_v15 = vrot.slane %v1339_v30, 1  ;;  %v6043_v30 = vld [vmem:[%s8876_s3] ss:$0 sm:$0xff] }
 0x15f   : > { %9432 = vst [vmem:[#allocation124_spill] sm:$0xff] %v6025_v0  ;;  %v3470_v22 = vadd.f32 %v3453_v24, %v3409_v50  ;;  %v1461_v28 = vmul.f32 %v5476_v31, %v5907_v32  ;;  %v9433_v46 = vrot.slane %v5949_v20, 6  ;;  %v9434_v53 = vrot.slane %v5992_v36, 1  ;;  %v9446_v36 = vld [vmem:[#allocation58_spill] sm:$0xff] }
 0x160   : > { %v1145_v13 = vadd.f32 %v1125_v23, %v1084_v33  ;;  %v6038_v6 = vmul.f32 %v5476_v31, %v5952_v17  ;;  %9436 = vst [vmem:[#allocation126_spill] sm:$0xff] %v6043_v30  ;;  %v1428_v50 = vrot.slane %v1400_v16, 1  ;;  %v1523_v37 = vmul.f32 %v5494_v8, %v5330_v43 }
 0x161   : > { %v3575_v58 = vsel %vm3191_vm5, %v3573_v14, %v9433_v46  ;;  %v1247_v25 = vsel %vm1051_vm0, %v1245_v35, %v9434_v53  ;;  %v3531_v24 = vadd.f32 %v3514_v34, %v3470_v22  ;;  %v6049_v14 = vmul.f32 %v5494_v8, %v5333_v44 }
 0x162   : > { %9435 = vst [vmem:[#allocation125_spill] sm:$0xff] %v6038_v6  ;;  %v1206_v23 = vadd.f32 %v1186_v19, %v1145_v13  ;;  %v1308_v35 = vsel %vm1051_vm0, %v1306_v12, %v9007_v3  ;;  %v1584_v33 = vmul.f32 %v5497_v10, %v5343_v48  ;;  %v9438_v16 = vrot.slane %v6012_v57, 1  ;;  %v9440_v12 = vld [vmem:[#allocation55_spill] sm:$0xff] }
 0x163   : > { %9437 = vst [vmem:[#allocation127_spill] sm:$0xff] %v6049_v14  ;;  %v3592_v22 = vadd.f32 %v3575_v58, %v3531_v24  ;;  %v1490_v53 = vrot.slane %v1461_v28, 2  ;;  %v6062_v20 = vmul.f32 %v5497_v10, %v5346_v49  ;;  %v1645_v3 = vmul.f32 %v9440_v12, %v5359_v54  ;;  %v9443_v28 = vld [vmem:[#allocation57_spill] sm:$0xff] }
 0x164   : > { %v1369_v46 = vsel %vm1051_vm0, %v1367_v15, %v9438_v16  ;;  %v1267_v19 = vadd.f32 %v1247_v25, %v1206_v23  ;;  %v6069_v34 = vmul.f32 %v9440_v12, %v5362_v55  ;;  %v1551_v24 = vrot.slane %v1523_v37, 2  ;;  %v9450_v15 = vld [vmem:[#allocation59_spill] sm:$0xff] }
 0x165   : > { %9439 = vst [vmem:[#allocation128_spill] sm:$0xff] %v6062_v20  ;;  %v6072_v58 = vadd.f32 %v6043_v30, %v3592_v22  ;;  %v1706_v16 = vmul.f32 %v9443_v28, %v5365_v56  ;;  %v9444_v25 = vrot.slane %v6025_v0, 1  ;;  %v1612_v13 = vrot.slane %v1584_v33, 2 }
 0x166   : > { %9441 = vst [vmem:[#allocation129_spill] sm:$0xff] %v6069_v34  ;;  %v1328_v57 = vadd.f32 %v1308_v35, %v1267_v19  ;;  %v6082_v26 = vmul.f32 %v9443_v28, %v5377_v61  ;;  %v1673_v37 = vrot.slane %v1645_v3, 2  ;;  %v1767_v9 = vmul.f32 %v9446_v36, %v5380_v62 }
 0x167   : > { %9442 = vst [vmem:[#allocation130_spill] sm:$0xff] %v6072_v58  ;;  %v1430_v23 = vsel %vm1051_vm0, %v1428_v50, %v9444_v25  ;;  %3618 = vadd.xlane.f32.xlu2 %v6072_v58  ;;  %v9447_v19 = vrot.slane %v6038_v6, 2  ;;  %v6094_v33 = vmul.f32 %v9446_v36, %v5383_v63  ;;  %v9449_v25 = vrot.slane %v6049_v14, 2 }
 0x168   : > { %9445 = vst [vmem:[#allocation131_spill] sm:$0xff] %v6082_v26  ;;  %v1389_v35 = vadd.f32 %v1369_v46, %v1328_v57  ;;  %v1734_v22 = vrot.slane %v1706_v16, 2  ;;  %v1828_v0 = vmul.f32 %v9450_v15, %v5393_v4  ;;  %v6104_v57 = vmul.f32 %v9450_v15, %v5396_v5  ;;  %v9452_v46 = vld [vmem:[#allocation63_spill] sm:$0xff] }
 0x169   : > { %v1492_v50 = vsel %vm1479_vm1, %v1490_v53, %v9447_v19  ;;  %9448 = vst [vmem:[#allocation132_spill] sm:$0xff] %v6094_v33  ;;  %v1553_v58 = vsel %vm1479_vm1, %v1551_v24, %v9449_v25  ;;  %v1889_v53 = vmul.f32 %v9452_v46, %v5907_v32  ;;  %v6110_v19 = vmul.f32 %v9452_v46, %v5952_v17  ;;  %v9458_v46 = vld [vmem:[#allocation66_spill] sm:$0xff] }
 0x16a   : > { %v1450_v7 = vadd.f32 %v1430_v23, %v1389_v35  ;;  %9451 = vst [vmem:[#allocation133_spill] sm:$0xff] %v6104_v57  ;;  %v9454_v24 = vrot.slane %v6062_v20, 2  ;;  %v9455_v25 = vrot.slane %v6069_v34, 2  ;;  %v1795_v23 = vrot.slane %v1767_v9, 2  ;;  %v9456_v35 = vld [vmem:[#allocation64_spill] sm:$0xff] }
 0x16b   : > { %9453 = vst [vmem:[#allocation134_spill] sm:$0xff] %v6110_v19  ;;  %v1951_v14 = vmul.f32 %v9456_v35, %v5330_v43  ;;  %v6123_v30 = vmul.f32 %v9456_v35, %v5333_v44  ;;  %v2012_v20 = vmul.f32 %v9458_v46, %v5343_v48  ;;  %v1856_v34 = vrot.slane %v1828_v0, 2  ;;  %v9463_v0 = vld [vmem:[#allocation71_spill] sm:$0xff] }
 0x16c   : > { %v1614_v16 = vsel %vm1479_vm1, %v1612_v13, %v9454_v24  ;;  %v1675_v3 = vsel %vm1479_vm1, %v1673_v37, %v9455_v25  ;;  %v1512_v6 = vadd.f32 %v1492_v50, %v1450_v7  ;;  %v9459_v13 = vrot.slane %v6082_v26, 2  ;;  %v9461_v7 = vld [vmem:[#allocation68_spill] sm:$0xff] }
 0x16d   : > { %9457 = vst [vmem:[#allocation135_spill] sm:$0xff] %v6123_v30  ;;  %v6132_v9 = vmul.f32 %v9458_v46, %v5346_v49  ;;  %v2073_v37 = vmul.f32 %v9461_v7, %v5359_v54  ;;  %v1918_v27 = vrot.slane %v1889_v53, 3  ;;  %v1979_v15 = vrot.slane %v1951_v14, 3  ;;  %v9466_v25 = vld [vmem:[#allocation72_spill] sm:$0xff] }
 0x16e   : > { %v1736_v24 = vsel %vm1479_vm1, %v1734_v22, %v9459_v13  ;;  %v1573_v50 = vadd.f32 %v1553_v58, %v1512_v6  ;;  %v6141_v22 = vmul.f32 %v9461_v7, %v5362_v55  ;;  %v2134_v13 = vmul.f32 %v9463_v0, %v5365_v56 }
 0x16f   : > { %9460 = vst [vmem:[#allocation136_spill] sm:$0xff] %v6132_v9  ;;  %v9464_v46 = vrot.slane %v6094_v33, 2  ;;  %v2040_v58 = vrot.slane %v2012_v20, 3  ;;  %v6150_v53 = vmul.f32 %v9463_v0, %v5377_v61  ;;  %v2101_v36 = vrot.slane %v2073_v37, 3 }
 0x170   : > { %9462 = vst [vmem:[#allocation137_spill] sm:$0xff] %v6141_v22  ;;  %v1634_v26 = vadd.f32 %v1614_v16, %v1573_v50  ;;  %v2195_v7 = vmul.f32 %v9466_v25, %v5380_v62  ;;  %v9467_v16 = vrot.slane %v6104_v57, 2  ;;  %v9470_v37 = vrot.slane %v6123_v30, 3 }
 0x171   : > { %v1797_v6 = vsel %vm1479_vm1, %v1795_v23, %v9464_v46  ;;  %9465 = vst [vmem:[#allocation138_spill] sm:$0xff] %v6150_v53  ;;  %v9468_v46 = vrot.slane %v6110_v19, 3  ;;  %v6164_v23 = vmul.f32 %v9466_v25, %v5383_v63  ;;  %v2162_v14 = vrot.slane %v2134_v13, 3 }
 0x172   : > { %v1695_v28 = vadd.f32 %v1675_v3, %v1634_v26  ;;  %v1858_v50 = vsel %vm1479_vm1, %v1856_v34, %v9467_v16  ;;  %v1981_v35 = vsel %vm1907_vm2, %v1979_v15, %v9470_v37  ;;  %v9471_v26 = vld [vmem:[#allocation73_spill] sm:$0xff]  ;;  %v9475_v15 = vrot.slane %v6132_v9, 3 }
 0x173   : > { %v1920_v20 = vsel %vm1907_vm2, %v1918_v27, %v9468_v46  ;;  %9469 = vst [vmem:[#allocation139_spill] sm:$0xff] %v6164_v23  ;;  %v2256_v3 = vmul.f32 %v9471_v26, %v5393_v4  ;;  %v6174_v34 = vmul.f32 %v9471_v26, %v5396_v5  ;;  %v9473_v27 = vld [vmem:[#allocation76_spill] sm:$0xff]  ;;  %v9476_v37 = vrot.slane %v6141_v22, 3 }
 0x174   : > { %v1756_v57 = vadd.f32 %v1736_v24, %v1695_v28  ;;  %v2317_v16 = vmul.f32 %v9473_v27, %v5907_v32  ;;  %v6180_v46 = vmul.f32 %v9473_v27, %v5952_v17  ;;  %v2042_v13 = vsel %vm1907_vm2, %v2040_v58, %v9475_v15  ;;  %v9477_v24 = vld [vmem:[#allocation78_spill] sm:$0xff]  ;;  %v9479_v27 = vld [vmem:[#allocation80_spill] sm:$0xff] }
 0x175   : > { %9472 = vst [vmem:[#allocation140_spill] sm:$0xff] %v6174_v34  ;;  %v2103_v33 = vsel %vm1907_vm2, %v2101_v36, %v9476_v37  ;;  %v2223_v28 = vrot.slane %v2195_v7, 3  ;;  %v2379_v30 = vmul.f32 %v9477_v24, %v5330_v43  ;;  %v6193_v25 = vmul.f32 %v9477_v24, %v5333_v44  ;;  %v9482_v43 = vld [vmem:[#allocation82_spill] sm:$0xff] }
 0x176   : > { %9474 = vst [vmem:[#allocation141_spill] sm:$0xff] %v6180_v46  ;;  %v1817_v19 = vadd.f32 %v1797_v6, %v1756_v57  ;;  %v2440_v9 = vmul.f32 %v9479_v27, %v5343_v48  ;;  %v9480_v58 = vrot.slane %v6150_v53, 3  ;;  %v2284_v22 = vrot.slane %v2256_v3, 3  ;;  %v9484_v3 = vld [vmem:[#allocation83_spill] sm:$0xff] }
 0x177   : > { %9478 = vst [vmem:[#allocation142_spill] sm:$0xff] %v6193_v25  ;;  %v6202_v36 = vmul.f32 %v9479_v27, %v5346_v49  ;;  %v2501_v57 = vmul.f32 %v9482_v43, %v5359_v54  ;;  %v9039_v6 = vrot.slane %v6174_v34, 3  ;;  %v2346_v44 = vrot.slane %v2317_v16, 4  ;;  %v4769_v27 = vld [vmem:[%s5327_s19 + $0xa8] sm:$0xff] }
 0x178   : > { %v2164_v15 = vsel %vm1907_vm2, %v2162_v14, %v9480_v58  ;;  %v1878_v7 = vadd.f32 %v1858_v50, %v1817_v19  ;;  %v2407_v26 = vrot.slane %v2379_v30, 4  ;;  %v6211_v14 = vmul.f32 %v9482_v43, %v5362_v55  ;;  %v9487_v55 = vld [vmem:[#allocation87_spill] sm:$0xff] }
 0x179   : > { %9481 = vst [vmem:[#allocation143_spill] sm:$0xff] %v6202_v36  ;;  %v2562_v49 = vmul.f32 %v9484_v3, %v5365_v56  ;;  %v9485_v53 = vrot.slane %v6164_v23, 3  ;;  %v2468_v19 = vrot.slane %v2440_v9, 4  ;;  %v6220_v50 = vmul.f32 %v9484_v3, %v5377_v61 }
 0x17a   : > { %9483 = vst [vmem:[#allocation144_spill] sm:$0xff] %v6211_v14  ;;  %v1940_v58 = vadd.f32 %v1920_v20, %v1878_v7  ;;  %v9041_v30 = vrot.slane %v6202_v36, 4  ;;  %v2529_v16 = vrot.slane %v2501_v57, 4  ;;  %v9042_v48 = vrot.slane %v6211_v14, 4  ;;  %v6295_v36 = vld [vmem:[%s5327_s19 + $0x78] sm:$0xff] }
 0x17b   : > { %v2225_v54 = vsel %vm1907_vm2, %v2223_v28, %v9485_v53  ;;  %9486 = vst [vmem:[#allocation145_spill] sm:$0xff] %v6220_v50  ;;  %v2623_v37 = vmul.f32 %v9487_v55, %v5380_v62  ;;  %v2286_v20 = vsel %vm1907_vm2, %v2284_v22, %v9039_v6  ;;  %v9488_v9 = vrot.slane %v6180_v46, 4  ;;  %v9491_v22 = vld [vmem:[#allocation88_spill] sm:$0xff] }
 0x17c   : > { %v2001_v56 = vadd.f32 %v1981_v35, %v1940_v58  ;;  %v6234_v61 = vmul.f32 %v9487_v55, %v5383_v63  ;;  %v9490_v28 = vrot.slane %v6193_v25, 4  ;;  %v2590_v62 = vrot.slane %v2562_v49, 4  ;;  %v9493_v63 = vld [vmem:[#allocation89_spill] sm:$0xff]  ;;  %v6271_v25 = vld [vmem:[%s5327_s19 + $0x50] sm:$0xff]  ;;  %v9502_v55 = vld [vmem:[#allocation99_spill] sm:$0xff] }
 0x17d   : > { %v2348_v53 = vsel %vm2335_vm3, %v2346_v44, %v9488_v9  ;;  %v2684_v7 = vmul.f32 %v9491_v22, %v5393_v4  ;;  %v6246_v44 = vmul.f32 %v9491_v22, %v5396_v5  ;;  %v2745_v9 = vmul.f32 %v9493_v63, %v5907_v32  ;;  %v9500_v46 = vld [vmem:[#allocation96_spill] sm:$0xff] }
 0x17e   : > { %9489 = vst [vmem:[#allocation146_spill] sm:$0xff] %v6234_v61  ;;  %v6239_v57 = vsel %vm2335_vm3, %v2407_v26, %v9490_v28  ;;  %v2062_v58 = vadd.f32 %v2042_v13, %v2001_v56  ;;  %v6252_v26 = vmul.f32 %v9493_v63, %v5952_v17  ;;  %v6257_v49 = vsel %vm2335_vm3, %v2468_v19, %v9041_v30  ;;  %v6265_v13 = vld [vmem:[%s5327_s19 + $0x48] sm:$0xff]  ;;  %v9495_v56 = vld [vmem:[#allocation92_spill] sm:$0xff] }
 0x17f   : > { %9492 = vst [vmem:[#allocation147_spill] sm:$0xff] %v6246_v44  ;;  %v6262_v4 = vsel %vm2335_vm3, %v2529_v16, %v9042_v48  ;;  %v2651_v5 = vrot.slane %v2623_v37, 4  ;;  %v2807_v28 = vmul.f32 %v6265_v13, %v9495_v56  ;;  %v6275_v19 = vmul.f32 %v6271_v25, %v9495_v56  ;;  %v6278_v30 = vld [vmem:[%s5327_s19 + $0x60] sm:$0xff]  ;;  %v6310_v22 = vld [vmem:[%s5327_s19 + $0x90] sm:$0xff] }
 0x180   : > { %9494 = vst [vmem:[#allocation148_spill] sm:$0xff] %v6252_v26  ;;  %v2123_v6 = vadd.f32 %v2103_v33, %v2062_v58  ;;  %v9497_v16 = vld [vmem:[#allocation94_spill] sm:$0xff]  ;;  %v9498_v48 = vrot.slane %v6220_v50, 4  ;;  %v2712_v33 = vrot.slane %v2684_v7, 4  ;;  %v6288_v58 = vld [vmem:[%s5327_s19 + $0x68] sm:$0xff]  ;;  %v2929_v34 = vmul.f32 %v6295_v36, %v9500_v46  ;;  %v6318_v7 = vld [vmem:[%s5327_s19 + $0x98] sm:$0xff] }
 0x181   : > { %9496 = vst [vmem:[#allocation149_spill] sm:$0xff] %v6275_v19  ;;  %v2868_v37 = vmul.f32 %v6278_v30, %v9497_v16  ;;  %v6292_v35 = vmul.f32 %v6288_v58, %v9497_v16  ;;  %v2774_v50 = vrot.slane %v2745_v9, 5  ;;  %v6303_v63 = vld [vmem:[%s5327_s19 + $0x80] sm:$0xff]  ;;  %v9503_v9 = vrot.slane %v6234_v61, 4 }
 0x182   : > { %v6285_v14 = vsel %vm2335_vm3, %v2590_v62, %v9498_v48  ;;  %v2184_v23 = vadd.f32 %v2164_v15, %v2123_v6  ;;  %v2835_v62 = vrot.slane %v2807_v28, 5  ;;  %v6307_v16 = vmul.f32 %v6303_v63, %v9500_v46 }
 0x183   : > { %9499 = vst [vmem:[#allocation150_spill] sm:$0xff] %v6292_v35  ;;  %v2990_v15 = vmul.f32 %v6310_v22, %v9502_v55  ;;  %v2653_v48 = vsel %vm2335_vm3, %v2651_v5, %v9503_v9  ;;  %v2896_v28 = vrot.slane %v2868_v37, 5  ;;  %v6322_v56 = vmul.f32 %v6318_v7, %v9502_v55  ;;  %v6337_v55 = vld [vmem:[%s5327_s19 + $0xb0] sm:$0xff] }
 0x184   : > { %9501 = vst [vmem:[#allocation151_spill] sm:$0xff] %v6307_v16  ;;  %v2245_v6 = vadd.f32 %v2225_v54, %v2184_v23  ;;  %v2957_v3 = vrot.slane %v2929_v34, 5  ;;  %v9505_v23 = vld [vmem:[#allocation100_spill] sm:$0xff]  ;;  %v9506_v5 = vrot.slane %v6246_v44, 4  ;;  %v9507_v9 = vrot.slane %v6252_v26, 5 }
 0x185   : > { %9504 = vst [vmem:[#allocation152_spill] sm:$0xff] %v6322_v56  ;;  %v3051_v54 = vmul.f32 %v4769_v27, %v9505_v23  ;;  %v6341_v34 = vmul.f32 %v6337_v55, %v9505_v23  ;;  %v9510_v43 = vrot.slane %v6275_v19, 5  ;;  %v3173_v23 = vmul.f32 %v5827_v21, %v5907_v32 }
 0x186   : > { %v2306_v61 = vadd.f32 %v2286_v20, %v2245_v6  ;;  %v2714_v37 = vsel %vm2335_vm3, %v2712_v33, %v9506_v5  ;;  %v6334_v24 = vsel %vm2763_vm4, %v2774_v50, %v9507_v9  ;;  %9508 = vst [vmem:[#allocation153_spill] sm:$0xff] %v6337_v55  ;;  %v3018_v20 = vrot.slane %v2990_v15, 5  ;;  %v4771_v33 = vld [vmem:[%s5327_s19 + $0xc0] sm:$0xff]  ;;  %v9511_v5 = vld [vmem:[#allocation103_spill] sm:$0xff] }
 0x187   : > { %9509 = vst [vmem:[#allocation154_spill] sm:$0xff] %v6341_v34  ;;  %v6346_v46 = vsel %vm2763_vm4, %v2835_v62, %v9510_v43  ;;  %v3112_v26 = vmul.f32 %v4771_v33, %v9511_v5  ;;  %v6352_v50 = vld [vmem:[%s5327_s19 + $0xc8] sm:$0xff]  ;;  %v6362_v43 = vmul.f32 %v5827_v21, %v5952_v17  ;;  %v9515_v62 = vrot.slane %v6292_v35, 5  ;;  %v9518_v35 = vld [vmem:[#allocation108_spill] sm:$0xff] }
 0x188   : > { %v2368_v44 = vadd.f32 %v2348_v53, %v2306_v61  ;;  %9512 = vst [vmem:[#allocation155_spill] sm:$0xff] %v6352_v50  ;;  %v6356_v9 = vmul.f32 %v6352_v50, %v9511_v5  ;;  %v9516_v53 = vrot.slane %v6307_v16, 5  ;;  %v3079_v6 = vrot.slane %v3051_v54, 5 }
 0x189   : > { %9514 = vst [vmem:[#allocation157_spill] sm:$0xff] %v6362_v43  ;;  %v6367_v15 = vsel %vm2763_vm4, %v2896_v28, %v9515_v62  ;;  %v3235_v19 = vmul.f32 %v6265_v13, %v5861_v45  ;;  %v6380_v21 = vmul.f32 %v6271_v25, %v5861_v45  ;;  %v3296_v28 = vmul.f32 %v6278_v30, %v9518_v35 }
 0x18a   : > { %9513 = vst [vmem:[#allocation156_spill] sm:$0xff] %v6356_v9  ;;  %v6372_v61 = vsel %vm2763_vm4, %v2957_v3, %v9516_v53  ;;  %v2429_v5 = vadd.f32 %v6239_v57, %v2368_v44  ;;  %v9519_v62 = vrot.slane %v6322_v56, 5  ;;  %v3140_v54 = vrot.slane %v3112_v26, 5  ;;  %v9521_v57 = vld [vmem:[#allocation109_spill] sm:$0xff] }
 0x18b   : > { %9517 = vst [vmem:[#allocation158_spill] sm:$0xff] %v6380_v21  ;;  %v6391_v53 = vmul.f32 %v6288_v58, %v9518_v35  ;;  %v3357_v44 = vmul.f32 %v6295_v36, %v9521_v57  ;;  %v3202_v45 = vrot.slane %v3173_v23, 6  ;;  %v3263_v56 = vrot.slane %v3235_v19, 6  ;;  %v6412_v19 = vld [vmem:[%s5327_s19] sm:$0xff] }
 0x18c   : > { %v6387_v3 = vsel %vm2763_vm4, %v3018_v20, %v9519_v62  ;;  %v2490_v0 = vadd.f32 %v6257_v49, %v2429_v5  ;;  %v6401_v26 = vmul.f32 %v6303_v63, %v9521_v57  ;;  %v3418_v62 = vmul.f32 %v6310_v22, %v5871_v51 }
 0x18d   : > { %9520 = vst [vmem:[#allocation159_spill] sm:$0xff] %v6391_v53  ;;  %v3324_v10 = vrot.slane %v3296_v28, 6  ;;  %v6408_v49 = vmul.f32 %v6318_v7, %v5871_v51  ;;  %v3479_v23 = vmul.f32 %v4769_v27, %v5916_v59  ;;  %v3385_v20 = vrot.slane %v3357_v44, 6  ;;  %v6426_v51 = vld [vmem:[%s5327_s19 + $0x18] sm:$0xff] }
 0x18e   : > { %9522 = vst [vmem:[#allocation160_spill] sm:$0xff] %v6401_v26  ;;  %v2551_v35 = vadd.f32 %v6262_v4, %v2490_v0  ;;  %v6418_v16 = vmul.f32 %v6337_v55, %v5916_v59  ;;  %v3446_v4 = vrot.slane %v3418_v62, 6  ;;  %v6423_v27 = vmul.f32 %v4771_v33, %v5899_v11 }
 0x18f   : > { %9523 = vst [vmem:[#allocation161_spill] sm:$0xff] %v6408_v49  ;;  %v9525_v44 = vrot.slane %v6341_v34, 5  ;;  %v9526_v12 = vrot.slane %v6356_v9, 5  ;;  %v9527_v55 = vrot.slane %v6362_v43, 6  ;;  %v3507_v62 = vrot.slane %v3479_v23, 6 }
 0x190   : > { %9524 = vst [vmem:[#allocation162_spill] sm:$0xff] %v6418_v16  ;;  %v2612_v0 = vadd.f32 %v6285_v14, %v2551_v35  ;;  %v908_v35 = vmul.f32 %v5313_v38, %v6412_v19  ;;  %v9531_v23 = vrot.slane %v6401_v26, 6  ;;  %v9532_v43 = vrot.slane %v6408_v49, 6 }
 0x191   : > { %v3081_v5 = vsel %vm2763_vm4, %v3079_v6, %v9525_v44  ;;  %v6434_v57 = vsel %vm2763_vm4, %v3140_v54, %v9526_v12  ;;  %v6439_v14 = vsel %vm3191_vm5, %v3202_v45, %v9527_v55  ;;  %v6446_v6 = vmul.f32 %v6352_v50, %v5899_v11  ;;  %v6449_v44 = vld [vmem:[%s5327_s19 + $0x8] sm:$0xff]  ;;  %v6452_v12 = vld [vmem:[%s5327_s19 + $0x20] sm:$0xff] }
 0x192   : > { %v2673_v33 = vadd.f32 %v2653_v48, %v2612_v0  ;;  %v9529_v54 = vrot.slane %v6380_v21, 6  ;;  %v9530_v55 = vrot.slane %v6391_v53, 6  ;;  %v6467_v0 = vsel %vm3191_vm5, %v3385_v20, %v9531_v23 }
 0x193   : > { %9528 = vst [vmem:[#allocation163_spill] sm:$0xff] %v6446_v6  ;;  %v925_v11 = vmul.f32 %v5316_v39, %v6426_v51  ;;  %v6474_v21 = vsel %vm3191_vm5, %v3446_v4, %v9532_v43  ;;  %v926_v20 = vmul.f32 %v5316_v39, %v6452_v12  ;;  %v9533_v43 = vrot.slane %v6418_v16, 6  ;;  %v9537_v16 = vld [vmem:[#allocation35_spill] sm:$0xff] }
 0x194   : > { %v6457_v45 = vsel %vm3191_vm5, %v3263_v56, %v9529_v54  ;;  %v6462_v48 = vsel %vm3191_vm5, %v3324_v10, %v9530_v55  ;;  %v2734_v28 = vadd.f32 %v2714_v37, %v2673_v33  ;;  %v3568_v56 = vrot.slane %v6423_v27, 6 }
 0x195   : > { %v942_v10 = vmul.f32 %v5319_v40, %v5907_v32  ;;  %v909_v54 = vmul.f32 %v5313_v38, %v6449_v44  ;;  %v933_v55 = vadd.f32 %v925_v11, %v908_v35  ;;  %v959_v37 = vmul.f32 %v6265_v13, %v5322_v41 }
 0x196   : > { %v2796_v33 = vadd.f32 %v6334_v24, %v2734_v28  ;;  %v6489_v4 = vsel %vm3191_vm5, %v3507_v62, %v9533_v43  ;;  %v943_v23 = vmul.f32 %v5319_v40, %v5952_v17  ;;  %v976_v26 = vmul.f32 %v6278_v30, %v5325_v42  ;;  %v9535_v62 = vld [vmem:[#allocation38_spill] sm:$0xff] }
 0x197   : > { %v950_v49 = vadd.f32 %v942_v10, %v933_v55  ;;  %v1027_v35 = vmul.f32 %v5340_v47, %v6412_v19  ;;  %v6500_v24 = vmul.f32 %v5340_v47, %v6449_v44  ;;  %v1089_v11 = vmul.f32 %v9535_v62, %v6426_v51 }
 0x198   : > { %v2857_v28 = vadd.f32 %v6346_v46, %v2796_v33  ;;  %v6507_v43 = vmul.f32 %v9535_v62, %v6452_v12  ;;  %v1150_v10 = vmul.f32 %v5374_v60, %v5907_v32  ;;  %v934_v55 = vadd.f32 %v926_v20, %v909_v54 }
 0x199   : > { %9534 = vst [vmem:[#allocation164_spill] sm:$0xff] %v6500_v24  ;;  %v967_v27 = vadd.f32 %v959_v37, %v950_v49  ;;  %v993_v53 = vmul.f32 %v6295_v36, %v9537_v16  ;;  %v1010_v9 = vmul.f32 %v6310_v22, %v5353_v52  ;;  %v1052_v33 = vrot.slane %v1027_v35, 1 }
 0x19a   : > { %9536 = vst [vmem:[#allocation165_spill] sm:$0xff] %v6507_v43  ;;  %v2918_v46 = vadd.f32 %v6367_v15, %v2857_v28  ;;  %v9098_v34 = vrot.slane %v6500_v24, 1  ;;  %v6519_v50 = vmul.f32 %v5374_v60, %v5952_v17  ;;  %v1113_v47 = vrot.slane %v1089_v11, 1 }
 0x19b   : > { %v984_v62 = vadd.f32 %v976_v26, %v967_v27  ;;  %v1211_v49 = vmul.f32 %v6265_v13, %v5435_v1  ;;  %v1174_v37 = vrot.slane %v1150_v10, 1  ;;  %v6528_v15 = vmul.f32 %v6271_v25, %v5435_v1 }
 0x19c   : > { %9538 = vst [vmem:[#allocation166_spill] sm:$0xff] %v6519_v50  ;;  %v2979_v20 = vadd.f32 %v6372_v61, %v2918_v46  ;;  %v960_v35 = vmul.f32 %v6271_v25, %v5322_v41  ;;  %v1272_v26 = vmul.f32 %v6278_v30, %v5438_v2  ;;  %v6536_v27 = vmul.f32 %v6288_v58, %v5438_v2  ;;  %v9584_v41 = vld [vmem:[#allocation78_spill] sm:$0xff] }
 0x19d   : > { %9539 = vst [vmem:[#allocation167_spill] sm:$0xff] %v6528_v15  ;;  %v1001_v28 = vadd.f32 %v993_v53, %v984_v62  ;;  %v951_v11 = vadd.f32 %v943_v23, %v934_v55  ;;  %v1054_v10 = vsel %vm1051_vm0, %v1052_v33, %v9098_v34  ;;  %v1333_v46 = vmul.f32 %v6295_v36, %v5456_v18 }
 0x19e   : > { %9540 = vst [vmem:[#allocation168_spill] sm:$0xff] %v6536_v27  ;;  %v3040_v61 = vadd.f32 %v6387_v3, %v2979_v20  ;;  %v1235_v54 = vrot.slane %v1211_v49, 1  ;;  %v9099_v53 = vrot.slane %v6528_v15, 1  ;;  %v6547_v62 = vmul.f32 %v6303_v63, %v5456_v18 }
 0x19f   : > { %v1018_v52 = vadd.f32 %v1010_v9, %v1001_v28  ;;  %v9542_v42 = vrot.slane %v6446_v6, 6  ;;  %v9543_v23 = vrot.slane %v6507_v43, 1  ;;  %v9544_v33 = vrot.slane %v6519_v50, 1 }
 0x1a0   : > { %9541 = vst [vmem:[#allocation169_spill] sm:$0xff] %v6547_v62  ;;  %v3101_v16 = vadd.f32 %v3081_v5, %v3040_v61  ;;  %v1296_v20 = vrot.slane %v1272_v26, 1  ;;  %v9101_v28 = vrot.slane %v6536_v27, 1  ;;  %v1394_v5 = vmul.f32 %v6310_v22, %v5473_v29 }
 0x1a1   : > { %v6552_v3 = vsel %vm3191_vm5, %v3568_v56, %v9542_v42  ;;  %v1115_v55 = vsel %vm1051_vm0, %v1113_v47, %v9543_v23  ;;  %v1176_v9 = vsel %vm1051_vm0, %v1174_v37, %v9544_v33  ;;  %v1080_v49 = vadd.f32 %v1054_v10, %v1018_v52 }
 0x1a2   : > { %v3162_v61 = vadd.f32 %v6434_v57, %v3101_v16  ;;  %v1357_v34 = vrot.slane %v1333_v46, 1  ;;  %v9100_v42 = vrot.slane %v6547_v62, 1  ;;  %v6567_v56 = vmul.f32 %v6318_v7, %v5473_v29  ;;  %v9549_v46 = vld [vmem:[#allocation52_spill] sm:$0xff] }
 0x1a3   : > { %v6569_v47 = vadd.f32 %v960_v35, %v951_v11  ;;  %v1141_v23 = vadd.f32 %v1115_v55, %v1080_v49  ;;  %v1237_v52 = vsel %vm1051_vm0, %v1235_v54, %v9099_v53  ;;  %v1455_v37 = vmul.f32 %v5476_v31, %v6412_v19  ;;  %v9551_v53 = vld [vmem:[#allocation55_spill] sm:$0xff] }
 0x1a4   : > { %9545 = vst [vmem:[#allocation170_spill] sm:$0xff] %v6567_v56  ;;  %v3224_v26 = vadd.f32 %v6439_v14, %v3162_v61  ;;  %v6579_v16 = vmul.f32 %v5476_v31, %v6449_v44  ;;  %v1517_v57 = vmul.f32 %v5494_v8, %v6426_v51  ;;  %v6585_v35 = vmul.f32 %v5494_v8, %v6452_v12 }
 0x1a5   : > { %9546 = vst [vmem:[#allocation171_spill] sm:$0xff] %v6569_v47  ;;  %v1202_v11 = vadd.f32 %v1176_v9, %v1141_v23  ;;  %v1298_v54 = vsel %vm1051_vm0, %v1296_v20, %v9101_v28  ;;  %v1418_v10 = vrot.slane %v1394_v5, 1  ;;  %v1578_v14 = vmul.f32 %v9549_v46, %v5907_v32 }
 0x1a6   : > { %9547 = vst [vmem:[#allocation172_spill] sm:$0xff] %v6579_v16  ;;  %v3285_v55 = vadd.f32 %v6457_v45, %v3224_v26  ;;  %v1359_v33 = vsel %vm1051_vm0, %v1357_v34, %v9100_v42  ;;  %v6599_v61 = vmul.f32 %v9549_v46, %v5952_v17  ;;  %v1480_v23 = vrot.slane %v1455_v37, 2 }
 0x1a7   : > { %9548 = vst [vmem:[#allocation173_spill] sm:$0xff] %v6585_v35  ;;  %v1263_v9 = vadd.f32 %v1237_v52, %v1202_v11  ;;  %v1639_v20 = vmul.f32 %v6265_v13, %v9551_v53  ;;  %v6605_v5 = vmul.f32 %v6271_v25, %v9551_v53  ;;  %v9106_v26 = vrot.slane %v6579_v16, 2  ;;  %v9553_v52 = vld [vmem:[#allocation57_spill] sm:$0xff] }
 0x1a8   : > { %9550 = vst [vmem:[#allocation174_spill] sm:$0xff] %v6599_v61  ;;  %v3346_v45 = vadd.f32 %v6462_v48, %v3285_v55  ;;  %v1541_v34 = vrot.slane %v1517_v57, 2  ;;  %v9107_v42 = vrot.slane %v6585_v35, 2  ;;  %v1602_v49 = vrot.slane %v1578_v14, 2 }
 0x1a9   : > { %9552 = vst [vmem:[#allocation175_spill] sm:$0xff] %v6605_v5  ;;  %v1324_v28 = vadd.f32 %v1298_v54, %v1263_v9  ;;  %v9108_v6 = vrot.slane %v6599_v61, 2  ;;  %v1700_v37 = vmul.f32 %v6278_v30, %v9553_v52  ;;  %v9554_v62 = vrot.slane %v6567_v56, 1  ;;  %v9556_v54 = vld [vmem:[#allocation58_spill] sm:$0xff] }
 0x1aa   : > { %v3407_v11 = vadd.f32 %v6467_v0, %v3346_v45  ;;  %v1663_v15 = vrot.slane %v1639_v20, 2  ;;  %v6620_v57 = vmul.f32 %v6288_v58, %v9553_v52  ;;  %v1761_v14 = vmul.f32 %v6295_v36, %v9556_v54 }
 0x1ab   : > { %v1420_v27 = vsel %vm1051_vm0, %v1418_v10, %v9554_v62  ;;  %v1385_v55 = vadd.f32 %v1359_v33, %v1324_v28  ;;  %v6626_v9 = vmul.f32 %v6303_v63, %v9556_v54  ;;  %v1482_v62 = vsel %vm1479_vm1, %v1480_v23, %v9106_v26  ;;  %v9558_v10 = vld [vmem:[#allocation59_spill] sm:$0xff] }
 0x1ac   : > { %9555 = vst [vmem:[#allocation57_spill] sm:$0xff] %v6620_v57  ;;  %v3468_v0 = vadd.f32 %v6474_v21, %v3407_v11  ;;  %v1543_v28 = vsel %vm1479_vm1, %v1541_v34, %v9107_v42  ;;  %v1822_v33 = vmul.f32 %v6310_v22, %v9558_v10  ;;  %v1604_v45 = vsel %vm1479_vm1, %v1602_v49, %v9108_v6  ;;  %v9561_v34 = vld [vmem:[#allocation63_spill] sm:$0xff]  ;;  %v9567_v6 = vld [vmem:[#allocation126_spill] sm:$0xff]  ;;  %v9569_v49 = vld [vmem:[#allocation68_spill] sm:$0xff] }
 0x1ad   : > { %9557 = vst [vmem:[#allocation176_spill] sm:$0xff] %v6626_v9  ;;  %v1446_v20 = vadd.f32 %v1420_v27, %v1385_v55  ;;  %v1724_v48 = vrot.slane %v1700_v37, 2  ;;  %v6642_v21 = vmul.f32 %v6318_v7, %v9558_v10  ;;  %v9560_v23 = vrot.slane %v6605_v5, 2 }
 0x1ae   : > { %v3529_v11 = vadd.f32 %v6489_v4, %v3468_v0  ;;  %v1883_v42 = vmul.f32 %v9561_v34, %v6412_v19  ;;  %v6652_v27 = vmul.f32 %v9561_v34, %v6449_v44  ;;  %v1785_v37 = vrot.slane %v1761_v14, 2  ;;  %v9563_v0 = vld [vmem:[#allocation64_spill] sm:$0xff] }
 0x1af   : > { %9559 = vst [vmem:[#allocation177_spill] sm:$0xff] %v6642_v21  ;;  %v1665_v26 = vsel %vm1479_vm1, %v1663_v15, %v9560_v23  ;;  %v1508_v55 = vadd.f32 %v1482_v62, %v1446_v20  ;;  %v1846_v4 = vrot.slane %v1822_v33, 2  ;;  %v1945_v5 = vmul.f32 %v9563_v0, %v6426_v51  ;;  %v9565_v62 = vld [vmem:[#allocation66_spill] sm:$0xff] }
 0x1b0   : > { %9562 = vst [vmem:[#allocation63_spill] sm:$0xff] %v6652_v27  ;;  %v3590_v61 = vadd.f32 %v6552_v3, %v3529_v11  ;;  %v6661_v15 = vmul.f32 %v9563_v0, %v6452_v12  ;;  %v2006_v20 = vmul.f32 %v9565_v62, %v5907_v32  ;;  %v6668_v14 = vmul.f32 %v9565_v62, %v5952_v17 }
 0x1b1   : > { %v1569_v23 = vadd.f32 %v1543_v28, %v1508_v55  ;;  %v1908_v33 = vrot.slane %v1883_v42, 3  ;;  %v2067_v16 = vmul.f32 %v6265_v13, %v9569_v49  ;;  %v9570_v28 = vrot.slane %v6620_v57, 2  ;;  %v9577_v57 = vld [vmem:[#allocation72_spill] sm:$0xff] }
 0x1b2   : > { %9564 = vst [vmem:[#allocation64_spill] sm:$0xff] %v6661_v15  ;;  %v6671_v3 = vadd.f32 %v9567_v6, %v3590_v61  ;;  %v9571_v35 = vrot.slane %v6626_v9, 2  ;;  %v6684_v43 = vmul.f32 %v6271_v25, %v9569_v49  ;;  %v1969_v6 = vrot.slane %v1945_v5, 3  ;;  %v9573_v61 = vld [vmem:[#allocation71_spill] sm:$0xff] }
 0x1b3   : > { %9566 = vst [vmem:[#allocation66_spill] sm:$0xff] %v6668_v14  ;;  %v1630_v56 = vadd.f32 %v1604_v45, %v1569_v23  ;;  %v1726_v55 = vsel %vm1479_vm1, %v1724_v48, %v9570_v28  ;;  %v2128_v45 = vmul.f32 %v6278_v30, %v9573_v61  ;;  %v6692_v23 = vmul.f32 %v6288_v58, %v9573_v61 }
 0x1b4   : > { %9568 = vst [vmem:[#allocation126_spill] sm:$0xff] %v6671_v3  ;;  %v1787_v50 = vsel %vm1479_vm1, %v1785_v37, %v9571_v35  ;;  %3614 = vadd.xlane.f32.xlu0 %v6671_v3  ;;  %v9575_v28 = vrot.slane %v6642_v21, 2  ;;  %v2030_v37 = vrot.slane %v2006_v20, 3  ;;  %v9125_v11 = vrot.slane %v6668_v14, 3 }
 0x1b5   : > { %9572 = vst [vmem:[#allocation178_spill] sm:$0xff] %v6684_v43  ;;  %v1691_v48 = vadd.f32 %v1665_v26, %v1630_v56  ;;  %v9576_v3 = vrot.slane %v6652_v27, 3  ;;  %v2091_v42 = vrot.slane %v2067_v16, 3  ;;  %v2189_v24 = vmul.f32 %v6295_v36, %v9577_v57  ;;  %v9579_v26 = vld [vmem:[#allocation73_spill] sm:$0xff] }
 0x1b6   : > { %9574 = vst [vmem:[#allocation179_spill] sm:$0xff] %v6692_v23  ;;  %v1848_v35 = vsel %vm1479_vm1, %v1846_v4, %v9575_v28  ;;  %v6706_v56 = vmul.f32 %v6303_v63, %v9577_v57  ;;  %v2250_v4 = vmul.f32 %v6310_v22, %v9579_v26  ;;  %v6712_v20 = vmul.f32 %v6318_v7, %v9579_v26 }
 0x1b7   : > { %v1910_v5 = vsel %vm1907_vm2, %v1908_v33, %v9576_v3  ;;  %v1752_v47 = vadd.f32 %v1726_v55, %v1691_v48  ;;  %v9581_v3 = vrot.slane %v6661_v15, 3  ;;  %v2152_v33 = vrot.slane %v2128_v45, 3  ;;  %v9582_v55 = vld [vmem:[#allocation76_spill] sm:$0xff] }
 0x1b8   : > { %9578 = vst [vmem:[#allocation180_spill] sm:$0xff] %v6706_v56  ;;  %v2311_v48 = vmul.f32 %v9582_v55, %v6412_v19  ;;  %v2032_v27 = vsel %vm1907_vm2, %v2030_v37, %v9125_v11  ;;  %v6725_v21 = vmul.f32 %v9582_v55, %v6449_v44  ;;  %v2373_v15 = vmul.f32 %v9584_v41, %v6426_v51 }
 0x1b9   : > { %9580 = vst [vmem:[#allocation181_spill] sm:$0xff] %v6712_v20  ;;  %v1971_v16 = vsel %vm1907_vm2, %v1969_v6, %v9581_v3  ;;  %v1813_v9 = vadd.f32 %v1787_v50, %v1752_v47  ;;  %v9585_v6 = vrot.slane %v6684_v43, 3  ;;  %v2213_v3 = vrot.slane %v2189_v24, 3  ;;  %v9587_v50 = vld [vmem:[#allocation80_spill] sm:$0xff] }
 0x1ba   : > { %9583 = vst [vmem:[#allocation182_spill] sm:$0xff] %v6725_v21  ;;  %v6734_v28 = vmul.f32 %v9584_v41, %v6452_v12  ;;  %v2434_v47 = vmul.f32 %v9587_v50, %v5907_v32  ;;  %v2274_v14 = vrot.slane %v2250_v4, 3  ;;  %v9588_v39 = vrot.slane %v6692_v23, 3 }
 0x1bb   : > { %v2093_v45 = vsel %vm1907_vm2, %v2091_v42, %v9585_v6  ;;  %v1874_v37 = vadd.f32 %v1848_v35, %v1813_v9  ;;  %v2336_v38 = vrot.slane %v2311_v48, 4  ;;  %v6745_v24 = vmul.f32 %v9587_v50, %v5952_v17  ;;  %v9590_v42 = vld [vmem:[#allocation82_spill] sm:$0xff] }
 0x1bc   : > { %9586 = vst [vmem:[#allocation183_spill] sm:$0xff] %v6734_v28  ;;  %v2154_v43 = vsel %vm1907_vm2, %v2152_v33, %v9588_v39  ;;  %v2495_v6 = vmul.f32 %v6265_v13, %v9590_v42  ;;  %v2397_v35 = vrot.slane %v2373_v15, 4  ;;  %v6752_v4 = vmul.f32 %v6271_v25, %v9590_v42  ;;  %v9592_v33 = vld [vmem:[#allocation83_spill] sm:$0xff] }
 0x1bd   : > { %9589 = vst [vmem:[#allocation184_spill] sm:$0xff] %v6745_v24  ;;  %v1936_v41 = vadd.f32 %v1910_v5, %v1874_v37  ;;  %v2458_v11 = vrot.slane %v2434_v47, 4  ;;  %v2556_v48 = vmul.f32 %v6278_v30, %v9592_v33  ;;  %v9593_v50 = vrot.slane %v6706_v56, 3  ;;  %v9596_v39 = vld [vmem:[#allocation87_spill] sm:$0xff] }
 0x1be   : > { %9591 = vst [vmem:[#allocation185_spill] sm:$0xff] %v6752_v4  ;;  %v9594_v37 = vrot.slane %v6712_v20, 3  ;;  %v6766_v9 = vmul.f32 %v6288_v58, %v9592_v33  ;;  %v2519_v40 = vrot.slane %v2495_v6, 4  ;;  %v2617_v42 = vmul.f32 %v6295_v36, %v9596_v39 }
 0x1bf   : > { %v1997_v23 = vadd.f32 %v1971_v16, %v1936_v41  ;;  %v2215_v5 = vsel %vm1907_vm2, %v2213_v3, %v9593_v50  ;;  %v6773_v41 = vmul.f32 %v6303_v63, %v9596_v39  ;;  %v9598_v3 = vrot.slane %v6725_v21, 4 }
 0x1c0   : > { %v2276_v15 = vsel %vm1907_vm2, %v2274_v14, %v9594_v37  ;;  %9595 = vst [vmem:[#allocation186_spill] sm:$0xff] %v6766_v9  ;;  %v9599_v14 = vld [vmem:[#allocation88_spill] sm:$0xff]  ;;  %v9601_v47 = vrot.slane %v6734_v28, 4  ;;  %v9602_v56 = vrot.slane %v6745_v24, 4  ;;  %v2641_v24 = vrot.slane %v2617_v42, 4 }
 0x1c1   : > { %9597 = vst [vmem:[#allocation187_spill] sm:$0xff] %v6773_v41  ;;  %v2058_v16 = vadd.f32 %v2032_v27, %v1997_v23  ;;  %v2338_v50 = vsel %vm2335_vm3, %v2336_v38, %v9598_v3  ;;  %v2678_v37 = vmul.f32 %v6310_v22, %v9599_v14  ;;  %v6782_v6 = vmul.f32 %v6318_v7, %v9599_v14  ;;  %v9603_v23 = vld [vmem:[#allocation89_spill] sm:$0xff]  ;;  %v9605_v14 = vld [vmem:[#allocation92_spill] sm:$0xff]  ;;  %v9608_v3 = vld [vmem:[#allocation94_spill] sm:$0xff] }
 0x1c2   : > { %v2399_v20 = vsel %vm2335_vm3, %v2397_v35, %v9601_v47  ;;  %v2460_v39 = vsel %vm2335_vm3, %v2458_v11, %v9602_v56  ;;  %v2580_v27 = vrot.slane %v2556_v48, 4  ;;  %v2739_v21 = vmul.f32 %v9603_v23, %v6412_v19 }
 0x1c3   : > { %9600 = vst [vmem:[#allocation188_spill] sm:$0xff] %v6782_v6  ;;  %v2119_v38 = vadd.f32 %v2093_v45, %v2058_v16  ;;  %v6795_v33 = vmul.f32 %v9603_v23, %v6449_v44  ;;  %v2801_v28 = vmul.f32 %v9605_v14, %v6426_v51  ;;  %v9606_v35 = vrot.slane %v6752_v4, 4 }
 0x1c4   : > { %v6805_v56 = vmul.f32 %v9605_v14, %v6452_v12  ;;  %v2702_v48 = vrot.slane %v2678_v37, 4  ;;  %v9154_v16 = vrot.slane %v6782_v6, 4  ;;  %v2862_v23 = vmul.f32 %v9608_v3, %v5907_v32  ;;  %v9611_v37 = vld [vmem:[#allocation96_spill] sm:$0xff] }
 0x1c5   : > { %9604 = vst [vmem:[#allocation189_spill] sm:$0xff] %v6795_v33  ;;  %v2521_v47 = vsel %vm2335_vm3, %v2519_v40, %v9606_v35  ;;  %v2180_v45 = vadd.f32 %v2154_v43, %v2119_v38  ;;  %v2764_v55 = vrot.slane %v2739_v21, 5  ;;  %v2825_v4 = vrot.slane %v2801_v28, 5 }
 0x1c6   : > { %9607 = vst [vmem:[#allocation190_spill] sm:$0xff] %v6805_v56  ;;  %v9609_v35 = vrot.slane %v6766_v9, 4  ;;  %v6817_v43 = vmul.f32 %v9608_v3, %v5952_v17  ;;  %v2923_v38 = vmul.f32 %v6265_v13, %v9611_v37  ;;  %v9612_v32 = vrot.slane %v6773_v41, 4  ;;  %v9616_v41 = vld [vmem:[#allocation100_spill] sm:$0xff] }
 0x1c7   : > { %v2241_v42 = vadd.f32 %v2215_v5, %v2180_v45  ;;  %v6826_v28 = vmul.f32 %v6271_v25, %v9611_v37  ;;  %v9614_v5 = vld [vmem:[#allocation99_spill] sm:$0xff]  ;;  %v2704_v40 = vsel %vm2335_vm3, %v2702_v48, %v9154_v16  ;;  %v2886_v26 = vrot.slane %v2862_v23, 5  ;;  %v9628_v16 = vld [vmem:[#allocation109_spill] sm:$0xff] }
 0x1c8   : > { %v2582_v11 = vsel %vm2335_vm3, %v2580_v27, %v9609_v35  ;;  %9610 = vst [vmem:[#allocation191_spill] sm:$0xff] %v6817_v43  ;;  %v2643_v21 = vsel %vm2335_vm3, %v2641_v24, %v9612_v32  ;;  %v2984_v45 = vmul.f32 %v6278_v30, %v9614_v5  ;;  %v6832_v27 = vmul.f32 %v6288_v58, %v9614_v5 }
 0x1c9   : > { %9613 = vst [vmem:[#allocation192_spill] sm:$0xff] %v6826_v28  ;;  %v2302_v35 = vadd.f32 %v2276_v15, %v2241_v42  ;;  %v3045_v24 = vmul.f32 %v6295_v36, %v9616_v41  ;;  %v9617_v32 = vrot.slane %v6795_v33, 5  ;;  %v9618_v37 = vrot.slane %v6805_v56, 5  ;;  %v9620_v42 = vld [vmem:[#allocation103_spill] sm:$0xff]  ;;  %v9622_v56 = vld [vmem:[#allocation104_spill] sm:$0xff] }
 0x1ca   : > { %9615 = vst [vmem:[#allocation193_spill] sm:$0xff] %v6832_v27  ;;  %v6851_v15 = vmul.f32 %v6303_v63, %v9616_v41  ;;  %v3106_v23 = vmul.f32 %v6310_v22, %v9620_v42  ;;  %v2947_v33 = vrot.slane %v2923_v38, 5  ;;  %v3167_v6 = vmul.f32 %v9622_v56, %v6412_v19  ;;  %v9624_v38 = vld [vmem:[#allocation107_spill] sm:$0xff] }
 0x1cb   : > { %v6842_v9 = vsel %vm2763_vm4, %v2764_v55, %v9617_v32  ;;  %v6847_v3 = vsel %vm2763_vm4, %v2825_v4, %v9618_v37  ;;  %v2364_v48 = vadd.f32 %v2338_v50, %v2302_v35  ;;  %v6858_v55 = vmul.f32 %v6318_v7, %v9620_v42  ;;  %v4773_v37 = vld [vmem:[%s5327_s19 + $0x30] sm:$0xff] }
 0x1cc   : > { %9619 = vst [vmem:[#allocation194_spill] sm:$0xff] %v6851_v15  ;;  %v3008_v4 = vrot.slane %v2984_v45, 5  ;;  %v3069_v5 = vrot.slane %v3045_v24, 5  ;;  %v6866_v50 = vmul.f32 %v9622_v56, %v6449_v44  ;;  %v3229_v35 = vmul.f32 %v9624_v38, %v6426_v51  ;;  %v9626_v32 = vld [vmem:[#allocation108_spill] sm:$0xff] }
 0x1cd   : > { %9621 = vst [vmem:[#allocation195_spill] sm:$0xff] %v6858_v55  ;;  %v2425_v41 = vadd.f32 %v2399_v20, %v2364_v48  ;;  %v3130_v42 = vrot.slane %v3106_v23, 5  ;;  %v6873_v45 = vmul.f32 %v9624_v38, %v6452_v12  ;;  %v3290_v14 = vmul.f32 %v4773_v37, %v9626_v32 }
 0x1ce   : > { %9623 = vst [vmem:[#allocation196_spill] sm:$0xff] %v6866_v50  ;;  %v9164_v20 = vrot.slane %v6858_v55, 5  ;;  %v3192_v24 = vrot.slane %v3167_v6, 6  ;;  %v3253_v48 = vrot.slane %v3229_v35, 6  ;;  %v6882_v23 = vmul.f32 %v9626_v32, %v5952_v17 }
 0x1cf   : > { %9625 = vst [vmem:[#allocation197_spill] sm:$0xff] %v6873_v45  ;;  %v2486_v19 = vadd.f32 %v2460_v39, %v2425_v41  ;;  %v3351_v12 = vmul.f32 %v6265_v13, %v9628_v16  ;;  %v3314_v56 = vrot.slane %v3290_v14, 6  ;;  %v6888_v39 = vmul.f32 %v6271_v25, %v9628_v16  ;;  %v9630_v41 = vld [vmem:[#allocation110_spill] sm:$0xff]  ;;  %v6938_v14 = vld [vmem:[%s5327_s19 + $0xb8] sm:$0x3f] }
 0x1d0   : > { %9627 = vst [vmem:[#allocation198_spill] sm:$0xff] %v6882_v23  ;;  %v6892_v6 = vmul.f32 %v6278_v30, %v9630_v41  ;;  %v9631_v37 = vrot.slane %v6817_v43, 5  ;;  %v9632_v35 = vrot.slane %v6826_v28, 5  ;;  %v9634_v51 = vrot.slane %v6832_v27, 5  ;;  %v9643_v27 = vld [vmem:[#allocation40_spill] sm:$0xff] }
 0x1d1   : > { %v2547_v38 = vadd.f32 %v2521_v47, %v2486_v19  ;;  %9629 = vst [vmem:[#allocation199_spill] sm:$0xff] %v6888_v39  ;;  %v6903_v47 = vmul.f32 %v6288_v58, %v9630_v41  ;;  %v3375_v44 = vrot.slane %v3351_v12, 6  ;;  %v9644_v28 = vrot.slane %v9643_v27, 1  ;;  %v9648_v27 = vld [vmem:[#allocation44_spill] sm:$0xff] }
 0x1d2   : > { %v2888_v17 = vsel %vm2763_vm4, %v2886_v26, %v9631_v37  ;;  %v2949_v13 = vsel %vm2763_vm4, %v2947_v33, %v9632_v35  ;;  %v6908_v30 = vsel %vm2763_vm4, %v3008_v4, %v9634_v51  ;;  %v6912_v37 = vld [vmem:[%s5327_s19 + $0x88] sm:$0x3f]  ;;  %v9635_v33 = vrot.slane %v6851_v15, 5  ;;  %v6935_v26 = vld [vmem:[%s5327_s19 + $0xa0] sm:$0x3f] }
 0x1d3   : > { %9633 = vst [vmem:[#allocation200_spill] sm:$0xff] %v6903_v47  ;;  %v2608_v19 = vadd.f32 %v2582_v11, %v2547_v38  ;;  %v6922_v11 = vsel %vm2763_vm4, %v3130_v42, %v9164_v20  ;;  %v9636_v38 = vrot.slane %v6866_v50, 6  ;;  %v9637_v51 = vrot.slane %v6873_v45, 6  ;;  %v6952_v45 = vld [vmem:[%s5327_s19 + $0xe8] sm:$0x3f] }
 0x1d4   : > { %v6917_v35 = vsel %vm2763_vm4, %v3069_v5, %v9635_v33  ;;  %v9638_v33 = vrot.slane %v6882_v23, 6  ;;  %v3436_v20 = vrot.slane %v6892_v6, 6  ;;  %v1283_v23 = vmul.f32 %v5438_v2, %v6938_v14 }
 0x1d5   : > { %v6927_v4 = vsel %vm3191_vm5, %v3192_v24, %v9636_v38  ;;  %v6932_v12 = vsel %vm3191_vm5, %v3253_v48, %v9637_v51  ;;  %v2669_v5 = vadd.f32 %v2643_v21, %v2608_v19  ;;  %v3473_v24 = vmul.f32 %v6295_v36, %v5916_v59  ;;  %v6949_v38 = vld [vmem:[%s5327_s19 + $0xd0] sm:$0x3f] }
 0x1d6   : > { %v6943_v42 = vsel %vm3191_vm5, %v3314_v56, %v9638_v33  ;;  %v6957_v51 = vmul.f32 %v6303_v63, %v5916_v59  ;;  %v6962_v56 = vld [vmem:[%s8875_s2 + $0x30] ss:$0 sm:$0xff]  ;;  %v1161_v36 = vmul.f32 %v5374_v60, %v6912_v37  ;;  %v9641_v19 = vrot.slane %v6888_v39, 6 }
 0x1d7   : > { %9640 = vst [vmem:[#allocation202_spill] sm:$0xff] %v6962_v56  ;;  %v3534_v21 = vmul.f32 %v6962_v56, %v6310_v22  ;;  %v2730_v6 = vadd.f32 %v2704_v40, %v2669_v5  ;;  %v1222_v48 = vmul.f32 %v5435_v1, %v6935_v26  ;;  %v6979_v50 = vmul.f32 %v6962_v56, %v6318_v7 }
 0x1d8   : > { %9639 = vst [vmem:[#allocation201_spill] sm:$0xff] %v6957_v51  ;;  %v6971_v33 = vsel %vm3191_vm5, %v3375_v44, %v9641_v19  ;;  %v1192_v22 = vrot.slane %v1161_v36, 1  ;;  %v1344_v55 = vmul.f32 %v5456_v18, %v6949_v38  ;;  %v1405_v40 = vmul.f32 %v5473_v29, %v6952_v45  ;;  %v6991_v36 = vld [vmem:[%s5327_s19 + $0x58] sm:$0x3f] }
 0x1d9   : > { %9642 = vst [vmem:[#allocation203_spill] sm:$0xff] %v6979_v50  ;;  %v2792_v44 = vadd.f32 %v6842_v9, %v2730_v6  ;;  %v3497_v5 = vrot.slane %v3473_v24, 6  ;;  %v1253_v19 = vrot.slane %v1222_v48, 1  ;;  %v1314_v39 = vrot.slane %v1283_v23, 1  ;;  %v9645_v9 = vld [vmem:[#allocation49_spill] sm:$0xff]  ;;  %v9646_v24 = vld [vmem:[#allocation43_spill] sm:$0xff] }
 0x1da   : > { %v1193_v43 = vsel %vm1051_vm0, %v9644_v28, %v1192_v22  ;;  %v1375_v56 = vrot.slane %v1344_v55, 1  ;;  %v1466_v18 = vmul.f32 %v6991_v36, %v5476_v31  ;;  %v3558_v59 = vrot.slane %v3534_v21, 6  ;;  %v7005_v22 = vld [vmem:[%s5327_s19 + $0x70] sm:$0x3f] }
 0x1db   : > { %v2853_v29 = vadd.f32 %v6847_v3, %v2792_v44  ;;  %v1209_v6 = vadd.f32 %v1193_v43, %v9645_v9  ;;  %v9647_v48 = vrot.slane %v9646_v24, 1  ;;  %v9188_v15 = vrot.slane %v6979_v50, 6 }
 0x1dc   : > { %v9649_v2 = vrot.slane %v9648_v27, 1  ;;  %v1436_v55 = vrot.slane %v1405_v40, 1  ;;  %v1528_v31 = vmul.f32 %v7005_v22, %v5494_v8  ;;  %v1589_v43 = vmul.f32 %v9549_v46, %v6912_v37 }
 0x1dd   : > { %v1254_v23 = vsel %vm1051_vm0, %v9647_v48, %v1253_v19  ;;  %v2914_v3 = vadd.f32 %v2888_v17, %v2853_v29  ;;  %v1650_v44 = vmul.f32 %v9551_v53, %v6935_v26  ;;  %v9650_v19 = vld [vmem:[#allocation46_spill] sm:$0xff]  ;;  %v1498_v48 = vrot.slane %v1466_v18, 2 }
 0x1de   : > { %v1315_v28 = vsel %vm1051_vm0, %v9649_v2, %v1314_v39  ;;  %v1270_v21 = vadd.f32 %v1254_v23, %v1209_v6  ;;  %v9651_v9 = vrot.slane %v9650_v19, 1  ;;  %v1711_v2 = vmul.f32 %v9553_v52, %v6938_v14 }
 0x1df   : > { %v1772_v39 = vmul.f32 %v9556_v54, %v6949_v38  ;;  %v2975_v40 = vadd.f32 %v2949_v13, %v2914_v3  ;;  %v9652_v29 = vrot.slane %v6903_v47, 6  ;;  %v9653_v6 = vrot.slane %v6957_v51, 6 }
 0x1e0   : > { %v1376_v24 = vsel %vm1051_vm0, %v9651_v9, %v1375_v56  ;;  %v1331_v27 = vadd.f32 %v1315_v28, %v1270_v21  ;;  %v7033_v18 = vsel %vm3191_vm5, %v3558_v59, %v9188_v15  ;;  %v9654_v56 = vld [vmem:[#allocation50_spill] sm:$0xff]  ;;  %v1559_v3 = vrot.slane %v1528_v31, 2 }
 0x1e1   : > { %v7023_v17 = vsel %vm3191_vm5, %v3436_v20, %v9652_v29  ;;  %v7028_v23 = vsel %vm3191_vm5, %v3497_v5, %v9653_v6  ;;  %v9655_v19 = vrot.slane %v9654_v56, 1  ;;  %v1833_v20 = vmul.f32 %v9558_v10, %v6952_v45  ;;  %v9656_v6 = vld [vmem:[#allocation51_spill] sm:$0xff] }
 0x1e2   : > { %v3036_v9 = vadd.f32 %v6908_v30, %v2975_v40  ;;  %v1392_v29 = vadd.f32 %v1376_v24, %v1331_v27  ;;  %v1620_v51 = vrot.slane %v1589_v43, 2  ;;  %v1681_v5 = vrot.slane %v1650_v44, 2  ;;  %v9658_v43 = vld [vmem:[#allocation53_spill] sm:$0xff]  ;;  %v9660_v27 = vld [vmem:[#allocation54_spill] sm:$0xff] }
 0x1e3   : > { %v1437_v13 = vsel %vm1051_vm0, %v9655_v19, %v1436_v55  ;;  %v9657_v28 = vrot.slane %v9656_v6, 2  ;;  %v1742_v50 = vrot.slane %v1711_v2, 2  ;;  %v1803_v59 = vrot.slane %v1772_v39, 2 }
 0x1e4   : > { %v1894_v56 = vmul.f32 %v6991_v36, %v9561_v34  ;;  %v3097_v55 = vadd.f32 %v6917_v35, %v3036_v9  ;;  %v1453_v31 = vadd.f32 %v1437_v13, %v1392_v29  ;;  %v1956_v19 = vmul.f32 %v7005_v22, %v9563_v0  ;;  %v9662_v29 = vld [vmem:[#allocation56_spill] sm:$0xff] }
 0x1e5   : > { %v1499_v21 = vsel %vm1479_vm1, %v9657_v28, %v1498_v48  ;;  %v2017_v30 = vmul.f32 %v9565_v62, %v6912_v37  ;;  %v9659_v44 = vrot.slane %v9658_v43, 2  ;;  %v1864_v40 = vrot.slane %v1833_v20, 2  ;;  %v9664_v43 = vld [vmem:[#allocation60_spill] sm:$0xff] }
 0x1e6   : > { %v2078_v48 = vmul.f32 %v9569_v49, %v6935_v26  ;;  %v2139_v2 = vmul.f32 %v9573_v61, %v6938_v14  ;;  %v3158_v35 = vadd.f32 %v6922_v11, %v3097_v55  ;;  %v1515_v39 = vadd.f32 %v1499_v21, %v1453_v31 }
 0x1e7   : > { %v1560_v24 = vsel %vm1479_vm1, %v9659_v44, %v1559_v3  ;;  %v9661_v13 = vrot.slane %v9660_v27, 2  ;;  %v9663_v6 = vrot.slane %v9662_v29, 2  ;;  %v9665_v3 = vrot.slane %v9664_v43, 2  ;;  %v9666_v44 = vld [vmem:[#allocation61_spill] sm:$0xff]  ;;  %v9668_v27 = vld [vmem:[#allocation62_spill] sm:$0xff] }
 0x1e8   : > { %v9667_v15 = vrot.slane %v9666_v44, 2  ;;  %v1926_v61 = vrot.slane %v1894_v56, 3  ;;  %v2200_v11 = vmul.f32 %v9577_v57, %v6949_v38  ;;  %v3220_v21 = vadd.f32 %v6927_v4, %v3158_v35  ;;  %v9671_v56 = vld [vmem:[#allocation76_spill] sm:$0xff]  ;;  %v9672_v44 = vld [vmem:[#allocation78_spill] sm:$0xff] }
 0x1e9   : > { %v1621_v9 = vsel %vm1479_vm1, %v9661_v13, %v1620_v51  ;;  %v1682_v28 = vsel %vm1479_vm1, %v9663_v6, %v1681_v5  ;;  %v1743_v20 = vsel %vm1479_vm1, %v9665_v3, %v1742_v50  ;;  %v1576_v55 = vadd.f32 %v1560_v24, %v1515_v39  ;;  %v9670_v50 = vld [vmem:[#allocation73_spill] sm:$0xff] }
 0x1ea   : > { %v1804_v47 = vsel %vm1479_vm1, %v9667_v15, %v1803_v59  ;;  %v1987_v51 = vrot.slane %v1956_v19, 3  ;;  %v2048_v31 = vrot.slane %v2017_v30, 3  ;;  %v9669_v13 = vrot.slane %v9668_v27, 2  ;;  %v9673_v19 = vld [vmem:[#allocation65_spill] sm:$0xff] }
 0x1eb   : > { %v2109_v29 = vrot.slane %v2078_v48, 3  ;;  %v2170_v6 = vrot.slane %v2139_v2, 3  ;;  %v2261_v43 = vmul.f32 %v9670_v50, %v6952_v45  ;;  %v3281_v15 = vadd.f32 %v6932_v12, %v3220_v21  ;;  %v9676_v2 = vld [vmem:[#allocation82_spill] sm:$0xff]  ;;  %v9677_v21 = vld [vmem:[#allocation67_spill] sm:$0xff] }
 0x1ec   : > { %v1865_v5 = vsel %vm1479_vm1, %v9669_v13, %v1864_v40  ;;  %v1637_v59 = vadd.f32 %v1621_v9, %v1576_v55  ;;  %v2322_v3 = vmul.f32 %v6991_v36, %v9671_v56  ;;  %v2384_v4 = vmul.f32 %v7005_v22, %v9672_v44  ;;  %v9675_v40 = vld [vmem:[#allocation80_spill] sm:$0xff]  ;;  %v9679_v13 = vld [vmem:[#allocation69_spill] sm:$0xff]  ;;  %v9681_v56 = vld [vmem:[#allocation70_spill] sm:$0xff] }
 0x1ed   : > { %v9674_v30 = vrot.slane %v9673_v19, 3  ;;  %v2231_v35 = vrot.slane %v2200_v11, 3  ;;  %v2445_v48 = vmul.f32 %v9675_v40, %v6912_v37  ;;  %v2506_v39 = vmul.f32 %v9676_v2, %v6935_v26 }
 0x1ee   : > { %v3342_v12 = vadd.f32 %v6943_v42, %v3281_v15  ;;  %v1698_v9 = vadd.f32 %v1682_v28, %v1637_v59  ;;  %v9678_v55 = vrot.slane %v9677_v21, 3  ;;  %v9680_v44 = vrot.slane %v9679_v13, 3  ;;  %v9685_v21 = vld [vmem:[#allocation75_spill] sm:$0xff] }
 0x1ef   : > { %v1927_v24 = vsel %vm1907_vm2, %v9674_v30, %v1926_v61  ;;  %v9682_v61 = vrot.slane %v9681_v56, 3  ;;  %v9683_v30 = vld [vmem:[#allocation74_spill] sm:$0xff]  ;;  %v2292_v2 = vrot.slane %v2261_v43, 3  ;;  %v2354_v42 = vrot.slane %v2322_v3, 4  ;;  %v9688_v13 = vld [vmem:[#allocation87_spill] sm:$0xff] }
 0x1f0   : > { %v1988_v27 = vsel %vm1907_vm2, %v9678_v55, %v1987_v51  ;;  %v2049_v19 = vsel %vm1907_vm2, %v9680_v44, %v2048_v31  ;;  %v9684_v40 = vrot.slane %v9683_v30, 3  ;;  %v3403_v28 = vadd.f32 %v6971_v33, %v3342_v12  ;;  %v9689_v33 = vld [vmem:[#allocation88_spill] sm:$0xff] }
 0x1f1   : > { %v2110_v11 = vsel %vm1907_vm2, %v9682_v61, %v2109_v29  ;;  %v1759_v15 = vadd.f32 %v1743_v20, %v1698_v9  ;;  %v2415_v59 = vrot.slane %v2384_v4, 4  ;;  %v2476_v51 = vrot.slane %v2445_v48, 4  ;;  %v9687_v29 = vld [vmem:[#allocation83_spill] sm:$0xff]  ;;  %v9690_v4 = vld [vmem:[#allocation89_spill] sm:$0xff]  ;;  %v9695_v30 = vld [vmem:[#allocation92_spill] sm:$0xff] }
 0x1f2   : > { %v7104_v50 = vsel %vm1907_vm2, %v9684_v40, %v2170_v6  ;;  %v9686_v55 = vrot.slane %v9685_v21, 3  ;;  %v2537_v56 = vrot.slane %v2506_v39, 4  ;;  %v2567_v44 = vmul.f32 %v9687_v29, %v6938_v14  ;;  %v9691_v48 = vld [vmem:[#allocation77_spill] sm:$0xff]  ;;  %v9693_v39 = vld [vmem:[#allocation79_spill] sm:$0xff] }
 0x1f3   : > { %v2628_v6 = vmul.f32 %v9688_v13, %v6949_v38  ;;  %v3464_v43 = vadd.f32 %v7023_v17, %v3403_v28  ;;  %v1820_v3 = vadd.f32 %v1804_v47, %v1759_v15  ;;  %v2689_v20 = vmul.f32 %v9689_v33, %v6952_v45  ;;  %v9696_v47 = vld [vmem:[#allocation94_spill] sm:$0xff]  ;;  %v9701_v33 = vld [vmem:[#allocation96_spill] sm:$0xff]  ;;  %v9739_v13 = vld [vmem:[#allocation37_spill] sm:$0xff] }
 0x1f4   : > { %v7110_v31 = vsel %vm1907_vm2, %v9686_v55, %v2231_v35  ;;  %v2750_v40 = vmul.f32 %v6991_v36, %v9690_v4  ;;  %v9692_v12 = vrot.slane %v9691_v48, 3  ;;  %v9694_v9 = vrot.slane %v9693_v39, 4  ;;  %v9697_v55 = vld [vmem:[#allocation81_spill] sm:$0xff] }
 0x1f5   : > { %v2812_v17 = vmul.f32 %v7005_v22, %v9695_v30  ;;  %v2873_v28 = vmul.f32 %v9696_v47, %v6912_v37  ;;  %v3525_v15 = vadd.f32 %v7028_v23, %v3464_v43  ;;  %v1881_v21 = vadd.f32 %v1865_v5, %v1820_v3  ;;  %v9702_v43 = vld [vmem:[#allocation85_spill] sm:$0xff] }
 0x1f6   : > { %v7124_v35 = vsel %vm1907_vm2, %v9692_v12, %v2292_v2  ;;  %v7129_v61 = vsel %vm2335_vm3, %v9694_v9, %v2354_v42  ;;  %v9698_v4 = vrot.slane %v9697_v55, 4  ;;  %v9699_v2 = vld [vmem:[#allocation84_spill] sm:$0xff]  ;;  %v2598_v42 = vrot.slane %v2567_v44, 4  ;;  %v9704_v44 = vld [vmem:[#allocation99_spill] sm:$0xff] }
 0x1f7   : > { %v9700_v12 = vrot.slane %v9699_v2, 4  ;;  %v2659_v9 = vrot.slane %v2628_v6, 4  ;;  %v2720_v30 = vrot.slane %v2689_v20, 4  ;;  %v2934_v47 = vmul.f32 %v9701_v33, %v6935_v26  ;;  %v7159_v6 = vld [vmem:[%s8876_s3] ss:$0 sm:$0xff] }
 0x1f8   : > { %v7139_v48 = vsel %vm2335_vm3, %v9698_v4, %v2415_v59  ;;  %v3586_v23 = vadd.f32 %v7033_v18, %v3525_v15  ;;  %v1943_v5 = vadd.f32 %v1927_v24, %v1881_v21  ;;  %v9703_v3 = vrot.slane %v9702_v43, 4  ;;  %9705 = vst [vmem:[#allocation40_spill] sm:$0xff] %v7159_v6  ;;  %v9712_v43 = vld [vmem:[#allocation90_spill] sm:$0xff] }
 0x1f9   : > { %v7144_v39 = vsel %vm2335_vm3, %v9700_v12, %v2476_v51  ;;  %v2782_v4 = vrot.slane %v2750_v40, 5  ;;  %v2843_v55 = vrot.slane %v2812_v17, 5  ;;  %v2904_v2 = vrot.slane %v2873_v28, 5  ;;  %v7167_v40 = vld [vmem:[%s5327_s19 + $0x38] sm:$0xff]  ;;  %v9709_v17 = vld [vmem:[#allocation30_spill] sm:$0xff] }
 0x1fa   : > { %v7152_v59 = vsel %vm2335_vm3, %v9703_v3, %v2537_v56  ;;  %v2965_v51 = vrot.slane %v2934_v47, 5  ;;  %v2995_v12 = vmul.f32 %v9704_v44, %v6938_v14  ;;  %v7162_v18 = vadd.f32 %v7159_v6, %v3586_v23  ;;  %v9707_v56 = vld [vmem:[#allocation100_spill] sm:$0xff]  ;;  %9708 = vst [vmem:[#allocation43_spill] sm:$0xff] %v7167_v40  ;;  %v9710_v28 = vld [vmem:[#allocation86_spill] sm:$0xff]  ;;  %v9714_v6 = vld [vmem:[#allocation91_spill] sm:$0xff] }
 0x1fb   : > { %v2004_v24 = vadd.f32 %v1988_v27, %v1943_v5  ;;  %v3056_v20 = vmul.f32 %v9707_v56, %v6949_v38  ;;  %v913_v47 = vmul.f32 %v7167_v40, %v9709_v17  ;;  %v9711_v15 = vrot.slane %v9710_v28, 4  ;;  %v9716_v56 = vld [vmem:[#allocation31_spill] sm:$0xff]  ;;  %v9717_v28 = vld [vmem:[#allocation93_spill] sm:$0xff]  ;;  %v9726_v33 = vld [vmem:[#allocation98_spill] sm:$0xff] }
 0x1fc   : > { %9706 = vst [vmem:[#allocation49_spill] sm:$0xff] %v7162_v18  ;;  %v9713_v3 = vrot.slane %v9712_v43, 4  ;;  %v9715_v27 = vrot.slane %v9714_v6, 4  ;;  %v930_v44 = vmul.f32 %v6271_v25, %v9716_v56  ;;  %3606 = vadd.xlane.f32.xlu1 %v7162_v18  ;;  %v9718_v17 = vrot.slane %v9717_v28, 5  ;;  %v9720_v43 = vld [vmem:[#allocation32_spill] sm:$0xff] }
 0x1fd   : > { %v7174_v21 = vsel %vm2335_vm3, %v9711_v15, %v2598_v42  ;;  %v2065_v40 = vadd.f32 %v2049_v19, %v2004_v24  ;;  %v9719_v15 = vld [vmem:[#allocation103_spill] sm:$0xff]  ;;  %v947_v6 = vmul.f32 %v6288_v58, %v9720_v43  ;;  %v3026_v25 = vrot.slane %v2995_v12, 5  ;;  %v7204_v56 = vld [vmem:[%s5327_s19 + $0x40] sm:$0x3f]  ;;  %v9723_v24 = vld [vmem:[#allocation33_spill] sm:$0xff] }
 0x1fe   : > { %v7179_v23 = vsel %vm2335_vm3, %v9713_v3, %v2659_v9  ;;  %v7184_v5 = vsel %vm2335_vm3, %v9715_v27, %v2720_v30  ;;  %v7192_v42 = vsel %vm2763_vm4, %v9718_v17, %v2782_v4  ;;  %v3117_v9 = vmul.f32 %v9719_v15, %v6952_v45  ;;  %v9721_v3 = vld [vmem:[#allocation95_spill] sm:$0xff]  ;;  %v9724_v17 = vld [vmem:[#allocation97_spill] sm:$0xff] }
 0x1ff   : > { %v9722_v30 = vrot.slane %v9721_v3, 5  ;;  %v938_v19 = vadd.f32 %v930_v44, %v913_v47  ;;  %v964_v28 = vmul.f32 %v6303_v63, %v9723_v24  ;;  %v2126_v4 = vadd.f32 %v2110_v11, %v2065_v40  ;;  %v9729_v43 = vld [vmem:[#allocation107_spill] sm:$0xff]  ;;  %v9730_v63 = vld [vmem:[#allocation34_spill] sm:$0xff] }
 0x200   : > { %v9725_v18 = vrot.slane %v9724_v17, 5  ;;  %v9727_v58 = vrot.slane %v9726_v33, 5  ;;  %v3240_v44 = vmul.f32 %v7005_v22, %v9729_v43  ;;  %v981_v11 = vmul.f32 %v6318_v7, %v9730_v63  ;;  %v9732_v17 = vld [vmem:[#allocation38_spill] sm:$0xff]  ;;  %v9735_v43 = vld [vmem:[#allocation35_spill] sm:$0xff]  ;;  %v9736_v7 = vld [vmem:[#allocation153_spill] sm:$0xff] }
 0x201   : > { %v7201_v27 = vsel %vm2763_vm4, %v9722_v30, %v2843_v55  ;;  %v3087_v55 = vrot.slane %v3056_v20, 5  ;;  %v9728_v30 = vld [vmem:[#allocation104_spill] sm:$0xff]  ;;  %v955_v47 = vadd.f32 %v947_v6, %v938_v19  ;;  %v2187_v40 = vadd.f32 %v7104_v50, %v2126_v4  ;;  %v9733_v20 = vld [vmem:[#allocation101_spill] sm:$0xff] }
 0x202   : > { %v7211_v15 = vsel %vm2763_vm4, %v9725_v18, %v2904_v2  ;;  %v7216_v3 = vsel %vm2763_vm4, %v9727_v58, %v2965_v51  ;;  %v3178_v12 = vmul.f32 %v6991_v36, %v9728_v30  ;;  %v3148_v2 = vrot.slane %v3117_v9, 5  ;;  %v9731_v18 = vld [vmem:[#allocation36_spill] sm:$0xff]  ;;  %v9737_v9 = vld [vmem:[#allocation102_spill] sm:$0xff] }
 0x203   : > { %v1035_v33 = vmul.f32 %v9731_v18, %v7204_v56  ;;  %v1097_v51 = vmul.f32 %v6991_v36, %v9732_v17  ;;  %v9734_v58 = vrot.slane %v9733_v20, 5  ;;  %v3301_v6 = vmul.f32 %v9626_v32, %v6912_v37  ;;  %v9740_v32 = vld [vmem:[#allocation155_spill] sm:$0xff] }
 0x204   : > { %v972_v19 = vadd.f32 %v964_v28, %v955_v47  ;;  %v998_v30 = vmul.f32 %v9736_v7, %v9735_v43  ;;  %v2248_v50 = vadd.f32 %v7110_v31, %v2187_v40  ;;  %v9738_v4 = vrot.slane %v9737_v9, 5  ;;  %v9741_v7 = vld [vmem:[#allocation105_spill] sm:$0xff] }
 0x205   : > { %v7232_v24 = vsel %vm2763_vm4, %v9734_v58, %v3026_v25  ;;  %v1065_v17 = vrot.slane %v1035_v33, 1  ;;  %v1158_v20 = vmul.f32 %v7005_v22, %v5374_v60  ;;  %v3210_v25 = vrot.slane %v3178_v12, 6 }
 0x206   : > { %v7242_v18 = vsel %vm2763_vm4, %v9738_v4, %v3087_v55  ;;  %v3271_v58 = vrot.slane %v3240_v44, 6  ;;  %v989_v63 = vadd.f32 %v981_v11, %v972_v19  ;;  %v1015_v28 = vmul.f32 %v9740_v32, %v9739_v13  ;;  %v9743_v4 = vld [vmem:[#allocation118_spill] sm:$0xff] }
 0x207   : > { %v2309_v47 = vadd.f32 %v7124_v35, %v2248_v50  ;;  %v9742_v43 = vrot.slane %v9741_v7, 5  ;;  %v3332_v40 = vrot.slane %v3301_v6, 6  ;;  %v1126_v55 = vrot.slane %v1097_v51, 1  ;;  %v9746_v6 = vld [vmem:[#allocation106_spill] sm:$0xff] }
 0x208   : > { %v3362_v33 = vmul.f32 %v9628_v16, %v6935_v26  ;;  %v1006_v9 = vadd.f32 %v998_v30, %v989_v63  ;;  %v9744_v12 = vrot.slane %v9743_v4, 1  ;;  %v1187_v11 = vrot.slane %v1158_v20, 1  ;;  %v9748_v63 = vld [vmem:[#allocation111_spill] sm:$0xff] }
 0x209   : > { %v7252_v31 = vsel %vm2763_vm4, %v9742_v43, %v3148_v2  ;;  %v2371_v32 = vadd.f32 %v7129_v61, %v2309_v47  ;;  %v3423_v35 = vmul.f32 %v9630_v41, %v6938_v14  ;;  %v1219_v43 = vmul.f32 %v5435_v1, %v6912_v37  ;;  %v9745_v2 = vld [vmem:[#allocation42_spill] sm:$0xff]  ;;  %v9750_v61 = vld [vmem:[#allocation115_spill] sm:$0xff]  ;;  %v9756_v1 = vld [vmem:[#allocation120_spill] sm:$0xff] }
 0x20a   : > { %v1066_v44 = vsel %vm1051_vm0, %v9744_v12, %v1065_v17  ;;  %v1280_v51 = vmul.f32 %v9745_v2, %v6935_v26  ;;  %v9747_v19 = vrot.slane %v9746_v6, 6  ;;  %v9749_v50 = vrot.slane %v9748_v63, 6  ;;  %v9751_v4 = vld [vmem:[#allocation119_spill] sm:$0xff]  ;;  %v9753_v6 = vld [vmem:[#allocation45_spill] sm:$0xff] }
 0x20b   : > { %v3484_v20 = vmul.f32 %v9750_v61, %v6949_v38  ;;  %v1023_v47 = vadd.f32 %v1015_v28, %v1006_v9  ;;  %v2432_v7 = vadd.f32 %v7139_v48, %v2371_v32  ;;  %v9752_v12 = vrot.slane %v9751_v4, 1 }
 0x20c   : > { %v7269_v30 = vsel %vm3191_vm5, %v9747_v19, %v3210_v25  ;;  %v7274_v17 = vsel %vm3191_vm5, %v9749_v50, %v3271_v58  ;;  %v1248_v2 = vrot.slane %v1219_v43, 1  ;;  %v1341_v25 = vmul.f32 %v9753_v6, %v6938_v14  ;;  %v9754_v19 = vld [vmem:[#allocation112_spill] sm:$0xff]  ;;  %v9758_v43 = vld [vmem:[#allocation202_spill] sm:$0xff]  ;;  %v9759_v6 = vld [vmem:[#allocation121_spill] sm:$0xff] }
 0x20d   : > { %v1127_v41 = vsel %vm1051_vm0, %v9752_v12, %v1126_v55  ;;  %v9755_v16 = vrot.slane %v9754_v19, 6  ;;  %v3393_v58 = vrot.slane %v3362_v33, 6  ;;  %v1085_v50 = vadd.f32 %v1066_v44, %v1023_v47 }
 0x20e   : > { %v9757_v61 = vrot.slane %v9756_v1, 1  ;;  %v2493_v48 = vadd.f32 %v7144_v39, %v2432_v7  ;;  %v3454_v9 = vrot.slane %v3423_v35, 6  ;;  %v3515_v32 = vrot.slane %v3484_v20, 6 }
 0x20f   : > { %v7287_v63 = vsel %vm3191_vm5, %v9755_v16, %v3332_v40  ;;  %v1309_v55 = vrot.slane %v1280_v51, 1  ;;  %v3545_v4 = vmul.f32 %v9758_v43, %v6952_v45  ;;  %v1146_v12 = vadd.f32 %v1127_v41, %v1085_v50  ;;  %v9761_v40 = vld [vmem:[#allocation47_spill] sm:$0xff]  ;;  %v9763_v51 = vld [vmem:[#allocation113_spill] sm:$0xff] }
 0x210   : > { %v1188_v28 = vsel %vm1051_vm0, %v9757_v61, %v1187_v11  ;;  %v9760_v19 = vrot.slane %v9759_v6, 1  ;;  %v1402_v33 = vmul.f32 %v9761_v40, %v6949_v38  ;;  %v2554_v1 = vadd.f32 %v7152_v59, %v2493_v48  ;;  %v9762_v11 = vld [vmem:[#allocation48_spill] sm:$0xff]  ;;  %v9765_v59 = vld [vmem:[#allocation114_spill] sm:$0xff] }
 0x211   : > { %v1370_v44 = vrot.slane %v1341_v25, 1  ;;  %v1463_v39 = vmul.f32 %v9762_v11, %v7204_v56  ;;  %v1525_v35 = vmul.f32 %v6991_v36, %v5494_v8  ;;  %v9764_v61 = vrot.slane %v9763_v51, 6  ;;  %v9767_v25 = vld [vmem:[#allocation122_spill] sm:$0xff] }
 0x212   : > { %v1249_v16 = vsel %vm1051_vm0, %v9760_v19, %v1248_v2  ;;  %v1207_v41 = vadd.f32 %v1188_v28, %v1146_v12  ;;  %v1431_v20 = vrot.slane %v1402_v33, 1  ;;  %v1586_v2 = vmul.f32 %v7005_v22, %v9549_v46  ;;  %v9769_v19 = vld [vmem:[#allocation116_spill] sm:$0xff] }
 0x213   : > { %v7308_v45 = vsel %vm3191_vm5, %v9764_v61, %v3393_v58  ;;  %v2615_v47 = vadd.f32 %v7174_v21, %v2554_v1  ;;  %v9766_v7 = vrot.slane %v9765_v59, 6  ;;  %v9768_v50 = vrot.slane %v9767_v25, 1  ;;  %v9771_v1 = vld [vmem:[#allocation123_spill] sm:$0xff] }
 0x214   : > { %v1647_v58 = vmul.f32 %v9551_v53, %v6912_v37  ;;  %v9770_v28 = vrot.slane %v9769_v19, 6  ;;  %v3576_v33 = vrot.slane %v3545_v4, 6  ;;  %v1268_v51 = vadd.f32 %v1249_v16, %v1207_v41 }
 0x215   : > { %v7316_v6 = vsel %vm3191_vm5, %v9766_v7, %v3454_v9  ;;  %v1310_v48 = vsel %vm1051_vm0, %v9768_v50, %v1309_v55  ;;  %v1708_v21 = vmul.f32 %v9553_v52, %v6935_v26  ;;  %v2676_v9 = vadd.f32 %v7179_v23, %v2615_v47  ;;  %v9773_v50 = vld [vmem:[#allocation124_spill] sm:$0xff] }
 0x216   : > { %v7326_v12 = vsel %vm3191_vm5, %v9770_v28, %v3515_v32  ;;  %v9772_v61 = vrot.slane %v9771_v1, 1  ;;  %v1493_v55 = vrot.slane %v1463_v39, 2  ;;  %v1554_v7 = vrot.slane %v1525_v35, 2  ;;  %v9775_v39 = vld [vmem:[#allocation117_spill] sm:$0xff] }
 0x217   : > { %v1329_v25 = vadd.f32 %v1310_v48, %v1268_v51  ;;  %v9774_v53 = vrot.slane %v9773_v50, 1  ;;  %v1615_v32 = vrot.slane %v1586_v2, 2  ;;  %v1769_v4 = vmul.f32 %v9556_v54, %v6938_v14  ;;  %v9779_v51 = vld [vmem:[#allocation127_spill] sm:$0xff]  ;;  %v9781_v50 = vld [vmem:[#allocation128_spill] sm:$0xff] }
 0x218   : > { %v1371_v59 = vsel %vm1051_vm0, %v9772_v61, %v1370_v44  ;;  %v2737_v16 = vadd.f32 %v7184_v5, %v2676_v9  ;;  %v1676_v41 = vrot.slane %v1647_v58, 2  ;;  %v1830_v23 = vmul.f32 %v9558_v10, %v6949_v38  ;;  %v9777_v5 = vld [vmem:[#allocation125_spill] sm:$0xff] }
 0x219   : > { %v1432_v19 = vsel %vm1051_vm0, %v9774_v53, %v1431_v20  ;;  %v1891_v44 = vmul.f32 %v9561_v34, %v7204_v56  ;;  %v9776_v35 = vrot.slane %v9775_v39, 6  ;;  %v1390_v48 = vadd.f32 %v1371_v59, %v1329_v25  ;;  %v9783_v39 = vld [vmem:[#allocation129_spill] sm:$0xff] }
 0x21a   : > { %v1737_v53 = vrot.slane %v1708_v21, 2  ;;  %v1953_v20 = vmul.f32 %v6991_v36, %v9563_v0  ;;  %v2799_v2 = vadd.f32 %v7192_v42, %v2737_v16  ;;  %v9778_v58 = vrot.slane %v9777_v5, 2 }
 0x21b   : > { %v7347_v47 = vsel %vm3191_vm5, %v9776_v35, %v3576_v33  ;;  %v9780_v9 = vrot.slane %v9779_v51, 2  ;;  %v2014_v61 = vmul.f32 %v7005_v22, %v9565_v62  ;;  %v1451_v33 = vadd.f32 %v1432_v19, %v1390_v48  ;;  %v9785_v51 = vld [vmem:[#allocation131_spill] sm:$0xff] }
 0x21c   : > { %v1494_v28 = vsel %vm1479_vm1, %v9778_v58, %v1493_v55  ;;  %v9782_v59 = vrot.slane %v9781_v50, 2  ;;  %v1798_v25 = vrot.slane %v1769_v4, 2  ;;  %v2075_v42 = vmul.f32 %v9569_v49, %v6912_v37 }
 0x21d   : > { %v1555_v1 = vsel %vm1479_vm1, %v9780_v9, %v1554_v7  ;;  %v2860_v16 = vadd.f32 %v7201_v27, %v2799_v2  ;;  %v9784_v55 = vrot.slane %v9783_v39, 2  ;;  %v1859_v5 = vrot.slane %v1830_v23, 2 }
 0x21e   : > { %v1616_v21 = vsel %vm1479_vm1, %v9782_v59, %v1615_v32  ;;  %v1921_v7 = vrot.slane %v1891_v44, 3  ;;  %v1513_v58 = vadd.f32 %v1494_v28, %v1451_v33  ;;  %v9786_v9 = vrot.slane %v9785_v51, 2  ;;  %v9787_v32 = vld [vmem:[#allocation71_spill] sm:$0xff]  ;;  %v9790_v28 = vld [vmem:[#allocation73_spill] sm:$0xff] }
 0x21f   : > { %v1677_v35 = vsel %vm1479_vm1, %v9784_v55, %v1676_v41  ;;  %v1982_v48 = vrot.slane %v1953_v20, 3  ;;  %v2136_v4 = vmul.f32 %v9787_v32, %v6935_v26  ;;  %v2921_v50 = vadd.f32 %v7211_v15, %v2860_v16  ;;  %v9788_v41 = vld [vmem:[#allocation132_spill] sm:$0xff]  ;;  %v9792_v55 = vld [vmem:[#allocation133_spill] sm:$0xff] }
 0x220   : > { %v1738_v19 = vsel %vm1479_vm1, %v9786_v9, %v1737_v53  ;;  %v2043_v59 = vrot.slane %v2014_v61, 3  ;;  %v2104_v49 = vrot.slane %v2075_v42, 3  ;;  %v2197_v27 = vmul.f32 %v9577_v57, %v6938_v14  ;;  %v9791_v53 = vld [vmem:[#allocation76_spill] sm:$0xff]  ;;  %v9794_v42 = vld [vmem:[#allocation134_spill] sm:$0xff]  ;;  %v9797_v9 = vld [vmem:[#allocation135_spill] sm:$0xff] }
 0x221   : > { %v1574_v2 = vadd.f32 %v1555_v1, %v1513_v58  ;;  %v9789_v23 = vrot.slane %v9788_v41, 2  ;;  %v2258_v33 = vmul.f32 %v9790_v28, %v6949_v38  ;;  %v2319_v20 = vmul.f32 %v9791_v53, %v7204_v56  ;;  %v9796_v58 = vld [vmem:[#allocation78_spill] sm:$0xff]  ;;  %v9799_v53 = vld [vmem:[#allocation80_spill] sm:$0xff] }
 0x222   : > { %v2982_v39 = vadd.f32 %v7216_v3, %v2921_v50  ;;  %v9793_v15 = vrot.slane %v9792_v55, 2  ;;  %v9795_v16 = vrot.slane %v9794_v42, 3  ;;  %v2381_v51 = vmul.f32 %v6991_v36, %v9796_v58  ;;  %v9800_v55 = vld [vmem:[#allocation136_spill] sm:$0xff]  ;;  %v9802_v42 = vld [vmem:[#allocation137_spill] sm:$0xff] }
 0x223   : > { %v1799_v44 = vsel %vm1479_vm1, %v9789_v23, %v1798_v25  ;;  %v1635_v25 = vadd.f32 %v1616_v21, %v1574_v2  ;;  %v9798_v41 = vrot.slane %v9797_v9, 3  ;;  %v2165_v28 = vrot.slane %v2136_v4, 3 }
 0x224   : > { %v1860_v61 = vsel %vm1479_vm1, %v9793_v15, %v1859_v5  ;;  %v1922_v1 = vsel %vm1907_vm2, %v9795_v16, %v1921_v7  ;;  %v2442_v3 = vmul.f32 %v7005_v22, %v9799_v53  ;;  %v3043_v50 = vadd.f32 %v7232_v24, %v2982_v39 }
 0x225   : > { %v1983_v23 = vsel %vm1907_vm2, %v9798_v41, %v1982_v48  ;;  %v9801_v5 = vrot.slane %v9800_v55, 3  ;;  %v9803_v7 = vrot.slane %v9802_v42, 3  ;;  %v2226_v21 = vrot.slane %v2197_v27, 3  ;;  %v9804_v48 = vld [vmem:[#allocation82_spill] sm:$0xff] }
 0x226   : > { %v1696_v2 = vadd.f32 %v1677_v35, %v1635_v25  ;;  %v2287_v9 = vrot.slane %v2258_v33, 3  ;;  %v2349_v58 = vrot.slane %v2319_v20, 4  ;;  %v2503_v4 = vmul.f32 %v9804_v48, %v6912_v37  ;;  %v9808_v25 = vld [vmem:[#allocation139_spill] sm:$0xff] }
 0x227   : > { %v2044_v15 = vsel %vm1907_vm2, %v9801_v5, %v2043_v59  ;;  %v7405_v16 = vsel %vm1907_vm2, %v9803_v7, %v2104_v49  ;;  %v3104_v41 = vadd.f32 %v7242_v18, %v3043_v50  ;;  %v2410_v53 = vrot.slane %v2381_v51, 4  ;;  %v9805_v59 = vld [vmem:[#allocation87_spill] sm:$0xff]  ;;  %v9806_v5 = vld [vmem:[#allocation138_spill] sm:$0xff]  ;;  %v9810_v51 = vld [vmem:[#allocation88_spill] sm:$0xff] }
 0x228   : > { %v2564_v24 = vmul.f32 %v9687_v29, %v6935_v26  ;;  %v2625_v39 = vmul.f32 %v9805_v59, %v6938_v14  ;;  %v1757_v55 = vadd.f32 %v1738_v19, %v1696_v2  ;;  %v9807_v49 = vrot.slane %v9806_v5, 3  ;;  %v9811_v7 = vld [vmem:[#allocation89_spill] sm:$0xff]  ;;  %v9812_v2 = vld [vmem:[#allocation140_spill] sm:$0xff] }
 0x229   : > { %v2471_v35 = vrot.slane %v2442_v3, 4  ;;  %v2532_v33 = vrot.slane %v2503_v4, 4  ;;  %v3165_v20 = vadd.f32 %v7252_v31, %v3104_v41  ;;  %v9809_v42 = vrot.slane %v9808_v25, 3  ;;  %v9814_v4 = vld [vmem:[#allocation92_spill] sm:$0xff]  ;;  %v9815_v41 = vld [vmem:[#allocation141_spill] sm:$0xff] }
 0x22a   : > { %v2166_v27 = vsel %vm1907_vm2, %v9807_v49, %v2165_v28  ;;  %v2686_v50 = vmul.f32 %v9810_v51, %v6949_v38  ;;  %v2747_v59 = vmul.f32 %v9811_v7, %v7204_v56  ;;  %v1818_v19 = vadd.f32 %v1799_v44, %v1757_v55 }
 0x22b   : > { %v7421_v18 = vsel %vm1907_vm2, %v9809_v42, %v2226_v21  ;;  %v9813_v5 = vrot.slane %v9812_v2, 3  ;;  %v2593_v3 = vrot.slane %v2564_v24, 4  ;;  %v2809_v31 = vmul.f32 %v6991_v36, %v9814_v4  ;;  %v9817_v42 = vld [vmem:[#allocation142_spill] sm:$0xff]  ;;  %v9819_v2 = vld [vmem:[#allocation143_spill] sm:$0xff]  ;;  %v9821_v4 = vld [vmem:[#allocation144_spill] sm:$0xff] }
 0x22c   : > { %v3227_v21 = vadd.f32 %v7269_v30, %v3165_v20  ;;  %v9816_v49 = vrot.slane %v9815_v41, 4  ;;  %v9818_v7 = vrot.slane %v9817_v42, 4  ;;  %v2654_v55 = vrot.slane %v2625_v39, 4  ;;  %v9823_v20 = vld [vmem:[#allocation94_spill] sm:$0xff] }
 0x22d   : > { %v7430_v28 = vsel %vm1907_vm2, %v9813_v5, %v2287_v9  ;;  %v1879_v9 = vadd.f32 %v1860_v61, %v1818_v19  ;;  %v9820_v24 = vrot.slane %v9819_v2, 4  ;;  %v9822_v51 = vrot.slane %v9821_v4, 4  ;;  %v9824_v19 = vld [vmem:[#allocation145_spill] sm:$0xff]  ;;  %v9826_v4 = vld [vmem:[#allocation96_spill] sm:$0xff]  ;;  %v9828_v42 = vld [vmem:[#allocation34_spill] sm:$0xff] }
 0x22e   : > { %v7438_v25 = vsel %vm2335_vm3, %v9816_v49, %v2349_v58  ;;  %v7443_v44 = vsel %vm2335_vm3, %v9818_v7, %v2410_v53  ;;  %v2870_v58 = vmul.f32 %v7005_v22, %v9823_v20  ;;  %v3288_v41 = vadd.f32 %v7274_v17, %v3227_v21 }
 0x22f   : > { %v7448_v5 = vsel %vm2335_vm3, %v9820_v24, %v2471_v35  ;;  %v7453_v30 = vsel %vm2335_vm3, %v9822_v51, %v2532_v33  ;;  %v2715_v53 = vrot.slane %v2686_v50, 4  ;;  %v2777_v39 = vrot.slane %v2747_v59, 5  ;;  %v7466_v51 = vld [vmem:[%s5327_s19 + $0x68] sm:$0xff]  ;;  %v9829_v50 = vld [vmem:[#allocation146_spill] sm:$0xff]  ;;  %v9832_v24 = vld [vmem:[#allocation100_spill] sm:$0xff] }
 0x230   : > { %v2838_v61 = vrot.slane %v2809_v31, 5  ;;  %v1941_v7 = vadd.f32 %v1922_v1, %v1879_v9  ;;  %v9825_v49 = vrot.slane %v9824_v19, 4  ;;  %v2931_v33 = vmul.f32 %v9826_v4, %v6912_v37  ;;  %9827 = vst [vmem:[#allocation44_spill] sm:$0xff] %v7466_v51  ;;  %v9833_v4 = vld [vmem:[#allocation171_spill] sm:$0xff] }
 0x231   : > { %v977_v2 = vmul.f32 %v7466_v51, %v9828_v42  ;;  %v3349_v17 = vadd.f32 %v7287_v63, %v3288_v41  ;;  %v9830_v59 = vrot.slane %v9829_v50, 4  ;;  %v2899_v31 = vrot.slane %v2870_v58, 5  ;;  %v7485_v42 = vld [vmem:[%s5327_s19 + $0x80] sm:$0xff]  ;;  %v9835_v63 = vld [vmem:[#allocation35_spill] sm:$0xff] }
 0x232   : > { %v7461_v35 = vsel %vm2335_vm3, %v9825_v49, %v2593_v3  ;;  %v9831_v3 = vld [vmem:[#allocation99_spill] sm:$0xff]  ;;  %v2002_v9 = vadd.f32 %v1983_v23, %v1941_v7  ;;  %v3053_v19 = vmul.f32 %v9832_v24, %v6938_v14  ;;  %v7481_v49 = vld [vmem:[%s5327_s19 + $0x10] sm:$0x3f]  ;;  %9834 = vst [vmem:[#allocation46_spill] sm:$0xff] %v7485_v42  ;;  %v994_v41 = vmul.f32 %v7485_v42, %v9835_v63 }
 0x233   : > { %v7474_v1 = vsel %vm2335_vm3, %v9830_v59, %v2654_v55  ;;  %v2992_v21 = vmul.f32 %v9831_v3, %v6935_v26  ;;  %v985_v51 = vadd.f32 %v977_v2, %v9833_v4  ;;  %v3410_v55 = vadd.f32 %v7308_v45, %v3349_v17  ;;  %v9836_v58 = vld [vmem:[#allocation147_spill] sm:$0xff]  ;;  %v9838_v23 = vld [vmem:[#allocation148_spill] sm:$0xff]  ;;  %v9840_v3 = vld [vmem:[#allocation149_spill] sm:$0xff] }
 0x234   : > { %v9837_v50 = vrot.slane %v9836_v58, 4  ;;  %v9839_v7 = vrot.slane %v9838_v23, 5  ;;  %v9841_v20 = vrot.slane %v9840_v3, 5  ;;  %v7506_v2 = vld [vmem:[%s5327_s19 + $0x28] sm:$0x3f]  ;;  %v2063_v42 = vadd.f32 %v2044_v15, %v2002_v9  ;;  %v7509_v17 = vld [vmem:[%s5327_s19 + $0x98] sm:$0xff] }
 0x235   : > { %9842 = vst [vmem:[#allocation50_spill] sm:$0xff] %v7506_v2  ;;  %v2960_v63 = vrot.slane %v2931_v33, 5  ;;  %v1002_v45 = vadd.f32 %v994_v41, %v985_v51  ;;  %v3471_v58 = vadd.f32 %v7316_v6, %v3410_v55  ;;  %v3021_v3 = vrot.slane %v2992_v21, 5  ;;  %v9847_v51 = vld [vmem:[#allocation103_spill] sm:$0xff]  ;;  %v9848_v41 = vld [vmem:[#allocation38_spill] sm:$0xff]  ;;  %v9849_v55 = vld [vmem:[#allocation104_spill] sm:$0xff] }
 0x236   : > { %v7493_v59 = vsel %vm2335_vm3, %v9837_v50, %v2715_v53  ;;  %v7498_v24 = vsel %vm2763_vm4, %v9839_v7, %v2777_v39  ;;  %v7503_v4 = vsel %vm2763_vm4, %v9841_v20, %v2838_v61  ;;  %9843 = vst [vmem:[#allocation51_spill] sm:$0xff] %v7509_v17  ;;  %v1011_v53 = vmul.f32 %v7509_v17, %v9739_v13  ;;  %v9844_v50 = vld [vmem:[#allocation150_spill] sm:$0xff]  ;;  %v9846_v20 = vld [vmem:[#allocation36_spill] sm:$0xff] }
 0x237   : > { %v9845_v39 = vrot.slane %v9844_v50, 5  ;;  %v1029_v61 = vmul.f32 %v9846_v20, %v7481_v49  ;;  %v2124_v15 = vadd.f32 %v7405_v16, %v2063_v42  ;;  %v3082_v33 = vrot.slane %v3053_v19, 5  ;;  %v9851_v19 = vld [vmem:[#allocation151_spill] sm:$0xff] }
 0x238   : > { %v3114_v9 = vmul.f32 %v9847_v51, %v6949_v38  ;;  %v1091_v7 = vmul.f32 %v9848_v41, %v7506_v2  ;;  %v3532_v6 = vadd.f32 %v7326_v12, %v3471_v58  ;;  %v3175_v50 = vmul.f32 %v9849_v55, %v7204_v56  ;;  %v9853_v12 = vld [vmem:[#allocation152_spill] sm:$0xff] }
 0x239   : > { %v7517_v23 = vsel %vm2763_vm4, %v9845_v39, %v2899_v31  ;;  %v9850_v31 = vld [vmem:[#allocation107_spill] sm:$0xff]  ;;  %v1055_v39 = vrot.slane %v1029_v61, 1  ;;  %v2185_v17 = vadd.f32 %v2166_v27, %v2124_v15  ;;  %v1019_v20 = vadd.f32 %v1011_v53, %v1002_v45  ;;  %v9856_v61 = vld [vmem:[#allocation164_spill] sm:$0xff] }
 0x23a   : > { %v3237_v21 = vmul.f32 %v6991_v36, %v9850_v31  ;;  %v1116_v13 = vrot.slane %v1091_v7, 1  ;;  %v1152_v16 = vmul.f32 %v5374_v60, %v7204_v56  ;;  %v3593_v42 = vadd.f32 %v7347_v47, %v3532_v6  ;;  %v9855_v31 = vld [vmem:[#allocation108_spill] sm:$0xff] }
 0x23b   : > { %v9852_v51 = vrot.slane %v9851_v19, 5  ;;  %v9854_v58 = vrot.slane %v9853_v12, 5  ;;  %v3298_v27 = vmul.f32 %v7005_v22, %v9855_v31  ;;  %v2246_v45 = vadd.f32 %v7421_v18, %v2185_v17  ;;  %v9858_v6 = vld [vmem:[#allocation40_spill] sm:$0xff]  ;;  %v9860_v12 = vld [vmem:[#allocation165_spill] sm:$0xff]  ;;  %v9862_v31 = vld [vmem:[#allocation154_spill] sm:$0xff] }
 0x23c   : > { %v3143_v53 = vrot.slane %v3114_v9, 5  ;;  %v9857_v15 = vrot.slane %v9856_v61, 1  ;;  %v1177_v7 = vrot.slane %v1152_v16, 1  ;;  %v7551_v19 = vadd.f32 %v9858_v6, %v3593_v42  ;;  %v9864_v9 = vld [vmem:[#allocation41_spill] sm:$0xff]  ;;  %v9866_v42 = vld [vmem:[#allocation166_spill] sm:$0xff] }
 0x23d   : > { %v7537_v41 = vsel %vm2763_vm4, %v9852_v51, %v2960_v63  ;;  %v7542_v55 = vsel %vm2763_vm4, %v9854_v58, %v3021_v3  ;;  %v3205_v63 = vrot.slane %v3175_v50, 6  ;;  %v3266_v51 = vrot.slane %v3237_v21, 6  ;;  %v9865_v50 = vld [vmem:[#allocation109_spill] sm:$0xff] }
 0x23e   : > { %v1056_v47 = vsel %vm1051_vm0, %v9857_v15, %v1055_v39  ;;  %9859 = vst [vmem:[#allocation53_spill] sm:$0xff] %v7551_v19  ;;  %v9861_v60 = vrot.slane %v9860_v12, 1  ;;  %v2307_v58 = vadd.f32 %v7430_v28, %v2246_v45  ;;  %v9863_v29 = vrot.slane %v9862_v31, 5  ;;  %3620 = vadd.xlane.f32.xlu2 %v7551_v19  ;;  %v9869_v31 = vld [vmem:[#allocation45_spill] sm:$0xff]  ;;  %v9870_v15 = vld [vmem:[#allocation156_spill] sm:$0xff] }
 0x23f   : > { %v1081_v17 = vadd.f32 %v1056_v47, %v1019_v20  ;;  %v1213_v39 = vmul.f32 %v6991_v36, %v9864_v9  ;;  %v3327_v16 = vrot.slane %v3298_v27, 6  ;;  %v3359_v21 = vmul.f32 %v9865_v50, %v6912_v37  ;;  %v9872_v12 = vld [vmem:[#allocation157_spill] sm:$0xff] }
 0x240   : > { %v1117_v3 = vsel %vm1051_vm0, %v9861_v60, %v1116_v13  ;;  %v7560_v18 = vsel %vm2763_vm4, %v9863_v29, %v3082_v33  ;;  %v9867_v61 = vrot.slane %v9866_v42, 1  ;;  %v9868_v13 = vld [vmem:[#allocation42_spill] sm:$0xff]  ;;  %v2369_v29 = vadd.f32 %v7438_v25, %v2307_v58 }
 0x241   : > { %v1274_v28 = vmul.f32 %v7005_v22, %v9868_v13  ;;  %v1142_v33 = vadd.f32 %v1117_v3, %v1081_v17  ;;  %v1238_v20 = vrot.slane %v1213_v39, 1  ;;  %v1335_v45 = vmul.f32 %v9869_v31, %v6912_v37  ;;  %v9876_v17 = vld [vmem:[#allocation167_spill] sm:$0xff] }
 0x242   : > { %v1178_v60 = vsel %vm1051_vm0, %v9867_v61, %v1177_v7  ;;  %v9871_v47 = vrot.slane %v9870_v15, 5  ;;  %v9873_v19 = vrot.slane %v9872_v12, 6  ;;  %v9874_v7 = vld [vmem:[#allocation158_spill] sm:$0xff]  ;;  %v2430_v3 = vadd.f32 %v7443_v44, %v2369_v29 }
 0x243   : > { %v9875_v61 = vrot.slane %v9874_v7, 6  ;;  %v1299_v25 = vrot.slane %v1274_v28, 1  ;;  %v1203_v58 = vadd.f32 %v1178_v60, %v1142_v33  ;;  %v9877_v39 = vrot.slane %v9876_v17, 1  ;;  %v9883_v60 = vld [vmem:[#allocation115_spill] sm:$0xff] }
 0x244   : > { %v7578_v27 = vsel %vm2763_vm4, %v9871_v47, %v3143_v53  ;;  %v7583_v42 = vsel %vm3191_vm5, %v9873_v19, %v3205_v63  ;;  %v1360_v53 = vrot.slane %v1335_v45, 1  ;;  %v9878_v47 = vld [vmem:[#allocation159_spill] sm:$0xff]  ;;  %v3388_v19 = vrot.slane %v3359_v21, 6  ;;  %v9880_v63 = vld [vmem:[#allocation110_spill] sm:$0xff]  ;;  %v9884_v21 = vld [vmem:[#allocation169_spill] sm:$0xff] }
 0x245   : > { %v7588_v13 = vsel %vm3191_vm5, %v9875_v61, %v3266_v51  ;;  %v1239_v15 = vsel %vm1051_vm0, %v9877_v39, %v1238_v20  ;;  %v9879_v31 = vrot.slane %v9878_v47, 6  ;;  %v3420_v7 = vmul.f32 %v9880_v63, %v6935_v26  ;;  %v9881_v51 = vld [vmem:[#allocation168_spill] sm:$0xff]  ;;  %v9888_v47 = vld [vmem:[#allocation55_spill] sm:$0xff] }
 0x246   : > { %v9882_v61 = vrot.slane %v9881_v51, 1  ;;  %v2491_v44 = vadd.f32 %v7448_v5, %v2430_v3  ;;  %v3481_v29 = vmul.f32 %v9883_v60, %v6938_v14  ;;  %v1264_v33 = vadd.f32 %v1239_v15, %v1203_v58  ;;  %v9886_v39 = vld [vmem:[#allocation160_spill] sm:$0xff] }
 0x247   : > { %v7597_v12 = vsel %vm3191_vm5, %v9879_v31, %v3327_v16  ;;  %v1396_v20 = vmul.f32 %v9761_v40, %v6935_v26  ;;  %v3542_v16 = vmul.f32 %v9758_v43, %v6949_v38  ;;  %v9885_v31 = vrot.slane %v9884_v21, 1 }
 0x248   : > { %v1300_v28 = vsel %vm1051_vm0, %v9882_v61, %v1299_v25  ;;  %v1457_v17 = vmul.f32 %v9762_v11, %v7481_v49  ;;  %v1519_v5 = vmul.f32 %v5494_v8, %v7506_v2  ;;  %v2552_v25 = vadd.f32 %v7453_v30, %v2491_v44  ;;  %v9889_v30 = vld [vmem:[#allocation170_spill] sm:$0xff] }
 0x249   : > { %v1361_v45 = vsel %vm1051_vm0, %v9885_v31, %v1360_v53  ;;  %v1325_v14 = vadd.f32 %v1300_v28, %v1264_v33  ;;  %v1421_v3 = vrot.slane %v1396_v20, 1  ;;  %v1580_v58 = vmul.f32 %v9549_v46, %v7204_v56  ;;  %v9891_v20 = vld [vmem:[#allocation172_spill] sm:$0xff] }
 0x24a   : > { %v9887_v15 = vrot.slane %v9886_v39, 6  ;;  %v1483_v43 = vrot.slane %v1457_v17, 2  ;;  %v1544_v53 = vrot.slane %v1519_v5, 2  ;;  %v1641_v51 = vmul.f32 %v6991_v36, %v9888_v47 }
 0x24b   : > { %v2613_v61 = vadd.f32 %v7461_v35, %v2552_v25  ;;  %v3449_v21 = vrot.slane %v3420_v7, 6  ;;  %v1386_v31 = vadd.f32 %v1361_v45, %v1325_v14  ;;  %v9890_v28 = vrot.slane %v9889_v30, 1  ;;  %v9893_v7 = vld [vmem:[#allocation173_spill] sm:$0xff]  ;;  %v9899_v30 = vld [vmem:[#allocation174_spill] sm:$0xff] }
 0x24c   : > { %v7624_v38 = vsel %vm3191_vm5, %v9887_v15, %v3388_v19  ;;  %v3510_v33 = vrot.slane %v3481_v29, 6  ;;  %v9892_v46 = vrot.slane %v9891_v20, 2  ;;  %v1605_v19 = vrot.slane %v1580_v58, 2  ;;  %v9895_v58 = vld [vmem:[#allocation161_spill] sm:$0xff] }
 0x24d   : > { %v1422_v44 = vsel %vm1051_vm0, %v9890_v28, %v1421_v3  ;;  %v1702_v17 = vmul.f32 %v7005_v22, %v9553_v52  ;;  %v2674_v5 = vadd.f32 %v7474_v1, %v2613_v61  ;;  %v3571_v15 = vrot.slane %v3542_v16, 6 }
 0x24e   : > { %v1484_v39 = vsel %vm1479_vm1, %v9892_v46, %v1483_v43  ;;  %v1447_v47 = vadd.f32 %v1422_v44, %v1386_v31  ;;  %v1763_v35 = vmul.f32 %v9556_v54, %v6912_v37  ;;  %v9894_v45 = vrot.slane %v9893_v7, 2  ;;  %v9897_v31 = vld [vmem:[#allocation162_spill] sm:$0xff] }
 0x24f   : > { %v1666_v29 = vrot.slane %v1641_v51, 2  ;;  %v1824_v14 = vmul.f32 %v9558_v10, %v6935_v26  ;;  %v1885_v46 = vmul.f32 %v9561_v34, %v7481_v49  ;;  %v2735_v3 = vadd.f32 %v7493_v59, %v2674_v5  ;;  %v9901_v5 = vld [vmem:[#allocation163_spill] sm:$0xff] }
 0x250   : > { %v1545_v25 = vsel %vm1479_vm1, %v9894_v45, %v1544_v53  ;;  %v9896_v1 = vrot.slane %v9895_v58, 6  ;;  %v1509_v43 = vadd.f32 %v1484_v39, %v1447_v47  ;;  %v1947_v61 = vmul.f32 %v9563_v0, %v7506_v2  ;;  %v9903_v58 = vld [vmem:[#allocation175_spill] sm:$0xff] }
 0x251   : > { %v9898_v53 = vrot.slane %v9897_v31, 6  ;;  %v9900_v28 = vrot.slane %v9899_v30, 2  ;;  %v1727_v20 = vrot.slane %v1702_v17, 2  ;;  %v2008_v59 = vmul.f32 %v9565_v62, %v7204_v56 }
 0x252   : > { %v7651_v16 = vsel %vm3191_vm5, %v9896_v1, %v3449_v21  ;;  %v2797_v21 = vadd.f32 %v7498_v24, %v2735_v3  ;;  %v9902_v47 = vrot.slane %v9901_v5, 6  ;;  %v1570_v7 = vadd.f32 %v1545_v25, %v1509_v43 }
 0x253   : > { %v7658_v51 = vsel %vm3191_vm5, %v9898_v53, %v3510_v33  ;;  %v1606_v44 = vsel %vm1479_vm1, %v9900_v28, %v1605_v19  ;;  %v1788_v45 = vrot.slane %v1763_v35, 2  ;;  %v9904_v33 = vrot.slane %v9903_v58, 2  ;;  %v9905_v19 = vld [vmem:[#allocation68_spill] sm:$0xff]  ;;  %v9912_v58 = vld [vmem:[#allocation177_spill] sm:$0xff] }
 0x254   : > { %v7669_v39 = vsel %vm3191_vm5, %v9902_v47, %v3571_v15  ;;  %v1849_v31 = vrot.slane %v1824_v14, 2  ;;  %v1911_v53 = vrot.slane %v1885_v46, 3  ;;  %v2069_v17 = vmul.f32 %v6991_v36, %v9905_v19  ;;  %v9906_v15 = vld [vmem:[#allocation57_spill] sm:$0xff] }
 0x255   : > { %v1667_v1 = vsel %vm1479_vm1, %v9904_v33, %v1666_v29  ;;  %v2858_v30 = vadd.f32 %v7503_v4, %v2797_v21  ;;  %v1631_v28 = vadd.f32 %v1606_v44, %v1570_v7  ;;  %v1972_v24 = vrot.slane %v1947_v61, 3  ;;  %v9908_v14 = vld [vmem:[#allocation73_spill] sm:$0xff]  ;;  %v9909_v4 = vld [vmem:[#allocation176_spill] sm:$0xff] }
 0x256   : > { %v2130_v3 = vmul.f32 %v7005_v22, %v9787_v32  ;;  %v9907_v5 = vrot.slane %v9906_v15, 2  ;;  %v2033_v25 = vrot.slane %v2008_v59, 3  ;;  %v2191_v29 = vmul.f32 %v9577_v57, %v6912_v37  ;;  %v9911_v21 = vld [vmem:[#allocation76_spill] sm:$0xff]  ;;  %v9914_v59 = vld [vmem:[#allocation63_spill] sm:$0xff] }
 0x257   : > { %v2252_v46 = vmul.f32 %v9908_v14, %v6935_v26  ;;  %v2919_v43 = vadd.f32 %v7517_v23, %v2858_v30  ;;  %v1692_v47 = vadd.f32 %v1667_v1, %v1631_v28  ;;  %v9910_v44 = vrot.slane %v9909_v4, 2  ;;  %v9916_v14 = vld [vmem:[#allocation78_spill] sm:$0xff]  ;;  %v9917_v28 = vld [vmem:[#allocation64_spill] sm:$0xff] }
 0x258   : > { %v1728_v35 = vsel %vm1479_vm1, %v9907_v5, %v1727_v20  ;;  %v2313_v7 = vmul.f32 %v9911_v21, %v7481_v49  ;;  %v9913_v33 = vrot.slane %v9912_v58, 2  ;;  %v9915_v15 = vrot.slane %v9914_v59, 3  ;;  %v9919_v21 = vld [vmem:[#allocation66_spill] sm:$0xff] }
 0x259   : > { %v1789_v61 = vsel %vm1479_vm1, %v9910_v44, %v1788_v45  ;;  %v2094_v57 = vrot.slane %v2069_v17, 3  ;;  %v2375_v23 = vmul.f32 %v9916_v14, %v7506_v2  ;;  %v2980_v1 = vadd.f32 %v7537_v41, %v2919_v43 }
 0x25a   : > { %v1850_v20 = vsel %vm1479_vm1, %v9913_v33, %v1849_v31  ;;  %v1912_v5 = vsel %vm1907_vm2, %v9915_v15, %v1911_v53  ;;  %v1753_v30 = vadd.f32 %v1728_v35, %v1692_v47  ;;  %v9918_v45 = vrot.slane %v9917_v28, 3  ;;  %v9921_v53 = vld [vmem:[#allocation80_spill] sm:$0xff]  ;;  %v9922_v35 = vld [vmem:[#allocation178_spill] sm:$0xff] }
 0x25b   : > { %v2155_v44 = vrot.slane %v2130_v3, 3  ;;  %v9920_v58 = vrot.slane %v9919_v21, 3  ;;  %v2216_v33 = vrot.slane %v2191_v29, 3  ;;  %v2277_v59 = vrot.slane %v2252_v46, 3  ;;  %v9924_v3 = vld [vmem:[#allocation83_spill] sm:$0xff] }
 0x25c   : > { %v1973_v4 = vsel %vm1907_vm2, %v9918_v45, %v1972_v24  ;;  %v2436_v17 = vmul.f32 %v9921_v53, %v7204_v56  ;;  %v3041_v15 = vadd.f32 %v7542_v55, %v2980_v1  ;;  %v1814_v14 = vadd.f32 %v1789_v61, %v1753_v30  ;;  %v9925_v29 = vld [vmem:[#allocation87_spill] sm:$0xff] }
 0x25d   : > { %v2034_v31 = vsel %vm1907_vm2, %v9920_v58, %v2033_v25  ;;  %v2339_v32 = vrot.slane %v2313_v7, 4  ;;  %v2400_v41 = vrot.slane %v2375_v23, 4  ;;  %v9923_v43 = vrot.slane %v9922_v35, 3  ;;  %v9926_v55 = vld [vmem:[#allocation179_spill] sm:$0xff]  ;;  %v9928_v23 = vld [vmem:[#allocation88_spill] sm:$0xff]  ;;  %v9931_v58 = vld [vmem:[#allocation181_spill] sm:$0xff] }
 0x25e   : > { %v2497_v24 = vmul.f32 %v6991_v36, %v9804_v48  ;;  %v2558_v25 = vmul.f32 %v7005_v22, %v9924_v3  ;;  %v2619_v46 = vmul.f32 %v9925_v29, %v6912_v37  ;;  %v3102_v21 = vadd.f32 %v7560_v18, %v3041_v15  ;;  %v9933_v29 = vld [vmem:[#allocation89_spill] sm:$0xff]  ;;  %v9934_v15 = vld [vmem:[#allocation182_spill] sm:$0xff] }
 0x25f   : > { %v2095_v47 = vsel %vm1907_vm2, %v9923_v43, %v2094_v57  ;;  %v1875_v28 = vadd.f32 %v1850_v20, %v1814_v14  ;;  %v9927_v61 = vrot.slane %v9926_v55, 3  ;;  %v2680_v1 = vmul.f32 %v9928_v23, %v6935_v26  ;;  %v9929_v57 = vld [vmem:[#allocation180_spill] sm:$0xff] }
 0x260   : > { %v9930_v30 = vrot.slane %v9929_v57, 3  ;;  %v9932_v35 = vrot.slane %v9931_v58, 3  ;;  %v2461_v3 = vrot.slane %v2436_v17, 4  ;;  %v2741_v18 = vmul.f32 %v9933_v29, %v7481_v49 }
 0x261   : > { %v2156_v7 = vsel %vm1907_vm2, %v9927_v61, %v2155_v44  ;;  %v3163_v14 = vadd.f32 %v7578_v27, %v3102_v21  ;;  %v1937_v20 = vadd.f32 %v1912_v5, %v1875_v28  ;;  %v9935_v44 = vrot.slane %v9934_v15, 4  ;;  %v9936_v61 = vld [vmem:[#allocation183_spill] sm:$0xff]  ;;  %v9939_v5 = vld [vmem:[#allocation94_spill] sm:$0xff]  ;;  %v9940_v28 = vld [vmem:[#allocation184_spill] sm:$0xff] }
 0x262   : > { %v2217_v45 = vsel %vm1907_vm2, %v9930_v30, %v2216_v33  ;;  %v2278_v43 = vsel %vm1907_vm2, %v9932_v35, %v2277_v59  ;;  %v9937_v23 = vrot.slane %v9936_v61, 4  ;;  %v2522_v33 = vrot.slane %v2497_v24, 4  ;;  %v9938_v59 = vld [vmem:[#allocation92_spill] sm:$0xff] }
 0x263   : > { %v2340_v55 = vsel %vm2335_vm3, %v9935_v44, %v2339_v32  ;;  %v2583_v30 = vrot.slane %v2558_v25, 4  ;;  %v2644_v58 = vrot.slane %v2619_v46, 4  ;;  %v2803_v17 = vmul.f32 %v9938_v59, %v7506_v2  ;;  %v9942_v24 = vld [vmem:[#allocation96_spill] sm:$0xff] }
 0x264   : > { %v7740_v57 = vsel %vm2335_vm3, %v9937_v23, %v2400_v41  ;;  %v3225_v35 = vadd.f32 %v7583_v42, %v3163_v14  ;;  %v1998_v29 = vadd.f32 %v1973_v4, %v1937_v20  ;;  %v2705_v27 = vrot.slane %v2680_v1, 4  ;;  %v9943_v42 = vld [vmem:[#allocation99_spill] sm:$0xff]  ;;  %v9944_v1 = vld [vmem:[#allocation185_spill] sm:$0xff] }
 0x265   : > { %v2864_v21 = vmul.f32 %v9939_v5, %v7204_v56  ;;  %v9941_v32 = vrot.slane %v9940_v28, 4  ;;  %v2767_v41 = vrot.slane %v2741_v18, 5  ;;  %v2828_v23 = vrot.slane %v2803_v17, 5  ;;  %v9946_v28 = vld [vmem:[#allocation186_spill] sm:$0xff]  ;;  %v9948_v17 = vld [vmem:[#allocation187_spill] sm:$0xff] }
 0x266   : > { %v2925_v25 = vmul.f32 %v6991_v36, %v9942_v24  ;;  %v3286_v46 = vadd.f32 %v7588_v13, %v3225_v35  ;;  %v2059_v44 = vadd.f32 %v2034_v31, %v1998_v29  ;;  %v2986_v4 = vmul.f32 %v7005_v22, %v9943_v42  ;;  %v9950_v13 = vld [vmem:[#allocation100_spill] sm:$0xff] }
 0x267   : > { %v7750_v15 = vsel %vm2335_vm3, %v9941_v32, %v2461_v3  ;;  %v2889_v61 = vrot.slane %v2864_v21, 5  ;;  %v9945_v14 = vrot.slane %v9944_v1, 4  ;;  %v9947_v3 = vrot.slane %v9946_v28, 4  ;;  %v9951_v21 = vld [vmem:[#allocation188_spill] sm:$0xff] }
 0x268   : > { %v9949_v32 = vrot.slane %v9948_v17, 4  ;;  %v3047_v31 = vmul.f32 %v9950_v13, %v6912_v37  ;;  %v3347_v29 = vadd.f32 %v7597_v12, %v3286_v46  ;;  %v2120_v35 = vadd.f32 %v2095_v47, %v2059_v44  ;;  %v9957_v12 = vld [vmem:[#allocation103_spill] sm:$0xff]  ;;  %v9958_v46 = vld [vmem:[#allocation104_spill] sm:$0xff] }
 0x269   : > { %v7760_v20 = vsel %vm2335_vm3, %v9945_v14, %v2522_v33  ;;  %v7765_v18 = vsel %vm2335_vm3, %v9947_v3, %v2583_v30  ;;  %v9952_v33 = vrot.slane %v9951_v21, 4  ;;  %v2950_v14 = vrot.slane %v2925_v25, 5  ;;  %v9953_v30 = vld [vmem:[#allocation189_spill] sm:$0xff] }
 0x26a   : > { %v7770_v24 = vsel %vm2335_vm3, %v9949_v32, %v2644_v58  ;;  %v9954_v28 = vrot.slane %v9953_v30, 5  ;;  %v9955_v58 = vld [vmem:[#allocation190_spill] sm:$0xff]  ;;  %v3108_v47 = vmul.f32 %v9957_v12, %v6935_v26  ;;  %v3169_v44 = vmul.f32 %v9958_v46, %v7481_v49  ;;  %v9959_v32 = vld [vmem:[#allocation191_spill] sm:$0xff] }
 0x26b   : > { %v7778_v1 = vsel %vm2335_vm3, %v9952_v33, %v2705_v27  ;;  %v9956_v17 = vrot.slane %v9955_v58, 5  ;;  %v3408_v27 = vadd.f32 %v7624_v38, %v3347_v29  ;;  %v2181_v25 = vadd.f32 %v2156_v7, %v2120_v35  ;;  %v9962_v58 = vld [vmem:[#allocation108_spill] sm:$0xff]  ;;  %v9963_v49 = vld [vmem:[#allocation30_spill] sm:$0xff] }
 0x26c   : > { %v7783_v3 = vsel %vm2763_vm4, %v9954_v28, %v2767_v41  ;;  %v9960_v21 = vrot.slane %v9959_v32, 5  ;;  %v3011_v33 = vrot.slane %v2986_v4, 5  ;;  %v3072_v30 = vrot.slane %v3047_v31, 5  ;;  %v9964_v35 = vld [vmem:[#allocation192_spill] sm:$0xff]  ;;  %v9966_v31 = vld [vmem:[#allocation31_spill] sm:$0xff] }
 0x26d   : > { %v7788_v37 = vsel %vm2763_vm4, %v9956_v17, %v2828_v23  ;;  %v9961_v23 = vld [vmem:[#allocation107_spill] sm:$0xff]  ;;  %v3292_v26 = vmul.f32 %v9962_v58, %v7204_v56  ;;  %v3469_v7 = vadd.f32 %v7651_v16, %v3408_v27  ;;  %v2242_v29 = vadd.f32 %v2217_v45, %v2181_v25  ;;  %v7816_v4 = vld [vmem:[%s5327_s19 + $0x30] sm:$0xff]  ;;  %v9968_v25 = vld [vmem:[#allocation193_spill] sm:$0xff] }
 0x26e   : > { %v7798_v41 = vsel %vm2763_vm4, %v9960_v21, %v2889_v61  ;;  %v3231_v28 = vmul.f32 %v9961_v23, %v7506_v2  ;;  %v7805_v17 = vld [vmem:[%s5327_s19 + $0x18] sm:$0xff]  ;;  %v9965_v32 = vrot.slane %v9964_v35, 5  ;;  %v927_v21 = vmul.f32 %v7816_v4, %v9966_v31  ;;  %v9967_v16 = vld [vmem:[#allocation32_spill] sm:$0xff] }
 0x26f   : > { %v910_v38 = vmul.f32 %v7805_v17, %v9963_v49  ;;  %v3133_v56 = vrot.slane %v3108_v47, 5  ;;  %v3195_v2 = vrot.slane %v3169_v44, 6  ;;  %v3353_v58 = vmul.f32 %v6991_v36, %v9865_v50  ;;  %v7823_v49 = vld [vmem:[%s5327_s19 + $0x48] sm:$0xff]  ;;  %v9970_v47 = vld [vmem:[#allocation194_spill] sm:$0xff] }
 0x270   : > { %v7813_v61 = vsel %vm2763_vm4, %v9965_v32, %v2950_v14  ;;  %v944_v45 = vmul.f32 %v7823_v49, %v9967_v16  ;;  %v3530_v27 = vadd.f32 %v7658_v51, %v3469_v7  ;;  %v2303_v14 = vadd.f32 %v2278_v43, %v2242_v29  ;;  %v7839_v46 = vld [vmem:[%s5327_s19 + $0x60] sm:$0xff]  ;;  %v9972_v16 = vld [vmem:[#allocation33_spill] sm:$0xff] }
 0x271   : > { %v9969_v35 = vrot.slane %v9968_v25, 5  ;;  %v935_v31 = vadd.f32 %v927_v21, %v910_v38  ;;  %v9971_v44 = vrot.slane %v9970_v47, 5  ;;  %v3256_v36 = vrot.slane %v3231_v28, 6  ;;  %v7845_v29 = vld [vmem:[%s5327_s19 + $0x78] sm:$0xff]  ;;  %v9973_v38 = vld [vmem:[#allocation34_spill] sm:$0xff] }
 0x272   : > { %v3317_v50 = vrot.slane %v3292_v26, 6  ;;  %v961_v51 = vmul.f32 %v7839_v46, %v9972_v16  ;;  %v3591_v43 = vadd.f32 %v7669_v39, %v3530_v27  ;;  %v2365_v7 = vadd.f32 %v2340_v55, %v2303_v14  ;;  %v9976_v26 = vld [vmem:[#allocation196_spill] sm:$0xff] }
 0x273   : > { %v7831_v32 = vsel %vm2763_vm4, %v9969_v35, %v3011_v33  ;;  %v7836_v23 = vsel %vm2763_vm4, %v9971_v44, %v3072_v30  ;;  %v952_v33 = vadd.f32 %v944_v45, %v935_v31  ;;  %v978_v21 = vmul.f32 %v7845_v29, %v9973_v38  ;;  %v9974_v30 = vld [vmem:[#allocation195_spill] sm:$0xff]  ;;  %v7868_v14 = vld [vmem:[%s5327_s19 + $0x90] sm:$0xff] }
 0x274   : > { %v9975_v25 = vrot.slane %v9974_v30, 5  ;;  %v9977_v35 = vrot.slane %v9976_v26, 6  ;;  %v3378_v39 = vrot.slane %v3353_v58, 6  ;;  %v7861_v55 = vmul.f32 %v7005_v22, %v9880_v63  ;;  %v9980_v30 = vld [vmem:[#allocation197_spill] sm:$0xff]  ;;  %v9982_v58 = vld [vmem:[#allocation198_spill] sm:$0xff] }
 0x275   : > { %v7864_v31 = vadd.f32 %v9858_v6, %v3591_v43  ;;  %v2426_v45 = vadd.f32 %v7740_v57, %v2365_v7  ;;  %v969_v27 = vadd.f32 %v961_v51, %v952_v33  ;;  %v9983_v26 = vrot.slane %v9982_v58, 6  ;;  %v7883_v6 = vld [vmem:[%s5327_s19 + $0xa8] sm:$0xff]  ;;  %v9985_v51 = vld [vmem:[#allocation36_spill] sm:$0xff] }
 0x276   : > { %v7852_v28 = vsel %vm2763_vm4, %v9975_v25, %v3133_v56  ;;  %v7857_v47 = vsel %vm3191_vm5, %v9977_v35, %v3195_v2  ;;  %v9979_v56 = vld [vmem:[#allocation35_spill] sm:$0xff]  ;;  %v9981_v2 = vrot.slane %v9980_v30, 6  ;;  %v9984_v43 = vld [vmem:[#allocation37_spill] sm:$0xff]  ;;  %v1030_v7 = vmul.f32 %v7805_v17, %v9985_v51  ;;  %v7892_v35 = vld [vmem:[%s5327_s19 + $0x20] sm:$0xff] }
 0x277   : > { %9978 = vst [vmem:[#allocation54_spill] sm:$0xff] %v7864_v31  ;;  %v995_v44 = vmul.f32 %v7868_v14, %v9979_v56  ;;  %v7880_v22 = vsel %vm3191_vm5, %v9983_v26, %v3317_v50  ;;  %v1012_v57 = vmul.f32 %v7883_v6, %v9984_v43  ;;  %3616 = vadd.xlane.f32.xlu0 %v7864_v31  ;;  %v9987_v30 = vld [vmem:[#allocation38_spill] sm:$0xff]  ;;  %v9988_v58 = vld [vmem:[#allocation199_spill] sm:$0xff] }
 0x278   : > { %v7875_v25 = vsel %vm3191_vm5, %v9981_v2, %v3256_v36  ;;  %v2487_v33 = vadd.f32 %v7750_v15, %v2426_v45  ;;  %v986_v36 = vadd.f32 %v978_v21, %v969_v27  ;;  %v7896_v50 = vmul.f32 %v7892_v35, %v9985_v51  ;;  %v9990_v15 = vld [vmem:[#allocation43_spill] sm:$0xff]  ;;  %v7923_v31 = vld [vmem:[%s5327_s19 + $0x50] sm:$0xff] }
 0x279   : > { %v1092_v2 = vmul.f32 %v7816_v4, %v9987_v30  ;;  %v9989_v26 = vrot.slane %v9988_v58, 6  ;;  %v1057_v56 = vrot.slane %v1030_v7, 1  ;;  %v7908_v21 = vmul.f32 %v9990_v15, %v9987_v30  ;;  %v7913_v51 = vld [vmem:[%s5327_s19 + $0x88] sm:$0x3f] }
 0x27a   : > { %9986 = vst [vmem:[#allocation56_spill] sm:$0xff] %v7896_v50  ;;  %v2548_v45 = vadd.f32 %v7760_v20, %v2487_v33  ;;  %v1003_v27 = vadd.f32 %v995_v44, %v986_v36  ;;  %v9227_v63 = vrot.slane %v7896_v50, 1  ;;  %v7917_v58 = vmul.f32 %v7913_v51, %v9883_v60 }
 0x27b   : > { %v7903_v43 = vsel %vm3191_vm5, %v9989_v26, %v3378_v39  ;;  %9991 = vst [vmem:[#allocation60_spill] sm:$0xff] %v7908_v21  ;;  %v1118_v38 = vrot.slane %v1092_v2, 1  ;;  %v9228_v39 = vrot.slane %v7908_v21, 1  ;;  %v9993_v26 = vld [vmem:[#allocation39_spill] sm:$0xff]  ;;  %v1214_v2 = vmul.f32 %v7839_v46, %v9864_v9  ;;  %v9999_v21 = vld [vmem:[#allocation45_spill] sm:$0xff] }
 0x27c   : > { %9992 = vst [vmem:[#allocation61_spill] sm:$0xff] %v7913_v51  ;;  %v1153_v7 = vmul.f32 %v7823_v49, %v9993_v26  ;;  %v7927_v20 = vmul.f32 %v7923_v31, %v9993_v26  ;;  %v2609_v44 = vadd.f32 %v7765_v18, %v2548_v45  ;;  %v1020_v33 = vadd.f32 %v1012_v57, %v1003_v27  ;;  %v9995_v26 = vld [vmem:[#allocation44_spill] sm:$0xff]  ;;  %v9996_v27 = vld [vmem:[#allocation42_spill] sm:$0xff] }
 0x27d   : > { %v1059_v36 = vsel %vm1051_vm0, %v1057_v56, %v9227_v63  ;;  %v1120_v51 = vsel %vm1051_vm0, %v1118_v38, %v9228_v39  ;;  %v7941_v16 = vmul.f32 %v9995_v26, %v9864_v9  ;;  %v1240_v45 = vrot.slane %v1214_v2, 1 }
 0x27e   : > { %9994 = vst [vmem:[#allocation62_spill] sm:$0xff] %v7927_v20  ;;  %v1179_v60 = vrot.slane %v1153_v7, 1  ;;  %v9231_v30 = vrot.slane %v7927_v20, 1  ;;  %v2670_v18 = vadd.f32 %v7770_v24, %v2609_v44  ;;  %v1082_v57 = vadd.f32 %v1059_v36, %v1020_v33  ;;  %v9997_v7 = vld [vmem:[#allocation46_spill] sm:$0xff]  ;;  %v10000_v36 = vld [vmem:[#allocation51_spill] sm:$0xff] }
 0x27f   : > { %v1275_v56 = vmul.f32 %v7845_v29, %v9996_v27  ;;  %v9235_v38 = vrot.slane %v7941_v16, 1  ;;  %v7952_v39 = vmul.f32 %v9997_v7, %v9996_v27  ;;  %v1336_v50 = vmul.f32 %v7868_v14, %v9999_v21 }
 0x280   : > { %v1181_v63 = vsel %vm1051_vm0, %v1179_v60, %v9231_v30  ;;  %v2731_v24 = vadd.f32 %v7778_v1, %v2670_v18  ;;  %v1143_v44 = vadd.f32 %v1120_v51, %v1082_v57  ;;  %v7959_v2 = vmul.f32 %v10000_v36, %v9999_v21  ;;  %v7970_v51 = vld [vmem:[%s5327_s19 + $0xb0] sm:$0xff] }
 0x281   : > { %9998 = vst [vmem:[#allocation65_spill] sm:$0xff] %v7952_v39  ;;  %v1301_v33 = vrot.slane %v1275_v56, 1  ;;  %v1242_v60 = vsel %vm1051_vm0, %v1240_v45, %v9235_v38  ;;  %v9236_v30 = vrot.slane %v7952_v39, 1  ;;  %v1362_v20 = vrot.slane %v1336_v50, 1 }
 0x282   : > { %10001 = vst [vmem:[#allocation67_spill] sm:$0xff] %v7959_v2  ;;  %v1397_v27 = vmul.f32 %v7883_v6, %v9761_v40  ;;  %v2793_v9 = vadd.f32 %v7783_v3, %v2731_v24  ;;  %v1204_v12 = vadd.f32 %v1181_v63, %v1143_v44  ;;  %v9238_v1 = vrot.slane %v7959_v2, 1 }
 0x283   : > { %v7974_v18 = vmul.f32 %v7970_v51, %v9761_v40  ;;  %v1303_v57 = vsel %vm1051_vm0, %v1301_v33, %v9236_v30  ;;  %v1458_v50 = vmul.f32 %v7805_v17, %v9762_v11  ;;  %v7983_v3 = vmul.f32 %v7892_v35, %v9762_v11 }
 0x284   : > { %v1423_v45 = vrot.slane %v1397_v27, 1  ;;  %v2854_v63 = vadd.f32 %v7788_v37, %v2793_v9  ;;  %v1265_v56 = vadd.f32 %v1242_v60, %v1204_v12  ;;  %v1364_v24 = vsel %vm1051_vm0, %v1362_v20, %v9238_v1  ;;  %v10004_v12 = vld [vmem:[#allocation52_spill] sm:$0xff] }
 0x285   : > { %10002 = vst [vmem:[#allocation69_spill] sm:$0xff] %v7974_v18  ;;  %v9241_v44 = vrot.slane %v7974_v18, 1  ;;  %v1485_v38 = vrot.slane %v1458_v50, 2  ;;  %v1520_v27 = vmul.f32 %v7816_v4, %v5494_v8  ;;  %v7995_v30 = vmul.f32 %v9990_v15, %v5494_v8 }
 0x286   : > { %10003 = vst [vmem:[#allocation70_spill] sm:$0xff] %v7983_v3  ;;  %v2915_v39 = vadd.f32 %v7798_v41, %v2854_v63  ;;  %v3500_v9 = vrot.slane %v7917_v58, 6  ;;  %v1326_v37 = vadd.f32 %v1303_v57, %v1265_v56  ;;  %v1581_v20 = vmul.f32 %v7823_v49, %v10004_v12  ;;  %v10007_v63 = vld [vmem:[#allocation55_spill] sm:$0xff] }
 0x287   : > { %v1425_v60 = vsel %vm1051_vm0, %v1423_v45, %v9241_v44  ;;  %v1546_v50 = vrot.slane %v1520_v27, 2  ;;  %v9244_v1 = vrot.slane %v7995_v30, 2  ;;  %v8007_v33 = vmul.f32 %v7923_v31, %v10004_v12 }
 0x288   : > { %v2976_v2 = vadd.f32 %v7813_v61, %v2915_v39  ;;  %v1387_v41 = vadd.f32 %v1364_v24, %v1326_v37  ;;  %v10006_v58 = vrot.slane %v7983_v3, 2  ;;  %v1642_v56 = vmul.f32 %v7839_v46, %v10007_v63 }
 0x289   : > { %10005 = vst [vmem:[#allocation74_spill] sm:$0xff] %v8007_v33  ;;  %v1607_v18 = vrot.slane %v1581_v20, 2  ;;  %v8018_v27 = vmul.f32 %v9995_v26, %v10007_v63  ;;  %v1703_v44 = vmul.f32 %v7845_v29, %v9553_v52  ;;  %v1548_v37 = vsel %vm1479_vm1, %v1546_v50, %v9244_v1  ;;  %v8045_v50 = vld [vmem:[%s5327_s19 + $0xa0] sm:$0x3f] }
 0x28a   : > { %v1487_v57 = vsel %vm1479_vm1, %v1485_v38, %v10006_v58  ;;  %v3037_v61 = vadd.f32 %v7831_v32, %v2976_v2  ;;  %v1448_v39 = vadd.f32 %v1425_v60, %v1387_v41  ;;  %v1668_v24 = vrot.slane %v1642_v56, 2  ;;  %v8042_v60 = vld [vmem:[%s8875_s2 + $0x30] ss:$0 sm:$0xff] }
 0x28b   : > { %v8025_v38 = vmul.f32 %v9997_v7, %v9553_v52  ;;  %v9248_v20 = vrot.slane %v8018_v27, 2  ;;  %v1729_v58 = vrot.slane %v1703_v44, 2  ;;  %v1764_v45 = vmul.f32 %v7868_v14, %v9556_v54 }
 0x28c   : > { %v3098_v3 = vadd.f32 %v7836_v23, %v3037_v61  ;;  %v1510_v63 = vadd.f32 %v1487_v57, %v1448_v39  ;;  %v8037_v2 = vmul.f32 %v10000_v36, %v9556_v54  ;;  %v3536_v44 = vmul.f32 %v8045_v50, %v8042_v60 }
 0x28d   : > { %10008 = vst [vmem:[#allocation75_spill] sm:$0xff] %v8025_v38  ;;  %v10009_v41 = vrot.slane %v8007_v33, 2  ;;  %v1825_v57 = vmul.f32 %v7883_v6, %v9558_v10  ;;  %v8056_v56 = vmul.f32 %v7970_v51, %v9558_v10  ;;  %v1670_v1 = vsel %vm1479_vm1, %v1668_v24, %v9248_v20 }
 0x28e   : > { %v3159_v61 = vadd.f32 %v7852_v28, %v3098_v3  ;;  %v1571_v39 = vadd.f32 %v1548_v37, %v1510_v63  ;;  %v1790_v32 = vrot.slane %v1764_v45, 2  ;;  %v10011_v54 = vrot.slane %v8025_v38, 2  ;;  %v10014_v38 = vld [vmem:[#allocation200_spill] sm:$0xff] }
 0x28f   : > { %v1609_v23 = vsel %vm1479_vm1, %v1607_v18, %v10009_v41  ;;  %10010 = vst [vmem:[#allocation77_spill] sm:$0xff] %v8056_v56  ;;  %v1886_v41 = vmul.f32 %v7805_v17, %v9561_v34  ;;  %v8070_v10 = vmul.f32 %v7892_v35, %v9561_v34  ;;  %v1851_v63 = vrot.slane %v1825_v57, 2 }
 0x290   : > { %v1731_v33 = vsel %vm1479_vm1, %v1729_v58, %v10011_v54  ;;  %v3221_v28 = vadd.f32 %v7857_v47, %v3159_v61  ;;  %v1632_v3 = vadd.f32 %v1609_v23, %v1571_v39  ;;  %v1948_v54 = vmul.f32 %v7816_v4, %v9563_v0  ;;  %v10016_v39 = vld [vmem:[#allocation201_spill] sm:$0xff] }
 0x291   : > { %v1913_v45 = vrot.slane %v1886_v41, 3  ;;  %v8079_v58 = vmul.f32 %v9990_v15, %v9563_v0  ;;  %v10013_v18 = vrot.slane %v7861_v55, 6  ;;  %v10015_v47 = vrot.slane %v10014_v38, 6 }
 0x292   : > { %v3282_v20 = vadd.f32 %v7875_v25, %v3221_v28  ;;  %v1693_v57 = vadd.f32 %v1670_v1, %v1632_v3  ;;  %v2009_v61 = vmul.f32 %v7823_v49, %v9565_v62  ;;  %v10017_v41 = vrot.slane %v10016_v39, 6 }
 0x293   : > { %10012 = vst [vmem:[#allocation79_spill] sm:$0xff] %v8079_v58  ;;  %v3440_v23 = vsel %vm3191_vm5, %v10015_v47, %v10013_v18  ;;  %v10018_v24 = vrot.slane %v8037_v2, 2  ;;  %v8097_v25 = vmul.f32 %v7923_v31, %v9565_v62  ;;  %v2070_v55 = vmul.f32 %v7839_v46, %v9905_v19 }
 0x294   : > { %v3501_v37 = vsel %vm3191_vm5, %v10017_v41, %v3500_v9  ;;  %v3343_v1 = vadd.f32 %v7880_v22, %v3282_v20  ;;  %v3561_v38 = vrot.slane %v3536_v44, 6  ;;  %v1754_v18 = vadd.f32 %v1731_v33, %v1693_v57 }
 0x295   : > { %v1792_v15 = vsel %vm1479_vm1, %v1790_v32, %v10018_v24  ;;  %v8104_v28 = vmul.f32 %v9995_v26, %v9905_v19  ;;  %v10019_v9 = vrot.slane %v8056_v56, 2  ;;  %v10020_v32 = vrot.slane %v8070_v10, 3  ;;  %v10021_v19 = vld [vmem:[#allocation71_spill] sm:$0xff] }
 0x296   : > { %v1974_v47 = vrot.slane %v1948_v54, 3  ;;  %v9252_v39 = vrot.slane %v8079_v58, 3  ;;  %v3404_v41 = vadd.f32 %v7903_v43, %v3343_v1  ;;  %v1815_v22 = vadd.f32 %v1792_v15, %v1754_v18  ;;  %v10026_v18 = vld [vmem:[#allocation73_spill] sm:$0xff] }
 0x297   : > { %v1853_v3 = vsel %vm1479_vm1, %v1851_v63, %v10019_v9  ;;  %v1915_v24 = vsel %vm1907_vm2, %v1913_v45, %v10020_v32  ;;  %v2035_v20 = vrot.slane %v2009_v61, 3  ;;  %v9257_v33 = vrot.slane %v8097_v25, 3  ;;  %v10022_v9 = vld [vmem:[#allocation72_spill] sm:$0xff]  ;;  %v10024_v61 = vld [vmem:[#allocation203_spill] sm:$0xff] }
 0x298   : > { %v2096_v44 = vrot.slane %v2070_v55, 3  ;;  %v2131_v56 = vmul.f32 %v7845_v29, %v10021_v19  ;;  %v8120_v63 = vmul.f32 %v9997_v7, %v10021_v19  ;;  %v3465_v45 = vadd.f32 %v3440_v23, %v3404_v41 }
 0x299   : > { %v1876_v54 = vadd.f32 %v1853_v3, %v1815_v22  ;;  %v2192_v32 = vmul.f32 %v7868_v14, %v10022_v9  ;;  %v8126_v43 = vmul.f32 %v10000_v36, %v10022_v9  ;;  %v10025_v15 = vrot.slane %v10024_v61, 6 }
 0x29a   : > { %v1976_v1 = vsel %vm1907_vm2, %v1974_v47, %v9252_v39  ;;  %v2253_v57 = vmul.f32 %v7883_v6, %v10026_v18  ;;  %v8138_v23 = vmul.f32 %v7970_v51, %v10026_v18  ;;  %v3526_v3 = vadd.f32 %v3501_v37, %v3465_v45 }
 0x29b   : > { %10023 = vst [vmem:[#allocation81_spill] sm:$0xff] %v8126_v43  ;;  %v3562_v55 = vsel %vm3191_vm5, %v10025_v15, %v3561_v38  ;;  %v1938_v41 = vadd.f32 %v1915_v24, %v1876_v54  ;;  %v2037_v22 = vsel %vm1907_vm2, %v2035_v20, %v9257_v33  ;;  %v10028_v61 = vrot.slane %v8104_v28, 3  ;;  %v10029_v24 = vld [vmem:[#allocation76_spill] sm:$0xff] }
 0x29c   : > { %10027 = vst [vmem:[#allocation84_spill] sm:$0xff] %v8138_v23  ;;  %v2157_v15 = vrot.slane %v2131_v56, 3  ;;  %v9258_v47 = vrot.slane %v8120_v63, 3  ;;  %v3587_v39 = vadd.f32 %v3562_v55, %v3526_v3  ;;  %v2218_v58 = vrot.slane %v2192_v32, 3  ;;  %v8158_v56 = vld [vmem:[%s8876_s3] ss:$0 sm:$0xff] }
 0x29d   : > { %v2098_v38 = vsel %vm1907_vm2, %v2096_v44, %v10028_v61  ;;  %v1999_v9 = vadd.f32 %v1976_v1, %v1938_v41  ;;  %v9259_v18 = vrot.slane %v8126_v43, 3  ;;  %v2279_v19 = vrot.slane %v2253_v57, 3  ;;  %v10032_v32 = vld [vmem:[#allocation78_spill] sm:$0xff]  ;;  %v8166_v55 = vld [vmem:[%s5327_s19 + $0x38] sm:$0xff] }
 0x29e   : > { %v2314_v45 = vmul.f32 %v7805_v17, %v10029_v24  ;;  %v8153_v20 = vmul.f32 %v7892_v35, %v10029_v24  ;;  %v8161_v44 = vadd.f32 %v8158_v56, %v3587_v39  ;;  %v2376_v57 = vmul.f32 %v7816_v4, %v10032_v32 }
 0x29f   : > { %v2060_v54 = vadd.f32 %v2037_v22, %v1999_v9  ;;  %v8170_v1 = vmul.f32 %v8166_v55, %v10032_v32  ;;  %v2159_v3 = vsel %vm1907_vm2, %v2157_v15, %v9258_v47  ;;  %v2220_v39 = vsel %vm1907_vm2, %v2218_v58, %v9259_v18  ;;  %v10036_v18 = vld [vmem:[#allocation83_spill] sm:$0xff] }
 0x2a0   : > { %10030 = vst [vmem:[#allocation85_spill] sm:$0xff] %v8153_v20  ;;  %3608 = vadd.xlane.f32.xlu1 %v8161_v44  ;;  %v2341_v9 = vrot.slane %v2314_v45, 4  ;;  %v2437_v61 = vmul.f32 %v7823_v49, %v9921_v53  ;;  %v8184_v33 = vmul.f32 %v7923_v31, %v9921_v53  ;;  %v10035_v15 = vrot.slane %v8138_v23, 3  ;;  %v10039_v53 = vld [vmem:[#allocation87_spill] sm:$0xff] }
 0x2a1   : > { %10031 = vst [vmem:[#allocation86_spill] sm:$0xff] %v8161_v44  ;;  %v2121_v41 = vadd.f32 %v2098_v38, %v2060_v54  ;;  %v2402_v38 = vrot.slane %v2376_v57, 4  ;;  %v2498_v58 = vmul.f32 %v7839_v46, %v9804_v48  ;;  %v8194_v45 = vmul.f32 %v9995_v26, %v9804_v48 }
 0x2a2   : > { %10033 = vst [vmem:[#allocation90_spill] sm:$0xff] %v8170_v1  ;;  %v2281_v47 = vsel %vm1907_vm2, %v2279_v19, %v10035_v15  ;;  %v2559_v22 = vmul.f32 %v7845_v29, %v10036_v18  ;;  %v10037_v19 = vrot.slane %v8153_v20, 4  ;;  %v2463_v15 = vrot.slane %v2437_v61, 4 }
 0x2a3   : > { %10034 = vst [vmem:[#allocation91_spill] sm:$0xff] %v8184_v33  ;;  %v2182_v37 = vadd.f32 %v2159_v3, %v2121_v41  ;;  %v8200_v3 = vmul.f32 %v9997_v7, %v10036_v18  ;;  %v9272_v54 = vrot.slane %v8184_v33, 4  ;;  %v10038_v23 = vrot.slane %v8170_v1, 4 }
 0x2a4   : > { %v2343_v57 = vsel %vm2335_vm3, %v2341_v9, %v10037_v19  ;;  %v2620_v43 = vmul.f32 %v7868_v14, %v10039_v53  ;;  %v8213_v18 = vmul.f32 %v10000_v36, %v10039_v53  ;;  %v2585_v20 = vrot.slane %v2559_v22, 4  ;;  %v10041_v19 = vld [vmem:[#allocation88_spill] sm:$0xff] }
 0x2a5   : > { %v2243_v41 = vadd.f32 %v2220_v39, %v2182_v37  ;;  %v2404_v48 = vsel %vm2335_vm3, %v2402_v38, %v10038_v23  ;;  %v2524_v37 = vrot.slane %v2498_v58, 4  ;;  %v9275_v39 = vrot.slane %v8194_v45, 4  ;;  %v10042_v38 = vld [vmem:[#allocation89_spill] sm:$0xff] }
 0x2a6   : > { %10040 = vst [vmem:[#allocation93_spill] sm:$0xff] %v8213_v18  ;;  %v8221_v23 = vmul.f32 %v7970_v51, %v10041_v19  ;;  %v2465_v58 = vsel %vm2335_vm3, %v2463_v15, %v9272_v54  ;;  %v8230_v22 = vmul.f32 %v7892_v35, %v10042_v38  ;;  %v10043_v53 = vrot.slane %v8200_v3, 4 }
 0x2a7   : > { %v2304_v44 = vadd.f32 %v2281_v47, %v2243_v41  ;;  %v2681_v47 = vmul.f32 %v7883_v6, %v10041_v19  ;;  %v2742_v41 = vmul.f32 %v7805_v17, %v10042_v38  ;;  %v2526_v19 = vsel %vm2335_vm3, %v2524_v37, %v9275_v39 }
 0x2a8   : > { %v2587_v1 = vsel %vm2335_vm3, %v2585_v20, %v10043_v53  ;;  %v9281_v15 = vrot.slane %v8221_v23, 4  ;;  %v9282_v38 = vrot.slane %v8230_v22, 5  ;;  %v2865_v37 = vmul.f32 %v7823_v49, %v9939_v5 }
 0x2a9   : > { %v2366_v61 = vadd.f32 %v2343_v57, %v2304_v44  ;;  %v2646_v44 = vrot.slane %v2620_v43, 4  ;;  %v9274_v57 = vrot.slane %v8213_v18, 4  ;;  %v2707_v33 = vrot.slane %v2681_v47, 4 }
 0x2aa   : > { %v2769_v54 = vrot.slane %v2742_v41, 5  ;;  %v8245_v43 = vmul.f32 %v8166_v55, %v9938_v59  ;;  %v8254_v20 = vmul.f32 %v7923_v31, %v9939_v5  ;;  %v2891_v5 = vrot.slane %v2865_v37, 5 }
 0x2ab   : > { %v2427_v9 = vadd.f32 %v2404_v48, %v2366_v61  ;;  %v2804_v48 = vmul.f32 %v7816_v4, %v9938_v59  ;;  %v2648_v53 = vsel %vm2335_vm3, %v2646_v44, %v9274_v57  ;;  %v2709_v44 = vsel %vm2335_vm3, %v2707_v33, %v9281_v15  ;;  %v10050_v59 = vld [vmem:[#allocation104_spill] sm:$0xff] }
 0x2ac   : > { %10044 = vst [vmem:[#allocation95_spill] sm:$0xff] %v8245_v43  ;;  %v2771_v57 = vsel %vm2763_vm4, %v2769_v54, %v9282_v38  ;;  %v10049_v38 = vld [vmem:[#allocation103_spill] sm:$0xff] }
 0x2ad   : > { %v2488_v32 = vadd.f32 %v2465_v58, %v2427_v9  ;;  %v10045_v9 = vld [vmem:[#allocation96_spill] sm:$0xff]  ;;  %v2987_v58 = vmul.f32 %v7845_v29, %v9943_v42  ;;  %v2830_v39 = vrot.slane %v2804_v48, 5  ;;  %v3109_v37 = vmul.f32 %v7883_v6, %v10049_v38 }
 0x2ae   : > { %v2926_v47 = vmul.f32 %v7839_v46, %v10045_v9  ;;  %v8260_v41 = vmul.f32 %v9995_v26, %v10045_v9  ;;  %v9286_v9 = vrot.slane %v8245_v43, 5 }
 0x2af   : > { %v2549_v61 = vadd.f32 %v2526_v19, %v2488_v32  ;;  %v8266_v32 = vmul.f32 %v9997_v7, %v9943_v42  ;;  %v3048_v42 = vmul.f32 %v7868_v14, %v9950_v13  ;;  %v3013_v15 = vrot.slane %v2987_v58, 5 }
 0x2b0   : > { %10046 = vst [vmem:[#allocation97_spill] sm:$0xff] %v8260_v41  ;;  %v8297_v58 = vmul.f32 %v7892_v35, %v10050_v59 }
 0x2b1   : > { %10047 = vst [vmem:[#allocation98_spill] sm:$0xff] %v8266_v32  ;;  %v2610_v19 = vadd.f32 %v2587_v1, %v2549_v61  ;;  %v8280_v1 = vmul.f32 %v10000_v36, %v9950_v13  ;;  %v2952_v61 = vrot.slane %v2926_v47, 5  ;;  %v3170_v47 = vmul.f32 %v7805_v17, %v10050_v59 }
 0x2b2   : > { %10051 = vst [vmem:[#allocation153_spill] sm:$0xff] %v8297_v58  ;;  %v3074_v33 = vrot.slane %v3048_v42, 5  ;;  %v10053_v13 = vrot.slane %v8260_v41, 5 }
 0x2b3   : > { %v2671_v18 = vadd.f32 %v2648_v53, %v2610_v19  ;;  %10048 = vst [vmem:[#allocation101_spill] sm:$0xff] %v8280_v1  ;;  %v8288_v53 = vmul.f32 %v7970_v51, %v10049_v38  ;;  %v2832_v19 = vsel %vm2763_vm4, %v2830_v39, %v9286_v9  ;;  %v10054_v39 = vrot.slane %v8266_v32, 5  ;;  %v10055_v9 = vld [vmem:[#allocation107_spill] sm:$0xff] }
 0x2b4   : > { %v2954_v43 = vsel %vm2763_vm4, %v2952_v61, %v10053_v13  ;;  %v3232_v59 = vmul.f32 %v7816_v4, %v10055_v9  ;;  %v3197_v41 = vrot.slane %v3170_v47, 6  ;;  %v10058_v61 = vld [vmem:[#allocation108_spill] sm:$0xff]  ;;  %v10063_v13 = vld [vmem:[#allocation33_spill] sm:$0xff] }
 0x2b5   : > { %v2732_v48 = vadd.f32 %v2709_v44, %v2671_v18  ;;  %v10052_v18 = vrot.slane %v8254_v20, 5  ;;  %v3015_v17 = vsel %vm2763_vm4, %v3013_v15, %v10054_v39  ;;  %v9293_v42 = vrot.slane %v8288_v53, 5  ;;  %v10059_v39 = vld [vmem:[#allocation31_spill] sm:$0xff] }
 0x2b6   : > { %v3293_v15 = vmul.f32 %v7823_v49, %v10058_v61  ;;  %v928_v4 = vmul.f32 %v8166_v55, %v10059_v39  ;;  %v3258_v47 = vrot.slane %v3232_v59, 6  ;;  %v10065_v39 = vld [vmem:[#allocation50_spill] sm:$0xff] }
 0x2b7   : > { %v2794_v54 = vadd.f32 %v2771_v57, %v2732_v48  ;;  %v2893_v44 = vsel %vm2763_vm4, %v2891_v5, %v10052_v18  ;;  %v8313_v57 = vmul.f32 %v8166_v55, %v10055_v9  ;;  %v3135_v5 = vrot.slane %v3109_v37, 5  ;;  %v10057_v18 = vld [vmem:[#allocation30_spill] sm:$0xff] }
 0x2b8   : > { %v911_v38 = vmul.f32 %v7892_v35, %v10057_v18  ;;  %v10060_v9 = vrot.slane %v8280_v1, 5  ;;  %v8328_v37 = vmul.f32 %v7923_v31, %v10058_v61  ;;  %v962_v55 = vmul.f32 %v9995_v26, %v10063_v13  ;;  %v10066_v61 = vld [vmem:[#allocation36_spill] sm:$0xff]  ;;  %v10072_v13 = vld [vmem:[#allocation39_spill] sm:$0xff] }
 0x2b9   : > { %10056 = vst [vmem:[#allocation102_spill] sm:$0xff] %v8313_v57  ;;  %v2855_v48 = vadd.f32 %v2832_v19, %v2794_v54  ;;  %v10062_v19 = vld [vmem:[#allocation32_spill] sm:$0xff]  ;;  %v9295_v18 = vrot.slane %v8313_v57, 6  ;;  %v1032_v1 = vmul.f32 %v10066_v61, %v10065_v39  ;;  %v10069_v61 = vld [vmem:[#allocation38_spill] sm:$0xff] }
 0x2ba   : > { %v3076_v54 = vsel %vm2763_vm4, %v3074_v33, %v10060_v9  ;;  %10061 = vst [vmem:[#allocation155_spill] sm:$0xff] %v8328_v37  ;;  %v945_v35 = vmul.f32 %v7923_v31, %v10062_v19  ;;  %v936_v49 = vadd.f32 %v928_v4, %v911_v38  ;;  %v3137_v9 = vsel %vm2763_vm4, %v3135_v5, %v9293_v42  ;;  %v10064_v33 = vld [vmem:[#allocation109_spill] sm:$0xff]  ;;  %v10068_v19 = vld [vmem:[#allocation34_spill] sm:$0xff] }
 0x2bb   : > { %v2916_v32 = vadd.f32 %v2893_v44, %v2855_v48  ;;  %v3354_v48 = vmul.f32 %v7839_v46, %v10064_v33  ;;  %v10067_v31 = vrot.slane %v8297_v58, 6  ;;  %v3319_v38 = vrot.slane %v3293_v15, 6  ;;  %v8353_v46 = vld [vmem:[%s5327_s19 + $0x40] sm:$0x3f]  ;;  %v8365_v42 = vld [vmem:[%s5327_s19 + $0x58] sm:$0x3f] }
 0x2bc   : > { %v953_v4 = vadd.f32 %v945_v35, %v936_v49  ;;  %v8350_v5 = vmul.f32 %v9995_v26, %v10064_v33  ;;  %v1094_v39 = vmul.f32 %v8353_v46, %v10069_v61  ;;  %v10070_v15 = vld [vmem:[#allocation110_spill] sm:$0xff]  ;;  %v10071_v49 = vld [vmem:[#allocation35_spill] sm:$0xff]  ;;  %v1155_v61 = vmul.f32 %v8365_v42, %v10072_v13  ;;  %v10076_v13 = vld [vmem:[#allocation41_spill] sm:$0xff] }
 0x2bd   : > { %v2977_v44 = vadd.f32 %v2954_v43, %v2916_v32  ;;  %v3199_v59 = vsel %vm3191_vm5, %v3197_v41, %v10067_v31  ;;  %v979_v43 = vmul.f32 %v9997_v7, %v10068_v19  ;;  %v3260_v41 = vsel %vm3191_vm5, %v3258_v47, %v9295_v18  ;;  %v10073_v47 = vld [vmem:[#allocation115_spill] sm:$0xff] }
 0x2be   : > { %v3415_v35 = vmul.f32 %v7845_v29, %v10070_v15  ;;  %v3380_v26 = vrot.slane %v3354_v48, 6  ;;  %v1060_v19 = vrot.slane %v1032_v1, 1  ;;  %v8371_v57 = vmul.f32 %v9997_v7, %v10070_v15 }
 0x2bf   : > { %v3038_v32 = vadd.f32 %v3015_v17, %v2977_v44  ;;  %v970_v17 = vadd.f32 %v962_v55, %v953_v4  ;;  %v996_v44 = vmul.f32 %v10000_v36, %v10071_v49  ;;  %v3476_v18 = vmul.f32 %v7868_v14, %v10073_v47  ;;  %v10074_v55 = vld [vmem:[#allocation37_spill] sm:$0xff] }
 0x2c0   : > { %v1013_v4 = vmul.f32 %v7970_v51, %v10074_v55  ;;  %v1121_v48 = vrot.slane %v1094_v39, 1  ;;  %v3381_v7 = vrot.slane %v8350_v5, 6  ;;  %v3441_v15 = vrot.slane %v3415_v35, 6  ;;  %v10079_v39 = vld [vmem:[#allocation42_spill] sm:$0xff] }
 0x2c1   : > { %v3099_v31 = vadd.f32 %v3076_v54, %v3038_v32  ;;  %v987_v29 = vadd.f32 %v979_v43, %v970_v17  ;;  %v10075_v54 = vrot.slane %v8328_v37, 6  ;;  %v8381_v32 = vld [vmem:[%s5327_s19 + $0x70] sm:$0x3f]  ;;  %v8388_v14 = vmul.f32 %v10000_v36, %v10073_v47 }
 0x2c2   : > { %v1216_v58 = vmul.f32 %v8381_v32, %v10076_v13  ;;  %v3537_v35 = vmul.f32 %v8042_v60, %v7883_v6  ;;  %v8400_v36 = vmul.f32 %v8042_v60, %v7970_v51  ;;  %v3502_v6 = vrot.slane %v3476_v18, 6 }
 0x2c3   : > { %v3160_v49 = vadd.f32 %v3137_v9, %v3099_v31  ;;  %v3321_v1 = vsel %vm3191_vm5, %v3319_v38, %v10075_v54  ;;  %v1004_v43 = vadd.f32 %v996_v44, %v987_v29  ;;  %v10077_v9 = vld [vmem:[#allocation56_spill] sm:$0xff]  ;;  %v1182_v38 = vrot.slane %v1155_v61, 1  ;;  %v10080_v54 = vld [vmem:[#allocation61_spill] sm:$0xff] }
 0x2c4   : > { %v10078_v31 = vrot.slane %v10077_v9, 1  ;;  %v1277_v37 = vmul.f32 %v10080_v54, %v10079_v39  ;;  %v10081_v29 = vld [vmem:[#allocation60_spill] sm:$0xff]  ;;  %v1243_v61 = vrot.slane %v1216_v58, 1  ;;  %v1338_v9 = vmul.f32 %v8045_v50, %v9999_v21 }
 0x2c5   : > { %v3222_v17 = vadd.f32 %v3199_v59, %v3160_v49  ;;  %v1021_v44 = vadd.f32 %v1013_v4, %v1004_v43  ;;  %v10082_v49 = vrot.slane %v10081_v29, 1  ;;  %v3503_v39 = vrot.slane %v8388_v14, 6  ;;  %v10083_v4 = vld [vmem:[#allocation62_spill] sm:$0xff] }
 0x2c6   : > { %v1061_v55 = vsel %vm1051_vm0, %v10078_v31, %v1060_v19  ;;  %v3382_v31 = vsel %vm3191_vm5, %v3380_v26, %v3381_v7  ;;  %v10085_v58 = vrot.slane %v8371_v57, 6  ;;  %v3563_v29 = vrot.slane %v3537_v35, 6 }
 0x2c7   : > { %v3283_v59 = vadd.f32 %v3260_v41, %v3222_v17  ;;  %v1122_v19 = vsel %vm1051_vm0, %v10082_v49, %v1121_v48  ;;  %v1083_v51 = vadd.f32 %v1061_v55, %v1021_v44  ;;  %v10084_v41 = vrot.slane %v10083_v4, 1  ;;  %v8415_v48 = vld [vmem:[%s5327_s19 + $0xb8] sm:$0x3f] }
 0x2c8   : > { %v1304_v17 = vrot.slane %v1277_v37, 1  ;;  %v1399_v21 = vmul.f32 %v8415_v48, %v9761_v40  ;;  %v3443_v26 = vsel %vm3191_vm5, %v3441_v15, %v10085_v58  ;;  %v3564_v18 = vrot.slane %v8400_v36, 6  ;;  %v8427_v37 = vld [vmem:[%s5327_s19 + $0x28] sm:$0x3f] }
 0x2c9   : > { %v3344_v13 = vadd.f32 %v3321_v1, %v3283_v59  ;;  %v1183_v43 = vsel %vm1051_vm0, %v10084_v41, %v1182_v38  ;;  %v1144_v49 = vadd.f32 %v1122_v19, %v1083_v51  ;;  %v10086_v1 = vrot.slane %v7941_v16, 1  ;;  %v10087_v4 = vld [vmem:[#allocation65_spill] sm:$0xff] }
 0x2ca   : > { %v1365_v38 = vrot.slane %v1338_v9, 1  ;;  %v1460_v59 = vmul.f32 %v8427_v37, %v9762_v11  ;;  %v3504_v40 = vsel %vm3191_vm5, %v3502_v6, %v3503_v39  ;;  %v10088_v41 = vrot.slane %v10087_v4, 1 }
 0x2cb   : > { %v3405_v55 = vadd.f32 %v3382_v31, %v3344_v13  ;;  %v1244_v44 = vsel %vm1051_vm0, %v10086_v1, %v1243_v61  ;;  %v1205_v15 = vadd.f32 %v1183_v43, %v1144_v49  ;;  %v1426_v19 = vrot.slane %v1399_v21, 1  ;;  %v10089_v31 = vld [vmem:[#allocation67_spill] sm:$0xff]  ;;  %v10091_v21 = vld [vmem:[#allocation69_spill] sm:$0xff] }
 0x2cc   : > { %v1305_v13 = vsel %vm1051_vm0, %v10088_v41, %v1304_v17  ;;  %v1522_v16 = vmul.f32 %v8353_v46, %v5494_v8  ;;  %v3565_v61 = vsel %vm3191_vm5, %v3563_v29, %v3564_v18  ;;  %v10090_v51 = vrot.slane %v10089_v31, 1  ;;  %v10093_v1 = vld [vmem:[#allocation55_spill] sm:$0xff] }
 0x2cd   : > { %v3466_v35 = vadd.f32 %v3443_v26, %v3405_v55  ;;  %v1266_v9 = vadd.f32 %v1244_v44, %v1205_v15  ;;  %v1488_v43 = vrot.slane %v1460_v59, 2  ;;  %v1583_v58 = vmul.f32 %v8365_v42, %v10004_v12  ;;  %v10094_v15 = vld [vmem:[#allocation70_spill] sm:$0xff] }
 0x2ce   : > { %v1366_v6 = vsel %vm1051_vm0, %v10090_v51, %v1365_v38  ;;  %v10092_v49 = vrot.slane %v10091_v21, 1  ;;  %v1549_v55 = vrot.slane %v1522_v16, 2  ;;  %v1644_v29 = vmul.f32 %v8381_v32, %v10093_v1  ;;  %v10097_v16 = vld [vmem:[#allocation58_spill] sm:$0xff] }
 0x2cf   : > { %v3527_v11 = vadd.f32 %v3504_v40, %v3466_v35  ;;  %v1327_v26 = vadd.f32 %v1305_v13, %v1266_v9  ;;  %v10095_v38 = vrot.slane %v10094_v15, 2  ;;  %v1610_v35 = vrot.slane %v1583_v58, 2 }
 0x2d0   : > { %v1427_v8 = vsel %vm1051_vm0, %v10092_v49, %v1426_v19  ;;  %v1705_v12 = vmul.f32 %v10080_v54, %v9553_v52  ;;  %v10096_v41 = vrot.slane %v7995_v30, 2  ;;  %v1671_v19 = vrot.slane %v1644_v29, 2 }
 0x2d1   : > { %v3588_v17 = vadd.f32 %v3565_v61, %v3527_v11  ;;  %v1388_v44 = vadd.f32 %v1366_v6, %v1327_v26  ;;  %v1489_v59 = vsel %vm1479_vm1, %v10095_v38, %v1488_v43  ;;  %v1766_v61 = vmul.f32 %v8045_v50, %v10097_v16  ;;  %v10098_v11 = vld [vmem:[#allocation74_spill] sm:$0xff]  ;;  %v10100_v43 = vld [vmem:[#allocation59_spill] sm:$0xff] }
 0x2d2   : > { %v1550_v13 = vsel %vm1479_vm1, %v10096_v41, %v1549_v55  ;;  %v10099_v31 = vrot.slane %v10098_v11, 2  ;;  %v1732_v6 = vrot.slane %v1705_v12, 2  ;;  %v1827_v52 = vmul.f32 %v8415_v48, %v10100_v43  ;;  %v10109_v11 = vld [vmem:[#allocation71_spill] sm:$0xff] }
 0x2d3   : > { %v8453_v40 = vadd.f32 %v8158_v56, %v3588_v17  ;;  %v1449_v4 = vadd.f32 %v1427_v8, %v1388_v44  ;;  %v10101_v26 = vrot.slane %v8018_v27, 2  ;;  %v1793_v17 = vrot.slane %v1766_v61, 2  ;;  %v10102_v8 = vld [vmem:[#allocation75_spill] sm:$0xff] }
 0x2d4   : > { %v1611_v51 = vsel %vm1479_vm1, %v10099_v31, %v1610_v35  ;;  %v1888_v21 = vmul.f32 %v8427_v37, %v9561_v34  ;;  %v10103_v55 = vrot.slane %v10102_v8, 2  ;;  %v1854_v29 = vrot.slane %v1827_v52, 2  ;;  %v10105_v34 = vld [vmem:[#allocation77_spill] sm:$0xff] }
 0x2d5   : > { %3610 = vadd.xlane.f32.xlu0 %v8453_v40  ;;  %v1511_v9 = vadd.f32 %v1489_v59, %v1449_v4  ;;  %v1672_v30 = vsel %vm1479_vm1, %v10101_v26, %v1671_v19  ;;  %v1950_v44 = vmul.f32 %v8353_v46, %v9563_v0  ;;  %v10104_v38 = vrot.slane %v8037_v2, 2  ;;  %v10107_v19 = vld [vmem:[#allocation68_spill] sm:$0xff] }
 0x2d6   : > { %v1733_v1 = vsel %vm1479_vm1, %v10103_v55, %v1732_v6  ;;  %v1916_v59 = vrot.slane %v1888_v21, 3  ;;  %v2011_v35 = vmul.f32 %v8365_v42, %v9565_v62  ;;  %v10106_v4 = vrot.slane %v10105_v34, 2  ;;  %v10110_v62 = vld [vmem:[#allocation79_spill] sm:$0xff] }
 0x2d7   : > { %v1572_v58 = vadd.f32 %v1550_v13, %v1511_v9  ;;  %v1794_v27 = vsel %vm1479_vm1, %v10104_v38, %v1793_v17  ;;  %v1977_v13 = vrot.slane %v1950_v44, 3  ;;  %v2072_v16 = vmul.f32 %v8381_v32, %v10107_v19  ;;  %v10120_v19 = vld [vmem:[#allocation80_spill] sm:$0xff] }
 0x2d8   : > { %v1855_v41 = vsel %vm1479_vm1, %v10106_v4, %v1854_v29  ;;  %v10108_v0 = vrot.slane %v8070_v10, 3  ;;  %v2038_v9 = vrot.slane %v2011_v35, 3  ;;  %v2133_v31 = vmul.f32 %v10080_v54, %v10109_v11  ;;  %v10117_v35 = vld [vmem:[#allocation78_spill] sm:$0xff]  ;;  %v10118_v4 = vld [vmem:[#allocation81_spill] sm:$0xff] }
 0x2d9   : > { %v1633_v49 = vadd.f32 %v1611_v51, %v1572_v58  ;;  %v10111_v6 = vrot.slane %v10110_v62, 3  ;;  %v2099_v52 = vrot.slane %v2072_v16, 3  ;;  %v10112_v58 = vld [vmem:[#allocation72_spill] sm:$0xff]  ;;  %v10113_v17 = vrot.slane %v8097_v25, 3 }
 0x2da   : > { %v1917_v2 = vsel %vm1907_vm2, %v10108_v0, %v1916_v59  ;;  %v2194_v26 = vmul.f32 %v8045_v50, %v10112_v58  ;;  %v2160_v21 = vrot.slane %v2133_v31, 3  ;;  %v2439_v16 = vmul.f32 %v8365_v42, %v10120_v19 }
 0x2db   : > { %v1694_v15 = vadd.f32 %v1672_v30, %v1633_v49  ;;  %v1978_v43 = vsel %vm1907_vm2, %v10111_v6, %v1977_v13  ;;  %v2039_v10 = vsel %vm1907_vm2, %v10113_v17, %v2038_v9  ;;  %v10114_v49 = vld [vmem:[#allocation73_spill] sm:$0xff]  ;;  %v10123_v9 = vld [vmem:[#allocation82_spill] sm:$0xff] }
 0x2dc   : > { %v2255_v8 = vmul.f32 %v8415_v48, %v10114_v49  ;;  %v2221_v44 = vrot.slane %v2194_v26, 3  ;;  %v2500_v11 = vmul.f32 %v8381_v32, %v10123_v9  ;;  %v10129_v49 = vld [vmem:[#allocation87_spill] sm:$0xff]  ;;  %v10139_v9 = vld [vmem:[#allocation94_spill] sm:$0xff] }
 0x2dd   : > { %v1755_v12 = vadd.f32 %v1733_v1, %v1694_v15  ;;  %v10115_v1 = vrot.slane %v8104_v28, 3  ;;  %v2316_v15 = vmul.f32 %v8427_v37, %v10029_v24  ;;  %v10121_v24 = vld [vmem:[#allocation84_spill] sm:$0xff] }
 0x2de   : > { %v2282_v59 = vrot.slane %v2255_v8, 3  ;;  %v10122_v0 = vrot.slane %v10121_v24, 3  ;;  %v2622_v8 = vmul.f32 %v8045_v50, %v10129_v49  ;;  %v3615_v49 = vpop.xlane.xlu0 %3614 }
 0x2df   : > { %v1816_v61 = vadd.f32 %v1794_v27, %v1755_v12  ;;  %v2100_v29 = vsel %vm1907_vm2, %v10115_v1, %v2099_v52  ;;  %v10116_v27 = vrot.slane %v8120_v63, 3  ;;  %v2378_v12 = vmul.f32 %v8353_v46, %v10117_v35  ;;  %v10126_v52 = vld [vmem:[#allocation83_spill] sm:$0xff] }
 0x2e0   : > { %v2344_v13 = vrot.slane %v2316_v15, 4  ;;  %v2283_v63 = vsel %vm1907_vm2, %v10122_v0, %v2282_v59  ;;  %v2561_v58 = vmul.f32 %v10080_v54, %v10126_v52  ;;  %v10130_v1 = vld [vmem:[#allocation91_spill] sm:$0xff]  ;;  %v10133_v59 = vrot.slane %v8194_v45, 4  ;;  %v10137_v0 = vld [vmem:[#allocation93_spill] sm:$0xff] }
 0x2e1   : > { %v1877_v51 = vadd.f32 %v1855_v41, %v1816_v61  ;;  %v2161_v25 = vsel %vm1907_vm2, %v10116_v27, %v2160_v21  ;;  %v10119_v41 = vrot.slane %v10118_v4, 3  ;;  %v2527_v21 = vrot.slane %v2500_v11, 4 }
 0x2e2   : > { %v2588_v15 = vrot.slane %v2561_v58, 4  ;;  %v2867_v11 = vmul.f32 %v8365_v42, %v10139_v9  ;;  %v10142_v58 = vrot.slane %v8230_v22, 5 }
 0x2e3   : > { %v1939_v30 = vadd.f32 %v1917_v2, %v1877_v51  ;;  %v2222_v28 = vsel %vm1907_vm2, %v10119_v41, %v2221_v44  ;;  %v2405_v2 = vrot.slane %v2378_v12, 4  ;;  %v10124_v51 = vld [vmem:[#allocation85_spill] sm:$0xff]  ;;  %v2528_v35 = vsel %vm2335_vm3, %v10133_v59, %v2527_v21 }
 0x2e4   : > { %v10125_v62 = vrot.slane %v10124_v51, 4  ;;  %v2649_v12 = vrot.slane %v2622_v8, 4  ;;  %v10140_v51 = vrot.slane %v8221_v23, 4  ;;  %v3638_v8 = vlaneseq }
 0x2e5   : > { %v2000_v55 = vadd.f32 %v1978_v43, %v1939_v30  ;;  %v2466_v43 = vrot.slane %v2439_v16, 4  ;;  %v10127_v30 = vld [vmem:[#allocation90_spill] sm:$0xff]  ;;  %v10136_v16 = vld [vmem:[#allocation92_spill] sm:$0xff] }
 0x2e6   : > { %v2345_v6 = vsel %vm2335_vm3, %v10125_v62, %v2344_v13  ;;  %v10128_v17 = vrot.slane %v10127_v30, 4  ;;  %v2894_v30 = vrot.slane %v2867_v11, 5  ;;  %v8571_v22 = vand.u32 127, %v3638_v8 }
 0x2e7   : > { %v2061_v38 = vadd.f32 %v2039_v10, %v2000_v55 }
 0x2e8   : > { %v2406_v10 = vsel %vm2335_vm3, %v10128_v17, %v2405_v2  ;;  %v10143_v17 = vld [vmem:[#allocation99_spill] sm:$0xff]  ;;  %vm3640_vm6 = vcmp.lt.s32.totalorder %v8571_v22, 4  ;;  %v4621_v22 = vld [vmem:[%s8877_s4 + $0x10] sm:$0xff] }
 0x2e9   : > { %v2122_v34 = vadd.f32 %v2100_v29, %v2061_v38  ;;  %v10131_v29 = vrot.slane %v10130_v1, 4  ;;  %v10132_v38 = vld [vmem:[#allocation88_spill] sm:$0xff] }
 0x2ea   : > { %v2683_v27 = vmul.f32 %v8415_v48, %v10132_v38  ;;  %v3626_v38 = vmul.f32 0.25, %v3615_v49 }
 0x2eb   : > { %v2183_v61 = vadd.f32 %v2161_v25, %v2122_v34  ;;  %v2467_v44 = vsel %vm2335_vm3, %v10131_v29, %v2466_v43  ;;  %v10134_v34 = vld [vmem:[#allocation89_spill] sm:$0xff] }
 0x2ec   : > { %v2744_v4 = vmul.f32 %v8427_v37, %v10134_v34  ;;  %v2710_v19 = vrot.slane %v2683_v27, 4 }
 0x2ed   : > { %v2244_v31 = vadd.f32 %v2222_v28, %v2183_v61  ;;  %v10135_v28 = vrot.slane %v8200_v3, 4  ;;  %v2806_v61 = vmul.f32 %v8353_v46, %v10136_v16 }
 0x2ee   : > { %v2772_v2 = vrot.slane %v2744_v4, 5  ;;  %v2711_v3 = vsel %vm2335_vm3, %v10140_v51, %v2710_v19  ;;  %v10149_v4 = vld [vmem:[#allocation126_spill] sm:$0xff]  ;;  %v10155_v51 = vld [vmem:[#allocation107_spill] sm:$0xff] }
 0x2ef   : > { %v2305_v26 = vadd.f32 %v2283_v63, %v2244_v31  ;;  %v2589_v13 = vsel %vm2335_vm3, %v10135_v28, %v2588_v15  ;;  %v10138_v63 = vrot.slane %v10137_v0, 4  ;;  %v2833_v62 = vrot.slane %v2806_v61, 5 }
 0x2f1   : > { %v2367_v55 = vadd.f32 %v2345_v6, %v2305_v26  ;;  %v2650_v45 = vsel %vm2335_vm3, %v10138_v63, %v2649_v12  ;;  %v10141_v6 = vld [vmem:[#allocation96_spill] sm:$0xff]  ;;  %v2773_v26 = vsel %vm2763_vm4, %v10142_v58, %v2772_v2  ;;  %v10148_v12 = vld [vmem:[#allocation103_spill] sm:$0xff]  ;;  %v10153_v2 = vld [vmem:[#allocation98_spill] sm:$0xff] }
 0x2f2   : > { %v2928_v43 = vmul.f32 %v8381_v32, %v10141_v6  ;;  %v3111_v34 = vmul.f32 %v8415_v48, %v10148_v12  ;;  %v10154_v9 = vrot.slane %v10153_v2, 5  ;;  %v3617_v6 = vpop.xlane.xlu0 %3616  ;;  %v3607_v2 = vpop.xlane.xlu1 %3606 }
 0x2f3   : > { %v2428_v25 = vadd.f32 %v2406_v10, %v2367_v55  ;;  %v2989_v10 = vmul.f32 %v10080_v54, %v10143_v17  ;;  %v10144_v55 = vld [vmem:[#allocation95_spill] sm:$0xff]  ;;  %v3627_v17 = vmul.f32 0.25, %v3617_v6 }
 0x2f4   : > { %v10145_v23 = vrot.slane %v10144_v55, 5  ;;  %v2955_v29 = vrot.slane %v2928_v43, 5  ;;  %v10156_v43 = vld [vmem:[#allocation101_spill] sm:$0xff]  ;;  %v10160_v55 = vld [vmem:[#allocation54_spill] sm:$0xff] }
 0x2f5   : > { %v2489_v41 = vadd.f32 %v2467_v44, %v2428_v25  ;;  %v10146_v44 = vld [vmem:[#allocation100_spill] sm:$0xff]  ;;  %v10147_v25 = vrot.slane %v8254_v20, 5 }
 0x2f6   : > { %v2834_v1 = vsel %vm2763_vm4, %v10145_v23, %v2833_v62  ;;  %v3050_v15 = vmul.f32 %v8045_v50, %v10146_v44  ;;  %v8606_v23 = vsub.f32 %v10160_v55, %v3627_v17 }
 0x2f7   : > { %v2550_v24 = vadd.f32 %v2528_v35, %v2489_v41  ;;  %v2895_v59 = vsel %vm2763_vm4, %v10147_v25, %v2894_v30  ;;  %v3016_v35 = vrot.slane %v2989_v10, 5  ;;  %v8579_v41 = vsub.f32 %v10149_v4, %v3626_v38 }
 0x2f8   : > { %v3077_v61 = vrot.slane %v3050_v15, 5 }
 0x2f9   : > { %v2611_v31 = vadd.f32 %v2589_v13, %v2550_v24  ;;  %v10150_v13 = vld [vmem:[#allocation97_spill] sm:$0xff]  ;;  %v10152_v24 = vld [vmem:[#allocation104_spill] sm:$0xff]  ;;  %v3647_v0 = vsel %vm3640_vm6, %v8579_v41, 0.0  ;;  %v3017_v11 = vsel %vm2763_vm4, %v10154_v9, %v3016_v35  ;;  %v10164_v35 = vld [vmem:[#allocation102_spill] sm:$0xff] }
 0x2fa   : > { %v10151_v19 = vrot.slane %v10150_v13, 5  ;;  %v3172_v20 = vmul.f32 %v8427_v37, %v10152_v24 }
 0x2fb   : > { %v2672_v52 = vadd.f32 %v2650_v45, %v2611_v31  ;;  %v3655_v45 = vmul.f32 %v3647_v0, %v3647_v0  ;;  %v3138_v31 = vrot.slane %v3111_v34, 5  ;;  %v3478_v34 = vmul.f32 %v8045_v50, %v10073_v47 }
 0x2fc   : > { %v2956_v16 = vsel %vm2763_vm4, %v10151_v19, %v2955_v29  ;;  %v3200_v58 = vrot.slane %v3172_v20, 6  ;;  %v10161_v29 = vld [vmem:[#allocation153_spill] sm:$0xff] }
 0x2fd   : > { %v2733_v21 = vadd.f32 %v2711_v3, %v2672_v52  ;;  %v3234_v3 = vmul.f32 %v8353_v46, %v10155_v51  ;;  %3667 = vadd.xlane.f32.xlu2 %v3655_v45  ;;  %v10157_v52 = vrot.slane %v10156_v43, 5  ;;  %v3356_v46 = vmul.f32 %v8381_v32, %v10064_v33  ;;  %v10169_v51 = vld [vmem:[#allocation49_spill] sm:$0xff] }
 0x2fe   : > { %v10162_v44 = vrot.slane %v10161_v29, 6  ;;  %v10165_v33 = vrot.slane %v10164_v35, 6  ;;  %v3505_v20 = vrot.slane %v3478_v34, 6  ;;  %v4623_v35 = vld [vmem:[%s8877_s4 + $0x20] sm:$0xff] }
 0x2ff   : > { %v2795_v27 = vadd.f32 %v2773_v26, %v2733_v21  ;;  %v3078_v37 = vsel %vm2763_vm4, %v10157_v52, %v3077_v61  ;;  %v10158_v26 = vld [vmem:[#allocation108_spill] sm:$0xff]  ;;  %v10159_v21 = vrot.slane %v8288_v53, 5  ;;  %v3261_v8 = vrot.slane %v3234_v3, 6 }
 0x300   : > { %v3295_v30 = vmul.f32 %v8365_v42, %v10158_v26  ;;  %v3201_v15 = vsel %vm3191_vm5, %v10162_v44, %v3200_v58  ;;  %v10163_v42 = vld [vmem:[#allocation110_spill] sm:$0xff]  ;;  %v3648_v53 = vsel %vm3640_vm6, %v8606_v23, 0.0  ;;  %v3383_v12 = vrot.slane %v3356_v46, 6  ;;  %v10171_v58 = vld [vmem:[#allocation53_spill] sm:$0xff] }
 0x301   : > { %v2856_v28 = vadd.f32 %v2834_v1, %v2795_v27  ;;  %v3139_v49 = vsel %vm2763_vm4, %v10159_v21, %v3138_v31  ;;  %v3417_v27 = vmul.f32 %v10080_v54, %v10163_v42  ;;  %v3262_v32 = vsel %vm3191_vm5, %v10165_v33, %v3261_v8  ;;  %v4625_v42 = vld [vmem:[%s8877_s4 + $0x30] sm:$0xff] }
 0x302   : > { %v3322_v38 = vrot.slane %v3295_v30, 6  ;;  %v3384_v24 = vsel %vm3191_vm5, %v3381_v7, %v3383_v12  ;;  %v3506_v9 = vsel %vm3191_vm5, %v3503_v39, %v3505_v20  ;;  %v3622_v7 = vmul.f32 0.25, %v3607_v2  ;;  %v10172_v30 = vld [vmem:[#allocation86_spill] sm:$0xff] }
 0x303   : > { %v2917_v63 = vadd.f32 %v2895_v59, %v2856_v28  ;;  %v3656_v59 = vmul.f32 %v3648_v53, %v3648_v53  ;;  %v10166_v28 = vld [vmem:[#allocation155_spill] sm:$0xff]  ;;  %v3444_v19 = vrot.slane %v3417_v27, 6 }
 0x304   : > { %v10167_v13 = vrot.slane %v10166_v28, 6 }
 0x305   : > { %v2978_v62 = vadd.f32 %v2956_v16, %v2917_v63  ;;  %3669 = vadd.xlane.f32.xlu0 %v3656_v59  ;;  %v3539_v16 = vmul.f32 %v8415_v48, %v8042_v60  ;;  %v10168_v63 = vrot.slane %v8371_v57, 6  ;;  %v3619_v60 = vpop.xlane.xlu2 %3618  ;;  %v8639_v57 = vsub.f32 %v10169_v51, %v3622_v7 }
 0x306   : > { %v3323_v54 = vsel %vm3191_vm5, %v10167_v13, %v3322_v38  ;;  %v3628_v43 = vmul.f32 0.25, %v3619_v60  ;;  %v4626_v38 = vld [vmem:[%s8877_s4 + $0x38] sm:$0xff] }
 0x307   : > { %v3039_v10 = vadd.f32 %v3017_v11, %v2978_v62  ;;  %v3445_v50 = vsel %vm3191_vm5, %v10168_v63, %v3444_v19  ;;  %v3566_v47 = vrot.slane %v3539_v16, 6  ;;  %v3643_v14 = vsel %vm3640_vm6, %v8639_v57, 0.0  ;;  %3851 = vmatpush.bf16.msra.mxu0 %v4626_v38  ;;  %4636 = vmatpush.bf16.msra.mxu2 %v4626_v38  ;;  %v4620_v38 = vld [vmem:[%s8877_s4 + $0x8] sm:$0xff] }
 0x308   : > { %v3651_v6 = vmul.f32 %v3643_v14, %v3643_v14 }
 0x309   : > { %v3100_v1 = vadd.f32 %v3078_v37, %v3039_v10  ;;  %v3567_v5 = vsel %vm3191_vm5, %v3564_v18, %v3566_v47  ;;  %v10170_v18 = vld [vmem:[#allocation130_spill] sm:$0xff] }
 0x30a   : > { %v8646_v37 = vsub.f32 %v10170_v18, %v3628_v43 }
 0x30b   : > { %v3161_v25 = vadd.f32 %v3139_v49, %v3100_v1  ;;  %3852 = vmatpush.bf16.msra.mxu0 %v4625_v42  ;;  %4637 = vmatpush.bf16.msra.mxu2 %v4625_v42 }
 0x30c   : > { %v3649_v21 = vsel %vm3640_vm6, %v8646_v37, 0.0 }
 0x30d   : > { %v3223_v4 = vadd.f32 %v3201_v15, %v3161_v25  ;;  %v3621_v39 = vpop.xlane.xlu2 %3620  ;;  %v3657_v46 = vmul.f32 %v3649_v21, %v3649_v21  ;;  %v4624_v25 = vld [vmem:[%s8877_s4 + $0x28] sm:$0xff] }
 0x30e   : > { %v3629_v36 = vmul.f32 0.25, %v3621_v39 }
 0x30f   : > { %v3284_v61 = vadd.f32 %v3262_v32, %v3223_v4  ;;  %3671 = vadd.xlane.f32.xlu0 %v3657_v46  ;;  %3853 = vmatpush.bf16.msra.mxu0 %v4624_v25  ;;  %v4622_v32 = vld [vmem:[%s8877_s4 + $0x18] sm:$0xff] }
 0x310   : > { %v8649_v26 = vsub.f32 %v10171_v58, %v3629_v36  ;;  %4638 = vmatpush.bf16.msra.mxu2 %v4624_v25 }
 0x311   : > { %v3345_v0 = vadd.f32 %v3323_v54, %v3284_v61 }
 0x312   : > { %v3650_v17 = vsel %vm3640_vm6, %v8649_v26, 0.0 }
 0x313   : > { %v3406_v45 = vadd.f32 %v3384_v24, %v3345_v0  ;;  %v3609_v62 = vpop.xlane.xlu1 %3608  ;;  %v3658_v49 = vmul.f32 %v3650_v17, %v3650_v17  ;;  %3854 = vmatpush.bf16.msra.mxu0 %v4623_v35 }
 0x314   : > { %v3623_v52 = vmul.f32 0.25, %v3609_v62  ;;  %4639 = vmatpush.bf16.msra.mxu2 %v4623_v35 }
 0x315   : > { %v3467_v11 = vadd.f32 %v3445_v50, %v3406_v45 }
 0x317   : > { %v3528_v48 = vadd.f32 %v3506_v9, %v3467_v11  ;;  %3855 = vmatpush.bf16.msra.mxu0 %v4622_v32 }
 0x318   : > { %4640 = vmatpush.bf16.msra.mxu2 %v4622_v32  ;;  %v4619_v32 = vld [vmem:[%s8877_s4] sm:$0xff] }
 0x319   : > { %v3589_v31 = vadd.f32 %v3567_v5, %v3528_v48 }
 0x31b   : > { %v3601_v3 = vadd.f32 %v8158_v56, %v3589_v31  ;;  %v8652_v56 = vsub.f32 %v10172_v30, %v3623_v52  ;;  %3856 = vmatpush.bf16.msra.mxu0 %v4621_v22 }
 0x31c   : > { %4641 = vmatpush.bf16.msra.mxu2 %v4621_v22 }
 0x31d   : > { %3612 = vadd.xlane.f32.xlu1 %v3601_v3  ;;  %v3644_v10 = vsel %vm3640_vm6, %v8652_v56, 0.0 }
 0x31e   : > { %v3652_v8 = vmul.f32 %v3644_v10, %v3644_v10 }
 0x31f   : > { %3857 = vmatpush.bf16.msra.mxu0 %v4620_v38 }
 0x320   : > { %3661 = vadd.xlane.f32.xlu2 %v3652_v8  ;;  %4642 = vmatpush.bf16.msra.mxu2 %v4620_v38 }
 0x323   : > { %3858 = vmatpush.bf16.msra.mxu0 %v4619_v32 }
 0x324   : > { %4643 = vmatpush.bf16.msra.mxu2 %v4619_v32 }
 0x325   : > { %3659 = vadd.xlane.f32.xlu1 %v3651_v6 }
 0x32d   : > { %3673 = vadd.xlane.f32.xlu1 %v3658_v49 }
 0x348   : > { %v3611_v55 = vpop.xlane.xlu0 %3610 }
 0x349   : > { %v3624_v1 = vmul.f32 0.25, %v3611_v55 }
 0x34b   : > { %v8664_v29 = vsub.f32 %v8453_v40, %v3624_v1 }
 0x34d   : > { %v3645_v44 = vsel %vm3640_vm6, %v8664_v29, 0.0 }
 0x34e   : > { %v3653_v15 = vmul.f32 %v3645_v44, %v3645_v44 }
 0x350   : > { %3663 = vadd.xlane.f32.xlu2 %v3653_v15 }
 0x370   : > { %v3668_v12 = vpop.xlane.xlu2 %3667 }
 0x371   : > { %v3679_v28 = vmul.f32 0.25, %v3668_v12 }
 0x373   : > { %v3687_v61 = vadd.f32 1e-06, %v3679_v28 }
 0x375   : > { %vm3737_vm11 = vweird.f32 %v3687_v61 }
 0x378   : > { %v3670_v13 = vpop.xlane.xlu0 %3669 }
 0x379   : > { %v3680_v16 = vmul.f32 0.25, %v3670_v13 }
 0x37b   : > { %v3688_v20 = vadd.f32 1e-06, %v3680_v16 }
 0x37d   : > { %vm3747_vm0 = vweird.f32 %v3688_v20 }
 0x382   : > { %v3672_v63 = vpop.xlane.xlu0 %3671 }
 0x383   : > { %v3681_v2 = vmul.f32 0.25, %v3672_v63 }
 0x385   : > { %v8692_v48 = vadd.f32 1e-06, %v3681_v2 }
 0x390   : > { %v3613_v27 = vpop.xlane.xlu1 %3612 }
 0x391   : > { %v3625_v40 = vmul.f32 0.25, %v3613_v27 }
 0x393   : > { %v8675_v53 = vsub.f32 %v3601_v3, %v3625_v40  ;;  %v3662_v54 = vpop.xlane.xlu2 %3661 }
 0x394   : > { %v3676_v24 = vmul.f32 0.25, %v3662_v54 }
 0x395   : > { %v3646_v59 = vsel %vm3640_vm6, %v8675_v53, 0.0 }
 0x396   : > { %v3654_v33 = vmul.f32 %v3646_v59, %v3646_v59  ;;  %v3684_v0 = vadd.f32 1e-06, %v3676_v24 }
 0x398   : > { %3665 = vadd.xlane.f32.xlu0 %v3654_v33  ;;  %v3660_v34 = vpop.xlane.xlu1 %3659  ;;  %vm3707_vm13 = vweird.f32 %v3684_v0 }
 0x399   : > { %v3675_v4 = vmul.f32 0.25, %v3660_v34 }
 0x39b   : > { %v3683_v19 = vadd.f32 1e-06, %v3675_v4 }
 0x39d   : > { %4729 = vrsqrt.f32 %v3683_v19  ;;  %vm3697_vm7 = vweird.f32 %v3683_v19 }
 0x39e   : > { %4731 = vrsqrt.f32 %v3687_v61 }
 0x39f   : > { %4733 = vrsqrt.f32 %v3688_v20 }
 0x3a0   : > { %4735 = vrsqrt.f32 %v3684_v0  ;;  %v3674_v50 = vpop.xlane.xlu1 %3673 }
 0x3a1   : > { %v3682_v9 = vmul.f32 0.25, %v3674_v50  ;;  %4737 = vrsqrt.f32 %v8692_v48 }
 0x3a3   : > { %v4730_v47 = vpop.eup %4729  ;;  %v8694_v31 = vadd.f32 1e-06, %v3682_v9 }
 0x3a4   : > { %v4732_v45 = vpop.eup %4731  ;;  %v3692_v11 = vmul.f32 %v4730_v47, %v3683_v19  ;;  %vm3698_vm8 = vweird.f32 %v4730_v47 }
 0x3a5   : > { %v4734_v60 = vpop.eup %4733  ;;  %v3732_v5 = vmul.f32 %v4732_v45, %v3687_v61  ;;  %4739 = vrsqrt.f32 %v8694_v31  ;;  %vm3738_vm9 = vweird.f32 %v4732_v45  ;;  %vm8706_vm12 = vmor %vm3697_vm7, %vm3698_vm8  ;;  %vm3767_vm4 = vweird.f32 %v8694_v31 }
 0x3a6   : > { %v4736_v7 = vpop.eup %4735  ;;  %v3693_v51 = vmul.f32 %v4730_v47, %v3692_v11  ;;  %v3742_v14 = vmul.f32 %v4734_v60, %v3688_v20  ;;  %vm3748_vm10 = vweird.f32 %v4734_v60  ;;  %vm8714_vm15 = vmor %vm3737_vm11, %vm3738_vm9  ;;  %vm3757_vm8 = vweird.f32 %v8692_v48 }
 0x3a7   : > { %v3733_v3 = vmul.f32 %v4732_v45, %v3732_v5  ;;  %v3702_v39 = vmul.f32 %v4736_v7, %v3684_v0  ;;  %v8698_v52 = vpop.eup %4737  ;;  %vm3708_vm14 = vweird.f32 %v4736_v7  ;;  %vm3749_vm1 = vmor %vm3747_vm0, %vm3748_vm10 }
 0x3a8   : > { %v3694_v62 = vmul.f32 0.5, %v3693_v51  ;;  %v3743_v43 = vmul.f32 %v4734_v60, %v3742_v14  ;;  %v3752_v21 = vmul.f32 %v8698_v52, %v8692_v48  ;;  %vm3709_vm3 = vmor %vm3707_vm13, %vm3708_vm14  ;;  %vm3758_vm6 = vweird.f32 %v8698_v52 }
 0x3a9   : > { %v3734_v6 = vmul.f32 0.5, %v3733_v3  ;;  %v3703_v36 = vmul.f32 %v4736_v7, %v3702_v39  ;;  %vm3759_vm9 = vmor %vm3757_vm8, %vm3758_vm6 }
 0x3aa   : > { %v3695_v18 = vsub.f32 1.5, %v3694_v62  ;;  %v3744_v17 = vmul.f32 0.5, %v3743_v43  ;;  %v3753_v15 = vmul.f32 %v8698_v52, %v3752_v21 }
 0x3ab   : > { %v8700_v58 = vpop.eup %4739  ;;  %v3735_v30 = vsub.f32 1.5, %v3734_v6  ;;  %v3704_v10 = vmul.f32 0.5, %v3703_v36 }
 0x3ac   : > { %v3762_v49 = vmul.f32 %v8700_v58, %v8694_v31  ;;  %v3696_v8 = vmul.f32 %v4730_v47, %v3695_v18  ;;  %v3745_v46 = vsub.f32 1.5, %v3744_v17  ;;  %v3754_v33 = vmul.f32 0.5, %v3753_v15  ;;  %v4632_v17 = vld [vmem:[%s8879_s6 + $0x28] sm:$0xff] }
 0x3ad   : > { %v3705_v55 = vsub.f32 1.5, %v3704_v10  ;;  %v3736_v1 = vmul.f32 %v4732_v45, %v3735_v30  ;;  %vm3768_vm5 = vweird.f32 %v8700_v58  ;;  %v4633_v30 = vld [vmem:[%s8879_s6 + $0x30] sm:$0xff] }
 0x3ae   : > { %v3763_v27 = vmul.f32 %v8700_v58, %v3762_v49  ;;  %v3700_v40 = vsel %vm8706_vm12, %v4730_v47, %v3696_v8  ;;  %v3746_v35 = vmul.f32 %v4734_v60, %v3745_v46  ;;  %v3755_v61 = vsub.f32 1.5, %v3754_v33  ;;  %vm3769_vm7 = vmor %vm3767_vm4, %vm3768_vm5 }
 0x3af   : > { %v3706_v25 = vmul.f32 %v4736_v7, %v3705_v55  ;;  %v3740_v59 = vsel %vm8714_vm15, %v4732_v45, %v3736_v1  ;;  %v3771_v34 = vmul.f32 %v3700_v40, %v8639_v57 }
 0x3b0   : > { %v3750_v12 = vsel %vm3749_vm1, %v4734_v60, %v3746_v35  ;;  %v3775_v28 = vmul.f32 %v3740_v59, %v8579_v41  ;;  %v3764_v54 = vmul.f32 0.5, %v3763_v27  ;;  %v3756_v41 = vmul.f32 %v8698_v52, %v3755_v61 }
 0x3b1   : > { %v3710_v22 = vsel %vm3709_vm3, %v4736_v7, %v3706_v25  ;;  %v3776_v13 = vmul.f32 %v3750_v12, %v8606_v23  ;;  %v4631_v12 = vld [vmem:[%s8879_s6 + $0x20] sm:$0xff] }
 0x3b2   : > { %v3772_v4 = vmul.f32 %v3710_v22, %v8652_v56  ;;  %v3765_v24 = vsub.f32 1.5, %v3764_v54  ;;  %v3760_v56 = vsel %vm3759_vm9, %v8698_v52, %v3756_v41  ;;  %v4630_v54 = vld [vmem:[%s8879_s6 + $0x18] sm:$0xff] }
 0x3b3   : > { %v3781_v16 = vpack.c.bf16 %v3776_v13, %v3775_v28  ;;  %v3777_v50 = vmul.f32 %v3760_v56, %v8646_v37 }
 0x3b4   : > { %v3779_v19 = vpack.c.bf16 %v3772_v4, %v3771_v34  ;;  %v3766_v23 = vmul.f32 %v8700_v58, %v3765_v24 }
 0x3b5   : > { %3869 = vmatmul.bf16.vlgmr.msra.gmra.mxu2 %v3781_v16 }
 0x3b6   : > { %3859 = vmatmul.bf16.vlgmr.msra.gmra.mxu0 %v3779_v19  ;;  %v3770_v63 = vsel %vm3769_vm7, %v8700_v58, %v3766_v23  ;;  %v4634_v58 = vld [vmem:[%s8879_s6 + $0x38] sm:$0xff] }
 0x3b7   : > { %v3778_v47 = vmul.f32 %v3770_v63, %v8649_v26  ;;  %4024 = vmatpush.bf16.msra.mxu1 %v4634_v58  ;;  %4644 = vmatpush.bf16.msra.mxu3 %v4634_v58 }
 0x3b9   : > { %v3782_v45 = vpack.c.bf16 %v3778_v47, %v3777_v50 }
 0x3bb   : > { %4025 = vmatpush.bf16.msra.mxu1 %v4633_v30  ;;  %4645 = vmatpush.bf16.msra.mxu3 %v4633_v30 }
 0x3bf   : > { %4026 = vmatpush.bf16.msra.mxu1 %v4632_v17  ;;  %4646 = vmatpush.bf16.msra.mxu3 %v4632_v17 }
 0x3c3   : > { %v3664_v20 = vpop.xlane.xlu2 %3663  ;;  %4027 = vmatpush.bf16.msra.mxu1 %v4631_v12  ;;  %4647 = vmatpush.bf16.msra.mxu3 %v4631_v12 }
 0x3c4   : > { %v3677_v57 = vmul.f32 0.25, %v3664_v20 }
 0x3c5   : > { %3874 = vmatmul.bf16.gmra.mxu2 %v3782_v45  ;;  %v4628_v45 = vld [vmem:[%s8879_s6 + $0x8] sm:$0xff] }
 0x3c6   : > { %v3685_v0 = vadd.f32 1e-06, %v3677_v57  ;;  %v4629_v57 = vld [vmem:[%s8879_s6 + $0x10] sm:$0xff] }
 0x3c7   : > { %4028 = vmatpush.bf16.msra.mxu1 %v4630_v54  ;;  %4648 = vmatpush.bf16.msra.mxu3 %v4630_v54 }
 0x3c8   : > { %4741 = vrsqrt.f32 %v3685_v0  ;;  %vm3717_vm10 = vweird.f32 %v3685_v0 }
 0x3cb   : > { %4029 = vmatpush.bf16.msra.mxu1 %v4629_v57  ;;  %4649 = vmatpush.bf16.msra.mxu3 %v4629_v57 }
 0x3ce   : > { %v4742_v2 = vpop.eup %4741 }
 0x3cf   : > { %v3712_v9 = vmul.f32 %v4742_v2, %v3685_v0  ;;  %vm3718_vm11 = vweird.f32 %v4742_v2  ;;  %4030 = vmatpush.bf16.msra.mxu1 %v4628_v45  ;;  %4650 = vmatpush.bf16.msra.mxu3 %v4628_v45 }
 0x3d0   : > { %vm3719_vm12 = vmor %vm3717_vm10, %vm3718_vm11 }
 0x3d1   : > { %v3713_v7 = vmul.f32 %v4742_v2, %v3712_v9 }
 0x3d3   : > { %v3714_v48 = vmul.f32 0.5, %v3713_v7 }
 0x3d5   : > { %v3715_v51 = vsub.f32 1.5, %v3714_v48 }
 0x3d7   : > { %v3716_v39 = vmul.f32 %v4742_v2, %v3715_v51  ;;  %v4627_v51 = vld [vmem:[%s8879_s6] sm:$0xff] }
 0x3d8   : > { %4031 = vmatpush.bf16.msra.mxu1 %v4627_v51  ;;  %4651 = vmatpush.bf16.msra.mxu3 %v4627_v51  ;;  %v4806_v51 = vld [vmem:[%s5327_s19 + $0x80] sm:$0xff] }
 0x3d9   : > { %v3720_v62 = vsel %vm3719_vm12, %v4742_v2, %v3716_v39 }
 0x3da   : > { %v3773_v36 = vmul.f32 %v3720_v62, %v8664_v29  ;;  %v8754_v29 = vld [vmem:[%s8878_s5] ss:$0 sm:$0xff] }
 0x40b   : > { %v3666_v11 = vpop.xlane.xlu0 %3665 }
 0x40c   : > { %v3678_v60 = vmul.f32 0.25, %v3666_v11 }
 0x40e   : > { %v3686_v5 = vadd.f32 1e-06, %v3678_v60 }
 0x410   : > { %4743 = vrsqrt.f32 %v3686_v5  ;;  %vm3727_vm13 = vweird.f32 %v3686_v5 }
 0x416   : > { %v4744_v31 = vpop.eup %4743 }
 0x417   : > { %v3722_v3 = vmul.f32 %v4744_v31, %v3686_v5  ;;  %vm3728_vm14 = vweird.f32 %v4744_v31 }
 0x418   : > { %vm3729_vm15 = vmor %vm3727_vm13, %vm3728_vm14 }
 0x419   : > { %v3723_v14 = vmul.f32 %v4744_v31, %v3722_v3 }
 0x41b   : > { %v3724_v37 = vmul.f32 0.5, %v3723_v14 }
 0x41d   : > { %v3725_v26 = vsub.f32 1.5, %v3724_v37 }
 0x41f   : > { %v3726_v6 = vmul.f32 %v4744_v31, %v3725_v26 }
 0x421   : > { %v3730_v43 = vsel %vm3729_vm15, %v4744_v31, %v3726_v6 }
 0x422   : > { %v3774_v52 = vmul.f32 %v3730_v43, %v8675_v53 }
 0x424   : > { %v3780_v18 = vpack.c.bf16 %v3774_v52, %v3773_v36 }
 0x426   : > { %3864 = vmatmul.bf16.gmra.mxu0 %v3780_v18 }
 0x433   : > { %v3860_v53 = vpop.f32.mrf.mxu0 }
 0x434   : > { %v3861_v10 = vadd.f32 %v8754_v29, %v3860_v53 }
 0x436   : > { %v3880_v21 = vmul.f32 %v3861_v10, %v3861_v10 }
 0x438   : > { %v3888_v49 = vmul.f32 %v3880_v21, %v3861_v10  ;;  %v3870_v8 = vpop.f32.mrf.mxu2 }
 0x439   : > { %v8758_v55 = vadd.f32 %v8754_v29, %v3870_v8 }
 0x43a   : > { %v3896_v46 = vmul.f32 0.044715, %v3888_v49 }
 0x43b   : > { %v3862_v1 = vpop.f32.mrf.mxu0  ;;  %v3884_v15 = vmul.f32 %v8758_v55, %v8758_v55 }
 0x43c   : > { %v3904_v44 = vadd.f32 %v3896_v46, %v3861_v10  ;;  %v3863_v38 = vadd.f32 %v8754_v29, %v3862_v1 }
 0x43d   : > { %v3892_v42 = vmul.f32 %v3884_v15, %v8758_v55 }
 0x43e   : > { %v3881_v27 = vmul.f32 %v3863_v38, %v3863_v38  ;;  %v3912_v40 = vmul.f32 0.7978846, %v3904_v44 }
 0x43f   : > { %v3900_v25 = vmul.f32 0.044715, %v3892_v42 }
 0x440   : > { %v3889_v59 = vmul.f32 %v3881_v27, %v3863_v38  ;;  %v3872_v35 = vpop.f32.mrf.mxu2  ;;  %4745 = vtanh.f32 %v3912_v40 }
 0x441   : > { %v3908_v33 = vadd.f32 %v3900_v25, %v8758_v55  ;;  %v3873_v22 = vadd.f32 %v8754_v29, %v3872_v35 }
 0x442   : > { %v3897_v32 = vmul.f32 0.044715, %v3889_v59 }
 0x443   : > { %v3885_v4 = vmul.f32 %v3873_v22, %v3873_v22  ;;  %v3916_v28 = vmul.f32 0.7978846, %v3908_v33 }
 0x444   : > { %v3905_v34 = vadd.f32 %v3897_v32, %v3863_v38 }
 0x445   : > { %v3893_v13 = vmul.f32 %v3885_v4, %v3873_v22  ;;  %4747 = vtanh.f32 %v3916_v28 }
 0x446   : > { %v3913_v19 = vmul.f32 0.7978846, %v3905_v34  ;;  %v4746_v16 = vpop.eup %4745 }
 0x447   : > { %v3901_v61 = vmul.f32 0.044715, %v3893_v13  ;;  %v3928_v23 = vadd.f32 1.0, %v4746_v16 }
 0x448   : > { %4749 = vtanh.f32 %v3913_v19  ;;  %v3875_v24 = vpop.f32.mrf.mxu2 }
 0x449   : > { %v3909_v20 = vadd.f32 %v3901_v61, %v3873_v22  ;;  %v3876_v41 = vadd.f32 %v8754_v29, %v3875_v24  ;;  %v3936_v9 = vmul.f32 0.5, %v3928_v23  ;;  %v4802_v23 = vld [vmem:[%s5327_s19 + $0x48] sm:$0xff] }
 0x44b   : > { %v3886_v56 = vmul.f32 %v3876_v41, %v3876_v41  ;;  %v3917_v0 = vmul.f32 0.7978846, %v3909_v20  ;;  %v4748_v63 = vpop.eup %4747  ;;  %v3944_v3 = vmul.f32 %v3936_v9, %v3861_v10 }
 0x44c   : > { %v3932_v7 = vadd.f32 1.0, %v4748_v63 }
 0x44d   : > { %v3894_v47 = vmul.f32 %v3886_v56, %v3876_v41  ;;  %4751 = vtanh.f32 %v3917_v0  ;;  %v4065_v56 = vrot.slane %v4802_v23, 3  ;;  %v4803_v0 = vld [vmem:[%s5327_s19 + $0x50] sm:$0xff] }
 0x44e   : > { %v4750_v50 = vpop.eup %4749  ;;  %v3940_v43 = vmul.f32 0.5, %v3932_v7  ;;  %v4066_v63 = vrot.slane %v4803_v0, 3 }
 0x44f   : > { %v3929_v2 = vadd.f32 1.0, %v4750_v50  ;;  %v3902_v11 = vmul.f32 0.044715, %v3894_v47  ;;  %v8791_v50 = vld [vmem:[%s8880_s7] ss:$0 sm:$0xff] }
 0x450   : > { %v3877_v60 = vpop.f32.mrf.mxu2  ;;  %v3948_v58 = vmul.f32 %v3940_v43, %v8758_v55  ;;  %v4067_v45 = vsel %vm1907_vm2, %v4065_v56, %v4066_v63 }
 0x451   : > { %v3937_v5 = vmul.f32 0.5, %v3929_v2  ;;  %v3910_v48 = vadd.f32 %v3902_v11, %v3876_v41  ;;  %v3878_v31 = vadd.f32 %v8754_v29, %v3877_v60  ;;  %v4804_v11 = vld [vmem:[%s5327_s19 + $0x58] sm:$0x3f] }
 0x452   : > { %v4068_v60 = vrot.slane %v4804_v11, 3 }
 0x453   : > { %v3945_v14 = vmul.f32 %v3937_v5, %v3863_v38  ;;  %v4752_v37 = vpop.eup %4751  ;;  %v3887_v39 = vmul.f32 %v3878_v31, %v3878_v31  ;;  %v3918_v26 = vmul.f32 0.7978846, %v3910_v48  ;;  %v4805_v48 = vld [vmem:[%s5327_s19 + $0x78] sm:$0xff] }
 0x454   : > { %v3933_v6 = vadd.f32 1.0, %v4752_v37  ;;  %v4069_v7 = vsel %vm1907_vm2, %v4066_v63, %v4068_v60 }
 0x455   : > { %v3952_v62 = vpack.c.bf16 %v3945_v14, %v3944_v3  ;;  %v3895_v36 = vmul.f32 %v3887_v39, %v3878_v31  ;;  %4753 = vtanh.f32 %v3918_v26  ;;  %v4076_v3 = vrot.slane %v4806_v51, 3 }
 0x456   : > { %v3941_v52 = vmul.f32 0.5, %v3933_v6 }
 0x457   : > { %4032 = vmatmul.bf16.vlgmr.msra.gmra.mxu1 %v3952_v62  ;;  %v3903_v18 = vmul.f32 0.044715, %v3895_v36  ;;  %v4807_v36 = vld [vmem:[%s5327_s19 + $0x88] sm:$0x3f] }
 0x458   : > { %v3949_v30 = vmul.f32 %v3941_v52, %v3873_v22  ;;  %v4078_v52 = vrot.slane %v4807_v36, 3 }
 0x459   : > { %v3911_v17 = vadd.f32 %v3903_v18, %v3878_v31 }
 0x45a   : > { %v3954_v53 = vpack.c.bf16 %v3949_v30, %v3948_v58  ;;  %v4079_v58 = vsel %vm1907_vm2, %v4076_v3, %v4078_v52 }
 0x45b   : > { %v3919_v10 = vmul.f32 0.7978846, %v3911_v17  ;;  %v4754_v21 = vpop.eup %4753 }
 0x45c   : > { %4042 = vmatmul.bf16.vlgmr.msra.gmra.mxu3 %v3954_v53  ;;  %v3934_v49 = vadd.f32 1.0, %v4754_v21  ;;  %v4808_v53 = vld [vmem:[%s5327_s19 + $0x90] sm:$0xff]  ;;  %v4809_v21 = vld [vmem:[%s5327_s19 + $0x98] sm:$0xff] }
 0x45d   : > { %4755 = vtanh.f32 %v3919_v10  ;;  %v4080_v10 = vrot.slane %v4808_v53, 3 }
 0x45e   : > { %v3942_v15 = vmul.f32 0.5, %v3934_v49  ;;  %v4081_v49 = vrot.slane %v4809_v21, 3 }
 0x460   : > { %v3950_v40 = vmul.f32 %v3942_v15, %v3876_v41 }
 0x463   : > { %v4756_v46 = vpop.eup %4755 }
 0x464   : > { %v3935_v44 = vadd.f32 1.0, %v4756_v46  ;;  %v4082_v46 = vsel %vm1907_vm2, %v4080_v10, %v4081_v49 }
 0x466   : > { %v3943_v42 = vmul.f32 0.5, %v3935_v44  ;;  %v4810_v44 = vld [vmem:[%s5327_s19 + $0xa0] sm:$0x3f] }
 0x467   : > { %v4083_v15 = vrot.slane %v4810_v44, 3 }
 0x468   : > { %v3951_v25 = vmul.f32 %v3943_v42, %v3878_v31  ;;  %v4075_v31 = vrot.slane %v4805_v48, 3 }
 0x469   : > { %v4084_v42 = vsel %vm1907_vm2, %v4081_v49, %v4083_v15 }
 0x46a   : > { %v3955_v35 = vpack.c.bf16 %v3951_v25, %v3950_v40  ;;  %v4077_v26 = vsel %vm1907_vm2, %v4075_v31, %v4076_v3  ;;  %v4811_v25 = vld [vmem:[%s5327_s19 + $0x60] sm:$0xff] }
 0x46c   : > { %4047 = vmatmul.bf16.gmra.mxu3 %v3955_v35 }
 0x4a3   : > { %v3865_v8 = vpop.f32.mrf.mxu0 }
 0x4a4   : > { %v3866_v1 = vadd.f32 %v8754_v29, %v3865_v8 }
 0x4a6   : > { %v3882_v38 = vmul.f32 %v3866_v1, %v3866_v1 }
 0x4a8   : > { %v3890_v27 = vmul.f32 %v3882_v38, %v3866_v1 }
 0x4aa   : > { %v3898_v55 = vmul.f32 0.044715, %v3890_v27 }
 0x4ab   : > { %v3867_v59 = vpop.f32.mrf.mxu0 }
 0x4ac   : > { %v3906_v33 = vadd.f32 %v3898_v55, %v3866_v1  ;;  %v3868_v32 = vadd.f32 %v8754_v29, %v3867_v59  ;;  %v4070_v55 = vrot.slane %v4811_v25, 3  ;;  %v4812_v59 = vld [vmem:[%s5327_s19 + $0x68] sm:$0xff] }
 0x4ad   : > { %v4071_v35 = vrot.slane %v4812_v59, 3 }
 0x4ae   : > { %v3883_v22 = vmul.f32 %v3868_v32, %v3868_v32  ;;  %v3914_v12 = vmul.f32 0.7978846, %v3906_v33 }
 0x4b0   : > { %v3891_v34 = vmul.f32 %v3883_v22, %v3868_v32  ;;  %4757 = vtanh.f32 %v3914_v12 }
 0x4b2   : > { %v3899_v4 = vmul.f32 0.044715, %v3891_v34  ;;  %v4813_v34 = vld [vmem:[%s5327_s19 + $0x70] sm:$0x3f]  ;;  %s4110_s19 = scalar_lea.sflag [#allocation5], %s10178_s23 }
 0x4b4   : > { %v3907_v28 = vadd.f32 %v3899_v4, %v3868_v32  ;;  %v4073_v4 = vrot.slane %v4813_v34, 3 }
 0x4b6   : > { %v3915_v13 = vmul.f32 0.7978846, %v3907_v28  ;;  %v4758_v54 = vpop.eup %4757 }
 0x4b7   : > { %v3930_v19 = vadd.f32 1.0, %v4758_v54 }
 0x4b8   : > { %4759 = vtanh.f32 %v3915_v13  ;;  %v4074_v13 = vsel %vm1907_vm2, %v4071_v35, %v4073_v4 }
 0x4b9   : > { %v3938_v24 = vmul.f32 0.5, %v3930_v19 }
 0x4bb   : > { %v3946_v29 = vmul.f32 %v3938_v24, %v3866_v1 }
 0x4be   : > { %v4760_v16 = vpop.eup %4759 }
 0x4bf   : > { %v3931_v61 = vadd.f32 1.0, %v4760_v16 }
 0x4c1   : > { %v3939_v20 = vmul.f32 0.5, %v3931_v61 }
 0x4c3   : > { %v3947_v41 = vmul.f32 %v3939_v20, %v3868_v32  ;;  %v4072_v32 = vsel %vm1907_vm2, %v4070_v55, %v4071_v35 }
 0x4c5   : > { %v3953_v57 = vpack.c.bf16 %v3947_v41, %v3946_v29 }
 0x4c7   : > { %4037 = vmatmul.bf16.gmra.mxu1 %v3953_v57 }
 0x4d4   : > { %v4033_v47 = vpop.f32.mrf.mxu1 }
 0x4d5   : > { %v4034_v2 = vadd.f32 %v8791_v50, %v4033_v47 }
 0x4d7   : > { %v4093_v9 = vadd.f32 %v4067_v45, %v4034_v2 }
 0x4d9   : > { %4101 = vst [vmem:[%s5065_s16] sm:$0xff] %v4093_v9 }
 0x4dc   : > { %v4035_v5 = vpop.f32.mrf.mxu1 }
 0x4dd   : > { %v4036_v14 = vadd.f32 %v8791_v50, %v4035_v5 }
 0x4df   : > { %v4094_v37 = vadd.f32 %v4069_v7, %v4036_v14  ;;  %v4043_v39 = vpop.f32.mrf.mxu3 }
 0x4e0   : > { %v4044_v62 = vadd.f32 %v8791_v50, %v4043_v39 }
 0x4e1   : > { %4102 = vst [vmem:[%s5065_s16 + $0x8] sm:$0xff] %v4094_v37 }
 0x4e2   : > { %v4097_v6 = vadd.f32 %v4077_v26, %v4044_v62 }
 0x4e4   : > { %4105 = vst [vmem:[%s5065_s16 + $0x20] sm:$0xff] %v4097_v6 }
 0x4e7   : > { %v4045_v43 = vpop.f32.mrf.mxu3 }
 0x4e8   : > { %v4046_v18 = vadd.f32 %v8791_v50, %v4045_v43 }
 0x4ea   : > { %v4098_v30 = vadd.f32 %v4079_v58, %v4046_v18 }
 0x4ec   : > { %4106 = vst [vmem:[%s5065_s16 + $0x28] sm:$0xff] %v4098_v30 }
 0x4ef   : > { %v4048_v17 = vpop.f32.mrf.mxu3 }
 0x4f0   : > { %v4049_v8 = vadd.f32 %v8791_v50, %v4048_v17 }
 0x4f2   : > { %v4099_v1 = vadd.f32 %v4082_v46, %v4049_v8 }
 0x4f4   : > { %4107 = vst [vmem:[%s5065_s16 + $0x30] sm:$0xff] %v4099_v1 }
 0x4f7   : > { %v4050_v38 = vpop.f32.mrf.mxu3 }
 0x4f8   : > { %v4051_v27 = vadd.f32 %v8791_v50, %v4050_v38 }
 0x4fa   : > { %v4100_v40 = vadd.f32 %v4084_v42, %v4051_v27 }
 0x4fc   : > { %4108 = vst [vmem:[%s5065_s16 + $0x38] sm:$0xff] %v4100_v40 }
 0x544   : > { %v4038_v33 = vpop.f32.mrf.mxu1 }
 0x545   : > { %v4039_v22 = vadd.f32 %v8791_v50, %v4038_v33 }
 0x547   : > { %v4095_v12 = vadd.f32 %v4072_v32, %v4039_v22 }
 0x549   : > { %4103 = vst [vmem:[%s5065_s16 + $0x10] sm:$0xff] %v4095_v12 }
 0x54c   : > { %v4040_v28 = vpop.f32.mrf.mxu1 }
 0x54d   : > { %v4041_v54 = vadd.f32 %v8791_v50, %v4040_v28 }
 0x54f   : > { %v4096_v19 = vadd.f32 %v4074_v13, %v4041_v54 }
 0x551   : > { %4104 = vst [vmem:[%s5065_s16 + $0x18] sm:$0xff] %v4096_v19 }
 0x552   : > { %4841 = shalt.err (!%p4838_p10)
}
 0x553   : > { %s4916_s16 = smov 128   ;;  %s4917_s22 = smov 8  }
 0x554   : > { %4652 = dma.vmem_to_hbm [thread:$0]  (%p5014_p3), %s4126_s30, 1024, %s4128_s9, %s4110_s19, %s4916_s16, %s4916_s16, %s4917_s22  }
 0x555 PF: > { %s10179_s18 = sld [smem:[#allocation24_spill]] }
 0x556   : > { %s10180_s29 = sld [smem:[#allocation20_spill]] }
 0x55b   : > { %p4658_p11 = scmp.ge.s32.totalorder %s10179_s18, 2 }
 0x55c   : > { %s4142_s11 = sand.u32 1, %s10180_s29  }
 0x55d   : > { %p4655_p12 = pnand %p4658_p11, %p5023_p8  ;;  %s4143_s13 = scalar_lea.sflag [#allocation5], %s4142_s11 }
 0x55f   : > { %p4656_p0 = pneg %p4655_p12 }
 0x561   : > { %4881 = dma.done.wait (%p4656_p0), %s4143_s13, 1024  }
 0x562   : > { %4883 = vsyncadd (%p4656_p0), %s4143_s13, 4294966272  ;;  %s21_s12 = sadd.s32 1, %s10179_s18   ;;  %s10182_s20 = sld [smem:[#allocation21_spill]] }
 0x563   : > { %p18_p1 = scmp.ge.s32.totalorder %s21_s12, 10   ;;  %s10183_s29 = sld [smem:[#allocation29_spill]] }
 0x564   : > { %s10184_s30 = sld [smem:[#allocation22_spill]]  ;;  %s10188_s27 = smov %s4890_s28 }
 0x565   : > { %s10185_s9 = sld [smem:[#allocation23_spill]]  ;;  %20 = sbr.rel (!%p18_p1) target bundleno = 5 (0x5), region = 467 }
 0x566   : > { %s10186_s10 = sld [smem:[#allocation25_spill]] }
 0x567   : > { %s10187_s11 = sld [smem:[#allocation27_spill]] }
 0x568   : > { %s10189_s28 = smov %s10182_s20 }
 0x56a   :  { %4149 = vsyncpa [#allocation5], 1 }
 0x56b   :  { %4151 = vsyncpa [#allocation5 + $0x1], 1 }
 0x56c   :  { %4152 = vsyncmov [#allocation3] }
 0x56f   :  { %s4153_s26 = vpop.sfrf %4152 }
 0x570   :  { %p4605_p3 = scmp.ne.s32.totalorder %s4153_s26, 0 }
 0x572   :  { %4157 = shalt.err (%p4605_p3)  }
 0x573   :  { %4159 = vsyncmov [#allocation3 + $0x1] }
 0x576   :  { %s4160_s23 = vpop.sfrf %4159 }
 0x577   :  { %p4606_p8 = scmp.ne.s32.totalorder %s4160_s23, 0 }
 0x579   :  { %4164 = shalt.err (%p4606_p8)  }
 0x57a   :  { %4166 = vsyncmov [#allocation3 + $0x2] }
 0x57d   :  { %s4167_s19 = vpop.sfrf %4166 }
 0x57e   :  { %p4607_p2 = scmp.ne.s32.totalorder %s4167_s19, 0 }
 0x580   :  { %4171 = shalt.err (%p4607_p2)  }
 0x581   :  { %4173 = vsyncmov [#allocation3 + $0x3] }
 0x584   :  { %s4174_s24 = vpop.sfrf %4173 }
 0x585   :  { %p4608_p13 = scmp.ne.s32.totalorder %s4174_s24, 0 }
 0x587   :  { %4178 = shalt.err (%p4608_p13)  }
 0x588   :  { %4180 = vsyncmov [#allocation3 + $0x4] }
 0x58b   :  { %s4181_s25 = vpop.sfrf %4180 }
 0x58c   :  { %p4609_p4 = scmp.ne.s32.totalorder %s4181_s25, 0 }
 0x58e   :  { %4185 = shalt.err (%p4609_p4)  }
 0x58f   :  { %4187 = vsyncmov [#allocation3 + $0x5] }
 0x592   :  { %s4188_s0 = vpop.sfrf %4187 }
 0x593   :  { %p4610_p5 = scmp.ne.s32.totalorder %s4188_s0, 0 }
 0x595   :  { %4192 = shalt.err (%p4610_p5)  }

</bundles_post_ra>
